<compile_context>
chip_gen: v5e
topology: v5e:2x2
jax: 0.10.0
libtpu: 0.0.40
codegen_flags: <defaults>
</compile_context>

<pallas_src>
import functools

import jax
import jax.numpy as jnp
from jax.experimental import pallas as pl
from jax.experimental.pallas import tpu as pltpu


_EPS = 1e-5          # nn.BatchNorm2d default
_LANE = 128
_SUB = 8


def _round_up(x, m):
    return ((x + m - 1) // m) * m


@functools.lru_cache(maxsize=None)
def _vmem_limit_bytes():
    """Generation-aware scoped-VMEM limit (~0.75x physical capacity)."""
    try:
        cap = getattr(pltpu.get_tpu_info(), "vmem_capacity_bytes", None)
        if cap:
            return max(32 * 1024 * 1024, int(cap) * 3 // 4)
    except Exception:
        pass
    return 48 * 1024 * 1024


def _params(sem):
    return pltpu.CompilerParams(dimension_semantics=sem,
                                vmem_limit_bytes=_vmem_limit_bytes())


def _row_tile(m, cap=1024):
    """Largest power-of-two row tile (<= cap) dividing M."""
    for t in (1024, 512, 256, 128, 64, 32, 16, 8):
        if t <= cap and t <= m and m % t == 0:
            return t
    # TODO(synk): pad M / masked tail when M has no power-of-two divisor >= 8.
    return m


def _reduce_partial_stats(parts):
    # parts: (nblk, 8, C) with identical sublanes; keep sublane 0, sum blocks.
    return jnp.sum(parts[:, 0, :], axis=0, keepdims=True)


# ----------------------------------------------------------------------------
# Stage 1: 1x1 conv (bf16 MXU / f32 acc) + per-block BN1 partial stats.
# ----------------------------------------------------------------------------
def _conv1x1_stats_kernel(x_ref, w_ref, y_ref, s_ref, q_ref):
    y = jnp.dot(x_ref[...], w_ref[...], preferred_element_type=jnp.float32)
    y_ref[...] = y.astype(y_ref.dtype)
    s = jnp.sum(y, axis=0, keepdims=True)
    q = jnp.sum(y * y, axis=0, keepdims=True)
    s_ref[...] = jnp.broadcast_to(s[None], s_ref.shape)
    q_ref[...] = jnp.broadcast_to(q[None], q_ref.shape)


def _conv1x1_stats(x_rows, w):
    M, CIN = x_rows.shape
    COUT = w.shape[1]
    tm = _row_tile(M)
    nblk = M // tm
    row_in = pl.BlockSpec((tm, CIN), lambda i: (i, 0))
    row_out = pl.BlockSpec((tm, COUT), lambda i: (i, 0))
    stat_out = pl.BlockSpec((1, _SUB, COUT), lambda i: (i, 0, 0))
    y, s_p, q_p = pl.pallas_call(
        _conv1x1_stats_kernel,
        out_shape=(jax.ShapeDtypeStruct((M, COUT), jnp.bfloat16),
                   jax.ShapeDtypeStruct((nblk, _SUB, COUT), jnp.float32),
                   jax.ShapeDtypeStruct((nblk, _SUB, COUT), jnp.float32)),
        grid_spec=pltpu.PrefetchScalarGridSpec(
            num_scalar_prefetch=0,
            grid=(nblk,),
            in_specs=[row_in, pl.BlockSpec((CIN, COUT), lambda i: (0, 0))],
            out_specs=(row_out, stat_out, stat_out)),
        compiler_params=_params(("parallel",)),
    )(x_rows, w)
    return y, _reduce_partial_stats(s_p), _reduce_partial_stats(q_p)


# ----------------------------------------------------------------------------
# Stage 2: BN1+ReLU prologue, kxk conv via k column-shifted bf16 halo buffers,
# per-image BN2 partial stats. One image per grid step.
# ----------------------------------------------------------------------------
def _bn_relu_convkxk_stats_kernel(x_ref, s_in_ref, q_in_ref, g_ref, b_ref,
                                  w_ref, y_ref, s_ref, q_ref, xs_ref,
                                  *, k, pad, hh, ww, inv_m, eps):
    cin = x_ref.shape[1]
    cout = w_ref.shape[2]

    # BN1 (training-mode batch stats) + ReLU, from raw f32 sums.
    mean = s_in_ref[...] * inv_m
    var = jnp.maximum(q_in_ref[...] * inv_m - mean * mean, 0.0)
    scale = jax.lax.rsqrt(var + eps) * g_ref[...]
    shift = b_ref[...] - mean * scale
    a = jnp.maximum(x_ref[...].astype(jnp.float32) * scale + shift, 0.0)
    a = a.astype(jnp.bfloat16).reshape(hh, ww, cin)

    zeros = functools.partial(jnp.zeros, dtype=jnp.bfloat16)
    # k column-shifted, row-padded copies: tap (dy, dx) later reads
    # xs[dx][dy:dy+hh] as a fully contiguous (hh*ww, cin) slab.
    for dx in range(k):
        dst_lo = max(0, pad - dx)
        dst_hi = min(ww, pad + ww - dx)
        src_lo = dst_lo + dx - pad
        src_hi = dst_hi + dx - pad
        # Zero only the halo strips that are never overwritten (cheap, and
        # valid even when the grid is sharded across TensorCores).
        if pad > 0:
            xs_ref[dx, 0:pad, :, :] = zeros((pad, ww, cin))
            xs_ref[dx, pad + hh:pad + hh + pad, :, :] = zeros((pad, ww, cin))
        if dst_lo > 0:
            xs_ref[dx, pad:pad + hh, 0:dst_lo, :] = zeros((hh, dst_lo, cin))
        if dst_hi < ww:
            xs_ref[dx, pad:pad + hh, dst_hi:ww, :] = zeros((hh, ww - dst_hi, cin))
        xs_ref[dx, pad:pad + hh, dst_lo:dst_hi, :] = a[:, src_lo:src_hi, :]

    acc = jnp.zeros((hh * ww, cout), jnp.float32)
    for dy in range(k):                 # static k*k-tap loop (fully unrolled)
        for dx in range(k):
            win = xs_ref[dx, dy:dy + hh, :, :].reshape(hh * ww, cin)
            acc = acc + jnp.dot(win, w_ref[dy * k + dx],
                                preferred_element_type=jnp.float32)

    y_ref[...] = acc.astype(y_ref.dtype)
    s = jnp.sum(acc, axis=0, keepdims=True)
    q = jnp.sum(acc * acc, axis=0, keepdims=True)
    s_ref[...] = jnp.broadcast_to(s[None], s_ref.shape)
    q_ref[...] = jnp.broadcast_to(q[None], q_ref.shape)


def _bn_relu_convkxk_stats(y1_rows, s1, q1, g1, b1, w2,
                           *, n, hh, ww, k, pad, m_rows):
    CIN = y1_rows.shape[1]
    COUT = w2.shape[2]
    rows = hh * ww
    img_in = pl.BlockSpec((rows, CIN), lambda i: (i, 0))
    img_out = pl.BlockSpec((rows, COUT), lambda i: (i, 0))
    stat_in = pl.BlockSpec((1, CIN), lambda i: (0, 0))
    stat_out = pl.BlockSpec((1, _SUB, COUT), lambda i: (i, 0, 0))
    w_spec = pl.BlockSpec((k * k, CIN, COUT), lambda i: (0, 0, 0))
    kernel = functools.partial(_bn_relu_convkxk_stats_kernel, k=k, pad=pad,
                               hh=hh, ww=ww, inv_m=1.0 / m_rows, eps=_EPS)
    y, s_p, q_p = pl.pallas_call(
        kernel,
        out_shape=(jax.ShapeDtypeStruct((n * rows, COUT), jnp.bfloat16),
                   jax.ShapeDtypeStruct((n, _SUB, COUT), jnp.float32),
                   jax.ShapeDtypeStruct((n, _SUB, COUT), jnp.float32)),
        grid_spec=pltpu.PrefetchScalarGridSpec(
            num_scalar_prefetch=0,
            grid=(n,),
            in_specs=[img_in, stat_in, stat_in, stat_in, stat_in, w_spec],
            out_specs=(img_out, stat_out, stat_out),
            scratch_shapes=[pltpu.VMEM((k, hh + 2 * pad, ww, CIN),
                                       jnp.bfloat16)]),
        # TODO(synk): strip-tile big images (grid=(N, H//S) + halo rows) so
        # whole-image blocks never approach v7x's 64 MiB VMEM.
        compiler_params=_params(("parallel",)),
    )(y1_rows, s1, q1, g1, b1, w2)
    return y, _reduce_partial_stats(s_p), _reduce_partial_stats(q_p)


# ----------------------------------------------------------------------------
# Stage 3: BN2+ReLU prologue, 1x1 conv matmul, per-block BN3 partial stats.
# ----------------------------------------------------------------------------
def _bn_relu_conv1x1_stats_kernel(x_ref, s_in_ref, q_in_ref, g_ref, b_ref,
                                  w_ref, y_ref, s_ref, q_ref, *, inv_m, eps):
    mean = s_in_ref[...] * inv_m
    var = jnp.maximum(q_in_ref[...] * inv_m - mean * mean, 0.0)
    scale = jax.lax.rsqrt(var + eps) * g_ref[...]
    shift = b_ref[...] - mean * scale
    a = jnp.maximum(x_ref[...].astype(jnp.float32) * scale + shift, 0.0)
    y = jnp.dot(a.astype(jnp.bfloat16), w_ref[...],
                preferred_element_type=jnp.float32)
    y_ref[...] = y
    s = jnp.sum(y, axis=0, keepdims=True)
    q = jnp.sum(y * y, axis=0, keepdims=True)
    s_ref[...] = jnp.broadcast_to(s[None], s_ref.shape)
    q_ref[...] = jnp.broadcast_to(q[None], q_ref.shape)


def _bn_relu_conv1x1_stats(x_rows, s_in, q_in, g, b, w, *, m_rows):
    M, CIN = x_rows.shape
    COUT = w.shape[1]
    tm = _row_tile(M)
    nblk = M // tm
    row_in = pl.BlockSpec((tm, CIN), lambda i: (i, 0))
    row_out = pl.BlockSpec((tm, COUT), lambda i: (i, 0))
    stat_in = pl.BlockSpec((1, CIN), lambda i: (0, 0))
    stat_out = pl.BlockSpec((1, _SUB, COUT), lambda i: (i, 0, 0))
    kernel = functools.partial(_bn_relu_conv1x1_stats_kernel,
                               inv_m=1.0 / m_rows, eps=_EPS)
    y, s_p, q_p = pl.pallas_call(
        kernel,
        out_shape=(jax.ShapeDtypeStruct((M, COUT), jnp.float32),
                   jax.ShapeDtypeStruct((nblk, _SUB, COUT), jnp.float32),
                   jax.ShapeDtypeStruct((nblk, _SUB, COUT), jnp.float32)),
        grid_spec=pltpu.PrefetchScalarGridSpec(
            num_scalar_prefetch=0,
            grid=(nblk,),
            in_specs=[row_in, stat_in, stat_in, stat_in, stat_in,
                      pl.BlockSpec((CIN, COUT), lambda i: (0, 0))],
            out_specs=(row_out, stat_out, stat_out)),
        compiler_params=_params(("parallel",)),
    )(x_rows, s_in, q_in, g, b, w)
    return y, _reduce_partial_stats(s_p), _reduce_partial_stats(q_p)


# ----------------------------------------------------------------------------
# Stage 4: BN3 + identity residual add + ReLU (fully parallel rows).
# ----------------------------------------------------------------------------
def _bn_add_relu_kernel(x_ref, s_ref, q_ref, g_ref, b_ref, res_ref, o_ref,
                        *, inv_m, eps):
    mean = s_ref[...] * inv_m
    var = jnp.maximum(q_ref[...] * inv_m - mean * mean, 0.0)
    scale = jax.lax.rsqrt(var + eps) * g_ref[...]
    shift = b_ref[...] - mean * scale
    y = x_ref[...] * scale + shift + res_ref[...].astype(jnp.float32)
    o_ref[...] = jnp.maximum(y, 0.0)


def _bn_add_relu(x_rows, s, q, g, b, res_rows, *, m_rows):
    M, C = x_rows.shape
    tm = _row_tile(M)
    row_f32 = pl.BlockSpec((tm, C), lambda i: (i, 0))
    row_res = pl.BlockSpec((tm, C), lambda i: (i, 0))
    stat = pl.BlockSpec((1, C), lambda i: (0, 0))
    kernel = functools.partial(_bn_add_relu_kernel, inv_m=1.0 / m_rows, eps=_EPS)
    return pl.pallas_call(
        kernel,
        out_shape=jax.ShapeDtypeStruct((M, C), jnp.float32),
        grid_spec=pltpu.PrefetchScalarGridSpec(
            num_scalar_prefetch=0,
            grid=(M // tm,),
            in_specs=[row_f32, stat, stat, stat, stat, row_res],
            out_specs=row_f32),
        compiler_params=_params(("parallel",)),
    )(x_rows, s, q, g, b, res_rows)


# ----------------------------------------------------------------------------
# Full forward pass.
# ----------------------------------------------------------------------------
def identity_block3_forward(x_nchw, params, *, kernel_size,
                            return_conv3_out=False):
    k = kernel_size
    pad = (k - 1) // 2

    w1, w2, w3 = params["w1"], params["w2"], params["w3"]
    p1, cin = w1.shape[0], w1.shape[1]
    p2, p3 = w2.shape[0], w3.shape[0]
    assert p3 == cin, "identity shortcut requires plane3 == inplanes"

    x = jnp.transpose(x_nchw, (0, 2, 3, 1)).astype(jnp.float32)  # NHWC
    N, H, W, _ = x.shape
    M = N * H * W
    assert (H * W) % 8 == 0  # TODO(synk): masked-tail handling for ragged H*W

    # Lane-dense channel padding (zero gamma/beta/weights in padded channels
    # keep them identically zero through every stage).
    CP = _round_up(cin, _LANE)
    P1 = _round_up(p1, _LANE)
    P2 = _round_up(p2, _LANE)
    P3 = _round_up(p3, _LANE)

    # bf16 inter-stage slabs (every stage is HBM-bandwidth-bound); f32 stats.
    x_rows = jnp.pad(x, ((0, 0), (0, 0), (0, 0), (0, CP - cin))
                     ).reshape(M, CP).astype(jnp.bfloat16)

    # bf16 weights for the MXU (f32 accumulation inside the kernels).
    w1m = jnp.pad(w1[:, :, 0, 0].T,
                  ((0, CP - cin), (0, P1 - p1))).astype(jnp.bfloat16)
    w2m = jnp.transpose(w2, (2, 3, 1, 0)).reshape(k * k, p1, p2)
    w2m = jnp.pad(w2m, ((0, 0), (0, P1 - p1), (0, P2 - p2))).astype(jnp.bfloat16)
    w3m = jnp.pad(w3[:, :, 0, 0].T,
                  ((0, P2 - p2), (0, P3 - p3))).astype(jnp.bfloat16)

    def _pad_vec(v, nn):
        return jnp.pad(v.astype(jnp.float32), (0, nn - v.shape[0])).reshape(1, nn)

    g1, b1 = _pad_vec(params["g1"], P1), _pad_vec(params["b1"], P1)
    g2, b2 = _pad_vec(params["g2"], P2), _pad_vec(params["b2"], P2)
    g3, b3 = _pad_vec(params["g3"], P3), _pad_vec(params["b3"], P3)

    # 1) conv1 (1x1) + bn1 partial stats (single pass over the slab).
    y1, s1, q1 = _conv1x1_stats(x_rows, w1m)
    # 2) bn1-apply + relu fused into conv2 (kxk, shifted-buffer tap gather) + bn2 stats.
    y2, s2, q2 = _bn_relu_convkxk_stats(y1, s1, q1, g1, b1, w2m,
                                        n=N, hh=H, ww=W, k=k, pad=pad, m_rows=M)
    # 3) bn2-apply + relu fused into conv3 (1x1) + bn3 stats.
    y3, s3, q3 = _bn_relu_conv1x1_stats(y2, s2, q2, g2, b2, w3m, m_rows=M)
    # 4) bn3-apply + identity residual + relu.
    out_rows = _bn_add_relu(y3, s3, q3, g3, b3, x_rows, m_rows=M)

    out = jnp.transpose(out_rows.reshape(N, H, W, P3)[..., :p3], (0, 3, 1, 2))
    if return_conv3_out:
        out_conv3 = jnp.transpose(y3.reshape(N, H, W, P3)[..., :p3],
                                  (0, 3, 1, 2))
        return out, out_conv3
    return out


def init_params(key, inplanes, planes, kernel_size):
    p1, p2, p3 = planes
    k = kernel_size
    ks = jax.random.split(key, 3)
    return {
        "w1": 0.1 * jax.random.normal(ks[0], (p1, inplanes, 1, 1), jnp.float32),
        "w2": 0.1 * jax.random.normal(ks[1], (p2, p1, k, k), jnp.float32),
        "w3": 0.1 * jax.random.normal(ks[2], (p3, p2, 1, 1), jnp.float32),
        # BatchNorm defaults: weight (gamma) = 1, bias (beta) = 0
        "g1": jnp.ones((p1,), jnp.float32), "b1": jnp.zeros((p1,), jnp.float32),
        "g2": jnp.ones((p2,), jnp.float32), "b2": jnp.zeros((p2,), jnp.float32),
        "g3": jnp.ones((p3,), jnp.float32), "b3": jnp.zeros((p3,), jnp.float32),
    }


if __name__ == "__main__":
    key = jax.random.PRNGKey(0)
    k_in, k_par = jax.random.split(key)

    inplanes = 4
    planes = (4, 4, 4)        # plane3 == inplanes (identity shortcut)
    kernel_size = 3

    x = jax.random.normal(k_in, (2, inplanes, 16, 16), jnp.float32)  # NCHW
    params = init_params(k_par, inplanes, planes, kernel_size)

    fwd = jax.jit(functools.partial(identity_block3_forward,
                                    kernel_size=kernel_size))
    y = fwd(x, params)
    jax.block_until_ready(y)

    assert y.shape == (2, planes[2], 16, 16), y.shape
    assert bool(jnp.all(jnp.isfinite(y)))
    print("KERNEL_OK")
</pallas_src>

<mosaic_0001>
module attributes {stable_mosaic.version = 11 : i64} {
  func.func @_conv1x1_stats_kernel(%arg0: i32, %arg1: memref<512x128xbf16, #tpu.memory_space<vmem>>, %arg2: memref<128x128xbf16, #tpu.memory_space<vmem>>, %arg3: memref<512x128xbf16, #tpu.memory_space<vmem>>, %arg4: memref<1x8x128xf32, #tpu.memory_space<vmem>>, %arg5: memref<1x8x128xf32, #tpu.memory_space<vmem>>) attributes {dimension_semantics = [#tpu.dimension_semantics<parallel>], iteration_bounds = array<i64: 1>, scalar_prefetch = 0 : i64, scratch_operands = 0 : i64, tpu.core_type = #tpu.core_type<tc>, window_params = [{transform_indices = @transform_0, window_bounds = array<i64: 512, 128>}, {pipeline_mode = #tpu.pipeline_mode<synchronous>, transform_indices = @transform_1, window_bounds = array<i64: 128, 128>}, {transform_indices = @transform_2, window_bounds = array<i64: 512, 128>}, {transform_indices = @transform_3, window_bounds = array<i64: 1, 8, 128>}, {transform_indices = @transform_4, window_bounds = array<i64: 1, 8, 128>}]} {
    %c0 = arith.constant 0 : index
    %c0_0 = arith.constant 0 : index
    %0 = vector.load %arg1[%c0, %c0_0] : memref<512x128xbf16, #tpu.memory_space<vmem>>, vector<512x128xbf16>
    %c0_1 = arith.constant 0 : index
    %c0_2 = arith.constant 0 : index
    %1 = vector.load %arg2[%c0_1, %c0_2] : memref<128x128xbf16, #tpu.memory_space<vmem>>, vector<128x128xbf16>
    %cst = arith.constant dense<0.000000e+00> : vector<512x128xf32>
    %2 = tpu.matmul %0, %1, %cst {dimension_numbers = #tpu.dot_dimension_numbers<[1], [0], [0], [1], [0, 0, 1, 1], [], []>} : vector<512x128xbf16>, vector<128x128xbf16>, vector<512x128xf32> -> vector<512x128xf32>
    %3 = arith.truncf %2 : vector<512x128xf32> to vector<512x128xbf16>
    %c0_3 = arith.constant 0 : index
    %c0_4 = arith.constant 0 : index
    %4 = vector.load %arg3[%c0_3, %c0_4] : memref<512x128xbf16, #tpu.memory_space<vmem>>, vector<512x128xbf16>
    tpu.vector_store %arg3[%c0_3, %c0_4], %3 {strides = array<i32>} : memref<512x128xbf16, #tpu.memory_space<vmem>>, vector<512x128xbf16>,
    %cst_5 = arith.constant dense<0.000000e+00> : vector<128xf32>
    %5 = vector.multi_reduction <add>, %2, %cst_5 [0] : vector<512x128xf32> to vector<128xf32>
    %6 = vector.shape_cast %5 : vector<128xf32> to vector<1x128xf32>
    %7 = arith.mulf %2, %2 : vector<512x128xf32>
    %cst_6 = arith.constant dense<0.000000e+00> : vector<128xf32>
    %8 = vector.multi_reduction <add>, %7, %cst_6 [0] : vector<512x128xf32> to vector<128xf32>
    %9 = vector.shape_cast %8 : vector<128xf32> to vector<1x128xf32>
    %10 = vector.shape_cast %6 : vector<1x128xf32> to vector<1x1x128xf32>
    %11 = vector.shape_cast %10 : vector<1x1x128xf32> to vector<1x1x128xf32>
    %12 = vector.broadcast %11 : vector<1x1x128xf32> to vector<1x8x128xf32>
    %c0_7 = arith.constant 0 : index
    %c0_8 = arith.constant 0 : index
    %c0_9 = arith.constant 0 : index
    %13 = vector.load %arg4[%c0_7, %c0_8, %c0_9] : memref<1x8x128xf32, #tpu.memory_space<vmem>>, vector<1x8x128xf32>
    tpu.vector_store %arg4[%c0_7, %c0_8, %c0_9], %12 {strides = array<i32>} : memref<1x8x128xf32, #tpu.memory_space<vmem>>, vector<1x8x128xf32>,
    %14 = vector.shape_cast %9 : vector<1x128xf32> to vector<1x1x128xf32>
    %15 = vector.shape_cast %14 : vector<1x1x128xf32> to vector<1x1x128xf32>
    %16 = vector.broadcast %15 : vector<1x1x128xf32> to vector<1x8x128xf32>
    %c0_10 = arith.constant 0 : index
    %c0_11 = arith.constant 0 : index
    %c0_12 = arith.constant 0 : index
    %17 = vector.load %arg5[%c0_10, %c0_11, %c0_12] : memref<1x8x128xf32, #tpu.memory_space<vmem>>, vector<1x8x128xf32>
    tpu.vector_store %arg5[%c0_10, %c0_11, %c0_12], %16 {strides = array<i32>} : memref<1x8x128xf32, #tpu.memory_space<vmem>>, vector<1x8x128xf32>,
    return
  }
  func.func @transform_0(%arg0: i32) -> (i32, i32) {
    %c0_i32 = arith.constant 0 : i32
    %c0_i32_0 = arith.constant 0 : i32
    return %arg0, %c0_i32 : i32, i32
  }
  func.func @transform_1(%arg0: i32) -> (i32, i32) {
    %c0_i32 = arith.constant 0 : i32
    %c0_i32_0 = arith.constant 0 : i32
    %c0_i32_1 = arith.constant 0 : i32
    return %c0_i32, %c0_i32_0 : i32, i32
  }
  func.func @transform_2(%arg0: i32) -> (i32, i32) {
    %c0_i32 = arith.constant 0 : i32
    %c0_i32_0 = arith.constant 0 : i32
    return %arg0, %c0_i32 : i32, i32
  }
  func.func @transform_3(%arg0: i32) -> (i32, i32, i32) {
    %c0_i32 = arith.constant 0 : i32
    %c0_i32_0 = arith.constant 0 : i32
    %c0_i32_1 = arith.constant 0 : i32
    return %arg0, %c0_i32, %c0_i32_0 : i32, i32, i32
  }
  func.func @transform_4(%arg0: i32) -> (i32, i32, i32) {
    %c0_i32 = arith.constant 0 : i32
    %c0_i32_0 = arith.constant 0 : i32
    %c0_i32_1 = arith.constant 0 : i32
    return %arg0, %c0_i32, %c0_i32_0 : i32, i32, i32
  }
}

module attributes {stable_mosaic.version = 11 : i64} {
  func.func @_bn_relu_conv1x1_stats_kernel(%arg0: i32, %arg1: memref<512x128xbf16, #tpu.memory_space<vmem>>, %arg2: memref<1x128xf32, #tpu.memory_space<vmem>>, %arg3: memref<1x128xf32, #tpu.memory_space<vmem>>, %arg4: memref<1x128xf32, #tpu.memory_space<vmem>>, %arg5: memref<1x128xf32, #tpu.memory_space<vmem>>, %arg6: memref<128x128xbf16, #tpu.memory_space<vmem>>, %arg7: memref<512x128xf32, #tpu.memory_space<vmem>>, %arg8: memref<1x8x128xf32, #tpu.memory_space<vmem>>, %arg9: memref<1x8x128xf32, #tpu.memory_space<vmem>>) attributes {dimension_semantics = [#tpu.dimension_semantics<parallel>], iteration_bounds = array<i64: 1>, scalar_prefetch = 0 : i64, scratch_operands = 0 : i64, tpu.core_type = #tpu.core_type<tc>, window_params = [{transform_indices = @transform_0, window_bounds = array<i64: 512, 128>}, {pipeline_mode = #tpu.pipeline_mode<synchronous>, transform_indices = @transform_1, window_bounds = array<i64: 1, 128>}, {pipeline_mode = #tpu.pipeline_mode<synchronous>, transform_indices = @transform_2, window_bounds = array<i64: 1, 128>}, {pipeline_mode = #tpu.pipeline_mode<synchronous>, transform_indices = @transform_3, window_bounds = array<i64: 1, 128>}, {pipeline_mode = #tpu.pipeline_mode<synchronous>, transform_indices = @transform_4, window_bounds = array<i64: 1, 128>}, {pipeline_mode = #tpu.pipeline_mode<synchronous>, transform_indices = @transform_5, window_bounds = array<i64: 128, 128>}, {transform_indices = @transform_6, window_bounds = array<i64: 512, 128>}, {transform_indices = @transform_7, window_bounds = array<i64: 1, 8, 128>}, {transform_indices = @transform_8, window_bounds = array<i64: 1, 8, 128>}]} {
    %c0 = arith.constant 0 : index
    %c0_0 = arith.constant 0 : index
    %0 = vector.load %arg2[%c0, %c0_0] : memref<1x128xf32, #tpu.memory_space<vmem>>, vector<1x128xf32>
    %cst = arith.constant 0.001953125 : f32
    %1 = vector.broadcast %cst : f32 to vector<1x128xf32>
    %2 = arith.mulf %0, %1 : vector<1x128xf32>
    %c0_1 = arith.constant 0 : index
    %c0_2 = arith.constant 0 : index
    %3 = vector.load %arg3[%c0_1, %c0_2] : memref<1x128xf32, #tpu.memory_space<vmem>>, vector<1x128xf32>
    %cst_3 = arith.constant 0.001953125 : f32
    %4 = vector.broadcast %cst_3 : f32 to vector<1x128xf32>
    %5 = arith.mulf %3, %4 : vector<1x128xf32>
    %6 = arith.mulf %2, %2 : vector<1x128xf32>
    %7 = arith.subf %5, %6 : vector<1x128xf32>
    %cst_4 = arith.constant 0.000000e+00 : f32
    %8 = vector.broadcast %cst_4 : f32 to vector<1x128xf32>
    %9 = arith.maximumf %7, %8 : vector<1x128xf32>
    %cst_5 = arith.constant 9.99999974E-6 : f32
    %10 = vector.broadcast %cst_5 : f32 to vector<1x128xf32>
    %11 = arith.addf %9, %10 : vector<1x128xf32>
    %12 = math.rsqrt %11 : vector<1x128xf32>
    %c0_6 = arith.constant 0 : index
    %c0_7 = arith.constant 0 : index
    %13 = vector.load %arg4[%c0_6, %c0_7] : memref<1x128xf32, #tpu.memory_space<vmem>>, vector<1x128xf32>
    %14 = arith.mulf %12, %13 : vector<1x128xf32>
    %c0_8 = arith.constant 0 : index
    %c0_9 = arith.constant 0 : index
    %15 = vector.load %arg5[%c0_8, %c0_9] : memref<1x128xf32, #tpu.memory_space<vmem>>, vector<1x128xf32>
    %16 = arith.mulf %2, %14 : vector<1x128xf32>
    %17 = arith.subf %15, %16 : vector<1x128xf32>
    %c0_10 = arith.constant 0 : index
    %c0_11 = arith.constant 0 : index
    %18 = vector.load %arg1[%c0_10, %c0_11] : memref<512x128xbf16, #tpu.memory_space<vmem>>, vector<512x128xbf16>
    %19 = arith.extf %18 : vector<512x128xbf16> to vector<512x128xf32>
    %20 = vector.broadcast %14 : vector<1x128xf32> to vector<512x128xf32>
    %21 = arith.mulf %19, %20 : vector<512x128xf32>
    %22 = vector.broadcast %17 : vector<1x128xf32> to vector<512x128xf32>
    %23 = arith.addf %21, %22 : vector<512x128xf32>
    %cst_12 = arith.constant 0.000000e+00 : f32
    %24 = vector.broadcast %cst_12 : f32 to vector<512x128xf32>
    %25 = arith.maximumf %23, %24 : vector<512x128xf32>
    %26 = arith.truncf %25 : vector<512x128xf32> to vector<512x128xbf16>
    %c0_13 = arith.constant 0 : index
    %c0_14 = arith.constant 0 : index
    %27 = vector.load %arg6[%c0_13, %c0_14] : memref<128x128xbf16, #tpu.memory_space<vmem>>, vector<128x128xbf16>
    %cst_15 = arith.constant dense<0.000000e+00> : vector<512x128xf32>
    %28 = tpu.matmul %26, %27, %cst_15 {dimension_numbers = #tpu.dot_dimension_numbers<[1], [0], [0], [1], [0, 0, 1, 1], [], []>} : vector<512x128xbf16>, vector<128x128xbf16>, vector<512x128xf32> -> vector<512x128xf32>
    %c0_16 = arith.constant 0 : index
    %c0_17 = arith.constant 0 : index
    %29 = vector.load %arg7[%c0_16, %c0_17] : memref<512x128xf32, #tpu.memory_space<vmem>>, vector<512x128xf32>
    tpu.vector_store %arg7[%c0_16, %c0_17], %28 {strides = array<i32>} : memref<512x128xf32, #tpu.memory_space<vmem>>, vector<512x128xf32>,
    %cst_18 = arith.constant dense<0.000000e+00> : vector<128xf32>
    %30 = vector.multi_reduction <add>, %28, %cst_18 [0] : vector<512x128xf32> to vector<128xf32>
    %31 = vector.shape_cast %30 : vector<128xf32> to vector<1x128xf32>
    %32 = arith.mulf %28, %28 : vector<512x128xf32>
    %cst_19 = arith.constant dense<0.000000e+00> : vector<128xf32>
    %33 = vector.multi_reduction <add>, %32, %cst_19 [0] : vector<512x128xf32> to vector<128xf32>
    %34 = vector.shape_cast %33 : vector<128xf32> to vector<1x128xf32>
    %35 = vector.shape_cast %31 : vector<1x128xf32> to vector<1x1x128xf32>
    %36 = vector.shape_cast %35 : vector<1x1x128xf32> to vector<1x1x128xf32>
    %37 = vector.broadcast %36 : vector<1x1x128xf32> to vector<1x8x128xf32>
    %c0_20 = arith.constant 0 : index
    %c0_21 = arith.constant 0 : index
    %c0_22 = arith.constant 0 : index
    %38 = vector.load %arg8[%c0_20, %c0_21, %c0_22] : memref<1x8x128xf32, #tpu.memory_space<vmem>>, vector<1x8x128xf32>
    tpu.vector_store %arg8[%c0_20, %c0_21, %c0_22], %37 {strides = array<i32>} : memref<1x8x128xf32, #tpu.memory_space<vmem>>, vector<1x8x128xf32>,
    %39 = vector.shape_cast %34 : vector<1x128xf32> to vector<1x1x128xf32>
    %40 = vector.shape_cast %39 : vector<1x1x128xf32> to vector<1x1x128xf32>
    %41 = vector.broadcast %40 : vector<1x1x128xf32> to vector<1x8x128xf32>
    %c0_23 = arith.constant 0 : index
    %c0_24 = arith.constant 0 : index
    %c0_25 = arith.constant 0 : index
    %42 = vector.load %arg9[%c0_23, %c0_24, %c0_25] : memref<1x8x128xf32, #tpu.memory_space<vmem>>, vector<1x8x128xf32>
    tpu.vector_store %arg9[%c0_23, %c0_24, %c0_25], %41 {strides = array<i32>} : memref<1x8x128xf32, #tpu.memory_space<vmem>>, vector<1x8x128xf32>,
    return
  }
  func.func @transform_0(%arg0: i32) -> (i32, i32) {
    %c0_i32 = arith.constant 0 : i32
    %c0_i32_0 = arith.constant 0 : i32
    return %arg0, %c0_i32 : i32, i32
  }
  func.func @transform_1(%arg0: i32) -> (i32, i32) {
    %c0_i32 = arith.constant 0 : i32
    %c0_i32_0 = arith.constant 0 : i32
    %c0_i32_1 = arith.constant 0 : i32
    return %c0_i32, %c0_i32_0 : i32, i32
  }
  func.func @transform_2(%arg0: i32) -> (i32, i32) {
    %c0_i32 = arith.constant 0 : i32
    %c0_i32_0 = arith.constant 0 : i32
    %c0_i32_1 = arith.constant 0 : i32
    return %c0_i32, %c0_i32_0 : i32, i32
  }
  func.func @transform_3(%arg0: i32) -> (i32, i32) {
    %c0_i32 = arith.constant 0 : i32
    %c0_i32_0 = arith.constant 0 : i32
    %c0_i32_1 = arith.constant 0 : i32
    return %c0_i32, %c0_i32_0 : i32, i32
  }
  func.func @transform_4(%arg0: i32) -> (i32, i32) {
    %c0_i32 = arith.constant 0 : i32
    %c0_i32_0 = arith.constant 0 : i32
    %c0_i32_1 = arith.constant 0 : i32
    return %c0_i32, %c0_i32_0 : i32, i32
  }
  func.func @transform_5(%arg0: i32) -> (i32, i32) {
    %c0_i32 = arith.constant 0 : i32
    %c0_i32_0 = arith.constant 0 : i32
    %c0_i32_1 = arith.constant 0 : i32
    return %c0_i32, %c0_i32_0 : i32, i32
  }
  func.func @transform_6(%arg0: i32) -> (i32, i32) {
    %c0_i32 = arith.constant 0 : i32
    %c0_i32_0 = arith.constant 0 : i32
    return %arg0, %c0_i32 : i32, i32
  }
  func.func @transform_7(%arg0: i32) -> (i32, i32, i32) {
    %c0_i32 = arith.constant 0 : i32
    %c0_i32_0 = arith.constant 0 : i32
    %c0_i32_1 = arith.constant 0 : i32
    return %arg0, %c0_i32, %c0_i32_0 : i32, i32, i32
  }
  func.func @transform_8(%arg0: i32) -> (i32, i32, i32) {
    %c0_i32 = arith.constant 0 : i32
    %c0_i32_0 = arith.constant 0 : i32
    %c0_i32_1 = arith.constant 0 : i32
    return %arg0, %c0_i32, %c0_i32_0 : i32, i32, i32
  }
}

module attributes {stable_mosaic.version = 11 : i64} {
  func.func @_bn_relu_convkxk_stats_kernel(%arg0: i32, %arg1: memref<256x128xbf16, #tpu.memory_space<vmem>>, %arg2: memref<1x128xf32, #tpu.memory_space<vmem>>, %arg3: memref<1x128xf32, #tpu.memory_space<vmem>>, %arg4: memref<1x128xf32, #tpu.memory_space<vmem>>, %arg5: memref<1x128xf32, #tpu.memory_space<vmem>>, %arg6: memref<9x128x128xbf16, #tpu.memory_space<vmem>>, %arg7: memref<256x128xbf16, #tpu.memory_space<vmem>>, %arg8: memref<1x8x128xf32, #tpu.memory_space<vmem>>, %arg9: memref<1x8x128xf32, #tpu.memory_space<vmem>>, %arg10: memref<3x18x16x128xbf16, #tpu.memory_space<vmem>>) attributes {dimension_semantics = [#tpu.dimension_semantics<parallel>], iteration_bounds = array<i64: 2>, scalar_prefetch = 0 : i64, scratch_operands = 1 : i64, tpu.core_type = #tpu.core_type<tc>, window_params = [{transform_indices = @transform_0, window_bounds = array<i64: 256, 128>}, {pipeline_mode = #tpu.pipeline_mode<synchronous>, transform_indices = @transform_1, window_bounds = array<i64: 1, 128>}, {pipeline_mode = #tpu.pipeline_mode<synchronous>, transform_indices = @transform_2, window_bounds = array<i64: 1, 128>}, {pipeline_mode = #tpu.pipeline_mode<synchronous>, transform_indices = @transform_3, window_bounds = array<i64: 1, 128>}, {pipeline_mode = #tpu.pipeline_mode<synchronous>, transform_indices = @transform_4, window_bounds = array<i64: 1, 128>}, {pipeline_mode = #tpu.pipeline_mode<synchronous>, transform_indices = @transform_5, window_bounds = array<i64: 9, 128, 128>}, {transform_indices = @transform_6, window_bounds = array<i64: 256, 128>}, {transform_indices = @transform_7, window_bounds = array<i64: 1, 8, 128>}, {transform_indices = @transform_8, window_bounds = array<i64: 1, 8, 128>}]} {
    %c0 = arith.constant 0 : index
    %c0_0 = arith.constant 0 : index
    %0 = vector.load %arg2[%c0, %c0_0] : memref<1x128xf32, #tpu.memory_space<vmem>>, vector<1x128xf32>
    %cst = arith.constant 0.001953125 : f32
    %1 = vector.broadcast %cst : f32 to vector<1x128xf32>
    %2 = arith.mulf %0, %1 : vector<1x128xf32>
    %c0_1 = arith.constant 0 : index
    %c0_2 = arith.constant 0 : index
    %3 = vector.load %arg3[%c0_1, %c0_2] : memref<1x128xf32, #tpu.memory_space<vmem>>, vector<1x128xf32>
    %cst_3 = arith.constant 0.001953125 : f32
    %4 = vector.broadcast %cst_3 : f32 to vector<1x128xf32>
    %5 = arith.mulf %3, %4 : vector<1x128xf32>
    %6 = arith.mulf %2, %2 : vector<1x128xf32>
    %7 = arith.subf %5, %6 : vector<1x128xf32>
    %cst_4 = arith.constant 0.000000e+00 : f32
    %8 = vector.broadcast %cst_4 : f32 to vector<1x128xf32>
    %9 = arith.maximumf %7, %8 : vector<1x128xf32>
    %cst_5 = arith.constant 9.99999974E-6 : f32
    %10 = vector.broadcast %cst_5 : f32 to vector<1x128xf32>
    %11 = arith.addf %9, %10 : vector<1x128xf32>
    %12 = math.rsqrt %11 : vector<1x128xf32>
    %c0_6 = arith.constant 0 : index
    %c0_7 = arith.constant 0 : index
    %13 = vector.load %arg4[%c0_6, %c0_7] : memref<1x128xf32, #tpu.memory_space<vmem>>, vector<1x128xf32>
    %14 = arith.mulf %12, %13 : vector<1x128xf32>
    %c0_8 = arith.constant 0 : index
    %c0_9 = arith.constant 0 : index
    %15 = vector.load %arg5[%c0_8, %c0_9] : memref<1x128xf32, #tpu.memory_space<vmem>>, vector<1x128xf32>
    %16 = arith.mulf %2, %14 : vector<1x128xf32>
    %17 = arith.subf %15, %16 : vector<1x128xf32>
    %c0_10 = arith.constant 0 : index
    %c0_11 = arith.constant 0 : index
    %18 = vector.load %arg1[%c0_10, %c0_11] : memref<256x128xbf16, #tpu.memory_space<vmem>>, vector<256x128xbf16>
    %19 = arith.extf %18 : vector<256x128xbf16> to vector<256x128xf32>
    %20 = vector.broadcast %14 : vector<1x128xf32> to vector<256x128xf32>
    %21 = arith.mulf %19, %20 : vector<256x128xf32>
    %22 = vector.broadcast %17 : vector<1x128xf32> to vector<256x128xf32>
    %23 = arith.addf %21, %22 : vector<256x128xf32>
    %cst_12 = arith.constant 0.000000e+00 : f32
    %24 = vector.broadcast %cst_12 : f32 to vector<256x128xf32>
    %25 = arith.maximumf %23, %24 : vector<256x128xf32>
    %26 = arith.truncf %25 : vector<256x128xf32> to vector<256x128xbf16>
    %27 = vector.shape_cast %26 : vector<256x128xbf16> to vector<16x16x128xbf16>
    %cst_13 = arith.constant 0.000000e+00 : bf16
    %28 = vector.broadcast %cst_13 : bf16 to vector<1x16x128xbf16>
    %c0_14 = arith.constant 0 : index
    %c0_15 = arith.constant 0 : index
    %c0_16 = arith.constant 0 : index
    %c0_17 = arith.constant 0 : index
    %29 = vector.load %arg10[%c0_14, %c0_15, %c0_16, %c0_17] : memref<3x18x16x128xbf16, #tpu.memory_space<vmem>>, vector<1x1x16x128xbf16>
    %30 = vector.shape_cast %29 : vector<1x1x16x128xbf16> to vector<1x16x128xbf16>
    %31 = vector.shape_cast %28 : vector<1x16x128xbf16> to vector<1x1x16x128xbf16>
    tpu.vector_store %arg10[%c0_14, %c0_15, %c0_16, %c0_17], %31 {strides = array<i32>} : memref<3x18x16x128xbf16, #tpu.memory_space<vmem>>, vector<1x1x16x128xbf16>,
    %cst_18 = arith.constant 0.000000e+00 : bf16
    %32 = vector.broadcast %cst_18 : bf16 to vector<1x16x128xbf16>
    %c0_19 = arith.constant 0 : index
    %c17 = arith.constant 17 : index
    %c0_20 = arith.constant 0 : index
    %c0_21 = arith.constant 0 : index
    %33 = vector.load %arg10[%c0_19, %c17, %c0_20, %c0_21] : memref<3x18x16x128xbf16, #tpu.memory_space<vmem>>, vector<1x1x16x128xbf16>
    %34 = vector.shape_cast %33 : vector<1x1x16x128xbf16> to vector<1x16x128xbf16>
    %35 = vector.shape_cast %32 : vector<1x16x128xbf16> to vector<1x1x16x128xbf16>
    tpu.vector_store %arg10[%c0_19, %c17, %c0_20, %c0_21], %35 {strides = array<i32>} : memref<3x18x16x128xbf16, #tpu.memory_space<vmem>>, vector<1x1x16x128xbf16>,
    %cst_22 = arith.constant 0.000000e+00 : bf16
    %36 = vector.broadcast %cst_22 : bf16 to vector<16x1x128xbf16>
    %c0_23 = arith.constant 0 : index
    %c1 = arith.constant 1 : index
    %c0_24 = arith.constant 0 : index
    %c0_25 = arith.constant 0 : index
    %37 = vector.load %arg10[%c0_23, %c1, %c0_24, %c0_25] : memref<3x18x16x128xbf16, #tpu.memory_space<vmem>>, vector<1x16x1x128xbf16>
    %38 = vector.shape_cast %37 : vector<1x16x1x128xbf16> to vector<16x1x128xbf16>
    %39 = vector.shape_cast %36 : vector<16x1x128xbf16> to vector<1x16x1x128xbf16>
    tpu.vector_store %arg10[%c0_23, %c1, %c0_24, %c0_25], %39 {strides = array<i32>} : memref<3x18x16x128xbf16, #tpu.memory_space<vmem>>, vector<1x16x1x128xbf16>,
    %40 = vector.extract_strided_slice %27 {offsets = [0, 0, 0], sizes = [16, 15, 128], strides = [1, 1, 1]} : vector<16x16x128xbf16> to vector<16x15x128xbf16>
    %c0_26 = arith.constant 0 : index
    %c1_27 = arith.constant 1 : index
    %c1_28 = arith.constant 1 : index
    %c0_29 = arith.constant 0 : index
    %41 = vector.load %arg10[%c0_26, %c1_27, %c1_28, %c0_29] : memref<3x18x16x128xbf16, #tpu.memory_space<vmem>>, vector<1x16x15x128xbf16>
    %42 = vector.shape_cast %41 : vector<1x16x15x128xbf16> to vector<16x15x128xbf16>
    %43 = vector.shape_cast %40 : vector<16x15x128xbf16> to vector<1x16x15x128xbf16>
    tpu.vector_store %arg10[%c0_26, %c1_27, %c1_28, %c0_29], %43 {strides = array<i32>} : memref<3x18x16x128xbf16, #tpu.memory_space<vmem>>, vector<1x16x15x128xbf16>,
    %cst_30 = arith.constant 0.000000e+00 : bf16
    %44 = vector.broadcast %cst_30 : bf16 to vector<1x16x128xbf16>
    %c1_31 = arith.constant 1 : index
    %c0_32 = arith.constant 0 : index
    %c0_33 = arith.constant 0 : index
    %c0_34 = arith.constant 0 : index
    %45 = vector.load %arg10[%c1_31, %c0_32, %c0_33, %c0_34] : memref<3x18x16x128xbf16, #tpu.memory_space<vmem>>, vector<1x1x16x128xbf16>
    %46 = vector.shape_cast %45 : vector<1x1x16x128xbf16> to vector<1x16x128xbf16>
    %47 = vector.shape_cast %44 : vector<1x16x128xbf16> to vector<1x1x16x128xbf16>
    tpu.vector_store %arg10[%c1_31, %c0_32, %c0_33, %c0_34], %47 {strides = array<i32>} : memref<3x18x16x128xbf16, #tpu.memory_space<vmem>>, vector<1x1x16x128xbf16>,
    %cst_35 = arith.constant 0.000000e+00 : bf16
    %48 = vector.broadcast %cst_35 : bf16 to vector<1x16x128xbf16>
    %c1_36 = arith.constant 1 : index
    %c17_37 = arith.constant 17 : index
    %c0_38 = arith.constant 0 : index
    %c0_39 = arith.constant 0 : index
    %49 = vector.load %arg10[%c1_36, %c17_37, %c0_38, %c0_39] : memref<3x18x16x128xbf16, #tpu.memory_space<vmem>>, vector<1x1x16x128xbf16>
    %50 = vector.shape_cast %49 : vector<1x1x16x128xbf16> to vector<1x16x128xbf16>
    %51 = vector.shape_cast %48 : vector<1x16x128xbf16> to vector<1x1x16x128xbf16>
    tpu.vector_store %arg10[%c1_36, %c17_37, %c0_38, %c0_39], %51 {strides = array<i32>} : memref<3x18x16x128xbf16, #tpu.memory_space<vmem>>, vector<1x1x16x128xbf16>,
    %c1_40 = arith.constant 1 : index
    %c1_41 = arith.constant 1 : index
    %c0_42 = arith.constant 0 : index
    %c0_43 = arith.constant 0 : index
    %52 = vector.load %arg10[%c1_40, %c1_41, %c0_42, %c0_43] : memref<3x18x16x128xbf16, #tpu.memory_space<vmem>>, vector<1x16x16x128xbf16>
    %53 = vector.shape_cast %52 : vector<1x16x16x128xbf16> to vector<16x16x128xbf16>
    %54 = vector.shape_cast %27 : vector<16x16x128xbf16> to vector<1x16x16x128xbf16>
    tpu.vector_store %arg10[%c1_40, %c1_41, %c0_42, %c0_43], %54 {strides = array<i32>} : memref<3x18x16x128xbf16, #tpu.memory_space<vmem>>, vector<1x16x16x128xbf16>,
    %cst_44 = arith.constant 0.000000e+00 : bf16
    %55 = vector.broadcast %cst_44 : bf16 to vector<1x16x128xbf16>
    %c2 = arith.constant 2 : index
    %c0_45 = arith.constant 0 : index
    %c0_46 = arith.constant 0 : index
    %c0_47 = arith.constant 0 : index
    %56 = vector.load %arg10[%c2, %c0_45, %c0_46, %c0_47] : memref<3x18x16x128xbf16, #tpu.memory_space<vmem>>, vector<1x1x16x128xbf16>
    %57 = vector.shape_cast %56 : vector<1x1x16x128xbf16> to vector<1x16x128xbf16>
    %58 = vector.shape_cast %55 : vector<1x16x128xbf16> to vector<1x1x16x128xbf16>
    tpu.vector_store %arg10[%c2, %c0_45, %c0_46, %c0_47], %58 {strides = array<i32>} : memref<3x18x16x128xbf16, #tpu.memory_space<vmem>>, vector<1x1x16x128xbf16>,
    %cst_48 = arith.constant 0.000000e+00 : bf16
    %59 = vector.broadcast %cst_48 : bf16 to vector<1x16x128xbf16>
    %c2_49 = arith.constant 2 : index
    %c17_50 = arith.constant 17 : index
    %c0_51 = arith.constant 0 : index
    %c0_52 = arith.constant 0 : index
    %60 = vector.load %arg10[%c2_49, %c17_50, %c0_51, %c0_52] : memref<3x18x16x128xbf16, #tpu.memory_space<vmem>>, vector<1x1x16x128xbf16>
    %61 = vector.shape_cast %60 : vector<1x1x16x128xbf16> to vector<1x16x128xbf16>
    %62 = vector.shape_cast %59 : vector<1x16x128xbf16> to vector<1x1x16x128xbf16>
    tpu.vector_store %arg10[%c2_49, %c17_50, %c0_51, %c0_52], %62 {strides = array<i32>} : memref<3x18x16x128xbf16, #tpu.memory_space<vmem>>, vector<1x1x16x128xbf16>,
    %cst_53 = arith.constant 0.000000e+00 : bf16
    %63 = vector.broadcast %cst_53 : bf16 to vector<16x1x128xbf16>
    %c2_54 = arith.constant 2 : index
    %c1_55 = arith.constant 1 : index
    %c15 = arith.constant 15 : index
    %c0_56 = arith.constant 0 : index
    %64 = vector.load %arg10[%c2_54, %c1_55, %c15, %c0_56] : memref<3x18x16x128xbf16, #tpu.memory_space<vmem>>, vector<1x16x1x128xbf16>
    %65 = vector.shape_cast %64 : vector<1x16x1x128xbf16> to vector<16x1x128xbf16>
    %66 = vector.shape_cast %63 : vector<16x1x128xbf16> to vector<1x16x1x128xbf16>
    tpu.vector_store %arg10[%c2_54, %c1_55, %c15, %c0_56], %66 {strides = array<i32>} : memref<3x18x16x128xbf16, #tpu.memory_space<vmem>>, vector<1x16x1x128xbf16>,
    %67 = vector.extract_strided_slice %27 {offsets = [0, 1, 0], sizes = [16, 15, 128], strides = [1, 1, 1]} : vector<16x16x128xbf16> to vector<16x15x128xbf16>
    %c2_57 = arith.constant 2 : index
    %c1_58 = arith.constant 1 : index
    %c0_59 = arith.constant 0 : index
    %c0_60 = arith.constant 0 : index
    %68 = vector.load %arg10[%c2_57, %c1_58, %c0_59, %c0_60] : memref<3x18x16x128xbf16, #tpu.memory_space<vmem>>, vector<1x16x15x128xbf16>
    %69 = vector.shape_cast %68 : vector<1x16x15x128xbf16> to vector<16x15x128xbf16>
    %70 = vector.shape_cast %67 : vector<16x15x128xbf16> to vector<1x16x15x128xbf16>
    tpu.vector_store %arg10[%c2_57, %c1_58, %c0_59, %c0_60], %70 {strides = array<i32>} : memref<3x18x16x128xbf16, #tpu.memory_space<vmem>>, vector<1x16x15x128xbf16>,
    %cst_61 = arith.constant 0.000000e+00 : f32
    %71 = vector.broadcast %cst_61 : f32 to vector<256x128xf32>
    %c0_62 = arith.constant 0 : index
    %c0_63 = arith.constant 0 : index
    %c0_64 = arith.constant 0 : index
    %c0_65 = arith.constant 0 : index
    %72 = vector.load %arg10[%c0_62, %c0_63, %c0_64, %c0_65] : memref<3x18x16x128xbf16, #tpu.memory_space<vmem>>, vector<1x16x16x128xbf16>
    %73 = vector.shape_cast %72 : vector<1x16x16x128xbf16> to vector<16x16x128xbf16>
    %74 = vector.shape_cast %73 : vector<16x16x128xbf16> to vector<256x128xbf16>
    %c0_66 = arith.constant 0 : index
    %c0_67 = arith.constant 0 : index
    %c0_68 = arith.constant 0 : index
    %75 = vector.load %arg6[%c0_66, %c0_67, %c0_68] : memref<9x128x128xbf16, #tpu.memory_space<vmem>>, vector<1x128x128xbf16>
    %76 = vector.shape_cast %75 : vector<1x128x128xbf16> to vector<128x128xbf16>
    %cst_69 = arith.constant dense<0.000000e+00> : vector<256x128xf32>
    %77 = tpu.matmul %74, %76, %cst_69 {dimension_numbers = #tpu.dot_dimension_numbers<[1], [0], [0], [1], [0, 0, 1, 1], [], []>} : vector<256x128xbf16>, vector<128x128xbf16>, vector<256x128xf32> -> vector<256x128xf32>
    %78 = arith.addf %71, %77 : vector<256x128xf32>
    %c1_70 = arith.constant 1 : index
    %c0_71 = arith.constant 0 : index
    %c0_72 = arith.constant 0 : index
    %c0_73 = arith.constant 0 : index
    %79 = vector.load %arg10[%c1_70, %c0_71, %c0_72, %c0_73] : memref<3x18x16x128xbf16, #tpu.memory_space<vmem>>, vector<1x16x16x128xbf16>
    %80 = vector.shape_cast %79 : vector<1x16x16x128xbf16> to vector<16x16x128xbf16>
    %81 = vector.shape_cast %80 : vector<16x16x128xbf16> to vector<256x128xbf16>
    %c1_74 = arith.constant 1 : index
    %c0_75 = arith.constant 0 : index
    %c0_76 = arith.constant 0 : index
    %82 = vector.load %arg6[%c1_74, %c0_75, %c0_76] : memref<9x128x128xbf16, #tpu.memory_space<vmem>>, vector<1x128x128xbf16>
    %83 = vector.shape_cast %82 : vector<1x128x128xbf16> to vector<128x128xbf16>
    %cst_77 = arith.constant dense<0.000000e+00> : vector<256x128xf32>
    %84 = tpu.matmul %81, %83, %cst_77 {dimension_numbers = #tpu.dot_dimension_numbers<[1], [0], [0], [1], [0, 0, 1, 1], [], []>} : vector<256x128xbf16>, vector<128x128xbf16>, vector<256x128xf32> -> vector<256x128xf32>
    %85 = arith.addf %78, %84 : vector<256x128xf32>
    %c2_78 = arith.constant 2 : index
    %c0_79 = arith.constant 0 : index
    %c0_80 = arith.constant 0 : index
    %c0_81 = arith.constant 0 : index
    %86 = vector.load %arg10[%c2_78, %c0_79, %c0_80, %c0_81] : memref<3x18x16x128xbf16, #tpu.memory_space<vmem>>, vector<1x16x16x128xbf16>
    %87 = vector.shape_cast %86 : vector<1x16x16x128xbf16> to vector<16x16x128xbf16>
    %88 = vector.shape_cast %87 : vector<16x16x128xbf16> to vector<256x128xbf16>
    %c2_82 = arith.constant 2 : index
    %c0_83 = arith.constant 0 : index
    %c0_84 = arith.constant 0 : index
    %89 = vector.load %arg6[%c2_82, %c0_83, %c0_84] : memref<9x128x128xbf16, #tpu.memory_space<vmem>>, vector<1x128x128xbf16>
    %90 = vector.shape_cast %89 : vector<1x128x128xbf16> to vector<128x128xbf16>
    %cst_85 = arith.constant dense<0.000000e+00> : vector<256x128xf32>
    %91 = tpu.matmul %88, %90, %cst_85 {dimension_numbers = #tpu.dot_dimension_numbers<[1], [0], [0], [1], [0, 0, 1, 1], [], []>} : vector<256x128xbf16>, vector<128x128xbf16>, vector<256x128xf32> -> vector<256x128xf32>
    %92 = arith.addf %85, %91 : vector<256x128xf32>
    %c0_86 = arith.constant 0 : index
    %c1_87 = arith.constant 1 : index
    %c0_88 = arith.constant 0 : index
    %c0_89 = arith.constant 0 : index
    %93 = vector.load %arg10[%c0_86, %c1_87, %c0_88, %c0_89] : memref<3x18x16x128xbf16, #tpu.memory_space<vmem>>, vector<1x16x16x128xbf16>
    %94 = vector.shape_cast %93 : vector<1x16x16x128xbf16> to vector<16x16x128xbf16>
    %95 = vector.shape_cast %94 : vector<16x16x128xbf16> to vector<256x128xbf16>
    %c3 = arith.constant 3 : index
    %c0_90 = arith.constant 0 : index
    %c0_91 = arith.constant 0 : index
    %96 = vector.load %arg6[%c3, %c0_90, %c0_91] : memref<9x128x128xbf16, #tpu.memory_space<vmem>>, vector<1x128x128xbf16>
    %97 = vector.shape_cast %96 : vector<1x128x128xbf16> to vector<128x128xbf16>
    %cst_92 = arith.constant dense<0.000000e+00> : vector<256x128xf32>
    %98 = tpu.matmul %95, %97, %cst_92 {dimension_numbers = #tpu.dot_dimension_numbers<[1], [0], [0], [1], [0, 0, 1, 1], [], []>} : vector<256x128xbf16>, vector<128x128xbf16>, vector<256x128xf32> -> vector<256x128xf32>
    %99 = arith.addf %92, %98 : vector<256x128xf32>
    %c1_93 = arith.constant 1 : index
    %c1_94 = arith.constant 1 : index
    %c0_95 = arith.constant 0 : index
    %c0_96 = arith.constant 0 : index
    %100 = vector.load %arg10[%c1_93, %c1_94, %c0_95, %c0_96] : memref<3x18x16x128xbf16, #tpu.memory_space<vmem>>, vector<1x16x16x128xbf16>
    %101 = vector.shape_cast %100 : vector<1x16x16x128xbf16> to vector<16x16x128xbf16>
    %102 = vector.shape_cast %101 : vector<16x16x128xbf16> to vector<256x128xbf16>
    %c4 = arith.constant 4 : index
    %c0_97 = arith.constant 0 : index
    %c0_98 = arith.constant 0 : index
    %103 = vector.load %arg6[%c4, %c0_97, %c0_98] : memref<9x128x128xbf16, #tpu.memory_space<vmem>>, vector<1x128x128xbf16>
    %104 = vector.shape_cast %103 : vector<1x128x128xbf16> to vector<128x128xbf16>
    %cst_99 = arith.constant dense<0.000000e+00> : vector<256x128xf32>
    %105 = tpu.matmul %102, %104, %cst_99 {dimension_numbers = #tpu.dot_dimension_numbers<[1], [0], [0], [1], [0, 0, 1, 1], [], []>} : vector<256x128xbf16>, vector<128x128xbf16>, vector<256x128xf32> -> vector<256x128xf32>
    %106 = arith.addf %99, %105 : vector<256x128xf32>
    %c2_100 = arith.constant 2 : index
    %c1_101 = arith.constant 1 : index
    %c0_102 = arith.constant 0 : index
    %c0_103 = arith.constant 0 : index
    %107 = vector.load %arg10[%c2_100, %c1_101, %c0_102, %c0_103] : memref<3x18x16x128xbf16, #tpu.memory_space<vmem>>, vector<1x16x16x128xbf16>
    %108 = vector.shape_cast %107 : vector<1x16x16x128xbf16> to vector<16x16x128xbf16>
    %109 = vector.shape_cast %108 : vector<16x16x128xbf16> to vector<256x128xbf16>
    %c5 = arith.constant 5 : index
    %c0_104 = arith.constant 0 : index
    %c0_105 = arith.constant 0 : index
    %110 = vector.load %arg6[%c5, %c0_104, %c0_105] : memref<9x128x128xbf16, #tpu.memory_space<vmem>>, vector<1x128x128xbf16>
    %111 = vector.shape_cast %110 : vector<1x128x128xbf16> to vector<128x128xbf16>
    %cst_106 = arith.constant dense<0.000000e+00> : vector<256x128xf32>
    %112 = tpu.matmul %109, %111, %cst_106 {dimension_numbers = #tpu.dot_dimension_numbers<[1], [0], [0], [1], [0, 0, 1, 1], [], []>} : vector<256x128xbf16>, vector<128x128xbf16>, vector<256x128xf32> -> vector<256x128xf32>
    %113 = arith.addf %106, %112 : vector<256x128xf32>
    %c0_107 = arith.constant 0 : index
    %c2_108 = arith.constant 2 : index
    %c0_109 = arith.constant 0 : index
    %c0_110 = arith.constant 0 : index
    %114 = vector.load %arg10[%c0_107, %c2_108, %c0_109, %c0_110] : memref<3x18x16x128xbf16, #tpu.memory_space<vmem>>, vector<1x16x16x128xbf16>
    %115 = vector.shape_cast %114 : vector<1x16x16x128xbf16> to vector<16x16x128xbf16>
    %116 = vector.shape_cast %115 : vector<16x16x128xbf16> to vector<256x128xbf16>
    %c6 = arith.constant 6 : index
    %c0_111 = arith.constant 0 : index
    %c0_112 = arith.constant 0 : index
    %117 = vector.load %arg6[%c6, %c0_111, %c0_112] : memref<9x128x128xbf16, #tpu.memory_space<vmem>>, vector<1x128x128xbf16>
    %118 = vector.shape_cast %117 : vector<1x128x128xbf16> to vector<128x128xbf16>
    %cst_113 = arith.constant dense<0.000000e+00> : vector<256x128xf32>
    %119 = tpu.matmul %116, %118, %cst_113 {dimension_numbers = #tpu.dot_dimension_numbers<[1], [0], [0], [1], [0, 0, 1, 1], [], []>} : vector<256x128xbf16>, vector<128x128xbf16>, vector<256x128xf32> -> vector<256x128xf32>
    %120 = arith.addf %113, %119 : vector<256x128xf32>
    %c1_114 = arith.constant 1 : index
    %c2_115 = arith.constant 2 : index
    %c0_116 = arith.constant 0 : index
    %c0_117 = arith.constant 0 : index
    %121 = vector.load %arg10[%c1_114, %c2_115, %c0_116, %c0_117] : memref<3x18x16x128xbf16, #tpu.memory_space<vmem>>, vector<1x16x16x128xbf16>
    %122 = vector.shape_cast %121 : vector<1x16x16x128xbf16> to vector<16x16x128xbf16>
    %123 = vector.shape_cast %122 : vector<16x16x128xbf16> to vector<256x128xbf16>
    %c7 = arith.constant 7 : index
    %c0_118 = arith.constant 0 : index
    %c0_119 = arith.constant 0 : index
    %124 = vector.load %arg6[%c7, %c0_118, %c0_119] : memref<9x128x128xbf16, #tpu.memory_space<vmem>>, vector<1x128x128xbf16>
    %125 = vector.shape_cast %124 : vector<1x128x128xbf16> to vector<128x128xbf16>
    %cst_120 = arith.constant dense<0.000000e+00> : vector<256x128xf32>
    %126 = tpu.matmul %123, %125, %cst_120 {dimension_numbers = #tpu.dot_dimension_numbers<[1], [0], [0], [1], [0, 0, 1, 1], [], []>} : vector<256x128xbf16>, vector<128x128xbf16>, vector<256x128xf32> -> vector<256x128xf32>
    %127 = arith.addf %120, %126 : vector<256x128xf32>
    %c2_121 = arith.constant 2 : index
    %c2_122 = arith.constant 2 : index
    %c0_123 = arith.constant 0 : index
    %c0_124 = arith.constant 0 : index
    %128 = vector.load %arg10[%c2_121, %c2_122, %c0_123, %c0_124] : memref<3x18x16x128xbf16, #tpu.memory_space<vmem>>, vector<1x16x16x128xbf16>
    %129 = vector.shape_cast %128 : vector<1x16x16x128xbf16> to vector<16x16x128xbf16>
    %130 = vector.shape_cast %129 : vector<16x16x128xbf16> to vector<256x128xbf16>
    %c8 = arith.constant 8 : index
    %c0_125 = arith.constant 0 : index
    %c0_126 = arith.constant 0 : index
    %131 = vector.load %arg6[%c8, %c0_125, %c0_126] : memref<9x128x128xbf16, #tpu.memory_space<vmem>>, vector<1x128x128xbf16>
    %132 = vector.shape_cast %131 : vector<1x128x128xbf16> to vector<128x128xbf16>
    %cst_127 = arith.constant dense<0.000000e+00> : vector<256x128xf32>
    %133 = tpu.matmul %130, %132, %cst_127 {dimension_numbers = #tpu.dot_dimension_numbers<[1], [0], [0], [1], [0, 0, 1, 1], [], []>} : vector<256x128xbf16>, vector<128x128xbf16>, vector<256x128xf32> -> vector<256x128xf32>
    %134 = arith.addf %127, %133 : vector<256x128xf32>
    %135 = arith.truncf %134 : vector<256x128xf32> to vector<256x128xbf16>
    %c0_128 = arith.constant 0 : index
    %c0_129 = arith.constant 0 : index
    %136 = vector.load %arg7[%c0_128, %c0_129] : memref<256x128xbf16, #tpu.memory_space<vmem>>, vector<256x128xbf16>
    tpu.vector_store %arg7[%c0_128, %c0_129], %135 {strides = array<i32>} : memref<256x128xbf16, #tpu.memory_space<vmem>>, vector<256x128xbf16>,
    %cst_130 = arith.constant dense<0.000000e+00> : vector<128xf32>
    %137 = vector.multi_reduction <add>, %134, %cst_130 [0] : vector<256x128xf32> to vector<128xf32>
    %138 = vector.shape_cast %137 : vector<128xf32> to vector<1x128xf32>
    %139 = arith.mulf %134, %134 : vector<256x128xf32>
    %cst_131 = arith.constant dense<0.000000e+00> : vector<128xf32>
    %140 = vector.multi_reduction <add>, %139, %cst_131 [0] : vector<256x128xf32> to vector<128xf32>
    %141 = vector.shape_cast %140 : vector<128xf32> to vector<1x128xf32>
    %142 = vector.shape_cast %138 : vector<1x128xf32> to vector<1x1x128xf32>
    %143 = vector.shape_cast %142 : vector<1x1x128xf32> to vector<1x1x128xf32>
    %144 = vector.broadcast %143 : vector<1x1x128xf32> to vector<1x8x128xf32>
    %c0_132 = arith.constant 0 : index
    %c0_133 = arith.constant 0 : index
    %c0_134 = arith.constant 0 : index
    %145 = vector.load %arg8[%c0_132, %c0_133, %c0_134] : memref<1x8x128xf32, #tpu.memory_space<vmem>>, vector<1x8x128xf32>
    tpu.vector_store %arg8[%c0_132, %c0_133, %c0_134], %144 {strides = array<i32>} : memref<1x8x128xf32, #tpu.memory_space<vmem>>, vector<1x8x128xf32>,
    %146 = vector.shape_cast %141 : vector<1x128xf32> to vector<1x1x128xf32>
    %147 = vector.shape_cast %146 : vector<1x1x128xf32> to vector<1x1x128xf32>
    %148 = vector.broadcast %147 : vector<1x1x128xf32> to vector<1x8x128xf32>
    %c0_135 = arith.constant 0 : index
    %c0_136 = arith.constant 0 : index
    %c0_137 = arith.constant 0 : index
    %149 = vector.load %arg9[%c0_135, %c0_136, %c0_137] : memref<1x8x128xf32, #tpu.memory_space<vmem>>, vector<1x8x128xf32>
    tpu.vector_store %arg9[%c0_135, %c0_136, %c0_137], %148 {strides = array<i32>} : memref<1x8x128xf32, #tpu.memory_space<vmem>>, vector<1x8x128xf32>,
    return
  }
  func.func @transform_0(%arg0: i32) -> (i32, i32) {
    %c0_i32 = arith.constant 0 : i32
    %c0_i32_0 = arith.constant 0 : i32
    return %arg0, %c0_i32 : i32, i32
  }
  func.func @transform_1(%arg0: i32) -> (i32, i32) {
    %c0_i32 = arith.constant 0 : i32
    %c0_i32_0 = arith.constant 0 : i32
    %c0_i32_1 = arith.constant 0 : i32
    return %c0_i32, %c0_i32_0 : i32, i32
  }
  func.func @transform_2(%arg0: i32) -> (i32, i32) {
    %c0_i32 = arith.constant 0 : i32
    %c0_i32_0 = arith.constant 0 : i32
    %c0_i32_1 = arith.constant 0 : i32
    return %c0_i32, %c0_i32_0 : i32, i32
  }
  func.func @transform_3(%arg0: i32) -> (i32, i32) {
    %c0_i32 = arith.constant 0 : i32
    %c0_i32_0 = arith.constant 0 : i32
    %c0_i32_1 = arith.constant 0 : i32
    return %c0_i32, %c0_i32_0 : i32, i32
  }
  func.func @transform_4(%arg0: i32) -> (i32, i32) {
    %c0_i32 = arith.constant 0 : i32
    %c0_i32_0 = arith.constant 0 : i32
    %c0_i32_1 = arith.constant 0 : i32
    return %c0_i32, %c0_i32_0 : i32, i32
  }
  func.func @transform_5(%arg0: i32) -> (i32, i32, i32) {
    %c0_i32 = arith.constant 0 : i32
    %c0_i32_0 = arith.constant 0 : i32
    %c0_i32_1 = arith.constant 0 : i32
    %c0_i32_2 = arith.constant 0 : i32
    return %c0_i32, %c0_i32_0, %c0_i32_1 : i32, i32, i32
  }
  func.func @transform_6(%arg0: i32) -> (i32, i32) {
    %c0_i32 = arith.constant 0 : i32
    %c0_i32_0 = arith.constant 0 : i32
    return %arg0, %c0_i32 : i32, i32
  }
  func.func @transform_7(%arg0: i32) -> (i32, i32, i32) {
    %c0_i32 = arith.constant 0 : i32
    %c0_i32_0 = arith.constant 0 : i32
    %c0_i32_1 = arith.constant 0 : i32
    return %arg0, %c0_i32, %c0_i32_0 : i32, i32, i32
  }
  func.func @transform_8(%arg0: i32) -> (i32, i32, i32) {
    %c0_i32 = arith.constant 0 : i32
    %c0_i32_0 = arith.constant 0 : i32
    %c0_i32_1 = arith.constant 0 : i32
    return %arg0, %c0_i32, %c0_i32_0 : i32, i32, i32
  }
}

module attributes {stable_mosaic.version = 11 : i64} {
  func.func @_bn_add_relu_kernel(%arg0: i32, %arg1: memref<512x128xf32, #tpu.memory_space<vmem>>, %arg2: memref<1x128xf32, #tpu.memory_space<vmem>>, %arg3: memref<1x128xf32, #tpu.memory_space<vmem>>, %arg4: memref<1x128xf32, #tpu.memory_space<vmem>>, %arg5: memref<1x128xf32, #tpu.memory_space<vmem>>, %arg6: memref<512x128xbf16, #tpu.memory_space<vmem>>, %arg7: memref<512x128xf32, #tpu.memory_space<vmem>>) attributes {dimension_semantics = [#tpu.dimension_semantics<parallel>], iteration_bounds = array<i64: 1>, scalar_prefetch = 0 : i64, scratch_operands = 0 : i64, tpu.core_type = #tpu.core_type<tc>, window_params = [{transform_indices = @transform_0, window_bounds = array<i64: 512, 128>}, {pipeline_mode = #tpu.pipeline_mode<synchronous>, transform_indices = @transform_1, window_bounds = array<i64: 1, 128>}, {pipeline_mode = #tpu.pipeline_mode<synchronous>, transform_indices = @transform_2, window_bounds = array<i64: 1, 128>}, {pipeline_mode = #tpu.pipeline_mode<synchronous>, transform_indices = @transform_3, window_bounds = array<i64: 1, 128>}, {pipeline_mode = #tpu.pipeline_mode<synchronous>, transform_indices = @transform_4, window_bounds = array<i64: 1, 128>}, {transform_indices = @transform_5, window_bounds = array<i64: 512, 128>}, {transform_indices = @transform_6, window_bounds = array<i64: 512, 128>}]} {
    %c0 = arith.constant 0 : index
    %c0_0 = arith.constant 0 : index
    %0 = vector.load %arg2[%c0, %c0_0] : memref<1x128xf32, #tpu.memory_space<vmem>>, vector<1x128xf32>
    %cst = arith.constant 0.001953125 : f32
    %1 = vector.broadcast %cst : f32 to vector<1x128xf32>
    %2 = arith.mulf %0, %1 : vector<1x128xf32>
    %c0_1 = arith.constant 0 : index
    %c0_2 = arith.constant 0 : index
    %3 = vector.load %arg3[%c0_1, %c0_2] : memref<1x128xf32, #tpu.memory_space<vmem>>, vector<1x128xf32>
    %cst_3 = arith.constant 0.001953125 : f32
    %4 = vector.broadcast %cst_3 : f32 to vector<1x128xf32>
    %5 = arith.mulf %3, %4 : vector<1x128xf32>
    %6 = arith.mulf %2, %2 : vector<1x128xf32>
    %7 = arith.subf %5, %6 : vector<1x128xf32>
    %cst_4 = arith.constant 0.000000e+00 : f32
    %8 = vector.broadcast %cst_4 : f32 to vector<1x128xf32>
    %9 = arith.maximumf %7, %8 : vector<1x128xf32>
    %cst_5 = arith.constant 9.99999974E-6 : f32
    %10 = vector.broadcast %cst_5 : f32 to vector<1x128xf32>
    %11 = arith.addf %9, %10 : vector<1x128xf32>
    %12 = math.rsqrt %11 : vector<1x128xf32>
    %c0_6 = arith.constant 0 : index
    %c0_7 = arith.constant 0 : index
    %13 = vector.load %arg4[%c0_6, %c0_7] : memref<1x128xf32, #tpu.memory_space<vmem>>, vector<1x128xf32>
    %14 = arith.mulf %12, %13 : vector<1x128xf32>
    %c0_8 = arith.constant 0 : index
    %c0_9 = arith.constant 0 : index
    %15 = vector.load %arg5[%c0_8, %c0_9] : memref<1x128xf32, #tpu.memory_space<vmem>>, vector<1x128xf32>
    %16 = arith.mulf %2, %14 : vector<1x128xf32>
    %17 = arith.subf %15, %16 : vector<1x128xf32>
    %c0_10 = arith.constant 0 : index
    %c0_11 = arith.constant 0 : index
    %18 = vector.load %arg1[%c0_10, %c0_11] : memref<512x128xf32, #tpu.memory_space<vmem>>, vector<512x128xf32>
    %19 = vector.broadcast %14 : vector<1x128xf32> to vector<512x128xf32>
    %20 = arith.mulf %18, %19 : vector<512x128xf32>
    %21 = vector.broadcast %17 : vector<1x128xf32> to vector<512x128xf32>
    %22 = arith.addf %20, %21 : vector<512x128xf32>
    %c0_12 = arith.constant 0 : index
    %c0_13 = arith.constant 0 : index
    %23 = vector.load %arg6[%c0_12, %c0_13] : memref<512x128xbf16, #tpu.memory_space<vmem>>, vector<512x128xbf16>
    %24 = arith.extf %23 : vector<512x128xbf16> to vector<512x128xf32>
    %25 = arith.addf %22, %24 : vector<512x128xf32>
    %cst_14 = arith.constant 0.000000e+00 : f32
    %26 = vector.broadcast %cst_14 : f32 to vector<512x128xf32>
    %27 = arith.maximumf %25, %26 : vector<512x128xf32>
    %c0_15 = arith.constant 0 : index
    %c0_16 = arith.constant 0 : index
    %28 = vector.load %arg7[%c0_15, %c0_16] : memref<512x128xf32, #tpu.memory_space<vmem>>, vector<512x128xf32>
    tpu.vector_store %arg7[%c0_15, %c0_16], %27 {strides = array<i32>} : memref<512x128xf32, #tpu.memory_space<vmem>>, vector<512x128xf32>,
    return
  }
  func.func @transform_0(%arg0: i32) -> (i32, i32) {
    %c0_i32 = arith.constant 0 : i32
    %c0_i32_0 = arith.constant 0 : i32
    return %arg0, %c0_i32 : i32, i32
  }
  func.func @transform_1(%arg0: i32) -> (i32, i32) {
    %c0_i32 = arith.constant 0 : i32
    %c0_i32_0 = arith.constant 0 : i32
    %c0_i32_1 = arith.constant 0 : i32
    return %c0_i32, %c0_i32_0 : i32, i32
  }
  func.func @transform_2(%arg0: i32) -> (i32, i32) {
    %c0_i32 = arith.constant 0 : i32
    %c0_i32_0 = arith.constant 0 : i32
    %c0_i32_1 = arith.constant 0 : i32
    return %c0_i32, %c0_i32_0 : i32, i32
  }
  func.func @transform_3(%arg0: i32) -> (i32, i32) {
    %c0_i32 = arith.constant 0 : i32
    %c0_i32_0 = arith.constant 0 : i32
    %c0_i32_1 = arith.constant 0 : i32
    return %c0_i32, %c0_i32_0 : i32, i32
  }
  func.func @transform_4(%arg0: i32) -> (i32, i32) {
    %c0_i32 = arith.constant 0 : i32
    %c0_i32_0 = arith.constant 0 : i32
    %c0_i32_1 = arith.constant 0 : i32
    return %c0_i32, %c0_i32_0 : i32, i32
  }
  func.func @transform_5(%arg0: i32) -> (i32, i32) {
    %c0_i32 = arith.constant 0 : i32
    %c0_i32_0 = arith.constant 0 : i32
    return %arg0, %c0_i32 : i32, i32
  }
  func.func @transform_6(%arg0: i32) -> (i32, i32) {
    %c0_i32 = arith.constant 0 : i32
    %c0_i32_0 = arith.constant 0 : i32
    return %arg0, %c0_i32 : i32, i32
  }
}

</mosaic_0001>

<bundles_post_ra>
// kernel: identity_block3_forward.4
= control target key start
LH: loop header
LB: loop body
LE: loop exit
PB: predicated region body
PF: predicated region fallthrough
CT: control target
= control target key end

     0   :  { %s1797_s1 = inlined_call_operand.vmem [shape: bf16[128,128], index: 1, kind: input, shape index: {}]   ;;  %s1798_s0 = inlined_call_operand.vmem [shape: bf16[512,128], index: 0, kind: input, shape index: {}]   ;;  %s1799_s2 = inlined_call_operand.vmem [shape: bf16[512,128], index: 2, kind: output, shape index: {0}]   ;;  %s1800_s3 = inlined_call_operand.vmem [shape: f32[1,8,128], index: 3, kind: output, shape index: {1}]   ;;  %s1801_s4 = inlined_call_operand.vmem [shape: f32[1,8,128], index: 4, kind: output, shape index: {2}]  }
   0x1   :  { %v1046_v0 = vld [vmem:[%s1797_s1 + $0x38] sm:$0xff]  ;;  %v1045_v1 = vld [vmem:[%s1797_s1 + $0x30] sm:$0xff]  ;;  %v1044_v2 = vld [vmem:[%s1797_s1 + $0x28] sm:$0xff] }
   0x2   :  { %334 = vmatpush.bf16.msra.mxu0 %v1046_v0  ;;  %1238 = vmatpush.bf16.msra.mxu1 %v1046_v0  ;;  %v1043_v3 = vld [vmem:[%s1797_s1 + $0x20] sm:$0xff]  ;;  %v1042_v4 = vld [vmem:[%s1797_s1 + $0x18] sm:$0xff]  ;;  %v1041_v5 = vld [vmem:[%s1797_s1 + $0x10] sm:$0xff] }
   0x3   :  { %1239 = vmatpush.bf16.msra.mxu2 %v1046_v0  ;;  %1240 = vmatpush.bf16.msra.mxu3 %v1046_v0  ;;  %v1040_v6 = vld [vmem:[%s1797_s1 + $0x8] sm:$0xff]  ;;  %v1039_v7 = vld [vmem:[%s1797_s1] sm:$0xff]  ;;  %v1009_v13 = vld [vmem:[%s1798_s0 + $0x10] sm:$0xff] }
   0x4   :  { %v1007_v8 = vld [vmem:[%s1798_s0] sm:$0xff]  ;;  %v1008_v10 = vld [vmem:[%s1798_s0 + $0x8] sm:$0xff]  ;;  %v1017_v14 = vld [vmem:[%s1798_s0 + $0x50] sm:$0xff] }
   0x5   :  { %v1015_v9 = vld [vmem:[%s1798_s0 + $0x40] sm:$0xff]  ;;  %v1016_v11 = vld [vmem:[%s1798_s0 + $0x48] sm:$0xff]  ;;  %v1010_v16 = vld [vmem:[%s1798_s0 + $0x18] sm:$0xff] }
   0x6   :  { %335 = vmatpush.bf16.msra.mxu0 %v1045_v1  ;;  %1241 = vmatpush.bf16.msra.mxu1 %v1045_v1  ;;  %v1023_v12 = vld [vmem:[%s1798_s0 + $0x80] sm:$0xff]  ;;  %v1024_v15 = vld [vmem:[%s1798_s0 + $0x88] sm:$0xff]  ;;  %v1018_v17 = vld [vmem:[%s1798_s0 + $0x58] sm:$0xff] }
   0x7   :  { %1242 = vmatpush.bf16.msra.mxu2 %v1045_v1  ;;  %1243 = vmatpush.bf16.msra.mxu3 %v1045_v1  ;;  %v1025_v18 = vld [vmem:[%s1798_s0 + $0x90] sm:$0xff]  ;;  %v1031_v19 = vld [vmem:[%s1798_s0 + $0xc0] sm:$0xff]  ;;  %v1026_v22 = vld [vmem:[%s1798_s0 + $0x98] sm:$0xff] }
   0x8   :  { %v1011_v20 = vld [vmem:[%s1798_s0 + $0x20] sm:$0xff]  ;;  %v1032_v23 = vld [vmem:[%s1798_s0 + $0xc8] sm:$0xff]  ;;  %v1033_v27 = vld [vmem:[%s1798_s0 + $0xd0] sm:$0xff] }
   0x9   :  { %v1019_v21 = vld [vmem:[%s1798_s0 + $0x60] sm:$0xff]  ;;  %v1012_v24 = vld [vmem:[%s1798_s0 + $0x28] sm:$0xff]  ;;  %v1013_v28 = vld [vmem:[%s1798_s0 + $0x30] sm:$0xff] }
   0xa   :  { %336 = vmatpush.bf16.msra.mxu0 %v1044_v2  ;;  %1244 = vmatpush.bf16.msra.mxu1 %v1044_v2  ;;  %v1020_v25 = vld [vmem:[%s1798_s0 + $0x68] sm:$0xff]  ;;  %v1027_v26 = vld [vmem:[%s1798_s0 + $0xa0] sm:$0xff]  ;;  %v1021_v29 = vld [vmem:[%s1798_s0 + $0x70] sm:$0xff] }
   0xb   :  { %1245 = vmatpush.bf16.msra.mxu2 %v1044_v2  ;;  %1246 = vmatpush.bf16.msra.mxu3 %v1044_v2  ;;  %v1028_v30 = vld [vmem:[%s1798_s0 + $0xa8] sm:$0xff]  ;;  %v1034_v31 = vld [vmem:[%s1798_s0 + $0xd8] sm:$0xff]  ;;  %v1029_v34 = vld [vmem:[%s1798_s0 + $0xb0] sm:$0xff] }
   0xc   :  { %v1014_v32 = vld [vmem:[%s1798_s0 + $0x38] sm:$0xff]  ;;  %v1035_v35 = vld [vmem:[%s1798_s0 + $0xe0] sm:$0xff]  ;;  %v1036_v39 = vld [vmem:[%s1798_s0 + $0xe8] sm:$0xff] }
   0xd   :  { %v1022_v33 = vld [vmem:[%s1798_s0 + $0x78] sm:$0xff]  ;;  %v1037_v53 = vld [vmem:[%s1798_s0 + $0xf0] sm:$0xff] }
   0xe   :  { %337 = vmatpush.bf16.msra.mxu0 %v1043_v3  ;;  %1247 = vmatpush.bf16.msra.mxu1 %v1043_v3  ;;  %v1030_v38 = vld [vmem:[%s1798_s0 + $0xb8] sm:$0xff] }
   0xf   :  { %1248 = vmatpush.bf16.msra.mxu2 %v1043_v3  ;;  %1249 = vmatpush.bf16.msra.mxu3 %v1043_v3 }
  0x12   :  { %338 = vmatpush.bf16.msra.mxu0 %v1042_v4  ;;  %1250 = vmatpush.bf16.msra.mxu1 %v1042_v4 }
  0x13   :  { %1251 = vmatpush.bf16.msra.mxu2 %v1042_v4  ;;  %1252 = vmatpush.bf16.msra.mxu3 %v1042_v4 }
  0x16   :  { %339 = vmatpush.bf16.msra.mxu0 %v1041_v5  ;;  %1253 = vmatpush.bf16.msra.mxu1 %v1041_v5 }
  0x17   :  { %1254 = vmatpush.bf16.msra.mxu2 %v1041_v5  ;;  %1255 = vmatpush.bf16.msra.mxu3 %v1041_v5  ;;  %v1038_v5 = vld [vmem:[%s1798_s0 + $0xf8] sm:$0xff] }
  0x1a   :  { %340 = vmatpush.bf16.msra.mxu0 %v1040_v6  ;;  %1256 = vmatpush.bf16.msra.mxu1 %v1040_v6 }
  0x1b   :  { %1257 = vmatpush.bf16.msra.mxu2 %v1040_v6  ;;  %1258 = vmatpush.bf16.msra.mxu3 %v1040_v6 }
  0x1e   :  { %341 = vmatpush.bf16.msra.mxu0 %v1039_v7  ;;  %1259 = vmatpush.bf16.msra.mxu1 %v1039_v7 }
  0x1f   :  { %1260 = vmatpush.bf16.msra.mxu2 %v1039_v7  ;;  %1261 = vmatpush.bf16.msra.mxu3 %v1039_v7 }
  0x21   :  { %342 = vmatmul.bf16.vlgmr.msra.gmra.mxu0 %v1007_v8  ;;  %382 = vmatmul.bf16.vlgmr.msra.gmra.mxu1 %v1015_v9 }
  0x22   :  { %422 = vmatmul.bf16.vlgmr.msra.gmra.mxu2 %v1023_v12  ;;  %462 = vmatmul.bf16.vlgmr.msra.gmra.mxu3 %v1031_v19 }
  0x31   :  { %347 = vmatmul.bf16.gmra.mxu0 %v1008_v10  ;;  %387 = vmatmul.bf16.gmra.mxu1 %v1016_v11 }
  0x32   :  { %427 = vmatmul.bf16.gmra.mxu2 %v1024_v15  ;;  %467 = vmatmul.bf16.gmra.mxu3 %v1032_v23 }
  0x41   :  { %352 = vmatmul.bf16.gmra.mxu0 %v1009_v13  ;;  %392 = vmatmul.bf16.gmra.mxu1 %v1017_v14 }
  0x42   :  { %432 = vmatmul.bf16.gmra.mxu2 %v1025_v18  ;;  %472 = vmatmul.bf16.gmra.mxu3 %v1033_v27 }
  0x51   :  { %357 = vmatmul.bf16.gmra.mxu0 %v1010_v16  ;;  %397 = vmatmul.bf16.gmra.mxu1 %v1018_v17 }
  0x52   :  { %437 = vmatmul.bf16.gmra.mxu2 %v1026_v22  ;;  %477 = vmatmul.bf16.gmra.mxu3 %v1034_v31 }
  0x61   :  { %362 = vmatmul.bf16.gmra.mxu0 %v1011_v20  ;;  %402 = vmatmul.bf16.gmra.mxu1 %v1019_v21 }
  0x62   :  { %442 = vmatmul.bf16.gmra.mxu2 %v1027_v26  ;;  %482 = vmatmul.bf16.gmra.mxu3 %v1035_v35 }
  0x71   :  { %367 = vmatmul.bf16.gmra.mxu0 %v1012_v24  ;;  %407 = vmatmul.bf16.gmra.mxu1 %v1020_v25 }
  0x72   :  { %447 = vmatmul.bf16.gmra.mxu2 %v1028_v30  ;;  %487 = vmatmul.bf16.gmra.mxu3 %v1036_v39 }
  0x81   :  { %372 = vmatmul.bf16.gmra.mxu0 %v1013_v28  ;;  %412 = vmatmul.bf16.gmra.mxu1 %v1021_v29 }
  0x82   :  { %452 = vmatmul.bf16.gmra.mxu2 %v1029_v34  ;;  %492 = vmatmul.bf16.gmra.mxu3 %v1037_v53 }
  0x91   :  { %377 = vmatmul.bf16.gmra.mxu0 %v1014_v32  ;;  %417 = vmatmul.bf16.gmra.mxu1 %v1022_v33 }
  0x92   :  { %457 = vmatmul.bf16.gmra.mxu2 %v1030_v38  ;;  %497 = vmatmul.bf16.gmra.mxu3 %v1038_v5 }
  0x9e   :  { %v343_v36 = vpop.f32.mrf.mxu0  ;;  %v1395_v37 = vpop.f32.mrf.mxu1 }
  0x9f   :  { %v700_v40 = vmul.f32 %v343_v36, %v343_v36 }
  0xa5   :  { %v1422_v60 = vpop.f32.mrf.mxu2  ;;  %v1473_v20 = vpop.f32.mrf.mxu3 }
  0xa6   :  { %v345_v41 = vpop.f32.mrf.mxu0  ;;  %v1403_v42 = vpop.f32.mrf.mxu1 }
  0xa7   :  { %v1050_v43 = vpack.c.bf16 %v345_v41, %v343_v36  ;;  %v631_v44 = vadd.f32 %v345_v41, %v343_v36  ;;  %v701_v45 = vmul.f32 %v345_v41, %v345_v41  ;;  %v1090_v46 = vpack.c.bf16 %v1403_v42, %v1395_v37 }
  0xa9   :  { %1051 = vst [vmem:[%s1799_s2] sm:$0xff] %v1050_v43   ;;  %v764_v47 = vadd.f32 %v701_v45, %v700_v40 }
  0xaa   :  { %1214 = vst [vmem:[%s1799_s2 + $0x40] sm:$0xff] %v1090_v46  }
  0xad   :  { %v1434_v2 = vpop.f32.mrf.mxu2  ;;  %v1485_v24 = vpop.f32.mrf.mxu3 }
  0xae   :  { %v348_v48 = vpop.f32.mrf.mxu0  ;;  %v1413_v49 = vpop.f32.mrf.mxu1  ;;  %v1130_v3 = vpack.c.bf16 %v1434_v2, %v1422_v60  ;;  %v1170_v26 = vpack.c.bf16 %v1485_v24, %v1473_v20 }
  0xaf   :  { %v632_v50 = vadd.f32 %v631_v44, %v348_v48  ;;  %v702_v51 = vmul.f32 %v348_v48, %v348_v48 }
  0xb0   :  { %1222 = vst [vmem:[%s1799_s2 + $0x80] sm:$0xff] %v1130_v3  }
  0xb1   :  { %v765_v52 = vadd.f32 %v764_v47, %v702_v51  ;;  %1230 = vst [vmem:[%s1799_s2 + $0xc0] sm:$0xff] %v1170_v26  }
  0xb5   :  { %v1450_v10 = vpop.f32.mrf.mxu2  ;;  %v1503_v32 = vpop.f32.mrf.mxu3 }
  0xb6   :  { %v350_v54 = vpop.f32.mrf.mxu0  ;;  %v1418_v55 = vpop.f32.mrf.mxu1 }
  0xb7   :  { %v1055_v56 = vpack.c.bf16 %v350_v54, %v348_v48  ;;  %v633_v57 = vadd.f32 %v632_v50, %v350_v54  ;;  %v703_v58 = vmul.f32 %v350_v54, %v350_v54  ;;  %v1095_v59 = vpack.c.bf16 %v1418_v55, %v1413_v49 }
  0xb9   :  { %1207 = vst [vmem:[%s1799_s2 + $0x8] sm:$0xff] %v1055_v56   ;;  %v766_v61 = vadd.f32 %v765_v52, %v703_v58 }
  0xba   :  { %1215 = vst [vmem:[%s1799_s2 + $0x48] sm:$0xff] %v1095_v59  }
  0xbd   :  { %v1460_v13 = vpop.f32.mrf.mxu2  ;;  %v1515_v36 = vpop.f32.mrf.mxu3 }
  0xbe   :  { %v353_v62 = vpop.f32.mrf.mxu0  ;;  %v1430_v63 = vpop.f32.mrf.mxu1  ;;  %v1135_v14 = vpack.c.bf16 %v1460_v13, %v1450_v10  ;;  %v1175_v39 = vpack.c.bf16 %v1515_v36, %v1503_v32 }
  0xbf   :  { %v1432_v0 = vadd.f32 %v633_v57, %v353_v62  ;;  %v704_v1 = vmul.f32 %v353_v62, %v353_v62 }
  0xc0   :  { %1223 = vst [vmem:[%s1799_s2 + $0x88] sm:$0xff] %v1135_v14  }
  0xc1   :  { %v1438_v4 = vadd.f32 %v766_v61, %v704_v1  ;;  %1231 = vst [vmem:[%s1799_s2 + $0xc8] sm:$0xff] %v1175_v39  }
  0xc5   :  { %v1471_v19 = vpop.f32.mrf.mxu2  ;;  %v1533_v46 = vpop.f32.mrf.mxu3 }
  0xc6   :  { %v355_v6 = vpop.f32.mrf.mxu0  ;;  %v1446_v7 = vpop.f32.mrf.mxu1 }
  0xc7   :  { %v1060_v8 = vpack.c.bf16 %v355_v6, %v353_v62  ;;  %v1100_v9 = vpack.c.bf16 %v1446_v7, %v1430_v63  ;;  %v705_v52 = vmul.f32 %v355_v6, %v355_v6  ;;  %v635_v57 = vadd.f32 %v1432_v0, %v355_v6 }
  0xc9   :  { %1208 = vst [vmem:[%s1799_s2 + $0x10] sm:$0xff] %v1060_v8   ;;  %v768_v58 = vadd.f32 %v1438_v4, %v705_v52 }
  0xca   :  { %1216 = vst [vmem:[%s1799_s2 + $0x50] sm:$0xff] %v1100_v9  }
  0xcd   :  { %v1483_v23 = vpop.f32.mrf.mxu2  ;;  %v1545_v51 = vpop.f32.mrf.mxu3 }
  0xce   :  { %v358_v11 = vpop.f32.mrf.mxu0  ;;  %v1458_v12 = vpop.f32.mrf.mxu1  ;;  %v1140_v25 = vpack.c.bf16 %v1483_v23, %v1471_v19  ;;  %v1180_v54 = vpack.c.bf16 %v1545_v51, %v1533_v46 }
  0xcf   :  { %v706_v56 = vmul.f32 %v358_v11, %v358_v11  ;;  %v636_v61 = vadd.f32 %v635_v57, %v358_v11 }
  0xd0   :  { %1224 = vst [vmem:[%s1799_s2 + $0x90] sm:$0xff] %v1140_v25  }
  0xd1   :  { %1232 = vst [vmem:[%s1799_s2 + $0xd0] sm:$0xff] %v1180_v54   ;;  %v769_v62 = vadd.f32 %v768_v58, %v706_v56 }
  0xd5   :  { %v1501_v31 = vpop.f32.mrf.mxu2  ;;  %v1565_v0 = vpop.f32.mrf.mxu3 }
  0xd6   :  { %v360_v15 = vpop.f32.mrf.mxu0  ;;  %v1467_v16 = vpop.f32.mrf.mxu1 }
  0xd7   :  { %v1065_v17 = vpack.c.bf16 %v360_v15, %v358_v11  ;;  %v1105_v18 = vpack.c.bf16 %v1467_v16, %v1458_v12  ;;  %v707_v59 = vmul.f32 %v360_v15, %v360_v15  ;;  %v637_v8 = vadd.f32 %v636_v61, %v360_v15 }
  0xd9   :  { %1209 = vst [vmem:[%s1799_s2 + $0x18] sm:$0xff] %v1065_v17   ;;  %v770_v6 = vadd.f32 %v769_v62, %v707_v59 }
  0xda   :  { %1217 = vst [vmem:[%s1799_s2 + $0x58] sm:$0xff] %v1105_v18  }
  0xdd   :  { %v1513_v35 = vpop.f32.mrf.mxu2 }
  0xde   :  { %v363_v21 = vpop.f32.mrf.mxu0  ;;  %v1481_v22 = vpop.f32.mrf.mxu1  ;;  %v1145_v38 = vpack.c.bf16 %v1513_v35, %v1501_v31 }
  0xdf   :  { %v708_v1 = vmul.f32 %v363_v21, %v363_v21  ;;  %v638_v25 = vadd.f32 %v637_v8, %v363_v21 }
  0xe0   :  { %1225 = vst [vmem:[%s1799_s2 + $0x98] sm:$0xff] %v1145_v38  }
  0xe1   :  { %v771_v4 = vadd.f32 %v770_v6, %v708_v1 }
  0xe5   :  { %v1531_v45 = vpop.f32.mrf.mxu2 }
  0xe6   :  { %v365_v27 = vpop.f32.mrf.mxu0  ;;  %v1497_v28 = vpop.f32.mrf.mxu1 }
  0xe7   :  { %v1070_v29 = vpack.c.bf16 %v365_v27, %v363_v21  ;;  %v1110_v30 = vpack.c.bf16 %v1497_v28, %v1481_v22  ;;  %v709_v18 = vmul.f32 %v365_v27, %v365_v27  ;;  %v639_v15 = vadd.f32 %v638_v25, %v365_v27 }
  0xe9   :  { %1210 = vst [vmem:[%s1799_s2 + $0x20] sm:$0xff] %v1070_v29   ;;  %v772_v26 = vadd.f32 %v771_v4, %v709_v18 }
  0xea   :  { %1218 = vst [vmem:[%s1799_s2 + $0x60] sm:$0xff] %v1110_v30  }
  0xed   :  { %v1543_v50 = vpop.f32.mrf.mxu2 }
  0xee   :  { %v368_v33 = vpop.f32.mrf.mxu0  ;;  %v1511_v34 = vpop.f32.mrf.mxu1  ;;  %v1150_v53 = vpack.c.bf16 %v1543_v50, %v1531_v45 }
  0xef   :  { %v710_v11 = vmul.f32 %v368_v33, %v368_v33  ;;  %v640_v30 = vadd.f32 %v639_v15, %v368_v33 }
  0xf0   :  { %1226 = vst [vmem:[%s1799_s2 + $0xa0] sm:$0xff] %v1150_v53   ;;  %v1577_v53 = vpop.f32.mrf.mxu3 }
  0xf1   :  { %v773_v38 = vadd.f32 %v772_v26, %v710_v11  ;;  %v1185_v27 = vpack.c.bf16 %v1577_v53, %v1565_v0  ;;  %v717_v26 = vmul.f32 %v1403_v42, %v1403_v42 }
  0xf3   :  { %1233 = vst [vmem:[%s1799_s2 + $0xd8] sm:$0xff] %v1185_v27  }
  0xf5   :  { %v1563_v17 = vpop.f32.mrf.mxu2 }
  0xf6   :  { %v370_v40 = vpop.f32.mrf.mxu0  ;;  %v1527_v41 = vpop.f32.mrf.mxu1 }
  0xf7   :  { %v1075_v43 = vpack.c.bf16 %v370_v40, %v368_v33  ;;  %v1115_v44 = vpack.c.bf16 %v1527_v41, %v1511_v34  ;;  %v711_v29 = vmul.f32 %v370_v40, %v370_v40  ;;  %v641_v21 = vadd.f32 %v640_v30, %v370_v40 }
  0xf8   :  { %v1595_v4 = vpop.f32.mrf.mxu3 }
  0xf9   :  { %1211 = vst [vmem:[%s1799_s2 + $0x28] sm:$0xff] %v1075_v43   ;;  %v774_v54 = vadd.f32 %v773_v38, %v711_v29  ;;  %v718_v38 = vmul.f32 %v1413_v49, %v1413_v49 }
  0xfa   :  { %1219 = vst [vmem:[%s1799_s2 + $0x68] sm:$0xff] %v1115_v44  }
  0xfd   :  { %v1575_v52 = vpop.f32.mrf.mxu2 }
  0xfe   :  { %v373_v47 = vpop.f32.mrf.mxu0  ;;  %v1541_v48 = vpop.f32.mrf.mxu1  ;;  %v1155_v57 = vpack.c.bf16 %v1575_v52, %v1563_v17 }
  0xff   :  { %v712_v39 = vmul.f32 %v373_v47, %v373_v47  ;;  %v642_v58 = vadd.f32 %v641_v21, %v373_v47 }
 0x100   :  { %1227 = vst [vmem:[%s1799_s2 + $0xa8] sm:$0xff] %v1155_v57   ;;  %v1617_v57 = vpop.f32.mrf.mxu3 }
 0x101   :  { %v775_v33 = vadd.f32 %v774_v54, %v712_v39  ;;  %v1190_v27 = vpack.c.bf16 %v1617_v57, %v1595_v4 }
 0x103   :  { %1234 = vst [vmem:[%s1799_s2 + $0xe0] sm:$0xff] %v1190_v27  }
 0x105   :  { %v1593_v25 = vpop.f32.mrf.mxu2 }
 0x106   :  { %v375_v3 = vpop.f32.mrf.mxu0  ;;  %v1559_v5 = vpop.f32.mrf.mxu1 }
 0x107   :  { %v1080_v9 = vpack.c.bf16 %v375_v3, %v373_v47  ;;  %v1120_v14 = vpack.c.bf16 %v1559_v5, %v1541_v48  ;;  %v713_v56 = vmul.f32 %v375_v3, %v375_v3  ;;  %v643_v40 = vadd.f32 %v642_v58, %v375_v3 }
 0x108   :  { %v716_v3 = vmul.f32 %v1395_v37, %v1395_v37  ;;  %v729_v27 = vmul.f32 %v1559_v5, %v1559_v5 }
 0x109   :  { %1212 = vst [vmem:[%s1799_s2 + $0x30] sm:$0xff] %v1080_v9   ;;  %v776_v61 = vadd.f32 %v775_v33, %v713_v56 }
 0x10a   :  { %1220 = vst [vmem:[%s1799_s2 + $0x70] sm:$0xff] %v1120_v14  }
 0x10d   :  { %v1615_v56 = vpop.f32.mrf.mxu2 }
 0x10e   :  { %v378_v43 = vpop.f32.mrf.mxu0  ;;  %v1573_v44 = vpop.f32.mrf.mxu1 }
 0x10f   :  { %v714_v59 = vmul.f32 %v378_v43, %v378_v43  ;;  %v644_v62 = vadd.f32 %v643_v40, %v378_v43 }
 0x111   :  { %v777_v1 = vadd.f32 %v776_v61, %v714_v59  ;;  %v722_v61 = vmul.f32 %v1458_v12, %v1458_v12 }
 0x116   :  { %v380_v8 = vpop.f32.mrf.mxu0  ;;  %v1589_v9 = vpop.f32.mrf.mxu1 }
 0x117   :  { %v1085_v14 = vpack.c.bf16 %v380_v8, %v378_v43  ;;  %v645_v6 = vadd.f32 %v644_v62, %v380_v8  ;;  %v715_v47 = vmul.f32 %v380_v8, %v380_v8  ;;  %v1125_v18 = vpack.c.bf16 %v1589_v9, %v1573_v44 }
 0x119   :  { %1213 = vst [vmem:[%s1799_s2 + $0x38] sm:$0xff] %v1085_v14   ;;  %v646_v11 = vadd.f32 %v645_v6, %v1395_v37  ;;  %v778_v15 = vadd.f32 %v777_v1, %v715_v47  ;;  %v719_v37 = vmul.f32 %v1418_v55, %v1418_v55  ;;  %v723_v1 = vmul.f32 %v1467_v16, %v1467_v16  ;;  %v1641_v6 = vpop.f32.mrf.mxu2 }
 0x11a   :  { %1221 = vst [vmem:[%s1799_s2 + $0x78] sm:$0xff] %v1125_v18   ;;  %v724_v47 = vmul.f32 %v1481_v22, %v1481_v22 }
 0x11b   :  { %v647_v29 = vadd.f32 %v646_v11, %v1403_v42  ;;  %v779_v30 = vadd.f32 %v778_v15, %v716_v3  ;;  %v1160_v42 = vpack.c.bf16 %v1615_v56, %v1593_v25  ;;  %v725_v11 = vmul.f32 %v1497_v28, %v1497_v28 }
 0x11d   :  { %v648_v39 = vadd.f32 %v647_v29, %v1413_v49  ;;  %v780_v43 = vadd.f32 %v779_v30, %v717_v26  ;;  %v720_v49 = vmul.f32 %v1430_v63, %v1430_v63  ;;  %1228 = vst [vmem:[%s1799_s2 + $0xb0] sm:$0xff] %v1160_v42   ;;  %v727_v30 = vmul.f32 %v1527_v41, %v1527_v41 }
 0x11f   :  { %v649_v21 = vadd.f32 %v648_v39, %v1418_v55  ;;  %v781_v54 = vadd.f32 %v780_v43, %v718_v38  ;;  %v721_v55 = vmul.f32 %v1446_v7, %v1446_v7 }
 0x121   :  { %v650_v58 = vadd.f32 %v649_v21, %v1430_v63  ;;  %v782_v33 = vadd.f32 %v781_v54, %v719_v37 }
 0x123   :  { %v651_v59 = vadd.f32 %v650_v58, %v1446_v7  ;;  %v783_v40 = vadd.f32 %v782_v33, %v720_v49  ;;  %v1643_v7 = vpop.f32.mrf.mxu3 }
 0x125   :  { %v784_v62 = vadd.f32 %v783_v40, %v721_v55  ;;  %v652_v63 = vadd.f32 %v651_v59, %v1458_v12  ;;  %v731_v59 = vmul.f32 %v1589_v9, %v1589_v9 }
 0x127   :  { %v653_v8 = vadd.f32 %v652_v63, %v1467_v16  ;;  %v785_v14 = vadd.f32 %v784_v62, %v722_v61  ;;  %v726_v16 = vmul.f32 %v1511_v34, %v1511_v34  ;;  %v733_v63 = vmul.f32 %v1434_v2, %v1434_v2 }
 0x129   :  { %v654_v18 = vadd.f32 %v653_v8, %v1481_v22  ;;  %v786_v3 = vadd.f32 %v785_v14, %v723_v1  ;;  %v1657_v22 = vpop.f32.mrf.mxu2  ;;  %v734_v8 = vmul.f32 %v1450_v10, %v1450_v10 }
 0x12b   :  { %v655_v12 = vadd.f32 %v654_v18, %v1497_v28  ;;  %v787_v15 = vadd.f32 %v786_v3, %v724_v47  ;;  %v1659_v43 = vpop.f32.mrf.mxu3  ;;  %v1165_v28 = vpack.c.bf16 %v1657_v22, %v1641_v6  ;;  %v735_v47 = vmul.f32 %v1460_v13, %v1460_v13 }
 0x12c   :  { %v1195_v37 = vpack.c.bf16 %v1659_v43, %v1643_v7 }
 0x12d   :  { %v656_v26 = vadd.f32 %v655_v12, %v1511_v34  ;;  %v788_v29 = vadd.f32 %v787_v15, %v725_v11  ;;  %v728_v34 = vmul.f32 %v1541_v48, %v1541_v48  ;;  %1229 = vst [vmem:[%s1799_s2 + $0xb8] sm:$0xff] %v1165_v28  }
 0x12e   :  { %1235 = vst [vmem:[%s1799_s2 + $0xe8] sm:$0xff] %v1195_v37   ;;  %v740_v37 = vmul.f32 %v1531_v45, %v1531_v45 }
 0x12f   :  { %v657_v38 = vadd.f32 %v656_v26, %v1527_v41  ;;  %v789_v39 = vadd.f32 %v788_v29, %v726_v16  ;;  %v738_v26 = vmul.f32 %v1501_v31, %v1501_v31 }
 0x131   :  { %v658_v21 = vadd.f32 %v657_v38, %v1541_v48  ;;  %v790_v54 = vadd.f32 %v789_v39, %v727_v30  ;;  %v730_v48 = vmul.f32 %v1573_v44, %v1573_v44 }
 0x133   :  { %v791_v41 = vadd.f32 %v790_v54, %v728_v34  ;;  %v659_v42 = vadd.f32 %v658_v21, %v1559_v5  ;;  %v1683_v40 = vpop.f32.mrf.mxu3  ;;  %v732_v5 = vmul.f32 %v1422_v60, %v1422_v60  ;;  %v741_v34 = vmul.f32 %v1543_v50, %v1543_v50 }
 0x135   :  { %v792_v49 = vadd.f32 %v791_v41, %v729_v27  ;;  %v660_v58 = vadd.f32 %v659_v42, %v1573_v44  ;;  %v742_v41 = vmul.f32 %v1563_v17, %v1563_v17 }
 0x137   :  { %v793_v33 = vadd.f32 %v792_v49, %v730_v48  ;;  %v661_v55 = vadd.f32 %v660_v58, %v1589_v9  ;;  %v743_v49 = vmul.f32 %v1575_v52, %v1575_v52 }
 0x139   :  { %v662_v61 = vadd.f32 %v661_v55, %v1422_v60  ;;  %v794_v62 = vadd.f32 %v793_v33, %v731_v59 }
 0x13b   :  { %v663_v1 = vadd.f32 %v662_v61, %v1434_v2  ;;  %v795_v44 = vadd.f32 %v794_v62, %v732_v5  ;;  %v1697_v60 = vpop.f32.mrf.mxu3  ;;  %v736_v2 = vmul.f32 %v1471_v19, %v1471_v19  ;;  %v746_v62 = vmul.f32 %v1641_v6, %v1641_v6 }
 0x13c   :  { %v1200_v11 = vpack.c.bf16 %v1697_v60, %v1683_v40 }
 0x13d   :  { %v664_v14 = vadd.f32 %v663_v1, %v1450_v10  ;;  %v796_v9 = vadd.f32 %v795_v44, %v733_v63  ;;  %v737_v10 = vmul.f32 %v1483_v23, %v1483_v23  ;;  %v748_v44 = vmul.f32 %v1473_v20, %v1473_v20 }
 0x13e   :  { %1236 = vst [vmem:[%s1799_s2 + $0xf0] sm:$0xff] %v1200_v11  }
 0x13f   :  { %v665_v18 = vadd.f32 %v664_v14, %v1460_v13  ;;  %v797_v3 = vadd.f32 %v796_v9, %v734_v8 }
 0x141   :  { %v666_v12 = vadd.f32 %v665_v18, %v1471_v19  ;;  %v798_v15 = vadd.f32 %v797_v3, %v735_v47  ;;  %v739_v19 = vmul.f32 %v1513_v35, %v1513_v35 }
 0x143   :  { %v667_v13 = vadd.f32 %v666_v12, %v1483_v23  ;;  %v799_v16 = vadd.f32 %v798_v15, %v736_v2  ;;  %v1716_v28 = vpop.f32.mrf.mxu3 }
 0x145   :  { %v800_v29 = vadd.f32 %v799_v16, %v737_v10  ;;  %v668_v30 = vadd.f32 %v667_v13, %v1501_v31 }
 0x147   :  { %v669_v38 = vadd.f32 %v668_v30, %v1513_v35  ;;  %v801_v39 = vadd.f32 %v800_v29, %v738_v26 }
 0x149   :  { %v670_v23 = vadd.f32 %v669_v38, %v1531_v45  ;;  %v802_v21 = vadd.f32 %v801_v39, %v739_v19 }
 0x14b   :  { %v671_v54 = vadd.f32 %v670_v23, %v1543_v50  ;;  %v803_v31 = vadd.f32 %v802_v21, %v740_v37  ;;  %v500_v45 = vpop.f32.mrf.mxu3  ;;  %v744_v50 = vmul.f32 %v1593_v25, %v1593_v25 }
 0x14c   :  { %v1205_v48 = vpack.c.bf16 %v500_v45, %v1716_v28 }
 0x14d   :  { %v672_v35 = vadd.f32 %v671_v54, %v1563_v17  ;;  %v804_v42 = vadd.f32 %v803_v31, %v741_v34  ;;  %v759_v34 = vmul.f32 %v1659_v43, %v1659_v43 }
 0x14e   :  { %1237 = vst [vmem:[%s1799_s2 + $0xf8] sm:$0xff] %v1205_v48   ;;  %v763_v48 = vmul.f32 %v500_v45, %v500_v45 }
 0x14f   :  { %v673_v27 = vadd.f32 %v672_v35, %v1575_v52  ;;  %v805_v58 = vadd.f32 %v804_v42, %v742_v41  ;;  %v745_v52 = vmul.f32 %v1615_v56, %v1615_v56  ;;  %v760_v41 = vmul.f32 %v1683_v40, %v1683_v40 }
 0x150   :  { %v761_v42 = vmul.f32 %v1697_v60, %v1697_v60 }
 0x151   :  { %v806_v33 = vadd.f32 %v805_v58, %v743_v49  ;;  %v674_v55 = vadd.f32 %v673_v27, %v1593_v25  ;;  %v747_v25 = vmul.f32 %v1657_v22, %v1657_v22  ;;  %v762_v49 = vmul.f32 %v1716_v28, %v1716_v28 }
 0x153   :  { %v807_v17 = vadd.f32 %v806_v33, %v744_v50  ;;  %v675_v59 = vadd.f32 %v674_v55, %v1615_v56  ;;  %v749_v56 = vmul.f32 %v1485_v24, %v1485_v24 }
 0x155   :  { %v808_v5 = vadd.f32 %v807_v17, %v745_v52  ;;  %v676_v61 = vadd.f32 %v675_v59, %v1641_v6  ;;  %v750_v6 = vmul.f32 %v1503_v32, %v1503_v32 }
 0x157   :  { %v809_v63 = vadd.f32 %v808_v5, %v746_v62  ;;  %v677_v1 = vadd.f32 %v676_v61, %v1657_v22  ;;  %v751_v22 = vmul.f32 %v1515_v36, %v1515_v36 }
 0x159   :  { %v678_v8 = vadd.f32 %v677_v1, %v1473_v20  ;;  %v810_v14 = vadd.f32 %v809_v63, %v747_v25  ;;  %v752_v20 = vmul.f32 %v1533_v46, %v1533_v46 }
 0x15b   :  { %v679_v9 = vadd.f32 %v678_v8, %v1485_v24  ;;  %v811_v47 = vadd.f32 %v810_v14, %v748_v44  ;;  %v753_v24 = vmul.f32 %v1545_v51, %v1545_v51 }
 0x15d   :  { %v680_v18 = vadd.f32 %v679_v9, %v1503_v32  ;;  %v812_v3 = vadd.f32 %v811_v47, %v749_v56  ;;  %v754_v32 = vmul.f32 %v1565_v0, %v1565_v0 }
 0x15f   :  { %v681_v11 = vadd.f32 %v680_v18, %v1515_v36  ;;  %v813_v2 = vadd.f32 %v812_v3, %v750_v6  ;;  %v755_v36 = vmul.f32 %v1577_v53, %v1577_v53 }
 0x161   :  { %v682_v12 = vadd.f32 %v681_v11, %v1533_v46  ;;  %v814_v15 = vadd.f32 %v813_v2, %v751_v22  ;;  %v756_v46 = vmul.f32 %v1595_v4, %v1595_v4 }
 0x163   :  { %v683_v10 = vadd.f32 %v682_v12, %v1545_v51  ;;  %v815_v13 = vadd.f32 %v814_v15, %v752_v20  ;;  %v757_v51 = vmul.f32 %v1617_v57, %v1617_v57 }
 0x165   :  { %v816_v16 = vadd.f32 %v815_v13, %v753_v24  ;;  %v684_v26 = vadd.f32 %v683_v10, %v1565_v0  ;;  %v758_v0 = vmul.f32 %v1643_v7, %v1643_v7 }
 0x167   :  { %v685_v29 = vadd.f32 %v684_v26, %v1577_v53  ;;  %v817_v30 = vadd.f32 %v816_v16, %v754_v32 }
 0x169   :  { %v686_v19 = vadd.f32 %v685_v29, %v1595_v4  ;;  %v818_v38 = vadd.f32 %v817_v30, %v755_v36 }
 0x16b   :  { %v687_v39 = vadd.f32 %v686_v19, %v1617_v57  ;;  %v819_v37 = vadd.f32 %v818_v38, %v756_v46 }
 0x16d   :  { %v688_v23 = vadd.f32 %v687_v39, %v1643_v7  ;;  %v820_v21 = vadd.f32 %v819_v37, %v757_v51 }
 0x16f   :  { %v689_v53 = vadd.f32 %v688_v23, %v1659_v43  ;;  %v821_v54 = vadd.f32 %v820_v21, %v758_v0 }
 0x171   :  { %v822_v4 = vadd.f32 %v821_v54, %v759_v34  ;;  %v690_v31 = vadd.f32 %v689_v53, %v1683_v40 }
 0x173   :  { %v823_v57 = vadd.f32 %v822_v4, %v760_v41  ;;  %v691_v35 = vadd.f32 %v690_v31, %v1697_v60 }
 0x175   :  { %v824_v7 = vadd.f32 %v823_v57, %v761_v42  ;;  %v692_v27 = vadd.f32 %v691_v35, %v1716_v28 }
 0x177   :  { %v825_v43 = vadd.f32 %v824_v7, %v762_v49  ;;  %v693_v58 = vadd.f32 %v692_v27, %v500_v45 }
 0x179   :  { %v694_v33 = vrot.slane %v693_v58, 4  ;;  %v826_v55 = vadd.f32 %v825_v43, %v763_v48 }
 0x17b   :  { %v695_v50 = vadd.f32 %v694_v33, %v693_v58  ;;  %v827_v17 = vrot.slane %v826_v55, 4 }
 0x17d   :  { %v696_v40 = vrot.slane %v695_v50, 2  ;;  %v828_v59 = vadd.f32 %v827_v17, %v826_v55 }
 0x17f   :  { %v697_v52 = vadd.f32 %v696_v40, %v695_v50  ;;  %v829_v5 = vrot.slane %v828_v59, 2 }
 0x181   :  { %v698_v61 = vrot.slane %v697_v52, 1  ;;  %v830_v62 = vadd.f32 %v829_v5, %v828_v59 }
 0x183   :  { %v699_v60 = vadd.f32 %v698_v61, %v697_v52  ;;  %v831_v63 = vrot.slane %v830_v62, 1 }
 0x185   :  { %v832_v1 = vadd.f32 %v831_v63, %v830_v62  ;;  %833 = vst [vmem:[%s1800_s3] sm:$0xff] %v699_v60 }
 0x187   :  { %834 = vst [vmem:[%s1801_s4] sm:$0xff] %v832_v1 }

// kernel: identity_block3_forward.7
= control target key start
LH: loop header
LB: loop body
LE: loop exit
PB: predicated region body
PF: predicated region fallthrough
CT: control target
= control target key end

     0   :  { %s1517_s1 = inlined_call_operand.vmem [shape: f32[1,128], index: 1, kind: input, shape index: {}]   ;;  %s1518_s2 = inlined_call_operand.vmem [shape: f32[1,128], index: 2, kind: input, shape index: {}]   ;;  %s1519_s5 = inlined_call_operand.vmem [shape: bf16[512,128], index: 5, kind: input, shape index: {}]   ;;  %s1520_s3 = inlined_call_operand.vmem [shape: f32[1,128], index: 3, kind: input, shape index: {}]   ;;  %s1521_s0 = inlined_call_operand.vmem [shape: f32[512,128], index: 0, kind: input, shape index: {}]   ;;  %s1522_s4 = inlined_call_operand.vmem [shape: f32[1,128], index: 4, kind: input, shape index: {}]   ;;  %s1523_s6 = inlined_call_operand.vmem [shape: f32[512,128], index: 6, kind: output, shape index: {}]  }
   0x1   :  { %v23_v0 = vld [vmem:[%s1517_s1] sm:$0x1]  ;;  %v782_v13 = vld [vmem:[%s1519_s5 + $0x8] sm:$0xff]   ;;  %v787_v14 = vld [vmem:[%s1519_s5 + $0x10] sm:$0xff]  }
   0x2   :  { %v25_v1 = vld [vmem:[%s1518_s2] sm:$0x1]  ;;  %v770_v2 = vmul.f32 0.001953125, %v23_v0  ;;  %v792_v15 = vld [vmem:[%s1519_s5 + $0x18] sm:$0xff]   ;;  %v804_v20 = vld [vmem:[%s1519_s5 + $0x28] sm:$0xff]   ;;  %v574_v23 = vunpack.c.l.bf16 %v782_v13  ;;  %v575_v24 = vunpack.c.h.bf16 %v782_v13  ;;  %v578_v25 = vunpack.c.l.bf16 %v787_v14 }
   0x3   :  { %v26_v3 = vmul.f32 0.001953125, %v25_v1  ;;  %v777_v11 = vld [vmem:[%s1519_s5] sm:$0xff]   ;;  %v809_v21 = vld [vmem:[%s1519_s5 + $0x30] sm:$0xff]   ;;  %v579_v26 = vunpack.c.h.bf16 %v787_v14  ;;  %v822_v27 = vld [vmem:[%s1519_s5 + $0x38] sm:$0xff]   ;;  %v582_v30 = vunpack.c.l.bf16 %v792_v15  ;;  %v583_v31 = vunpack.c.h.bf16 %v792_v15 }
   0x4   :  { %v27_v4 = vmul.f32 %v770_v2, %v770_v2  ;;  %v797_v16 = vld [vmem:[%s1519_s5 + $0x20] sm:$0xff]   ;;  %v570_v18 = vunpack.c.l.bf16 %v777_v11  ;;  %v571_v19 = vunpack.c.h.bf16 %v777_v11  ;;  %v838_v34 = vld [vmem:[%s1519_s5 + $0x48] sm:$0xff]   ;;  %v590_v36 = vunpack.c.l.bf16 %v804_v20  ;;  %v847_v39 = vld [vmem:[%s1519_s5 + $0x50] sm:$0xff]  }
   0x5   :  { %v41_v29 = vld [vmem:[%s1520_s3] sm:$0x1]  ;;  %v586_v32 = vunpack.c.l.bf16 %v797_v16  ;;  %v587_v35 = vunpack.c.h.bf16 %v797_v16  ;;  %v591_v37 = vunpack.c.h.bf16 %v804_v20  ;;  %v594_v38 = vunpack.c.l.bf16 %v809_v21  ;;  %v852_v40 = vld [vmem:[%s1519_s5 + $0x58] sm:$0xff]   ;;  %v47_v49 = vld [vmem:[%s1521_s0 + $0x8] sm:$0xff] }
   0x6   :  { %v28_v5 = vsub.f32 %v26_v3, %v27_v4  ;;  %v833_v33 = vld [vmem:[%s1519_s5 + $0x40] sm:$0xff]   ;;  %v595_v44 = vunpack.c.h.bf16 %v809_v21  ;;  %v598_v45 = vunpack.c.l.bf16 %v822_v27  ;;  %v599_v46 = vunpack.c.h.bf16 %v822_v27  ;;  %v48_v50 = vld [vmem:[%s1521_s0 + $0x10] sm:$0xff]  ;;  %v882_v54 = vld [vmem:[%s1519_s5 + $0x68] sm:$0xff]  }
   0x7   :  { %v43_v42 = vld [vmem:[%s1522_s4] sm:$0x1]  ;;  %v602_v51 = vunpack.c.l.bf16 %v833_v33  ;;  %v603_v52 = vunpack.c.h.bf16 %v833_v33  ;;  %v606_v53 = vunpack.c.l.bf16 %v838_v34  ;;  %v49_v55 = vld [vmem:[%s1521_s0 + $0x18] sm:$0xff]  ;;  %v51_v57 = vld [vmem:[%s1521_s0 + $0x28] sm:$0xff]  ;;  %v607_v58 = vunpack.c.h.bf16 %v838_v34 }
   0x8   :  { %v29_v6 = vmax.f32 %v28_v5, 0.0  ;;  %v46_v43 = vld [vmem:[%s1521_s0] sm:$0xff]  ;;  %v610_v59 = vunpack.c.l.bf16 %v847_v39  ;;  %v611_v60 = vunpack.c.h.bf16 %v847_v39  ;;  %v614_v61 = vunpack.c.l.bf16 %v852_v40  ;;  %v52_v0 = vld [vmem:[%s1521_s0 + $0x30] sm:$0xff]  ;;  %v53_v1 = vld [vmem:[%s1521_s0 + $0x38] sm:$0xff] }
   0x9   :  { %v868_v47 = vld [vmem:[%s1519_s5 + $0x60] sm:$0xff]   ;;  %v911_v5 = vld [vmem:[%s1519_s5 + $0x70] sm:$0xff]   ;;  %v69_v27 = vld [vmem:[%s1521_s0 + $0xb8] sm:$0xff] }
   0xa   :  { %v30_v7 = vadd.f32 1e-05, %v29_v6  ;;  %v50_v56 = vld [vmem:[%s1521_s0 + $0x20] sm:$0xff]  ;;  %v55_v6 = vld [vmem:[%s1521_s0 + $0x48] sm:$0xff]  ;;  %v60_v13 = vld [vmem:[%s1521_s0 + $0x70] sm:$0xff] }
   0xc   :  { %727 = vrsqrt.f32 %v30_v7  ;;  %vm37_vm0 = vweird.f32 %v30_v7 }
  0x12   :  { %v728_v8 = vpop.eup %727 }
  0x13   :  { %v32_v9 = vmul.f32 %v728_v8, %v30_v7  ;;  %vm38_vm1 = vweird.f32 %v728_v8  ;;  %v56_v7 = vld [vmem:[%s1521_s0 + $0x50] sm:$0xff] }
  0x14   :  { %vm811_vm2 = vmor %vm37_vm0, %vm38_vm1 }
  0x15   :  { %v33_v10 = vmul.f32 %v728_v8, %v32_v9 }
  0x17   :  { %v34_v12 = vmul.f32 0.5, %v33_v10  ;;  %v59_v10 = vld [vmem:[%s1521_s0 + $0x68] sm:$0xff] }
  0x19   :  { %v35_v17 = vsub.f32 1.5, %v34_v12 }
  0x1b   :  { %v36_v28 = vmul.f32 %v728_v8, %v35_v17 }
  0x1d   :  { %v40_v41 = vsel %vm811_vm2, %v728_v8, %v36_v28 }
  0x1e   :  { %v42_v48 = vmul.f32 %v41_v29, %v40_v41  ;;  %v57_v41 = vld [vmem:[%s1521_s0 + $0x58] sm:$0xff] }
  0x20   :  { %v44_v62 = vmul.f32 %v42_v48, %v770_v2  ;;  %v898_v63 = vperm.slane %v42_v48, 0  ;;  %v54_v2 = vld [vmem:[%s1521_s0 + $0x40] sm:$0xff] }
  0x21   :  { %v58_v48 = vld [vmem:[%s1521_s0 + $0x60] sm:$0xff] }
  0x22   :  { %v45_v17 = vsub.f32 %v43_v42, %v44_v62  ;;  %v113_v22 = vmul.f32 %v898_v63, %v46_v43  ;;  %v114_v28 = vmul.f32 %v898_v63, %v47_v49  ;;  %v115_v29 = vmul.f32 %v898_v63, %v48_v50 }
  0x23   :  { %v116_v42 = vmul.f32 %v898_v63, %v49_v55  ;;  %v117_v43 = vmul.f32 %v898_v63, %v50_v56  ;;  %v118_v49 = vmul.f32 %v898_v63, %v51_v57  ;;  %v119_v50 = vmul.f32 %v898_v63, %v52_v0 }
  0x24   :  { %v942_v62 = vperm.slane %v45_v17, 0  ;;  %v120_v12 = vmul.f32 %v898_v63, %v53_v1  ;;  %v121_v9 = vmul.f32 %v898_v63, %v54_v2  ;;  %v122_v8 = vmul.f32 %v898_v63, %v55_v6 }
  0x25   :  { %v123_v4 = vmul.f32 %v898_v63, %v56_v7  ;;  %v124_v3 = vmul.f32 %v898_v63, %v57_v41  ;;  %v125_v55 = vmul.f32 %v898_v63, %v58_v48  ;;  %v126_v56 = vmul.f32 %v898_v63, %v59_v10 }
  0x26   :  { %v180_v57 = vadd.f32 %v942_v62, %v113_v22  ;;  %v181_v0 = vadd.f32 %v942_v62, %v114_v28  ;;  %v182_v17 = vadd.f32 %v942_v62, %v115_v29  ;;  %v183_v1 = vadd.f32 %v942_v62, %v116_v42 }
  0x27   :  { %v184_v2 = vadd.f32 %v942_v62, %v117_v43  ;;  %v185_v6 = vadd.f32 %v942_v62, %v118_v49  ;;  %v186_v7 = vadd.f32 %v942_v62, %v119_v50  ;;  %v187_v41 = vadd.f32 %v942_v62, %v120_v12 }
  0x28   :  { %v372_v48 = vadd.f32 %v570_v18, %v180_v57  ;;  %v373_v10 = vadd.f32 %v571_v19, %v181_v0  ;;  %v374_v22 = vadd.f32 %v574_v23, %v182_v17  ;;  %v375_v28 = vadd.f32 %v575_v24, %v183_v1  ;;  %v61_v23 = vld [vmem:[%s1521_s0 + $0x78] sm:$0xff] }
  0x29   :  { %v376_v29 = vadd.f32 %v578_v25, %v184_v2  ;;  %v377_v42 = vadd.f32 %v579_v26, %v185_v6  ;;  %v378_v12 = vadd.f32 %v582_v30, %v186_v7  ;;  %v379_v18 = vadd.f32 %v583_v31, %v187_v41  ;;  %v66_v2 = vld [vmem:[%s1521_s0 + $0xa0] sm:$0xff]  ;;  %v67_v7 = vld [vmem:[%s1521_s0 + $0xa8] sm:$0xff] }
  0x2a   :  { %v436_v11 = vmax.f32 %v372_v48, 0.0  ;;  %v437_v19 = vmax.f32 %v373_v10, 0.0  ;;  %v438_v43 = vmax.f32 %v374_v22, 0.0  ;;  %v439_v49 = vmax.f32 %v375_v28, 0.0 }
  0x2b   :  { %v440_v14 = vmax.f32 %v376_v29, 0.0  ;;  %v441_v24 = vmax.f32 %v377_v42, 0.0  ;;  %v442_v25 = vmax.f32 %v378_v12, 0.0  ;;  %v443_v26 = vmax.f32 %v379_v18, 0.0  ;;  %v68_v18 = vld [vmem:[%s1521_s0 + $0xb0] sm:$0xff] }
  0x2c   :  { %500 = vst [vmem:[%s1523_s6] sm:$0xff] %v436_v11  ;;  %v188_v15 = vadd.f32 %v942_v62, %v121_v9  ;;  %v189_v30 = vadd.f32 %v942_v62, %v122_v8  ;;  %v190_v31 = vadd.f32 %v942_v62, %v123_v4  ;;  %v191_v50 = vadd.f32 %v942_v62, %v124_v3 }
  0x2d   :  { %501 = vst [vmem:[%s1523_s6 + $0x8] sm:$0xff] %v437_v19  ;;  %v192_v57 = vadd.f32 %v942_v62, %v125_v55  ;;  %v193_v0 = vadd.f32 %v942_v62, %v126_v56  ;;  %v127_v17 = vmul.f32 %v898_v63, %v60_v13  ;;  %v128_v1 = vmul.f32 %v898_v63, %v61_v23  ;;  %v62_v55 = vld [vmem:[%s1521_s0 + $0x80] sm:$0xff]  ;;  %v63_v56 = vld [vmem:[%s1521_s0 + $0x88] sm:$0xff] }
  0x2e   :  { %502 = vst [vmem:[%s1523_s6 + $0x10] sm:$0xff] %v438_v43  ;;  %v380_v4 = vadd.f32 %v586_v32, %v188_v15  ;;  %v381_v3 = vadd.f32 %v587_v35, %v189_v30  ;;  %v382_v8 = vadd.f32 %v590_v36, %v190_v31  ;;  %v383_v9 = vadd.f32 %v591_v37, %v191_v50  ;;  %v64_v36 = vld [vmem:[%s1521_s0 + $0x90] sm:$0xff]  ;;  %v65_v37 = vld [vmem:[%s1521_s0 + $0x98] sm:$0xff] }
  0x2f   :  { %503 = vst [vmem:[%s1523_s6 + $0x18] sm:$0xff] %v439_v49  ;;  %v384_v16 = vadd.f32 %v594_v38, %v192_v57  ;;  %v385_v32 = vadd.f32 %v595_v44, %v193_v0  ;;  %v194_v20 = vadd.f32 %v942_v62, %v127_v17  ;;  %v195_v35 = vadd.f32 %v942_v62, %v128_v1  ;;  %v70_v57 = vld [vmem:[%s1521_s0 + $0xc0] sm:$0xff]  ;;  %v71_v0 = vld [vmem:[%s1521_s0 + $0xc8] sm:$0xff] }
  0x30   :  { %504 = vst [vmem:[%s1523_s6 + $0x20] sm:$0xff] %v440_v14  ;;  %v444_v21 = vmax.f32 %v380_v4, 0.0  ;;  %v445_v38 = vmax.f32 %v381_v3, 0.0  ;;  %v446_v44 = vmax.f32 %v382_v8, 0.0  ;;  %v447_v6 = vmax.f32 %v383_v9, 0.0  ;;  %v74_v17 = vld [vmem:[%s1521_s0 + $0xe0] sm:$0xff] }
  0x31   :  { %505 = vst [vmem:[%s1523_s6 + $0x28] sm:$0xff] %v441_v24  ;;  %v448_v41 = vmax.f32 %v384_v16, 0.0  ;;  %v449_v48 = vmax.f32 %v385_v32, 0.0  ;;  %v386_v10 = vadd.f32 %v598_v45, %v194_v20  ;;  %v387_v22 = vadd.f32 %v599_v46, %v195_v35  ;;  %v75_v4 = vld [vmem:[%s1521_s0 + $0xe8] sm:$0xff] }
  0x32   :  { %506 = vst [vmem:[%s1523_s6 + $0x30] sm:$0xff] %v442_v25  ;;  %v129_v28 = vmul.f32 %v898_v63, %v62_v55  ;;  %v130_v29 = vmul.f32 %v898_v63, %v63_v56  ;;  %v131_v42 = vmul.f32 %v898_v63, %v64_v36  ;;  %v132_v12 = vmul.f32 %v898_v63, %v65_v37  ;;  %v76_v36 = vld [vmem:[%s1521_s0 + $0xf0] sm:$0xff] }
  0x33   :  { %507 = vst [vmem:[%s1523_s6 + $0x38] sm:$0xff] %v443_v26  ;;  %v450_v45 = vmax.f32 %v386_v10, 0.0  ;;  %v451_v46 = vmax.f32 %v387_v22, 0.0  ;;  %v133_v11 = vmul.f32 %v898_v63, %v66_v2  ;;  %v134_v19 = vmul.f32 %v898_v63, %v67_v7  ;;  %v710_v7 = vld [vmem:[%s1519_s5 + $0x78] sm:$0xff]  }
  0x34   :  { %508 = vst [vmem:[%s1523_s6 + $0x40] sm:$0xff] %v444_v21  ;;  %v196_v43 = vadd.f32 %v942_v62, %v129_v28  ;;  %v197_v49 = vadd.f32 %v942_v62, %v130_v29  ;;  %v198_v13 = vadd.f32 %v942_v62, %v131_v42  ;;  %v199_v23 = vadd.f32 %v942_v62, %v132_v12 }
  0x35   :  { %509 = vst [vmem:[%s1523_s6 + $0x48] sm:$0xff] %v445_v38  ;;  %v200_v14 = vadd.f32 %v942_v62, %v133_v11  ;;  %v201_v24 = vadd.f32 %v942_v62, %v134_v19  ;;  %v135_v25 = vmul.f32 %v898_v63, %v68_v18  ;;  %v136_v26 = vmul.f32 %v898_v63, %v69_v27  ;;  %v77_v11 = vld [vmem:[%s1521_s0 + $0xf8] sm:$0xff] }
  0x36   :  { %510 = vst [vmem:[%s1523_s6 + $0x50] sm:$0xff] %v446_v44  ;;  %v388_v15 = vadd.f32 %v602_v51, %v196_v43  ;;  %v389_v30 = vadd.f32 %v603_v52, %v197_v49  ;;  %v390_v31 = vadd.f32 %v606_v53, %v198_v13  ;;  %v391_v50 = vadd.f32 %v607_v58, %v199_v23  ;;  %v72_v53 = vld [vmem:[%s1521_s0 + $0xd0] sm:$0xff]  ;;  %v73_v58 = vld [vmem:[%s1521_s0 + $0xd8] sm:$0xff]  ;;  %v711_v23 = vld [vmem:[%s1519_s5 + $0x80] sm:$0xff]  }
  0x37   :  { %511 = vst [vmem:[%s1523_s6 + $0x58] sm:$0xff] %v447_v6  ;;  %v392_v33 = vadd.f32 %v610_v59, %v200_v14  ;;  %v393_v51 = vadd.f32 %v611_v60, %v201_v24  ;;  %v202_v34 = vadd.f32 %v942_v62, %v135_v25  ;;  %v203_v52 = vadd.f32 %v942_v62, %v136_v26  ;;  %v79_v14 = vld [vmem:[%s1521_s0 + $0x108] sm:$0xff] }
  0x38   :  { %512 = vst [vmem:[%s1523_s6 + $0x60] sm:$0xff] %v448_v41  ;;  %v452_v39 = vmax.f32 %v388_v15, 0.0  ;;  %v453_v59 = vmax.f32 %v389_v30, 0.0  ;;  %v454_v60 = vmax.f32 %v390_v31, 0.0  ;;  %v455_v1 = vmax.f32 %v391_v50, 0.0  ;;  %v80_v15 = vld [vmem:[%s1521_s0 + $0x110] sm:$0xff] }
  0x39   :  { %513 = vst [vmem:[%s1523_s6 + $0x68] sm:$0xff] %v449_v48  ;;  %v456_v3 = vmax.f32 %v392_v33, 0.0  ;;  %v457_v8 = vmax.f32 %v393_v51, 0.0  ;;  %v394_v9 = vadd.f32 %v614_v61, %v202_v34  ;;  %v1526_v55 = vunpack.c.h.bf16 %v852_v40  ;;  %v81_v33 = vld [vmem:[%s1521_s0 + $0x118] sm:$0xff] }
  0x3a   :  { %514 = vst [vmem:[%s1523_s6 + $0x70] sm:$0xff] %v450_v45  ;;  %v137_v16 = vmul.f32 %v898_v63, %v70_v57  ;;  %v138_v32 = vmul.f32 %v898_v63, %v71_v0  ;;  %v139_v20 = vmul.f32 %v898_v63, %v72_v53  ;;  %v140_v35 = vmul.f32 %v898_v63, %v73_v58  ;;  %v712_v0 = vld [vmem:[%s1519_s5 + $0x88] sm:$0xff]   ;;  %v82_v58 = vld [vmem:[%s1521_s0 + $0x120] sm:$0xff] }
  0x3b   :  { %v395_v56 = vadd.f32 %v1526_v55, %v203_v52  ;;  %515 = vst [vmem:[%s1523_s6 + $0x78] sm:$0xff] %v451_v46  ;;  %v458_v40 = vmax.f32 %v394_v9, 0.0  ;;  %v141_v37 = vmul.f32 %v898_v63, %v74_v17  ;;  %v142_v2 = vmul.f32 %v898_v63, %v75_v4  ;;  %v83_v55 = vld [vmem:[%s1521_s0 + $0x128] sm:$0xff] }
  0x3c   :  { %516 = vst [vmem:[%s1523_s6 + $0x80] sm:$0xff] %v452_v39  ;;  %v204_v21 = vadd.f32 %v942_v62, %v137_v16  ;;  %v205_v38 = vadd.f32 %v942_v62, %v138_v32  ;;  %v206_v44 = vadd.f32 %v942_v62, %v139_v20  ;;  %v207_v6 = vadd.f32 %v942_v62, %v140_v35 }
  0x3d   :  { %v459_v61 = vmax.f32 %v395_v56, 0.0  ;;  %517 = vst [vmem:[%s1523_s6 + $0x88] sm:$0xff] %v453_v59  ;;  %v208_v41 = vadd.f32 %v942_v62, %v141_v37  ;;  %v209_v48 = vadd.f32 %v942_v62, %v142_v2  ;;  %v627_v10 = vunpack.c.h.bf16 %v911_v5  ;;  %v84_v37 = vld [vmem:[%s1521_s0 + $0x130] sm:$0xff] }
  0x3e   :  { %v143_v22 = vmul.f32 %v898_v63, %v76_v36  ;;  %518 = vst [vmem:[%s1523_s6 + $0x90] sm:$0xff] %v454_v60  ;;  %v1527_v28 = vunpack.c.l.bf16 %v868_v47  ;;  %v1528_v42 = vunpack.c.h.bf16 %v868_v47  ;;  %v1529_v18 = vunpack.c.l.bf16 %v882_v54 }
  0x3f   :  { %v1530_v45 = vunpack.c.h.bf16 %v882_v54  ;;  %519 = vst [vmem:[%s1523_s6 + $0x98] sm:$0xff] %v455_v1  ;;  %v1531_v19 = vunpack.c.l.bf16 %v911_v5  ;;  %v401_v49 = vadd.f32 %v627_v10, %v209_v48  ;;  %v630_v13 = vunpack.c.l.bf16 %v710_v7  ;;  %v78_v54 = vld [vmem:[%s1521_s0 + $0x100] sm:$0xff]  ;;  %v713_v1 = vld [vmem:[%s1519_s5 + $0x90] sm:$0xff]  }
  0x40   :  { %v396_v29 = vadd.f32 %v1527_v28, %v204_v21  ;;  %v397_v12 = vadd.f32 %v1528_v42, %v205_v38  ;;  %v398_v27 = vadd.f32 %v1529_v18, %v206_v44  ;;  %v210_v47 = vadd.f32 %v942_v62, %v143_v22  ;;  %520 = vst [vmem:[%s1523_s6 + $0xa0] sm:$0xff] %v456_v3  ;;  %v86_v28 = vld [vmem:[%s1521_s0 + $0x140] sm:$0xff] }
  0x41   :  { %v399_v46 = vadd.f32 %v1530_v45, %v207_v6  ;;  %v400_v43 = vadd.f32 %v1531_v19, %v208_v41  ;;  %521 = vst [vmem:[%s1523_s6 + $0xa8] sm:$0xff] %v457_v8  ;;  %v465_v31 = vmax.f32 %v401_v49, 0.0  ;;  %v144_v57 = vmul.f32 %v898_v63, %v77_v11  ;;  %v714_v6 = vld [vmem:[%s1519_s5 + $0x98] sm:$0xff]   ;;  %v87_v45 = vld [vmem:[%s1521_s0 + $0x148] sm:$0xff]  ;;  %v88_v49 = vld [vmem:[%s1521_s0 + $0x150] sm:$0xff] }
  0x42   :  { %v460_v5 = vmax.f32 %v396_v29, 0.0  ;;  %v461_v24 = vmax.f32 %v397_v12, 0.0  ;;  %v462_v25 = vmax.f32 %v398_v27, 0.0  ;;  %v402_v50 = vadd.f32 %v630_v13, %v210_v47  ;;  %522 = vst [vmem:[%s1523_s6 + $0xb0] sm:$0xff] %v458_v40  ;;  %v715_v27 = vld [vmem:[%s1519_s5 + $0xa0] sm:$0xff]  }
  0x43   :  { %v463_v26 = vmax.f32 %v399_v46, 0.0  ;;  %v464_v30 = vmax.f32 %v400_v43, 0.0  ;;  %v631_v51 = vunpack.c.h.bf16 %v710_v7  ;;  %v145_v34 = vmul.f32 %v898_v63, %v78_v54  ;;  %523 = vst [vmem:[%s1523_s6 + $0xb8] sm:$0xff] %v459_v61  ;;  %v85_v7 = vld [vmem:[%s1521_s0 + $0x138] sm:$0xff] }
  0x44   :  { %v634_v52 = vunpack.c.l.bf16 %v711_v23  ;;  %v146_v53 = vmul.f32 %v898_v63, %v79_v14  ;;  %v466_v17 = vmax.f32 %v402_v50, 0.0  ;;  %v211_v39 = vadd.f32 %v942_v62, %v144_v57  ;;  %524 = vst [vmem:[%s1523_s6 + $0xc0] sm:$0xff] %v460_v5  ;;  %v716_v14 = vld [vmem:[%s1519_s5 + $0xa8] sm:$0xff]   ;;  %v89_v5 = vld [vmem:[%s1521_s0 + $0x158] sm:$0xff] }
  0x45   :  { %v635_v59 = vunpack.c.h.bf16 %v711_v23  ;;  %v147_v60 = vmul.f32 %v898_v63, %v80_v15  ;;  %v212_v4 = vadd.f32 %v942_v62, %v145_v34  ;;  %v638_v8 = vunpack.c.l.bf16 %v712_v0  ;;  %525 = vst [vmem:[%s1523_s6 + $0xc8] sm:$0xff] %v461_v24 }
  0x46   :  { %v213_v3 = vadd.f32 %v942_v62, %v146_v53  ;;  %v148_v9 = vmul.f32 %v898_v63, %v81_v33  ;;  %v403_v56 = vadd.f32 %v631_v51, %v211_v39  ;;  %v639_v32 = vunpack.c.h.bf16 %v712_v0  ;;  %526 = vst [vmem:[%s1523_s6 + $0xd0] sm:$0xff] %v462_v25  ;;  %v90_v0 = vld [vmem:[%s1521_s0 + $0x160] sm:$0xff]  ;;  %v717_v53 = vld [vmem:[%s1519_s5 + $0xb0] sm:$0xff]  }
  0x47   :  { %v214_v16 = vadd.f32 %v942_v62, %v147_v60  ;;  %v149_v20 = vmul.f32 %v898_v63, %v82_v58  ;;  %v404_v35 = vadd.f32 %v634_v52, %v212_v4  ;;  %v642_v61 = vunpack.c.l.bf16 %v713_v1  ;;  %527 = vst [vmem:[%s1523_s6 + $0xd8] sm:$0xff] %v463_v26  ;;  %v91_v58 = vld [vmem:[%s1521_s0 + $0x168] sm:$0xff] }
  0x48   :  { %v405_v36 = vadd.f32 %v635_v59, %v213_v3  ;;  %v215_v40 = vadd.f32 %v942_v62, %v148_v9  ;;  %v467_v2 = vmax.f32 %v403_v56, 0.0  ;;  %v150_v44 = vmul.f32 %v898_v63, %v83_v55  ;;  %528 = vst [vmem:[%s1523_s6 + $0xe0] sm:$0xff] %v464_v30  ;;  %v92_v9 = vld [vmem:[%s1521_s0 + $0x170] sm:$0xff]  ;;  %v718_v55 = vld [vmem:[%s1519_s5 + $0xb8] sm:$0xff]  }
  0x49   :  { %v406_v21 = vadd.f32 %v638_v8, %v214_v16  ;;  %v216_v38 = vadd.f32 %v942_v62, %v149_v20  ;;  %v468_v41 = vmax.f32 %v404_v35, 0.0  ;;  %v643_v22 = vunpack.c.h.bf16 %v713_v1  ;;  %529 = vst [vmem:[%s1523_s6 + $0xe8] sm:$0xff] %v465_v31  ;;  %v93_v35 = vld [vmem:[%s1521_s0 + $0x178] sm:$0xff] }
  0x4a   :  { %v469_v48 = vmax.f32 %v405_v36, 0.0  ;;  %v407_v10 = vadd.f32 %v639_v32, %v215_v40  ;;  %v217_v12 = vadd.f32 %v942_v62, %v150_v44  ;;  %v151_v18 = vmul.f32 %v898_v63, %v84_v37  ;;  %530 = vst [vmem:[%s1523_s6 + $0xf0] sm:$0xff] %v466_v17 }
  0x4b   :  { %v470_v29 = vmax.f32 %v406_v21, 0.0  ;;  %v408_v42 = vadd.f32 %v642_v61, %v216_v38  ;;  %v646_v11 = vunpack.c.l.bf16 %v714_v6  ;;  %v152_v19 = vmul.f32 %v898_v63, %v85_v7  ;;  %531 = vst [vmem:[%s1523_s6 + $0xf8] sm:$0xff] %v467_v2  ;;  %v94_v2 = vld [vmem:[%s1521_s0 + $0x180] sm:$0xff] }
  0x4c   :  { %v471_v46 = vmax.f32 %v407_v10, 0.0  ;;  %v647_v43 = vunpack.c.h.bf16 %v714_v6  ;;  %v409_v13 = vadd.f32 %v643_v22, %v217_v12  ;;  %v218_v54 = vadd.f32 %v942_v62, %v151_v18  ;;  %532 = vst [vmem:[%s1523_s6 + $0x100] sm:$0xff] %v468_v41  ;;  %v719_v21 = vld [vmem:[%s1519_s5 + $0xc0] sm:$0xff]   ;;  %v95_v41 = vld [vmem:[%s1521_s0 + $0x188] sm:$0xff] }
  0x4d   :  { %v472_v47 = vmax.f32 %v408_v42, 0.0  ;;  %v153_v23 = vmul.f32 %v898_v63, %v86_v28  ;;  %v219_v24 = vadd.f32 %v942_v62, %v152_v19  ;;  %v650_v25 = vunpack.c.l.bf16 %v715_v27  ;;  %533 = vst [vmem:[%s1523_s6 + $0x108] sm:$0xff] %v469_v48 }
  0x4e   :  { %v154_v26 = vmul.f32 %v898_v63, %v87_v45  ;;  %v651_v15 = vunpack.c.h.bf16 %v715_v27  ;;  %v473_v30 = vmax.f32 %v409_v13, 0.0  ;;  %v410_v31 = vadd.f32 %v646_v11, %v218_v54  ;;  %534 = vst [vmem:[%s1523_s6 + $0x110] sm:$0xff] %v470_v29  ;;  %v96_v29 = vld [vmem:[%s1521_s0 + $0x190] sm:$0xff]  ;;  %v720_v45 = vld [vmem:[%s1519_s5 + $0xc8] sm:$0xff]  }
  0x4f   :  { %v220_v50 = vadd.f32 %v942_v62, %v153_v23  ;;  %v155_v57 = vmul.f32 %v898_v63, %v88_v49  ;;  %v411_v33 = vadd.f32 %v647_v43, %v219_v24  ;;  %v654_v34 = vunpack.c.l.bf16 %v716_v14  ;;  %535 = vst [vmem:[%s1523_s6 + $0x118] sm:$0xff] %v471_v46  ;;  %v97_v46 = vld [vmem:[%s1521_s0 + $0x198] sm:$0xff] }
  0x50   :  { %v221_v51 = vadd.f32 %v942_v62, %v154_v26  ;;  %v156_v52 = vmul.f32 %v898_v63, %v89_v5  ;;  %v474_v17 = vmax.f32 %v410_v31, 0.0  ;;  %v655_v60 = vunpack.c.h.bf16 %v716_v14  ;;  %536 = vst [vmem:[%s1523_s6 + $0x120] sm:$0xff] %v472_v47  ;;  %v98_v14 = vld [vmem:[%s1521_s0 + $0x1a0] sm:$0xff] }
  0x51   :  { %v412_v39 = vadd.f32 %v650_v25, %v220_v50  ;;  %v222_v59 = vadd.f32 %v942_v62, %v155_v57  ;;  %v475_v1 = vmax.f32 %v411_v33, 0.0  ;;  %v157_v8 = vmul.f32 %v898_v63, %v90_v0  ;;  %537 = vst [vmem:[%s1523_s6 + $0x128] sm:$0xff] %v473_v30  ;;  %v99_v30 = vld [vmem:[%s1521_s0 + $0x1a8] sm:$0xff] }
  0x52   :  { %v413_v4 = vadd.f32 %v651_v15, %v221_v51  ;;  %v223_v3 = vadd.f32 %v942_v62, %v156_v52  ;;  %v658_v32 = vunpack.c.l.bf16 %v717_v53  ;;  %v158_v20 = vmul.f32 %v898_v63, %v91_v58  ;;  %538 = vst [vmem:[%s1523_s6 + $0x130] sm:$0xff] %v474_v17  ;;  %v721_v15 = vld [vmem:[%s1519_s5 + $0xd0] sm:$0xff]   ;;  %v722_v58 = vld [vmem:[%s1519_s5 + $0xd8] sm:$0xff]  }
  0x53   :  { %v476_v56 = vmax.f32 %v412_v39, 0.0  ;;  %v414_v16 = vadd.f32 %v654_v34, %v222_v59  ;;  %v224_v61 = vadd.f32 %v942_v62, %v157_v8  ;;  %v659_v37 = vunpack.c.h.bf16 %v717_v53  ;;  %539 = vst [vmem:[%s1523_s6 + $0x138] sm:$0xff] %v475_v1  ;;  %v100_v53 = vld [vmem:[%s1521_s0 + $0x1b0] sm:$0xff]  ;;  %v101_v1 = vld [vmem:[%s1521_s0 + $0x1b8] sm:$0xff] }
  0x54   :  { %v477_v36 = vmax.f32 %v413_v4, 0.0  ;;  %v415_v40 = vadd.f32 %v655_v60, %v223_v3  ;;  %v225_v44 = vadd.f32 %v942_v62, %v158_v20  ;;  %v159_v6 = vmul.f32 %v898_v63, %v92_v9 }
  0x55   :  { %v478_v38 = vmax.f32 %v414_v16, 0.0  ;;  %v662_v7 = vunpack.c.l.bf16 %v718_v55  ;;  %540 = vst [vmem:[%s1523_s6 + $0x140] sm:$0xff] %v476_v56  ;;  %v416_v10 = vadd.f32 %v658_v32, %v224_v61  ;;  %v160_v22 = vmul.f32 %v898_v63, %v93_v35  ;;  %v723_v56 = vld [vmem:[%s1519_s5 + $0xe0] sm:$0xff]  }
  0x56   :  { %v479_v48 = vmax.f32 %v415_v40, 0.0  ;;  %v663_v28 = vunpack.c.h.bf16 %v718_v55  ;;  %541 = vst [vmem:[%s1523_s6 + $0x148] sm:$0xff] %v477_v36  ;;  %v417_v42 = vadd.f32 %v659_v37, %v225_v44  ;;  %v226_v12 = vadd.f32 %v942_v62, %v159_v6  ;;  %v102_v55 = vld [vmem:[%s1521_s0 + $0x1c0] sm:$0xff]  ;;  %v103_v36 = vld [vmem:[%s1521_s0 + $0x1c8] sm:$0xff] }
  0x57   :  { %v161_v18 = vmul.f32 %v898_v63, %v94_v2  ;;  %v666_v27 = vunpack.c.l.bf16 %v719_v21  ;;  %542 = vst [vmem:[%s1523_s6 + $0x150] sm:$0xff] %v478_v38  ;;  %v480_v11 = vmax.f32 %v416_v10, 0.0  ;;  %v227_v19 = vadd.f32 %v942_v62, %v160_v22 }
  0x58   :  { %v162_v43 = vmul.f32 %v898_v63, %v95_v41  ;;  %v667_v49 = vunpack.c.h.bf16 %v719_v21  ;;  %543 = vst [vmem:[%s1523_s6 + $0x158] sm:$0xff] %v479_v48  ;;  %v481_v47 = vmax.f32 %v417_v42, 0.0  ;;  %v418_v13 = vadd.f32 %v662_v7, %v226_v12  ;;  %v104_v21 = vld [vmem:[%s1521_s0 + $0x1d0] sm:$0xff]  ;;  %v724_v41 = vld [vmem:[%s1519_s5 + $0xe8] sm:$0xff]   ;;  %v105_v48 = vld [vmem:[%s1521_s0 + $0x1d8] sm:$0xff] }
  0x59   :  { %v228_v54 = vadd.f32 %v942_v62, %v161_v18  ;;  %v163_v23 = vmul.f32 %v898_v63, %v96_v29  ;;  %544 = vst [vmem:[%s1523_s6 + $0x160] sm:$0xff] %v480_v11  ;;  %v419_v5 = vadd.f32 %v663_v28, %v227_v19  ;;  %v670_v25 = vunpack.c.l.bf16 %v720_v45 }
  0x5a   :  { %v229_v24 = vadd.f32 %v942_v62, %v162_v43  ;;  %v164_v26 = vmul.f32 %v898_v63, %v97_v46  ;;  %545 = vst [vmem:[%s1523_s6 + $0x168] sm:$0xff] %v481_v47  ;;  %v482_v31 = vmax.f32 %v418_v13, 0.0  ;;  %v671_v0 = vunpack.c.h.bf16 %v720_v45  ;;  %v106_v45 = vld [vmem:[%s1521_s0 + $0x1e0] sm:$0xff]  ;;  %v107_v47 = vld [vmem:[%s1521_s0 + $0x1e8] sm:$0xff] }
  0x5b   :  { %v420_v50 = vadd.f32 %v666_v27, %v228_v54  ;;  %v230_v57 = vadd.f32 %v942_v62, %v163_v23  ;;  %v483_v33 = vmax.f32 %v419_v5, 0.0  ;;  %v165_v52 = vmul.f32 %v898_v63, %v98_v14 }
  0x5c   :  { %v421_v51 = vadd.f32 %v667_v49, %v229_v24  ;;  %v231_v34 = vadd.f32 %v942_v62, %v164_v26  ;;  %546 = vst [vmem:[%s1523_s6 + $0x170] sm:$0xff] %v482_v31  ;;  %v674_v59 = vunpack.c.l.bf16 %v721_v15  ;;  %v166_v60 = vmul.f32 %v898_v63, %v99_v30  ;;  %v725_v49 = vld [vmem:[%s1519_s5 + $0xf0] sm:$0xff]   ;;  %v726_v30 = vld [vmem:[%s1519_s5 + $0xf8] sm:$0xff]  }
  0x5d   :  { %v484_v17 = vmax.f32 %v420_v50, 0.0  ;;  %v422_v39 = vadd.f32 %v670_v25, %v230_v57  ;;  %547 = vst [vmem:[%s1523_s6 + $0x178] sm:$0xff] %v483_v33  ;;  %v232_v8 = vadd.f32 %v942_v62, %v165_v52  ;;  %v675_v9 = vunpack.c.h.bf16 %v721_v15  ;;  %v108_v15 = vld [vmem:[%s1521_s0 + $0x1f0] sm:$0xff]  ;;  %v109_v33 = vld [vmem:[%s1521_s0 + $0x1f8] sm:$0xff] }
  0x5e   :  { %v485_v4 = vmax.f32 %v421_v51, 0.0  ;;  %v423_v3 = vadd.f32 %v671_v0, %v231_v34  ;;  %v233_v32 = vadd.f32 %v942_v62, %v166_v60  ;;  %v167_v20 = vmul.f32 %v898_v63, %v100_v53 }
  0x5f   :  { %548 = vst [vmem:[%s1523_s6 + $0x180] sm:$0xff] %v484_v17  ;;  %v486_v16 = vmax.f32 %v422_v39, 0.0  ;;  %v678_v35 = vunpack.c.l.bf16 %v722_v58  ;;  %v424_v61 = vadd.f32 %v674_v59, %v232_v8  ;;  %v168_v37 = vmul.f32 %v898_v63, %v101_v1 }
  0x60   :  { %549 = vst [vmem:[%s1523_s6 + $0x188] sm:$0xff] %v485_v4  ;;  %v487_v40 = vmax.f32 %v423_v3, 0.0  ;;  %v679_v2 = vunpack.c.h.bf16 %v722_v58  ;;  %v425_v38 = vadd.f32 %v675_v9, %v233_v32  ;;  %v234_v44 = vadd.f32 %v942_v62, %v167_v20 }
  0x61   :  { %550 = vst [vmem:[%s1523_s6 + $0x190] sm:$0xff] %v486_v16  ;;  %v169_v6 = vmul.f32 %v898_v63, %v102_v55  ;;  %v682_v7 = vunpack.c.l.bf16 %v723_v56  ;;  %v488_v10 = vmax.f32 %v424_v61, 0.0  ;;  %v235_v22 = vadd.f32 %v942_v62, %v168_v37 }
  0x62   :  { %551 = vst [vmem:[%s1523_s6 + $0x198] sm:$0xff] %v487_v40  ;;  %v170_v28 = vmul.f32 %v898_v63, %v103_v36  ;;  %v683_v29 = vunpack.c.h.bf16 %v723_v56  ;;  %v489_v42 = vmax.f32 %v425_v38, 0.0  ;;  %v426_v12 = vadd.f32 %v678_v35, %v234_v44 }
  0x63   :  { %v236_v18 = vadd.f32 %v942_v62, %v169_v6  ;;  %v171_v27 = vmul.f32 %v898_v63, %v104_v21  ;;  %552 = vst [vmem:[%s1523_s6 + $0x1a0] sm:$0xff] %v488_v10  ;;  %v427_v46 = vadd.f32 %v679_v2, %v235_v22  ;;  %v686_v19 = vunpack.c.l.bf16 %v724_v41 }
  0x64   :  { %v237_v11 = vadd.f32 %v942_v62, %v170_v28  ;;  %v172_v43 = vmul.f32 %v898_v63, %v105_v48  ;;  %553 = vst [vmem:[%s1523_s6 + $0x1a8] sm:$0xff] %v489_v42  ;;  %v490_v13 = vmax.f32 %v426_v12, 0.0  ;;  %v687_v14 = vunpack.c.h.bf16 %v724_v41 }
  0x65   :  { %v428_v54 = vadd.f32 %v682_v7, %v236_v18  ;;  %v238_v23 = vadd.f32 %v942_v62, %v171_v27  ;;  %v491_v5 = vmax.f32 %v427_v46, 0.0  ;;  %v173_v26 = vmul.f32 %v898_v63, %v106_v45 }
  0x66   :  { %v429_v24 = vadd.f32 %v683_v29, %v237_v11  ;;  %v239_v25 = vadd.f32 %v942_v62, %v172_v43  ;;  %554 = vst [vmem:[%s1523_s6 + $0x1b0] sm:$0xff] %v490_v13  ;;  %v690_v57 = vunpack.c.l.bf16 %v725_v49  ;;  %v174_v0 = vmul.f32 %v898_v63, %v107_v47 }
  0x67   :  { %v492_v31 = vmax.f32 %v428_v54, 0.0  ;;  %v430_v50 = vadd.f32 %v686_v19, %v238_v23  ;;  %555 = vst [vmem:[%s1523_s6 + $0x1b8] sm:$0xff] %v491_v5  ;;  %v240_v52 = vadd.f32 %v942_v62, %v173_v26  ;;  %v691_v53 = vunpack.c.h.bf16 %v725_v49 }
  0x68   :  { %v493_v51 = vmax.f32 %v429_v24, 0.0  ;;  %v431_v34 = vadd.f32 %v687_v14, %v239_v25  ;;  %v241_v17 = vadd.f32 %v942_v62, %v174_v0  ;;  %v175_v39 = vmul.f32 %v898_v63, %v108_v15 }
  0x69   :  { %556 = vst [vmem:[%s1523_s6 + $0x1c0] sm:$0xff] %v492_v31  ;;  %v494_v58 = vmax.f32 %v430_v50, 0.0  ;;  %v694_v59 = vunpack.c.l.bf16 %v726_v30  ;;  %v432_v1 = vadd.f32 %v690_v57, %v240_v52  ;;  %v176_v4 = vmul.f32 %v898_v63, %v109_v33 }
  0x6a   :  { %557 = vst [vmem:[%s1523_s6 + $0x1c8] sm:$0xff] %v493_v51  ;;  %v495_v60 = vmax.f32 %v431_v34, 0.0  ;;  %v695_v3 = vunpack.c.h.bf16 %v726_v30  ;;  %v433_v8 = vadd.f32 %v691_v53, %v241_v17  ;;  %v242_v9 = vadd.f32 %v942_v62, %v175_v39 }
  0x6b   :  { %558 = vst [vmem:[%s1523_s6 + $0x1d0] sm:$0xff] %v494_v58  ;;  %v496_v55 = vmax.f32 %v432_v1, 0.0  ;;  %v243_v56 = vadd.f32 %v942_v62, %v176_v4 }
  0x6c   :  { %559 = vst [vmem:[%s1523_s6 + $0x1d8] sm:$0xff] %v495_v60  ;;  %v497_v16 = vmax.f32 %v433_v8, 0.0  ;;  %v434_v32 = vadd.f32 %v694_v59, %v242_v9 }
  0x6d   :  { %560 = vst [vmem:[%s1523_s6 + $0x1e0] sm:$0xff] %v496_v55  ;;  %v435_v63 = vadd.f32 %v695_v3, %v243_v56 }
  0x6e   :  { %561 = vst [vmem:[%s1523_s6 + $0x1e8] sm:$0xff] %v497_v16  ;;  %v498_v20 = vmax.f32 %v434_v32, 0.0 }
  0x6f   :  { %v499_v35 = vmax.f32 %v435_v63, 0.0 }
  0x70   :  { %562 = vst [vmem:[%s1523_s6 + $0x1f0] sm:$0xff] %v498_v20 }
  0x71   :  { %563 = vst [vmem:[%s1523_s6 + $0x1f8] sm:$0xff] %v499_v35 }

// kernel: identity_block3_forward.6
= control target key start
LH: loop header
LB: loop body
LE: loop exit
PB: predicated region body
PF: predicated region fallthrough
CT: control target
= control target key end

     0   :  { %s1945_s5 = inlined_call_operand.vmem [shape: bf16[128,128], index: 5, kind: input, shape index: {}]   ;;  %s1946_s1 = inlined_call_operand.vmem [shape: f32[1,128], index: 1, kind: input, shape index: {}]   ;;  %s1947_s2 = inlined_call_operand.vmem [shape: f32[1,128], index: 2, kind: input, shape index: {}]   ;;  %s1948_s0 = inlined_call_operand.vmem [shape: bf16[512,128], index: 0, kind: input, shape index: {}]   ;;  %s1949_s3 = inlined_call_operand.vmem [shape: f32[1,128], index: 3, kind: input, shape index: {}]   ;;  %s1950_s4 = inlined_call_operand.vmem [shape: f32[1,128], index: 4, kind: input, shape index: {}]   ;;  %s1951_s6 = inlined_call_operand.vmem [shape: f32[512,128], index: 6, kind: output, shape index: {0}]   ;;  %s1952_s7 = inlined_call_operand.vmem [shape: f32[1,8,128], index: 7, kind: output, shape index: {1}]   ;;  %s1953_s8 = inlined_call_operand.vmem [shape: f32[1,8,128], index: 8, kind: output, shape index: {2}]  }
   0x1   :  { %v959_v0 = vld [vmem:[%s1945_s5 + $0x38] sm:$0xff]  ;;  %v958_v1 = vld [vmem:[%s1945_s5 + $0x30] sm:$0xff]  ;;  %v26_v2 = vld [vmem:[%s1946_s1] sm:$0x1] }
   0x2   :  { %471 = vmatpush.bf16.msra.mxu0 %v959_v0  ;;  %1119 = vmatpush.bf16.msra.mxu1 %v959_v0  ;;  %v1199_v3 = vmul.f32 0.001953125, %v26_v2  ;;  %v28_v4 = vld [vmem:[%s1947_s2] sm:$0x1]  ;;  %v957_v7 = vld [vmem:[%s1945_s5 + $0x28] sm:$0xff]  ;;  %v955_v12 = vld [vmem:[%s1945_s5 + $0x18] sm:$0xff] }
   0x3   :  { %1120 = vmatpush.bf16.msra.mxu2 %v959_v0  ;;  %1121 = vmatpush.bf16.msra.mxu3 %v959_v0  ;;  %v29_v5 = vmul.f32 0.001953125, %v28_v4  ;;  %v956_v10 = vld [vmem:[%s1945_s5 + $0x20] sm:$0xff]  ;;  %v954_v13 = vld [vmem:[%s1945_s5 + $0x10] sm:$0xff]  ;;  %v953_v16 = vld [vmem:[%s1945_s5 + $0x8] sm:$0xff] }
   0x4   :  { %v30_v6 = vmul.f32 %v1199_v3, %v1199_v3  ;;  %v952_v19 = vld [vmem:[%s1945_s5] sm:$0xff]  ;;  %v1088_v40 = vld [vmem:[%s1948_s0 + $0x8] sm:$0xff]  }
   0x5   :  { %v44_v22 = vld [vmem:[%s1949_s3] sm:$0x1]  ;;  %v966_v47 = vunpack.c.l.bf16 %v1088_v40  ;;  %v967_v48 = vunpack.c.h.bf16 %v1088_v40  ;;  %v1096_v51 = vld [vmem:[%s1948_s0 + $0x48] sm:$0xff]  }
   0x6   :  { %472 = vmatpush.bf16.msra.mxu0 %v958_v1  ;;  %1122 = vmatpush.bf16.msra.mxu1 %v958_v1  ;;  %v31_v8 = vsub.f32 %v29_v5, %v30_v6  ;;  %v961_v23 = vld [vmem:[%s1948_s0] sm:$0xff]   ;;  %v998_v53 = vunpack.c.l.bf16 %v1096_v51  ;;  %v999_v54 = vunpack.c.h.bf16 %v1096_v51 }
   0x7   :  { %1123 = vmatpush.bf16.msra.mxu2 %v958_v1  ;;  %1124 = vmatpush.bf16.msra.mxu3 %v958_v1  ;;  %v1095_v24 = vld [vmem:[%s1948_s0 + $0x40] sm:$0xff]   ;;  %v962_v27 = vunpack.c.l.bf16 %v961_v23  ;;  %v963_v28 = vunpack.c.h.bf16 %v961_v23 }
   0x8   :  { %v32_v9 = vmax.f32 %v31_v8, 0.0  ;;  %v46_v29 = vld [vmem:[%s1950_s4] sm:$0x1]  ;;  %v994_v30 = vunpack.c.l.bf16 %v1095_v24  ;;  %v995_v31 = vunpack.c.h.bf16 %v1095_v24 }
   0x9   :  { %v1103_v0 = vld [vmem:[%s1948_s0 + $0x80] sm:$0xff]  }
   0xa   :  { %473 = vmatpush.bf16.msra.mxu0 %v957_v7  ;;  %1125 = vmatpush.bf16.msra.mxu1 %v957_v7  ;;  %v33_v11 = vadd.f32 1e-05, %v32_v9  ;;  %v1026_v4 = vunpack.c.l.bf16 %v1103_v0  ;;  %v1027_v5 = vunpack.c.h.bf16 %v1103_v0  ;;  %v1105_v0 = vld [vmem:[%s1948_s0 + $0x90] sm:$0xff]  }
   0xb   :  { %1126 = vmatpush.bf16.msra.mxu2 %v957_v7  ;;  %1127 = vmatpush.bf16.msra.mxu3 %v957_v7 }
   0xc   :  { %1143 = vrsqrt.f32 %v33_v11  ;;  %vm40_vm0 = vweird.f32 %v33_v11 }
   0xe   :  { %474 = vmatpush.bf16.msra.mxu0 %v956_v10  ;;  %1128 = vmatpush.bf16.msra.mxu1 %v956_v10 }
   0xf   :  { %1129 = vmatpush.bf16.msra.mxu2 %v956_v10  ;;  %1130 = vmatpush.bf16.msra.mxu3 %v956_v10 }
  0x12   :  { %475 = vmatpush.bf16.msra.mxu0 %v955_v12  ;;  %1131 = vmatpush.bf16.msra.mxu1 %v955_v12  ;;  %v1144_v14 = vpop.eup %1143 }
  0x13   :  { %1132 = vmatpush.bf16.msra.mxu2 %v955_v12  ;;  %1133 = vmatpush.bf16.msra.mxu3 %v955_v12  ;;  %v35_v15 = vmul.f32 %v1144_v14, %v33_v11  ;;  %vm41_vm1 = vweird.f32 %v1144_v14 }
  0x14   :  { %vm42_vm2 = vmor %vm40_vm0, %vm41_vm1 }
  0x15   :  { %v36_v17 = vmul.f32 %v1144_v14, %v35_v15 }
  0x16   :  { %476 = vmatpush.bf16.msra.mxu0 %v954_v13  ;;  %1134 = vmatpush.bf16.msra.mxu1 %v954_v13 }
  0x17   :  { %1135 = vmatpush.bf16.msra.mxu2 %v954_v13  ;;  %1136 = vmatpush.bf16.msra.mxu3 %v954_v13  ;;  %v37_v18 = vmul.f32 0.5, %v36_v17 }
  0x19   :  { %v38_v20 = vsub.f32 1.5, %v37_v18 }
  0x1a   :  { %477 = vmatpush.bf16.msra.mxu0 %v953_v16  ;;  %1137 = vmatpush.bf16.msra.mxu1 %v953_v16 }
  0x1b   :  { %1138 = vmatpush.bf16.msra.mxu2 %v953_v16  ;;  %1139 = vmatpush.bf16.msra.mxu3 %v953_v16  ;;  %v39_v21 = vmul.f32 %v1144_v14, %v38_v20  ;;  %v1097_v16 = vld [vmem:[%s1948_s0 + $0x50] sm:$0xff]  }
  0x1c   :  { %v1003_v20 = vunpack.c.h.bf16 %v1097_v16 }
  0x1d   :  { %v43_v25 = vsel %vm42_vm2, %v1144_v14, %v39_v21 }
  0x1e   :  { %478 = vmatpush.bf16.msra.mxu0 %v952_v19  ;;  %1140 = vmatpush.bf16.msra.mxu1 %v952_v19  ;;  %v45_v26 = vmul.f32 %v44_v22, %v43_v25 }
  0x1f   :  { %1141 = vmatpush.bf16.msra.mxu2 %v952_v19  ;;  %1142 = vmatpush.bf16.msra.mxu3 %v952_v19  ;;  %v1002_v19 = vunpack.c.l.bf16 %v1097_v16 }
  0x20   :  { %v47_v32 = vmul.f32 %v45_v26, %v1199_v3  ;;  %v1237_v33 = vperm.slane %v45_v26, 0  ;;  %v1089_v3 = vld [vmem:[%s1948_s0 + $0x10] sm:$0xff]  }
  0x21   :  { %v970_v10 = vunpack.c.l.bf16 %v1089_v3  ;;  %v971_v12 = vunpack.c.h.bf16 %v1089_v3  ;;  %v1034_v3 = vunpack.c.l.bf16 %v1105_v0 }
  0x22   :  { %v48_v34 = vsub.f32 %v46_v29, %v47_v32  ;;  %v180_v35 = vmul.f32 %v962_v27, %v1237_v33  ;;  %v181_v36 = vmul.f32 %v963_v28, %v1237_v33  ;;  %v196_v37 = vmul.f32 %v994_v30, %v1237_v33  ;;  %v1104_v30 = vld [vmem:[%s1948_s0 + $0x88] sm:$0xff]  }
  0x23   :  { %v197_v38 = vmul.f32 %v995_v31, %v1237_v33  ;;  %v182_v56 = vmul.f32 %v966_v47, %v1237_v33  ;;  %v183_v57 = vmul.f32 %v967_v48, %v1237_v33  ;;  %v198_v58 = vmul.f32 %v998_v53, %v1237_v33  ;;  %v1098_v48 = vld [vmem:[%s1948_s0 + $0x58] sm:$0xff]  }
  0x24   :  { %v1243_v39 = vperm.slane %v48_v34, 0  ;;  %v199_v59 = vmul.f32 %v999_v54, %v1237_v33  ;;  %v212_v8 = vmul.f32 %v1026_v4, %v1237_v33  ;;  %v213_v9 = vmul.f32 %v1027_v5, %v1237_v33  ;;  %v1090_v34 = vld [vmem:[%s1948_s0 + $0x18] sm:$0xff]  }
  0x25   :  { %v184_v21 = vmul.f32 %v970_v10, %v1237_v33  ;;  %v185_v22 = vmul.f32 %v971_v12, %v1237_v33  ;;  %v200_v24 = vmul.f32 %v1002_v19, %v1237_v33  ;;  %v201_v25 = vmul.f32 %v1003_v20, %v1237_v33 }
  0x26   :  { %v247_v41 = vadd.f32 %v1243_v39, %v180_v35  ;;  %v248_v42 = vadd.f32 %v1243_v39, %v181_v36  ;;  %v263_v43 = vadd.f32 %v1243_v39, %v196_v37  ;;  %v264_v44 = vadd.f32 %v1243_v39, %v197_v38 }
  0x27   :  { %v249_v60 = vadd.f32 %v1243_v39, %v182_v56  ;;  %v250_v61 = vadd.f32 %v1243_v39, %v183_v57  ;;  %v265_v62 = vadd.f32 %v1243_v39, %v198_v58  ;;  %v266_v63 = vadd.f32 %v1243_v39, %v199_v59 }
  0x28   :  { %v311_v45 = vmax.f32 %v247_v41, 0.0  ;;  %v312_v46 = vmax.f32 %v248_v42, 0.0  ;;  %v327_v49 = vmax.f32 %v263_v43, 0.0  ;;  %v328_v50 = vmax.f32 %v264_v44, 0.0 }
  0x29   :  { %v313_v1 = vmax.f32 %v249_v60, 0.0  ;;  %v314_v2 = vmax.f32 %v250_v61, 0.0  ;;  %v329_v6 = vmax.f32 %v265_v62, 0.0  ;;  %v330_v7 = vmax.f32 %v266_v63, 0.0 }
  0x2a   :  { %v375_v52 = vpack.c.bf16 %v312_v46, %v311_v45  ;;  %v383_v55 = vpack.c.bf16 %v328_v50, %v327_v49  ;;  %v279_v13 = vadd.f32 %v1243_v39, %v212_v8  ;;  %v280_v14 = vadd.f32 %v1243_v39, %v213_v9 }
  0x2b   :  { %v376_v11 = vpack.c.bf16 %v314_v2, %v313_v1  ;;  %v384_v15 = vpack.c.bf16 %v330_v7, %v329_v6  ;;  %v251_v26 = vadd.f32 %v1243_v39, %v184_v21  ;;  %v252_v27 = vadd.f32 %v1243_v39, %v185_v22  ;;  %v1111_v1 = vld [vmem:[%s1948_s0 + $0xc0] sm:$0xff]  }
  0x2c   :  { %479 = vmatmul.bf16.vlgmr.msra.gmra.mxu0 %v375_v52  ;;  %519 = vmatmul.bf16.vlgmr.msra.gmra.mxu1 %v383_v55  ;;  %v343_v17 = vmax.f32 %v279_v13, 0.0  ;;  %v344_v18 = vmax.f32 %v280_v14, 0.0  ;;  %v267_v28 = vadd.f32 %v1243_v39, %v200_v24  ;;  %v268_v29 = vadd.f32 %v1243_v39, %v201_v25  ;;  %v1091_v2 = vld [vmem:[%s1948_s0 + $0x20] sm:$0xff]  }
  0x2d   :  { %v315_v31 = vmax.f32 %v251_v26, 0.0  ;;  %v316_v32 = vmax.f32 %v252_v27, 0.0  ;;  %v1030_v35 = vunpack.c.l.bf16 %v1104_v30  ;;  %v1031_v36 = vunpack.c.h.bf16 %v1104_v30  ;;  %v1099_v21 = vld [vmem:[%s1948_s0 + $0x60] sm:$0xff]  }
  0x2e   :  { %v391_v23 = vpack.c.bf16 %v344_v18, %v343_v17  ;;  %v331_v37 = vmax.f32 %v267_v28, 0.0  ;;  %v332_v38 = vmax.f32 %v268_v29, 0.0  ;;  %v974_v42 = vunpack.c.l.bf16 %v1090_v34 }
  0x2f   :  { %v214_v40 = vmul.f32 %v1030_v35, %v1237_v33  ;;  %v215_v41 = vmul.f32 %v1031_v36, %v1237_v33  ;;  %v975_v43 = vunpack.c.h.bf16 %v1090_v34  ;;  %v377_v44 = vpack.c.bf16 %v316_v32, %v315_v31 }
  0x30   :  { %559 = vmatmul.bf16.vlgmr.msra.gmra.mxu2 %v391_v23  ;;  %v385_v47 = vpack.c.bf16 %v332_v38, %v331_v37  ;;  %v1006_v51 = vunpack.c.l.bf16 %v1098_v48  ;;  %v1007_v52 = vunpack.c.h.bf16 %v1098_v48  ;;  %v186_v53 = vmul.f32 %v974_v42, %v1237_v33  ;;  %v1106_v42 = vld [vmem:[%s1948_s0 + $0x98] sm:$0xff]  }
  0x31   :  { %v281_v45 = vadd.f32 %v1243_v39, %v214_v40  ;;  %v282_v46 = vadd.f32 %v1243_v39, %v215_v41  ;;  %v187_v54 = vmul.f32 %v975_v43, %v1237_v33  ;;  %v1035_v4 = vunpack.c.h.bf16 %v1105_v0  ;;  %v1112_v43 = vld [vmem:[%s1948_s0 + $0xc8] sm:$0xff]  }
  0x32   :  { %v202_v56 = vmul.f32 %v1006_v51, %v1237_v33  ;;  %v203_v57 = vmul.f32 %v1007_v52, %v1237_v33  ;;  %v253_v58 = vadd.f32 %v1243_v39, %v186_v53  ;;  %v1058_v5 = vunpack.c.l.bf16 %v1111_v1 }
  0x33   :  { %v345_v49 = vmax.f32 %v281_v45, 0.0  ;;  %v346_v50 = vmax.f32 %v282_v46, 0.0  ;;  %v254_v59 = vadd.f32 %v1243_v39, %v187_v54  ;;  %v1059_v6 = vunpack.c.h.bf16 %v1111_v1 }
  0x34   :  { %v269_v60 = vadd.f32 %v1243_v39, %v202_v56  ;;  %v270_v61 = vadd.f32 %v1243_v39, %v203_v57  ;;  %v317_v62 = vmax.f32 %v253_v58, 0.0  ;;  %v216_v9 = vmul.f32 %v1034_v3, %v1237_v33 }
  0x35   :  { %v392_v55 = vpack.c.bf16 %v346_v50, %v345_v49  ;;  %v318_v63 = vmax.f32 %v254_v59, 0.0  ;;  %v217_v10 = vmul.f32 %v1035_v4, %v1237_v33  ;;  %v229_v12 = vmul.f32 %v1059_v6, %v1237_v33 }
  0x36   :  { %v333_v7 = vmax.f32 %v269_v60, 0.0  ;;  %v334_v8 = vmax.f32 %v270_v61, 0.0  ;;  %v978_v14 = vunpack.c.l.bf16 %v1091_v2  ;;  %v283_v16 = vadd.f32 %v1243_v39, %v216_v9 }
  0x37   :  { %v378_v13 = vpack.c.bf16 %v318_v63, %v317_v62  ;;  %v284_v17 = vadd.f32 %v1243_v39, %v217_v10  ;;  %v296_v19 = vadd.f32 %v1243_v39, %v229_v12  ;;  %v1010_v28 = vunpack.c.l.bf16 %v1099_v21  ;;  %v1100_v63 = vld [vmem:[%s1948_s0 + $0x68] sm:$0xff]  }
  0x38   :  { %v386_v20 = vpack.c.bf16 %v334_v8, %v333_v7  ;;  %v347_v22 = vmax.f32 %v283_v16, 0.0  ;;  %v188_v26 = vmul.f32 %v978_v14, %v1237_v33  ;;  %v1011_v29 = vunpack.c.h.bf16 %v1099_v21 }
  0x39   :  { %v348_v23 = vmax.f32 %v284_v17, 0.0  ;;  %v360_v25 = vmax.f32 %v296_v19, 0.0  ;;  %v204_v32 = vmul.f32 %v1010_v28, %v1237_v33  ;;  %v1038_v45 = vunpack.c.l.bf16 %v1106_v42  ;;  %v1113_v19 = vld [vmem:[%s1948_s0 + $0xd0] sm:$0xff]  }
  0x3a   :  { %v205_v34 = vmul.f32 %v1011_v29, %v1237_v33  ;;  %v255_v35 = vadd.f32 %v1243_v39, %v188_v26  ;;  %v1039_v46 = vunpack.c.h.bf16 %v1106_v42  ;;  %v1063_v48 = vunpack.c.h.bf16 %v1112_v43 }
  0x3b   :  { %v393_v30 = vpack.c.bf16 %v348_v23, %v347_v22  ;;  %v271_v37 = vadd.f32 %v1243_v39, %v204_v32  ;;  %v218_v51 = vmul.f32 %v1038_v45, %v1237_v33  ;;  %v1014_v6 = vunpack.c.l.bf16 %v1100_v63 }
  0x3c   :  { %484 = vmatmul.bf16.gmra.mxu0 %v376_v11  ;;  %524 = vmatmul.bf16.gmra.mxu1 %v384_v15  ;;  %v228_v11 = vmul.f32 %v1058_v5, %v1237_v33  ;;  %v979_v15 = vunpack.c.h.bf16 %v1091_v2  ;;  %v272_v38 = vadd.f32 %v1243_v39, %v205_v34  ;;  %v319_v40 = vmax.f32 %v255_v35, 0.0 }
  0x3d   :  { %v335_v49 = vmax.f32 %v271_v37, 0.0  ;;  %v219_v52 = vmul.f32 %v1039_v46, %v1237_v33  ;;  %v231_v54 = vmul.f32 %v1063_v48, %v1237_v33  ;;  %v285_v58 = vadd.f32 %v1243_v39, %v218_v51 }
  0x3e   :  { %v295_v18 = vadd.f32 %v1243_v39, %v228_v11  ;;  %v189_v27 = vmul.f32 %v979_v15, %v1237_v33  ;;  %v336_v50 = vmax.f32 %v272_v38, 0.0  ;;  %v1015_v7 = vunpack.c.h.bf16 %v1100_v63 }
  0x3f   :  { %v286_v59 = vadd.f32 %v1243_v39, %v219_v52  ;;  %v298_v61 = vadd.f32 %v1243_v39, %v231_v54  ;;  %v349_v0 = vmax.f32 %v285_v58, 0.0  ;;  %v206_v10 = vmul.f32 %v1014_v6, %v1237_v33 }
  0x40   :  { %564 = vmatmul.bf16.gmra.mxu2 %v392_v55  ;;  %v359_v24 = vmax.f32 %v295_v18, 0.0  ;;  %v256_v36 = vadd.f32 %v1243_v39, %v189_v27  ;;  %v387_v62 = vpack.c.bf16 %v336_v50, %v335_v49  ;;  %v207_v11 = vmul.f32 %v1015_v7, %v1237_v33  ;;  %v1107_v18 = vld [vmem:[%s1948_s0 + $0xa0] sm:$0xff]  }
  0x41   :  { %v350_v1 = vmax.f32 %v286_v59, 0.0  ;;  %v362_v3 = vmax.f32 %v298_v61, 0.0  ;;  %v273_v14 = vadd.f32 %v1243_v39, %v206_v10  ;;  %v1042_v21 = vunpack.c.l.bf16 %v1107_v18  ;;  %v1114_v61 = vld [vmem:[%s1948_s0 + $0xd8] sm:$0xff]  }
  0x42   :  { %v399_v31 = vpack.c.bf16 %v360_v25, %v359_v24  ;;  %v320_v41 = vmax.f32 %v256_v36, 0.0  ;;  %v274_v15 = vadd.f32 %v1243_v39, %v207_v11  ;;  %v1043_v22 = vunpack.c.h.bf16 %v1107_v18 }
  0x43   :  { %v394_v8 = vpack.c.bf16 %v350_v1, %v349_v0  ;;  %v1066_v23 = vunpack.c.l.bf16 %v1113_v19  ;;  %v1067_v24 = vunpack.c.h.bf16 %v1113_v19  ;;  %v337_v25 = vmax.f32 %v273_v14, 0.0 }
  0x44   :  { %599 = vmatmul.bf16.vlgmr.msra.gmra.mxu3 %v399_v31  ;;  %v379_v55 = vpack.c.bf16 %v320_v41, %v319_v40  ;;  %v338_v26 = vmax.f32 %v274_v15, 0.0  ;;  %v220_v27 = vmul.f32 %v1042_v21, %v1237_v33  ;;  %v221_v28 = vmul.f32 %v1043_v22, %v1237_v33  ;;  %v1101_v41 = vld [vmem:[%s1948_s0 + $0x70] sm:$0xff]  }
  0x45   :  { %v232_v29 = vmul.f32 %v1066_v23, %v1237_v33  ;;  %v1018_v48 = vunpack.c.l.bf16 %v1101_v41  ;;  %v1019_v49 = vunpack.c.h.bf16 %v1101_v41  ;;  %v1070_v1 = vunpack.c.l.bf16 %v1114_v61 }
  0x46   :  { %v287_v35 = vadd.f32 %v1243_v39, %v220_v27  ;;  %v288_v36 = vadd.f32 %v1243_v39, %v221_v28  ;;  %v388_v40 = vpack.c.bf16 %v338_v26, %v337_v25 }
  0x47   :  { %v299_v37 = vadd.f32 %v1243_v39, %v232_v29  ;;  %v208_v52 = vmul.f32 %v1018_v48, %v1237_v33  ;;  %v234_v7 = vmul.f32 %v1070_v1, %v1237_v33 }
  0x48   :  { %v351_v42 = vmax.f32 %v287_v35, 0.0 }
  0x49   :  { %v301_v14 = vadd.f32 %v1243_v39, %v234_v7 }
  0x4c   :  { %489 = vmatmul.bf16.gmra.mxu0 %v377_v44  ;;  %529 = vmatmul.bf16.gmra.mxu1 %v385_v47  ;;  %v1092_v44 = vld [vmem:[%s1948_s0 + $0x28] sm:$0xff]   ;;  %v1062_v47 = vunpack.c.l.bf16 %v1112_v43  ;;  %v352_v43 = vmax.f32 %v288_v36, 0.0 }
  0x4d   :  { %v982_v56 = vunpack.c.l.bf16 %v1092_v44  ;;  %v983_v57 = vunpack.c.h.bf16 %v1092_v44  ;;  %v363_v44 = vmax.f32 %v299_v37, 0.0  ;;  %v1109_v37 = vld [vmem:[%s1948_s0 + $0xb0] sm:$0xff]  }
  0x4e   :  { %v230_v53 = vmul.f32 %v1062_v47, %v1237_v33  ;;  %v395_v50 = vpack.c.bf16 %v352_v43, %v351_v42  ;;  %v1051_v41 = vunpack.c.h.bf16 %v1109_v37 }
  0x4f   :  { %v190_v4 = vmul.f32 %v982_v56, %v1237_v33  ;;  %v191_v5 = vmul.f32 %v983_v57, %v1237_v33  ;;  %v275_v56 = vadd.f32 %v1243_v39, %v208_v52 }
  0x50   :  { %569 = vmatmul.bf16.gmra.mxu2 %v393_v30  ;;  %v297_v60 = vadd.f32 %v1243_v39, %v230_v53  ;;  %v233_v30 = vmul.f32 %v1067_v24, %v1237_v33  ;;  %v209_v53 = vmul.f32 %v1019_v49, %v1237_v33 }
  0x51   :  { %v257_v12 = vadd.f32 %v1243_v39, %v190_v4 }
  0x52   :  { %v361_v2 = vmax.f32 %v297_v60, 0.0  ;;  %v300_v38 = vadd.f32 %v1243_v39, %v233_v30  ;;  %v276_v57 = vadd.f32 %v1243_v39, %v209_v53  ;;  %v1108_v60 = vld [vmem:[%s1948_s0 + $0xa8] sm:$0xff]  }
  0x53   :  { %v321_v16 = vmax.f32 %v257_v12, 0.0  ;;  %v1046_v63 = vunpack.c.l.bf16 %v1108_v60  ;;  %v1047_v0 = vunpack.c.h.bf16 %v1108_v60 }
  0x54   :  { %v400_v9 = vpack.c.bf16 %v362_v3, %v361_v2  ;;  %v364_v45 = vmax.f32 %v300_v38, 0.0  ;;  %v1071_v2 = vunpack.c.h.bf16 %v1114_v61  ;;  %v339_v3 = vmax.f32 %v275_v56, 0.0  ;;  %v1115_v38 = vld [vmem:[%s1948_s0 + $0xe0] sm:$0xff]  }
  0x55   :  { %v340_v4 = vmax.f32 %v276_v57, 0.0  ;;  %v223_v6 = vmul.f32 %v1047_v0, %v1237_v33  ;;  %v1074_v42 = vunpack.c.l.bf16 %v1115_v38  ;;  %v1075_v43 = vunpack.c.h.bf16 %v1115_v38 }
  0x56   :  { %604 = vmatmul.bf16.gmra.mxu3 %v400_v9  ;;  %v401_v51 = vpack.c.bf16 %v364_v45, %v363_v44 }
  0x57   :  { %v236_v48 = vmul.f32 %v1074_v42, %v1237_v33  ;;  %v237_v49 = vmul.f32 %v1075_v43, %v1237_v33 }
  0x59   :  { %v303_v53 = vadd.f32 %v1243_v39, %v236_v48  ;;  %v1118_v48 = vld [vmem:[%s1948_s0 + $0xf8] sm:$0xff]  }
  0x5c   :  { %494 = vmatmul.bf16.gmra.mxu0 %v378_v13  ;;  %534 = vmatmul.bf16.gmra.mxu1 %v386_v20  ;;  %v258_v13 = vadd.f32 %v1243_v39, %v191_v5  ;;  %v1093_v20 = vld [vmem:[%s1948_s0 + $0x30] sm:$0xff]   ;;  %v222_v5 = vmul.f32 %v1046_v63, %v1237_v33  ;;  %v1116_v63 = vld [vmem:[%s1948_s0 + $0xe8] sm:$0xff]  }
  0x5d   :  { %v986_v32 = vunpack.c.l.bf16 %v1093_v20  ;;  %v987_v34 = vunpack.c.h.bf16 %v1093_v20  ;;  %v365_v20 = vmax.f32 %v301_v14, 0.0 }
  0x5e   :  { %v322_v17 = vmax.f32 %v258_v13, 0.0  ;;  %v289_v12 = vadd.f32 %v1243_v39, %v222_v5  ;;  %v290_v13 = vadd.f32 %v1243_v39, %v223_v6 }
  0x5f   :  { %v192_v46 = vmul.f32 %v986_v32, %v1237_v33  ;;  %v193_v47 = vmul.f32 %v987_v34, %v1237_v33 }
  0x60   :  { %574 = vmatmul.bf16.gmra.mxu2 %v394_v8  ;;  %v380_v31 = vpack.c.bf16 %v322_v17, %v321_v16  ;;  %v235_v8 = vmul.f32 %v1071_v2, %v1237_v33  ;;  %v389_v16 = vpack.c.bf16 %v340_v4, %v339_v3  ;;  %v1102_v17 = vld [vmem:[%s1948_s0 + $0x78] sm:$0xff]   ;;  %v353_v18 = vmax.f32 %v289_v12, 0.0 }
  0x61   :  { %v259_v54 = vadd.f32 %v1243_v39, %v192_v46  ;;  %v354_v19 = vmax.f32 %v290_v13, 0.0  ;;  %v1022_v24 = vunpack.c.l.bf16 %v1102_v17  ;;  %v1023_v25 = vunpack.c.h.bf16 %v1102_v17 }
  0x62   :  { %v302_v15 = vadd.f32 %v1243_v39, %v235_v8  ;;  %v1078_v2 = vunpack.c.l.bf16 %v1116_v63  ;;  %v1079_v3 = vunpack.c.h.bf16 %v1116_v63 }
  0x63   :  { %v323_v58 = vmax.f32 %v259_v54, 0.0  ;;  %v396_v26 = vpack.c.bf16 %v354_v19, %v353_v18  ;;  %v210_v28 = vmul.f32 %v1022_v24, %v1237_v33  ;;  %v211_v29 = vmul.f32 %v1023_v25, %v1237_v33  ;;  %v1117_v25 = vld [vmem:[%s1948_s0 + $0xf0] sm:$0xff]  }
  0x64   :  { %v366_v21 = vmax.f32 %v302_v15, 0.0  ;;  %v304_v54 = vadd.f32 %v1243_v39, %v237_v49  ;;  %v238_v6 = vmul.f32 %v1078_v2, %v1237_v33  ;;  %v239_v7 = vmul.f32 %v1079_v3, %v1237_v33 }
  0x65   :  { %v277_v32 = vadd.f32 %v1243_v39, %v210_v28  ;;  %v278_v34 = vadd.f32 %v1243_v39, %v211_v29  ;;  %v1083_v28 = vunpack.c.h.bf16 %v1117_v25 }
  0x66   :  { %609 = vmatmul.bf16.gmra.mxu3 %v401_v51  ;;  %v402_v27 = vpack.c.bf16 %v366_v21, %v365_v20 }
  0x67   :  { %v341_v44 = vmax.f32 %v277_v32, 0.0  ;;  %v342_v45 = vmax.f32 %v278_v34, 0.0 }
  0x6c   :  { %499 = vmatmul.bf16.gmra.mxu0 %v379_v55  ;;  %539 = vmatmul.bf16.gmra.mxu1 %v387_v62  ;;  %v260_v55 = vadd.f32 %v1243_v39, %v193_v47  ;;  %v1094_v62 = vld [vmem:[%s1948_s0 + $0x38] sm:$0xff]   ;;  %v225_v47 = vmul.f32 %v1051_v41, %v1237_v33 }
  0x6d   :  { %v990_v10 = vunpack.c.l.bf16 %v1094_v62  ;;  %v991_v11 = vunpack.c.h.bf16 %v1094_v62  ;;  %v1110_v62 = vld [vmem:[%s1948_s0 + $0xb8] sm:$0xff]  }
  0x6e   :  { %v324_v59 = vmax.f32 %v260_v55, 0.0  ;;  %v292_v52 = vadd.f32 %v1243_v39, %v225_v47  ;;  %v390_v55 = vpack.c.bf16 %v342_v45, %v341_v44  ;;  %v1054_v0 = vunpack.c.l.bf16 %v1110_v62 }
  0x6f   :  { %v194_v22 = vmul.f32 %v990_v10, %v1237_v33  ;;  %v195_v23 = vmul.f32 %v991_v11, %v1237_v33  ;;  %v1055_v1 = vunpack.c.h.bf16 %v1110_v62  ;;  %v305_v10 = vadd.f32 %v1243_v39, %v238_v6 }
  0x70   :  { %579 = vmatmul.bf16.gmra.mxu2 %v395_v50  ;;  %v381_v9 = vpack.c.bf16 %v324_v59, %v323_v58  ;;  %v356_v57 = vmax.f32 %v292_v52, 0.0  ;;  %v367_v58 = vmax.f32 %v303_v53, 0.0  ;;  %v368_v59 = vmax.f32 %v304_v54, 0.0 }
  0x71   :  { %v261_v30 = vadd.f32 %v1243_v39, %v194_v22  ;;  %v226_v4 = vmul.f32 %v1054_v0, %v1237_v33  ;;  %v227_v5 = vmul.f32 %v1055_v1, %v1237_v33  ;;  %v306_v11 = vadd.f32 %v1243_v39, %v239_v7 }
  0x72   :  { %v403_v61 = vpack.c.bf16 %v368_v59, %v367_v58 }
  0x73   :  { %v325_v35 = vmax.f32 %v261_v30, 0.0  ;;  %v293_v8 = vadd.f32 %v1243_v39, %v226_v4  ;;  %v370_v17 = vmax.f32 %v306_v11, 0.0  ;;  %v241_v30 = vmul.f32 %v1083_v28, %v1237_v33 }
  0x75   :  { %v357_v14 = vmax.f32 %v293_v8, 0.0  ;;  %v308_v32 = vadd.f32 %v1243_v39, %v241_v30 }
  0x76   :  { %614 = vmatmul.bf16.gmra.mxu3 %v402_v27  ;;  %v1082_v27 = vunpack.c.l.bf16 %v1117_v25 }
  0x78   :  { %v240_v29 = vmul.f32 %v1082_v27, %v1237_v33 }
  0x7c   :  { %504 = vmatmul.bf16.gmra.mxu0 %v380_v31  ;;  %544 = vmatmul.bf16.gmra.mxu1 %v388_v40  ;;  %v262_v31 = vadd.f32 %v1243_v39, %v195_v23  ;;  %v1050_v40 = vunpack.c.l.bf16 %v1109_v37 }
  0x7e   :  { %v326_v36 = vmax.f32 %v262_v31, 0.0  ;;  %v224_v46 = vmul.f32 %v1050_v40, %v1237_v33  ;;  %v307_v31 = vadd.f32 %v1243_v39, %v240_v29  ;;  %v372_v40 = vmax.f32 %v308_v32, 0.0 }
  0x80   :  { %584 = vmatmul.bf16.gmra.mxu2 %v396_v26  ;;  %v382_v50 = vpack.c.bf16 %v326_v36, %v325_v35  ;;  %v291_v51 = vadd.f32 %v1243_v39, %v224_v46  ;;  %v371_v38 = vmax.f32 %v307_v31, 0.0 }
  0x82   :  { %v355_v56 = vmax.f32 %v291_v51, 0.0  ;;  %v405_v42 = vpack.c.bf16 %v372_v40, %v371_v38  ;;  %v1087_v51 = vunpack.c.h.bf16 %v1118_v48 }
  0x84   :  { %v397_v60 = vpack.c.bf16 %v356_v57, %v355_v56  ;;  %v243_v53 = vmul.f32 %v1087_v51, %v1237_v33 }
  0x86   :  { %619 = vmatmul.bf16.gmra.mxu3 %v403_v61 }
  0x8c   :  { %509 = vmatmul.bf16.gmra.mxu0 %v381_v9  ;;  %549 = vmatmul.bf16.gmra.mxu1 %v389_v16  ;;  %v294_v9 = vadd.f32 %v1243_v39, %v227_v5  ;;  %v369_v16 = vmax.f32 %v305_v10, 0.0 }
  0x8e   :  { %v358_v15 = vmax.f32 %v294_v9, 0.0  ;;  %v404_v19 = vpack.c.bf16 %v370_v17, %v369_v16 }
  0x90   :  { %589 = vmatmul.bf16.gmra.mxu2 %v397_v60  ;;  %v398_v18 = vpack.c.bf16 %v358_v15, %v357_v14 }
  0x96   :  { %624 = vmatmul.bf16.gmra.mxu3 %v404_v19 }
  0x9c   :  { %514 = vmatmul.bf16.gmra.mxu0 %v382_v50  ;;  %554 = vmatmul.bf16.gmra.mxu1 %v390_v55  ;;  %v1086_v50 = vunpack.c.l.bf16 %v1118_v48  ;;  %v310_v55 = vadd.f32 %v1243_v39, %v243_v53 }
  0x9e   :  { %v242_v52 = vmul.f32 %v1086_v50, %v1237_v33  ;;  %v374_v33 = vmax.f32 %v310_v55, 0.0 }
  0xa0   :  { %594 = vmatmul.bf16.gmra.mxu2 %v398_v18  ;;  %v309_v54 = vadd.f32 %v1243_v39, %v242_v52 }
  0xa2   :  { %v373_v61 = vmax.f32 %v309_v54, 0.0 }
  0xa4   :  { %v406_v62 = vpack.c.bf16 %v374_v33, %v373_v61 }
  0xa6   :  { %629 = vmatmul.bf16.gmra.mxu3 %v405_v42 }
  0xa9   :  { %v480_v12 = vpop.f32.mrf.mxu0  ;;  %v1448_v13 = vpop.f32.mrf.mxu1 }
  0xaa   :  { %640 = vst [vmem:[%s1951_s6] sm:$0xff] %v480_v12  ;;  %v773_v21 = vmul.f32 %v480_v12, %v480_v12 }
  0xab   :  { %656 = vst [vmem:[%s1951_s6 + $0x80] sm:$0xff] %v1448_v13 }
  0xb1   :  { %v482_v20 = vpop.f32.mrf.mxu0  ;;  %v1457_v24 = vpop.f32.mrf.mxu1 }
  0xb2   :  { %641 = vst [vmem:[%s1951_s6 + $0x8] sm:$0xff] %v482_v20  ;;  %v704_v22 = vadd.f32 %v482_v20, %v480_v12  ;;  %v774_v23 = vmul.f32 %v482_v20, %v482_v20 }
  0xb3   :  { %657 = vst [vmem:[%s1951_s6 + $0x88] sm:$0xff] %v1457_v24  ;;  %v1479_v44 = vpop.f32.mrf.mxu2 }
  0xb4   :  { %v837_v26 = vadd.f32 %v774_v23, %v773_v21  ;;  %672 = vst [vmem:[%s1951_s6 + $0x100] sm:$0xff] %v1479_v44 }
  0xb6   :  { %634 = vmatmul.bf16.gmra.mxu3 %v406_v62 }
  0xb9   :  { %v485_v34 = vpop.f32.mrf.mxu0  ;;  %v1473_v37 = vpop.f32.mrf.mxu1 }
  0xba   :  { %642 = vst [vmem:[%s1951_s6 + $0x10] sm:$0xff] %v485_v34  ;;  %v705_v35 = vadd.f32 %v704_v22, %v485_v34  ;;  %v775_v36 = vmul.f32 %v485_v34, %v485_v34 }
  0xbb   :  { %658 = vst [vmem:[%s1951_s6 + $0x90] sm:$0xff] %v1473_v37  ;;  %v1501_v57 = vpop.f32.mrf.mxu2 }
  0xbc   :  { %v838_v41 = vadd.f32 %v837_v26, %v775_v36  ;;  %673 = vst [vmem:[%s1951_s6 + $0x108] sm:$0xff] %v1501_v57 }
  0xc1   :  { %v487_v43 = vpop.f32.mrf.mxu0  ;;  %v1484_v47 = vpop.f32.mrf.mxu1 }
  0xc2   :  { %643 = vst [vmem:[%s1951_s6 + $0x18] sm:$0xff] %v487_v43  ;;  %v706_v45 = vadd.f32 %v705_v35, %v487_v43  ;;  %v776_v46 = vmul.f32 %v487_v43, %v487_v43 }
  0xc3   :  { %659 = vst [vmem:[%s1951_s6 + $0x98] sm:$0xff] %v1484_v47  ;;  %v1520_v0 = vpop.f32.mrf.mxu2 }
  0xc4   :  { %v839_v49 = vadd.f32 %v838_v41, %v776_v46  ;;  %674 = vst [vmem:[%s1951_s6 + $0x110] sm:$0xff] %v1520_v0 }
  0xc7   :  { %v1557_v8 = vpop.f32.mrf.mxu3 }
  0xc8   :  { %688 = vst [vmem:[%s1951_s6 + $0x180] sm:$0xff] %v1557_v8 }
  0xc9   :  { %v490_v56 = vpop.f32.mrf.mxu0  ;;  %v1508_v60 = vpop.f32.mrf.mxu1 }
  0xca   :  { %644 = vst [vmem:[%s1951_s6 + $0x20] sm:$0xff] %v490_v56  ;;  %v1506_v58 = vadd.f32 %v706_v45, %v490_v56  ;;  %v777_v59 = vmul.f32 %v490_v56, %v490_v56 }
  0xcb   :  { %660 = vst [vmem:[%s1951_s6 + $0xa0] sm:$0xff] %v1508_v60  ;;  %v1535_v3 = vpop.f32.mrf.mxu2 }
  0xcc   :  { %v1514_v39 = vadd.f32 %v839_v49, %v777_v59  ;;  %675 = vst [vmem:[%s1951_s6 + $0x118] sm:$0xff] %v1535_v3 }
  0xcf   :  { %v1578_v12 = vpop.f32.mrf.mxu3 }
  0xd0   :  { %689 = vst [vmem:[%s1951_s6 + $0x188] sm:$0xff] %v1578_v12 }
  0xd1   :  { %v492_v63 = vpop.f32.mrf.mxu0  ;;  %v1525_v1 = vpop.f32.mrf.mxu1 }
  0xd2   :  { %645 = vst [vmem:[%s1951_s6 + $0x28] sm:$0xff] %v492_v63  ;;  %v778_v31 = vmul.f32 %v492_v63, %v492_v63  ;;  %v708_v32 = vadd.f32 %v1506_v58, %v492_v63 }
  0xd3   :  { %661 = vst [vmem:[%s1951_s6 + $0xa8] sm:$0xff] %v1525_v1  ;;  %v1550_v6 = vpop.f32.mrf.mxu2 }
  0xd4   :  { %676 = vst [vmem:[%s1951_s6 + $0x120] sm:$0xff] %v1550_v6  ;;  %v841_v35 = vadd.f32 %v1514_v39, %v778_v31 }
  0xd9   :  { %v495_v2 = vpop.f32.mrf.mxu0  ;;  %v1540_v4 = vpop.f32.mrf.mxu1 }
  0xda   :  { %646 = vst [vmem:[%s1951_s6 + $0x30] sm:$0xff] %v495_v2  ;;  %v1599_v17 = vpop.f32.mrf.mxu3  ;;  %v779_v34 = vmul.f32 %v495_v2, %v495_v2  ;;  %v709_v36 = vadd.f32 %v708_v32, %v495_v2 }
  0xdb   :  { %662 = vst [vmem:[%s1951_s6 + $0xb0] sm:$0xff] %v1540_v4  ;;  %v1571_v10 = vpop.f32.mrf.mxu2 }
  0xdc   :  { %677 = vst [vmem:[%s1951_s6 + $0x128] sm:$0xff] %v1571_v10  ;;  %v842_v42 = vadd.f32 %v841_v35, %v779_v34 }
  0xdd   :  { %690 = vst [vmem:[%s1951_s6 + $0x190] sm:$0xff] %v1599_v17 }
  0xe1   :  { %v497_v5 = vpop.f32.mrf.mxu0  ;;  %v1555_v7 = vpop.f32.mrf.mxu1 }
  0xe2   :  { %647 = vst [vmem:[%s1951_s6 + $0x38] sm:$0xff] %v497_v5  ;;  %v1620_v21 = vpop.f32.mrf.mxu3  ;;  %v780_v38 = vmul.f32 %v497_v5, %v497_v5  ;;  %v710_v43 = vadd.f32 %v709_v36, %v497_v5 }
  0xe3   :  { %663 = vst [vmem:[%s1951_s6 + $0xb8] sm:$0xff] %v1555_v7  ;;  %v1592_v15 = vpop.f32.mrf.mxu2 }
  0xe4   :  { %678 = vst [vmem:[%s1951_s6 + $0x130] sm:$0xff] %v1592_v15  ;;  %v843_v49 = vadd.f32 %v842_v42, %v780_v38 }
  0xe5   :  { %691 = vst [vmem:[%s1951_s6 + $0x198] sm:$0xff] %v1620_v21 }
  0xe9   :  { %v500_v9 = vpop.f32.mrf.mxu0  ;;  %v1576_v11 = vpop.f32.mrf.mxu1 }
  0xea   :  { %648 = vst [vmem:[%s1951_s6 + $0x40] sm:$0xff] %v500_v9  ;;  %v1641_v26 = vpop.f32.mrf.mxu3  ;;  %v781_v45 = vmul.f32 %v500_v9, %v500_v9  ;;  %v711_v50 = vadd.f32 %v710_v43, %v500_v9 }
  0xeb   :  { %664 = vst [vmem:[%s1951_s6 + $0xc0] sm:$0xff] %v1576_v11  ;;  %v1613_v19 = vpop.f32.mrf.mxu2 }
  0xec   :  { %679 = vst [vmem:[%s1951_s6 + $0x138] sm:$0xff] %v1613_v19  ;;  %v844_v52 = vadd.f32 %v843_v49, %v781_v45 }
  0xed   :  { %692 = vst [vmem:[%s1951_s6 + $0x1a0] sm:$0xff] %v1641_v26 }
  0xf1   :  { %v502_v14 = vpop.f32.mrf.mxu0  ;;  %v1597_v16 = vpop.f32.mrf.mxu1 }
  0xf2   :  { %649 = vst [vmem:[%s1951_s6 + $0x48] sm:$0xff] %v502_v14  ;;  %v1662_v30 = vpop.f32.mrf.mxu3  ;;  %v782_v51 = vmul.f32 %v502_v14, %v502_v14  ;;  %v712_v53 = vadd.f32 %v711_v50, %v502_v14 }
  0xf3   :  { %665 = vst [vmem:[%s1951_s6 + $0xc8] sm:$0xff] %v1597_v16  ;;  %v1634_v23 = vpop.f32.mrf.mxu2 }
  0xf4   :  { %680 = vst [vmem:[%s1951_s6 + $0x140] sm:$0xff] %v1634_v23  ;;  %v845_v55 = vadd.f32 %v844_v52, %v782_v51  ;;  %v790_v51 = vmul.f32 %v1457_v24, %v1457_v24 }
  0xf5   :  { %693 = vst [vmem:[%s1951_s6 + $0x1a8] sm:$0xff] %v1662_v30 }
  0xf9   :  { %v505_v18 = vpop.f32.mrf.mxu0  ;;  %v1618_v20 = vpop.f32.mrf.mxu1 }
  0xfa   :  { %650 = vst [vmem:[%s1951_s6 + $0x50] sm:$0xff] %v505_v18  ;;  %v1685_v48 = vpop.f32.mrf.mxu3  ;;  %v783_v54 = vmul.f32 %v505_v18, %v505_v18  ;;  %v713_v56 = vadd.f32 %v712_v53, %v505_v18 }
  0xfb   :  { %666 = vst [vmem:[%s1951_s6 + $0xd0] sm:$0xff] %v1618_v20  ;;  %v1655_v28 = vpop.f32.mrf.mxu2 }
  0xfc   :  { %681 = vst [vmem:[%s1951_s6 + $0x148] sm:$0xff] %v1655_v28  ;;  %v846_v33 = vadd.f32 %v845_v55, %v783_v54 }
  0xfd   :  { %694 = vst [vmem:[%s1951_s6 + $0x1b0] sm:$0xff] %v1685_v48 }
 0x101   :  { %v507_v22 = vpop.f32.mrf.mxu0  ;;  %v1639_v25 = vpop.f32.mrf.mxu1 }
 0x102   :  { %651 = vst [vmem:[%s1951_s6 + $0x58] sm:$0xff] %v507_v22  ;;  %v784_v58 = vmul.f32 %v507_v22, %v507_v22  ;;  %v714_v39 = vadd.f32 %v713_v56, %v507_v22  ;;  %v1706_v2 = vpop.f32.mrf.mxu3 }
 0x103   :  { %667 = vst [vmem:[%s1951_s6 + $0xd8] sm:$0xff] %v1639_v25  ;;  %v1678_v41 = vpop.f32.mrf.mxu2 }
 0x104   :  { %682 = vst [vmem:[%s1951_s6 + $0x150] sm:$0xff] %v1678_v41  ;;  %v847_v5 = vadd.f32 %v846_v33, %v784_v58  ;;  %v792_v58 = vmul.f32 %v1484_v47, %v1484_v47 }
 0x105   :  { %695 = vst [vmem:[%s1951_s6 + $0x1b8] sm:$0xff] %v1706_v2 }
 0x109   :  { %v510_v27 = vpop.f32.mrf.mxu0  ;;  %v1660_v29 = vpop.f32.mrf.mxu1 }
 0x10a   :  { %652 = vst [vmem:[%s1951_s6 + $0x60] sm:$0xff] %v510_v27  ;;  %v785_v62 = vmul.f32 %v510_v27, %v510_v27  ;;  %v715_v9 = vadd.f32 %v714_v39, %v510_v27  ;;  %v1727_v45 = vpop.f32.mrf.mxu3 }
 0x10b   :  { %668 = vst [vmem:[%s1951_s6 + $0xe0] sm:$0xff] %v1660_v29  ;;  %v1699_v61 = vpop.f32.mrf.mxu2 }
 0x10c   :  { %683 = vst [vmem:[%s1951_s6 + $0x158] sm:$0xff] %v1699_v61  ;;  %v848_v18 = vadd.f32 %v847_v5, %v785_v62 }
 0x10d   :  { %696 = vst [vmem:[%s1951_s6 + $0x1c0] sm:$0xff] %v1727_v45 }
 0x111   :  { %v512_v40 = vpop.f32.mrf.mxu0  ;;  %v1683_v46 = vpop.f32.mrf.mxu1 }
 0x112   :  { %653 = vst [vmem:[%s1951_s6 + $0x68] sm:$0xff] %v512_v40  ;;  %v786_v14 = vmul.f32 %v512_v40, %v512_v40  ;;  %v716_v22 = vadd.f32 %v715_v9, %v512_v40  ;;  %v789_v40 = vmul.f32 %v1448_v13, %v1448_v13 }
 0x113   :  { %669 = vst [vmem:[%s1951_s6 + $0xe8] sm:$0xff] %v1683_v46  ;;  %v1720_v36 = vpop.f32.mrf.mxu2 }
 0x114   :  { %v849_v32 = vadd.f32 %v848_v18, %v786_v14  ;;  %684 = vst [vmem:[%s1951_s6 + $0x160] sm:$0xff] %v1720_v36  ;;  %v795_v14 = vmul.f32 %v1540_v4, %v1540_v4 }
 0x119   :  { %v515_v59 = vpop.f32.mrf.mxu0  ;;  %v1704_v63 = vpop.f32.mrf.mxu1 }
 0x11a   :  { %654 = vst [vmem:[%s1951_s6 + $0x70] sm:$0xff] %v515_v59  ;;  %v787_v31 = vmul.f32 %v515_v59, %v515_v59  ;;  %v717_v34 = vadd.f32 %v716_v22, %v515_v59 }
 0x11b   :  { %670 = vst [vmem:[%s1951_s6 + $0xf0] sm:$0xff] %v1704_v63  ;;  %v1750_v56 = vpop.f32.mrf.mxu2 }
 0x11c   :  { %v850_v27 = vadd.f32 %v849_v32, %v787_v31  ;;  %685 = vst [vmem:[%s1951_s6 + $0x168] sm:$0xff] %v1750_v56  ;;  %v796_v32 = vmul.f32 %v1555_v7, %v1555_v7 }
 0x121   :  { %v517_v35 = vpop.f32.mrf.mxu0  ;;  %v1725_v43 = vpop.f32.mrf.mxu1 }
 0x122   :  { %655 = vst [vmem:[%s1951_s6 + $0x78] sm:$0xff] %v517_v35  ;;  %v718_v38 = vadd.f32 %v717_v34, %v517_v35  ;;  %v788_v42 = vmul.f32 %v517_v35, %v517_v35 }
 0x123   :  { %671 = vst [vmem:[%s1951_s6 + $0xf8] sm:$0xff] %v1725_v43  ;;  %v1774_v31 = vpop.f32.mrf.mxu2 }
 0x124   :  { %v719_v49 = vadd.f32 %v718_v38, %v1448_v13  ;;  %v851_v50 = vadd.f32 %v850_v27, %v788_v42  ;;  %v791_v13 = vmul.f32 %v1473_v37, %v1473_v37  ;;  %686 = vst [vmem:[%s1951_s6 + $0x170] sm:$0xff] %v1774_v31 }
 0x126   :  { %v720_v52 = vadd.f32 %v719_v49, %v1457_v24  ;;  %v852_v53 = vadd.f32 %v851_v50, %v789_v40  ;;  %v1759_v24 = vpop.f32.mrf.mxu3  ;;  %v799_v40 = vmul.f32 %v1618_v20, %v1618_v20 }
 0x127   :  { %697 = vst [vmem:[%s1951_s6 + $0x1c8] sm:$0xff] %v1759_v24 }
 0x128   :  { %v721_v54 = vadd.f32 %v720_v52, %v1473_v37  ;;  %v853_v55 = vadd.f32 %v852_v53, %v790_v51  ;;  %v793_v37 = vmul.f32 %v1508_v60, %v1508_v60  ;;  %v800_v52 = vmul.f32 %v1639_v25, %v1639_v25 }
 0x12a   :  { %v722_v59 = vadd.f32 %v721_v54, %v1484_v47  ;;  %v854_v33 = vadd.f32 %v853_v55, %v791_v13  ;;  %v794_v47 = vmul.f32 %v1525_v1, %v1525_v1  ;;  %v801_v13 = vmul.f32 %v1660_v29, %v1660_v29 }
 0x12b   :  { %v1798_v51 = vpop.f32.mrf.mxu2 }
 0x12c   :  { %v723_v39 = vadd.f32 %v722_v59, %v1508_v60  ;;  %v855_v62 = vadd.f32 %v854_v33, %v792_v58  ;;  %687 = vst [vmem:[%s1951_s6 + $0x178] sm:$0xff] %v1798_v51  ;;  %v802_v58 = vmul.f32 %v1683_v46, %v1683_v46 }
 0x12e   :  { %v724_v5 = vadd.f32 %v723_v39, %v1525_v1  ;;  %v856_v9 = vadd.f32 %v855_v62, %v793_v37  ;;  %v1783_v1 = vpop.f32.mrf.mxu3  ;;  %v803_v37 = vmul.f32 %v1704_v63, %v1704_v63 }
 0x12f   :  { %698 = vst [vmem:[%s1951_s6 + $0x1d0] sm:$0xff] %v1783_v1 }
 0x130   :  { %v857_v18 = vadd.f32 %v856_v9, %v794_v47  ;;  %v725_v22 = vadd.f32 %v724_v5, %v1540_v4  ;;  %v797_v4 = vmul.f32 %v1576_v11, %v1576_v11  ;;  %v804_v47 = vmul.f32 %v1725_v43, %v1725_v43 }
 0x132   :  { %v726_v60 = vadd.f32 %v725_v22, %v1555_v7  ;;  %v858_v34 = vadd.f32 %v857_v18, %v795_v14  ;;  %v798_v7 = vmul.f32 %v1597_v16, %v1597_v16 }
 0x134   :  { %v727_v35 = vadd.f32 %v726_v60, %v1576_v11  ;;  %v859_v27 = vadd.f32 %v858_v34, %v796_v32  ;;  %v808_v60 = vmul.f32 %v1535_v3, %v1535_v3 }
 0x136   :  { %v728_v38 = vadd.f32 %v727_v35, %v1597_v16  ;;  %v860_v42 = vadd.f32 %v859_v27, %v797_v4  ;;  %v1807_v16 = vpop.f32.mrf.mxu3  ;;  %v810_v27 = vmul.f32 %v1571_v10, %v1571_v10 }
 0x137   :  { %699 = vst [vmem:[%s1951_s6 + $0x1d8] sm:$0xff] %v1807_v16 }
 0x138   :  { %v729_v49 = vadd.f32 %v728_v38, %v1618_v20  ;;  %v861_v50 = vadd.f32 %v860_v42, %v798_v7  ;;  %v811_v38 = vmul.f32 %v1592_v15, %v1592_v15 }
 0x13a   :  { %v730_v11 = vadd.f32 %v729_v49, %v1639_v25  ;;  %v862_v53 = vadd.f32 %v861_v50, %v799_v40  ;;  %v812_v49 = vmul.f32 %v1613_v19, %v1613_v19 }
 0x13c   :  { %v731_v20 = vadd.f32 %v730_v11, %v1660_v29  ;;  %v863_v54 = vadd.f32 %v862_v53, %v800_v52 }
 0x13e   :  { %v864_v25 = vadd.f32 %v863_v54, %v801_v13  ;;  %v732_v55 = vadd.f32 %v731_v20, %v1683_v46  ;;  %v1825_v29 = vpop.f32.mrf.mxu3  ;;  %v805_v46 = vmul.f32 %v1479_v44, %v1479_v44  ;;  %v815_v13 = vmul.f32 %v1678_v41, %v1678_v41 }
 0x13f   :  { %700 = vst [vmem:[%s1951_s6 + $0x1e0] sm:$0xff] %v1825_v29 }
 0x140   :  { %v865_v59 = vadd.f32 %v864_v25, %v802_v58  ;;  %v733_v33 = vadd.f32 %v732_v55, %v1704_v63  ;;  %v806_v63 = vmul.f32 %v1501_v57, %v1501_v57  ;;  %v816_v58 = vmul.f32 %v1699_v61, %v1699_v61 }
 0x142   :  { %v866_v39 = vadd.f32 %v865_v59, %v803_v37  ;;  %v734_v62 = vadd.f32 %v733_v33, %v1725_v43  ;;  %v807_v43 = vmul.f32 %v1520_v0, %v1520_v0  ;;  %v817_v37 = vmul.f32 %v1720_v36, %v1720_v36 }
 0x144   :  { %v735_v5 = vadd.f32 %v734_v62, %v1479_v44  ;;  %v867_v9 = vadd.f32 %v866_v39, %v804_v47  ;;  %v818_v62 = vmul.f32 %v1750_v56, %v1750_v56 }
 0x146   :  { %v736_v14 = vadd.f32 %v735_v5, %v1501_v57  ;;  %v868_v18 = vadd.f32 %v867_v9, %v805_v46  ;;  %v1843_v44 = vpop.f32.mrf.mxu3  ;;  %v809_v57 = vmul.f32 %v1550_v6, %v1550_v6  ;;  %v819_v46 = vmul.f32 %v1774_v31, %v1774_v31 }
 0x147   :  { %701 = vst [vmem:[%s1951_s6 + $0x1e8] sm:$0xff] %v1843_v44 }
 0x148   :  { %v737_v22 = vadd.f32 %v736_v14, %v1520_v0  ;;  %v869_v32 = vadd.f32 %v868_v18, %v806_v63  ;;  %v820_v63 = vmul.f32 %v1798_v51, %v1798_v51 }
 0x14a   :  { %v738_v34 = vadd.f32 %v737_v22, %v1535_v3  ;;  %v870_v4 = vadd.f32 %v869_v32, %v807_v43 }
 0x14c   :  { %v739_v35 = vadd.f32 %v738_v34, %v1550_v6  ;;  %v871_v0 = vadd.f32 %v870_v4, %v808_v60 }
 0x14e   :  { %v740_v7 = vadd.f32 %v739_v35, %v1571_v10  ;;  %v872_v3 = vadd.f32 %v871_v0, %v809_v57  ;;  %v1861_v6 = vpop.f32.mrf.mxu3  ;;  %v813_v10 = vmul.f32 %v1634_v23, %v1634_v23 }
 0x14f   :  { %702 = vst [vmem:[%s1951_s6 + $0x1f0] sm:$0xff] %v1861_v6 }
 0x150   :  { %v873_v42 = vadd.f32 %v872_v3, %v810_v27  ;;  %v741_v40 = vadd.f32 %v740_v7, %v1592_v15  ;;  %v814_v15 = vmul.f32 %v1655_v28, %v1655_v28 }
 0x152   :  { %v742_v50 = vadd.f32 %v741_v40, %v1613_v19  ;;  %v874_v52 = vadd.f32 %v873_v42, %v811_v38 }
 0x154   :  { %v743_v11 = vadd.f32 %v742_v50, %v1634_v23  ;;  %v875_v53 = vadd.f32 %v874_v52, %v812_v49 }
 0x156   :  { %v744_v20 = vadd.f32 %v743_v11, %v1655_v28  ;;  %v876_v19 = vadd.f32 %v875_v53, %v813_v10  ;;  %v637_v23 = vpop.f32.mrf.mxu3  ;;  %v832_v53 = vmul.f32 %v1807_v16, %v1807_v16 }
 0x157   :  { %703 = vst [vmem:[%s1951_s6 + $0x1f8] sm:$0xff] %v637_v23 }
 0x158   :  { %v745_v54 = vadd.f32 %v744_v20, %v1678_v41  ;;  %v877_v25 = vadd.f32 %v876_v19, %v814_v15  ;;  %v833_v19 = vmul.f32 %v1825_v29, %v1825_v29 }
 0x15a   :  { %v746_v55 = vadd.f32 %v745_v54, %v1699_v61  ;;  %v878_v59 = vadd.f32 %v877_v25, %v815_v13  ;;  %v834_v54 = vmul.f32 %v1843_v44, %v1843_v44 }
 0x15c   :  { %v879_v33 = vadd.f32 %v878_v59, %v816_v58  ;;  %v747_v28 = vadd.f32 %v746_v55, %v1720_v36  ;;  %v821_v36 = vmul.f32 %v1557_v8, %v1557_v8  ;;  %v835_v55 = vmul.f32 %v1861_v6, %v1861_v6 }
 0x15d   :  { %v836_v59 = vmul.f32 %v637_v23, %v637_v23 }
 0x15e   :  { %v880_v39 = vadd.f32 %v879_v33, %v817_v37  ;;  %v748_v41 = vadd.f32 %v747_v28, %v1750_v56  ;;  %v822_v56 = vmul.f32 %v1578_v12, %v1578_v12 }
 0x160   :  { %v881_v47 = vadd.f32 %v880_v39, %v818_v62  ;;  %v749_v61 = vadd.f32 %v748_v41, %v1774_v31  ;;  %v823_v31 = vmul.f32 %v1599_v17, %v1599_v17 }
 0x162   :  { %v882_v5 = vadd.f32 %v881_v47, %v819_v46  ;;  %v750_v9 = vadd.f32 %v749_v61, %v1798_v51  ;;  %v824_v51 = vmul.f32 %v1620_v21, %v1620_v21 }
 0x164   :  { %v751_v14 = vadd.f32 %v750_v9, %v1557_v8  ;;  %v883_v18 = vadd.f32 %v882_v5, %v820_v63  ;;  %v825_v8 = vmul.f32 %v1641_v26, %v1641_v26 }
 0x166   :  { %v752_v43 = vadd.f32 %v751_v14, %v1578_v12  ;;  %v884_v22 = vadd.f32 %v883_v18, %v821_v36  ;;  %v826_v12 = vmul.f32 %v1662_v30, %v1662_v30 }
 0x168   :  { %v753_v32 = vadd.f32 %v752_v43, %v1599_v17  ;;  %v885_v60 = vadd.f32 %v884_v22, %v822_v56  ;;  %v827_v17 = vmul.f32 %v1685_v48, %v1685_v48 }
 0x16a   :  { %v754_v34 = vadd.f32 %v753_v32, %v1620_v21  ;;  %v886_v4 = vadd.f32 %v885_v60, %v823_v31  ;;  %v828_v21 = vmul.f32 %v1706_v2, %v1706_v2 }
 0x16c   :  { %v755_v57 = vadd.f32 %v754_v34, %v1641_v26  ;;  %v887_v35 = vadd.f32 %v886_v4, %v824_v51  ;;  %v829_v26 = vmul.f32 %v1727_v45, %v1727_v45 }
 0x16e   :  { %v756_v0 = vadd.f32 %v755_v57, %v1662_v30  ;;  %v888_v27 = vadd.f32 %v887_v35, %v825_v8  ;;  %v830_v30 = vmul.f32 %v1759_v24, %v1759_v24 }
 0x170   :  { %v889_v7 = vadd.f32 %v888_v27, %v826_v12  ;;  %v757_v3 = vadd.f32 %v756_v0, %v1685_v48  ;;  %v831_v48 = vmul.f32 %v1783_v1, %v1783_v1 }
 0x172   :  { %v758_v38 = vadd.f32 %v757_v3, %v1706_v2  ;;  %v890_v42 = vadd.f32 %v889_v7, %v827_v17 }
 0x174   :  { %v759_v40 = vadd.f32 %v758_v38, %v1727_v45  ;;  %v891_v49 = vadd.f32 %v890_v42, %v828_v21 }
 0x176   :  { %v760_v50 = vadd.f32 %v759_v40, %v1759_v24  ;;  %v892_v52 = vadd.f32 %v891_v49, %v829_v26 }
 0x178   :  { %v761_v10 = vadd.f32 %v760_v50, %v1783_v1  ;;  %v893_v11 = vadd.f32 %v892_v52, %v830_v30 }
 0x17a   :  { %v762_v2 = vadd.f32 %v761_v10, %v1807_v16  ;;  %v894_v15 = vadd.f32 %v893_v11, %v831_v48 }
 0x17c   :  { %v895_v45 = vadd.f32 %v894_v15, %v832_v53  ;;  %v763_v20 = vadd.f32 %v762_v2, %v1825_v29 }
 0x17e   :  { %v896_v24 = vadd.f32 %v895_v45, %v833_v19  ;;  %v764_v13 = vadd.f32 %v763_v20, %v1843_v44 }
 0x180   :  { %v897_v1 = vadd.f32 %v896_v24, %v834_v54  ;;  %v765_v25 = vadd.f32 %v764_v13, %v1861_v6 }
 0x182   :  { %v898_v16 = vadd.f32 %v897_v1, %v835_v55  ;;  %v766_v58 = vadd.f32 %v765_v25, %v637_v23 }
 0x184   :  { %v767_v33 = vrot.slane %v766_v58, 4  ;;  %v899_v28 = vadd.f32 %v898_v16, %v836_v59 }
 0x186   :  { %v768_v37 = vadd.f32 %v767_v33, %v766_v58  ;;  %v900_v39 = vrot.slane %v899_v28, 4 }
 0x188   :  { %v769_v29 = vrot.slane %v768_v37, 2  ;;  %v901_v41 = vadd.f32 %v900_v39, %v899_v28 }
 0x18a   :  { %v770_v62 = vadd.f32 %v769_v29, %v768_v37  ;;  %v902_v47 = vrot.slane %v901_v41, 2 }
 0x18c   :  { %v771_v61 = vrot.slane %v770_v62, 1  ;;  %v903_v46 = vadd.f32 %v902_v47, %v901_v41 }
 0x18e   :  { %v772_v44 = vadd.f32 %v771_v61, %v770_v62  ;;  %v904_v5 = vrot.slane %v903_v46, 1 }
 0x190   :  { %v905_v9 = vadd.f32 %v904_v5, %v903_v46  ;;  %906 = vst [vmem:[%s1952_s7] sm:$0xff] %v772_v44 }
 0x192   :  { %907 = vst [vmem:[%s1953_s8] sm:$0xff] %v905_v9 }

// kernel: identity_block3_forward.5
= control target key start
LH: loop header
LB: loop body
LE: loop exit
PB: predicated region body
PF: predicated region fallthrough
CT: control target
= control target key end

     0   :  { %s5940_s27 = smov 0   ;;  %s7083_s0 = inlined_call_operand.vmem [shape: bf16[512,128], index: 0, kind: input, shape index: {}]   ;;  %s7084_s1 = inlined_call_operand.vmem [shape: f32[1,128], index: 1, kind: input, shape index: {}]   ;;  %s7085_s2 = inlined_call_operand.vmem [shape: f32[1,128], index: 2, kind: input, shape index: {}]   ;;  %s7086_s3 = inlined_call_operand.vmem [shape: f32[1,128], index: 3, kind: input, shape index: {}]   ;;  %s7087_s4 = inlined_call_operand.vmem [shape: f32[1,128], index: 4, kind: input, shape index: {}]   ;;  %s7088_s5 = inlined_call_operand.vmem [shape: bf16[9,128,128], index: 5, kind: input, shape index: {}]   ;;  %s7089_s6 = inlined_call_operand.vmem [shape: bf16[512,128], index: 6, kind: output, shape index: {0}]   ;;  %s7090_s7 = inlined_call_operand.vmem [shape: f32[2,8,128], index: 7, kind: output, shape index: {1}]   ;;  %s7091_s8 = inlined_call_operand.vmem [shape: f32[2,8,128], index: 8, kind: output, shape index: {2}]  }
   0x1 LB: > { %s5946_s28 = sadd.s32 4294967295, %s5892_s27   ;;  %p4365_p0 = scmp.ge.s32.totalorder %s5892_s27, 1  ;;  %s5892_s27 = sphi %s5940_s27, %s19_s27  }
   0x2   : > { %p268_p1 = scmp.lt.s32.totalorder %s5892_s27, 3 }
   0x4   : > { %p269_p2 = pnand %p4365_p0, %p268_p1 }
   0x6   : > { %272 = sbr.rel (%p269_p2) target bundleno = 786 (0x312), region = 44 }
   0xb   : > { %v5413_v0 = vld [vmem:[%s7088_s5 + $0x78] sm:$0xff]  ;;  %v5412_v1 = vld [vmem:[%s7088_s5 + $0x70] sm:$0xff]  ;;  %v331_v2 = vld [vmem:[%s7084_s1] sm:$0x1]  ;;  %s4366_s19 = sshll.u32 %s5946_s28, 5  ;;  %v5894_v16 = vmov 0  }
   0xc   : > { %5851 = vmatpush.bf16.msra.mxu1 %v5413_v0  ;;  %5852 = vmatpush.bf16.msra.mxu2 %v5413_v0  ;;  %v5959_v3 = vmul.f32 0.001953125, %v331_v2  ;;  %v333_v4 = vld [vmem:[%s7085_s2] sm:$0x1]  ;;  %v5411_v7 = vld [vmem:[%s7088_s5 + $0x68] sm:$0xff]  ;;  %p311_p3 = scmp.lt.s32.totalorder %s4366_s19, 63  ;;  %v5409_v12 = vld [vmem:[%s7088_s5 + $0x58] sm:$0xff] }
   0xd   : > { %5853 = vmatpush.bf16.msra.mxu3 %v5413_v0  ;;  %1548 = vmatpush.bf16.msra.mxu0 %v5413_v0  ;;  %v334_v5 = vmul.f32 0.001953125, %v333_v4  ;;  %v5410_v10 = vld [vmem:[%s7088_s5 + $0x60] sm:$0xff]  ;;  %v5408_v13 = vld [vmem:[%s7088_s5 + $0x50] sm:$0xff]  ;;  %967 = vst [vmem:[#allocation2 + $0x90] sm:$0xf] %v5894_v16  ;;  %v5407_v17 = vld [vmem:[%s7088_s5 + $0x48] sm:$0xff] }
   0xe   : > { %v335_v6 = vmul.f32 %v5959_v3, %v5959_v3  ;;  %s7141_s19 = smov (!%p311_p3, %s4366_s19), 63  ;;  %968 = vst [vmem:[#allocation2 + $0x94] sm:$0xf] %v5894_v16  ;;  %v5406_v20 = vld [vmem:[%s7088_s5 + $0x40] sm:$0xff]  ;;  %v5437_v27 = vld [vmem:[%s7088_s5 + $0xb8] sm:$0xff]  ;;  %v5436_v43 = vld [vmem:[%s7088_s5 + $0xb0] sm:$0xff] }
   0xf   : > { %s4367_s24 = sshll.u32 %s7141_s19, 2  ;;  %552 = vst [vmem:[#allocation2] sm:$0xf] %v5894_v16  ;;  %v349_v23 = vld [vmem:[%s7086_s3] sm:$0x1]  ;;  %v5461_v28 = vld [vmem:[%s7088_s5 + $0xf8] sm:$0xff] }
  0x10   : > { %5854 = vmatpush.bf16.msra.mxu1 %v5412_v1  ;;  %5855 = vmatpush.bf16.msra.mxu2 %v5412_v1  ;;  %v336_v8 = vsub.f32 %v334_v5, %v335_v6  ;;  %s5990_s9 = scalar_lea.vmem %s7083_s0, %s4367_s24  ;;  %553 = vst [vmem:[#allocation2 + $0x4] sm:$0xf] %v5894_v16  ;;  %v5389_v30 = vld [vmem:[%s7088_s5 + $0x38] sm:$0xff]  ;;  %v351_v39 = vld [vmem:[%s7087_s4] sm:$0x1]  ;;  %v5460_v44 = vld [vmem:[%s7088_s5 + $0xf0] sm:$0xff]  ;;  %s7011_s30 = scalar_lea.vmem %s7089_s6, %s4367_s24 }
  0x11   : > { %5856 = vmatpush.bf16.msra.mxu3 %v5412_v1  ;;  %1549 = vmatpush.bf16.msra.mxu0 %v5412_v1  ;;  %555 = vst [vmem:[#allocation2 + $0x88] sm:$0xf] %v5894_v16  ;;  %v5808_v24 = vld [vmem:[%s5990_s9 + $0x18] sm:$0xff]   ;;  %v5809_v38 = vld [vmem:[%s5990_s9 + $0x20] sm:$0xff]   ;;  %v5388_v47 = vld [vmem:[%s7088_s5 + $0x30] sm:$0xff]  ;;  %vm558_vm3 = vcmask 1040384  }
  0x12   : > { %v337_v9 = vmax.f32 %v336_v8, 0.0  ;;  %556 = vst [vmem:[#allocation2 + $0x8c] sm:$0xf] %v5894_v16  ;;  %v5812_v26 = vld [vmem:[%s5990_s9 + $0x38] sm:$0xff]   ;;  %v5596_v35 = vunpack.c.l.bf16 %v5808_v24  ;;  %v5597_v36 = vunpack.c.h.bf16 %v5808_v24  ;;  %v5600_v48 = vunpack.c.l.bf16 %v5809_v38  ;;  %v5813_v0 = vld [vmem:[%s5990_s9 + $0x40] sm:$0xff]   ;;  %v5387_v22 = vld [vmem:[%s7088_s5 + $0x28] sm:$0xff] }
  0x13   : > { %970 = vst [vmem:[#allocation2 + $0x118] sm:$0xf] %v5894_v16  ;;  %v5816_v29 = vld [vmem:[%s5990_s9 + $0x58] sm:$0xff]   ;;  %v5612_v37 = vunpack.c.l.bf16 %v5812_v26  ;;  %v5613_v40 = vunpack.c.h.bf16 %v5812_v26  ;;  %v5601_v49 = vunpack.c.h.bf16 %v5809_v38  ;;  %v5817_v8 = vld [vmem:[%s5990_s9 + $0x60] sm:$0xff]   ;;  %vm559_vm4 = vsmask.f32 256 }
  0x14   : > { %5857 = vmatpush.bf16.msra.mxu1 %v5411_v7  ;;  %5858 = vmatpush.bf16.msra.mxu2 %v5411_v7  ;;  %v338_v11 = vadd.f32 1e-05, %v337_v9  ;;  %971 = vst [vmem:[#allocation2 + $0x11c] sm:$0xf] %v5894_v16  ;;  %v5485_v33 = vld [vmem:[%s7088_s5 + $0x138] sm:$0xff]  ;;  %v5628_v41 = vunpack.c.l.bf16 %v5816_v29  ;;  %v5629_v42 = vunpack.c.h.bf16 %v5816_v29  ;;  %vm6299_vm6 = vmand %vm558_vm3, %vm559_vm4  ;;  %vm899_vm8 = vcmask 1043456  }
  0x15   : > { %5859 = vmatpush.bf16.msra.mxu3 %v5411_v7  ;;  %1550 = vmatpush.bf16.msra.mxu0 %v5411_v7  ;;  %1006 = vst [vmem:[#allocation2 + $0x120] sm:$0xf] %v5894_v16  ;;  %v5390_v32 = vld [vmem:[#allocation2 + $0x90] sm:$0xff]  ;;  %v5616_v7 = vunpack.c.l.bf16 %v5813_v0  ;;  %vm609_vm5 = vsmask.f32 4368  ;;  %vm1012_vm10 = vcmask 1043459  }
  0x16   : > { %5884 = vrsqrt.f32 %v338_v11  ;;  %vm345_vm0 = vweird.f32 %v338_v11  ;;  %1007 = vst [vmem:[#allocation2 + $0x124] sm:$0xf] %v5894_v16  ;;  %vm6308_vm7 = vmor %vm559_vm4, %vm609_vm5  ;;  %vm900_vm9 = vsmask.f32 7938  ;;  %vm1013_vm11 = vsmask.f32 7950 }
  0x17   : > { %1009 = vst [vmem:[#allocation2 + $0x1a8] sm:$0xf] %v5894_v16  ;;  %vm6320_vm12 = vmand %vm1012_vm10, %vm1013_vm11  ;;  %vm1063_vm13 = vsmask.f32 3328  ;;  %vm1064_vm14 = vsmask.f32 7440 }
  0x18   : > { %5860 = vmatpush.bf16.msra.mxu1 %v5410_v10  ;;  %5861 = vmatpush.bf16.msra.mxu2 %v5410_v10  ;;  %1010 = vst [vmem:[#allocation2 + $0x1ac] sm:$0xf] %v5894_v16  ;;  %v5484_v16 = vld [vmem:[%s7088_s5 + $0x130] sm:$0xff]  ;;  %vm6333_vm15 = vmand %vm899_vm8, %vm900_vm9  ;;  %p322_p4 = scmp.lt.s32.totalorder %s5946_s28, 1 }
  0x19   : > { %5862 = vmatpush.bf16.msra.mxu3 %v5410_v10  ;;  %1551 = vmatpush.bf16.msra.mxu0 %v5410_v10 }
  0x1a   : > { %s7143_s28 = smov (!%p322_p4, %s5946_s28), 1 }
  0x1b   : > { %s4370_s19 = sshll.u32 %s7143_s28, 3 }
  0x1c   : > { %5863 = vmatpush.bf16.msra.mxu1 %v5409_v12  ;;  %5864 = vmatpush.bf16.msra.mxu2 %v5409_v12  ;;  %v5885_v14 = vpop.eup %5884  ;;  %s325_s11 = scalar_lea.vmem %s7090_s7, %s4370_s19  ;;  %s329_s14 = scalar_lea.vmem %s7091_s8, %s4370_s19 }
  0x1d   : > { %5865 = vmatpush.bf16.msra.mxu3 %v5409_v12  ;;  %1552 = vmatpush.bf16.msra.mxu0 %v5409_v12  ;;  %v340_v15 = vmul.f32 %v5885_v14, %v338_v11  ;;  %vm346_vm1 = vweird.f32 %v5885_v14  ;;  %v5617_v12 = vunpack.c.h.bf16 %v5813_v0  ;;  %v5457_v0 = vld [vmem:[%s7088_s5 + $0xd8] sm:$0xff] }
  0x1e   : > { %vm5995_vm2 = vmor %vm345_vm0, %vm346_vm1 }
  0x1f   : > { %v341_v18 = vmul.f32 %v5885_v14, %v340_v15  ;;  %v5459_v15 = vld [vmem:[%s7088_s5 + $0xe8] sm:$0xff]  ;;  %vm6347_vm0 = vmor %vm1063_vm13, %vm1064_vm14 }
  0x20   : > { %5866 = vmatpush.bf16.msra.mxu1 %v5408_v13  ;;  %5867 = vmatpush.bf16.msra.mxu2 %v5408_v13  ;;  %vm6355_vm1 = vmand %vm899_vm8, %vm1063_vm13 }
  0x21   : > { %5868 = vmatpush.bf16.msra.mxu3 %v5408_v13  ;;  %1553 = vmatpush.bf16.msra.mxu0 %v5408_v13  ;;  %v342_v19 = vmul.f32 0.5, %v341_v18 }
  0x23   : > { %v343_v21 = vsub.f32 1.5, %v342_v19  ;;  %v5632_v19 = vunpack.c.l.bf16 %v5817_v8 }
  0x24   : > { %5869 = vmatpush.bf16.msra.mxu1 %v5407_v17  ;;  %5870 = vmatpush.bf16.msra.mxu2 %v5407_v17 }
  0x25   : > { %5871 = vmatpush.bf16.msra.mxu3 %v5407_v17  ;;  %1554 = vmatpush.bf16.msra.mxu0 %v5407_v17  ;;  %v344_v25 = vmul.f32 %v5885_v14, %v343_v21  ;;  %v5583_v21 = vld [vmem:[%s5990_s9] sm:$0xff]  }
  0x26   : > { %v5584_v29 = vunpack.c.l.bf16 %v5583_v21 }
  0x27   : > { %v348_v31 = vsel %vm5995_vm2, %v5885_v14, %v344_v25  ;;  %v5435_v14 = vld [vmem:[%s7088_s5 + $0xa8] sm:$0xff] }
  0x28   : > { %5872 = vmatpush.bf16.msra.mxu1 %v5406_v20  ;;  %5873 = vmatpush.bf16.msra.mxu2 %v5406_v20  ;;  %v350_v34 = vmul.f32 %v349_v23, %v348_v31  ;;  %v5434_v23 = vld [vmem:[%s7088_s5 + $0xa0] sm:$0xff] }
  0x29   : > { %5874 = vmatpush.bf16.msra.mxu3 %v5406_v20  ;;  %1555 = vmatpush.bf16.msra.mxu0 %v5406_v20  ;;  %v5633_v20 = vunpack.c.h.bf16 %v5817_v8  ;;  %v5386_v31 = vld [vmem:[%s7088_s5 + $0x20] sm:$0xff]  ;;  %v5385_v8 = vld [vmem:[%s7088_s5 + $0x18] sm:$0xff] }
  0x2a   : > { %v352_v45 = vmul.f32 %v350_v34, %v5959_v3  ;;  %v6030_v46 = vperm.slane %v350_v34, 0 }
  0x2c   : > { %2063 = vmatpush.bf16.msrb.mxu2 %v5437_v27  ;;  %1781 = vmatpush.bf16.msrb.mxu1 %v5389_v30  ;;  %v353_v50 = vsub.f32 %v351_v39, %v352_v45  ;;  %v427_v51 = vmul.f32 %v5596_v35, %v6030_v46  ;;  %v428_v52 = vmul.f32 %v5597_v36, %v6030_v46  ;;  %v5483_v30 = vld [vmem:[%s7088_s5 + $0x128] sm:$0xff]  ;;  %v5585_v35 = vunpack.c.h.bf16 %v5583_v21 }
  0x2d   : > { %2377 = vmatpush.bf16.msrb.mxu3 %v5461_v28  ;;  %2691 = vmatpush.bf16.msrb.mxu0 %v5485_v33  ;;  %v435_v53 = vmul.f32 %v5612_v37, %v6030_v46  ;;  %v436_v54 = vmul.f32 %v5613_v40, %v6030_v46  ;;  %v443_v55 = vmul.f32 %v5628_v41, %v6030_v46  ;;  %v5458_v28 = vld [vmem:[%s7088_s5 + $0xe0] sm:$0xff] }
  0x2e   : > { %1556 = vmatmul.bf16.vlgmr.msra.gmra.mxu0 %v5390_v32  ;;  %v444_v56 = vmul.f32 %v5629_v42, %v6030_v46  ;;  %v6041_v57 = vperm.slane %v353_v50, 0  ;;  %v429_v58 = vmul.f32 %v5600_v48, %v6030_v46  ;;  %v430_v59 = vmul.f32 %v5601_v49, %v6030_v46 }
  0x2f   : > { %v437_v26 = vmul.f32 %v5616_v7, %v6030_v46  ;;  %v438_v27 = vmul.f32 %v5617_v12, %v6030_v46  ;;  %v445_v33 = vmul.f32 %v5632_v19, %v6030_v46  ;;  %v446_v34 = vmul.f32 %v5633_v20, %v6030_v46  ;;  %v5481_v12 = vld [vmem:[%s7088_s5 + $0x118] sm:$0xff]  ;;  %v5806_v20 = vld [vmem:[%s5990_s9 + $0x8] sm:$0xff]  }
  0x30   : > { %2064 = vmatpush.bf16.msrb.mxu2 %v5436_v43  ;;  %1782 = vmatpush.bf16.msrb.mxu1 %v5388_v47  ;;  %v462_v60 = vadd.f32 %v6041_v57, %v427_v51  ;;  %v463_v61 = vadd.f32 %v6041_v57, %v428_v52  ;;  %v470_v62 = vadd.f32 %v6041_v57, %v435_v53  ;;  %v5810_v53 = vld [vmem:[%s5990_s9 + $0x28] sm:$0xff]  }
  0x31   : > { %2378 = vmatpush.bf16.msrb.mxu3 %v5460_v44  ;;  %v471_v63 = vadd.f32 %v6041_v57, %v436_v54  ;;  %v478_v1 = vadd.f32 %v6041_v57, %v443_v55  ;;  %v479_v2 = vadd.f32 %v6041_v57, %v444_v56  ;;  %v464_v10 = vadd.f32 %v6041_v57, %v429_v58 }
  0x32   : > { %v6052_v3 = vmax.f32 %v462_v60, 0.0  ;;  %v6054_v4 = vmax.f32 %v463_v61, 0.0  ;;  %v6056_v5 = vmax.f32 %v470_v62, 0.0  ;;  %v465_v11 = vadd.f32 %v6041_v57, %v430_v59  ;;  %2692 = vmatpush.bf16.msrb.mxu0 %v5484_v16  ;;  %v5433_v61 = vld [vmem:[%s7088_s5 + $0x98] sm:$0xff]  ;;  %v5814_v62 = vld [vmem:[%s5990_s9 + $0x48] sm:$0xff]  }
  0x33   : > { %v6058_v6 = vmax.f32 %v471_v63, 0.0  ;;  %v6076_v17 = vmax.f32 %v478_v1, 0.0  ;;  %v6078_v18 = vmax.f32 %v479_v2, 0.0  ;;  %v6087_v24 = vmax.f32 %v464_v10, 0.0  ;;  %v5818_v63 = vld [vmem:[%s5990_s9 + $0x68] sm:$0xff]   ;;  %v5482_v1 = vld [vmem:[%s7088_s5 + $0x120] sm:$0xff] }
  0x34   : > { %v5664_v9 = vpack.c.bf16 %v6054_v4, %v6052_v3  ;;  %2065 = vmatpush.bf16.msrb.mxu2 %v5435_v14  ;;  %v6089_v25 = vmax.f32 %v465_v11, 0.0  ;;  %1783 = vmatpush.bf16.msrb.mxu1 %v5387_v22  ;;  %v472_v37 = vadd.f32 %v6041_v57, %v437_v26  ;;  %v473_v38 = vadd.f32 %v6041_v57, %v438_v27  ;;  %v5456_v11 = vld [vmem:[%s7088_s5 + $0xd0] sm:$0xff] }
  0x35   : > { %v5684_v13 = vpack.c.bf16 %v6058_v6, %v6056_v5  ;;  %2379 = vmatpush.bf16.msrb.mxu3 %v5459_v15  ;;  %v5704_v32 = vpack.c.bf16 %v6078_v18, %v6076_v17  ;;  %v421_v40 = vmul.f32 %v5584_v29, %v6030_v46  ;;  %v480_v44 = vadd.f32 %v6041_v57, %v445_v33 }
  0x36   : > { %5823 = vst [vmem:[#allocation2 + $0xb0] sm:$0xff] %v5664_v9   ;;  %v5669_v36 = vpack.c.bf16 %v6089_v25, %v6087_v24  ;;  %2693 = vmatpush.bf16.msrb.mxu0 %v5483_v30  ;;  %v6111_v42 = vmax.f32 %v472_v37, 0.0  ;;  %v6113_v43 = vmax.f32 %v473_v38, 0.0  ;;  %v481_v45 = vadd.f32 %v6041_v57, %v446_v34  ;;  %v5432_v9 = vld [vmem:[%s7088_s5 + $0x90] sm:$0xff] }
  0x37   : > { %5827 = vst [vmem:[#allocation2 + $0xd0] sm:$0xff] %v5684_v13   ;;  %v422_v47 = vmul.f32 %v5585_v35, %v6030_v46  ;;  %v6120_v49 = vmax.f32 %v480_v44, 0.0  ;;  %v456_v51 = vadd.f32 %v6041_v57, %v421_v40  ;;  %v5604_v59 = vunpack.c.l.bf16 %v5810_v53  ;;  %v5384_v30 = vld [vmem:[%s7088_s5 + $0x10] sm:$0xff] }
  0x38   : > { %2066 = vmatpush.bf16.msrb.mxu2 %v5434_v23  ;;  %5831 = vst [vmem:[#allocation2 + $0xf0] sm:$0xff] %v5704_v32   ;;  %1784 = vmatpush.bf16.msrb.mxu1 %v5386_v31  ;;  %v5689_v48 = vpack.c.bf16 %v6113_v43, %v6111_v42  ;;  %v6122_v50 = vmax.f32 %v481_v45, 0.0  ;;  %v5605_v60 = vunpack.c.h.bf16 %v5810_v53  ;;  %v5620_v15 = vunpack.c.l.bf16 %v5814_v62 }
  0x39   : > { %2380 = vmatpush.bf16.msrb.mxu3 %v5458_v28  ;;  %5824 = vst [vmem:[#allocation2 + $0xb8] sm:$0xff] %v5669_v36   ;;  %v457_v52 = vadd.f32 %v6041_v57, %v422_v47  ;;  %v6129_v56 = vmax.f32 %v456_v51, 0.0  ;;  %v431_v7 = vmul.f32 %v5604_v59, %v6030_v46  ;;  %v5621_v16 = vunpack.c.h.bf16 %v5814_v62 }
  0x3a   : > { %5828 = vst [vmem:[#allocation2 + $0xd8] sm:$0xff] %v5689_v48   ;;  %v5709_v55 = vpack.c.bf16 %v6122_v50, %v6120_v49  ;;  %v432_v10 = vmul.f32 %v5605_v60, %v6030_v46  ;;  %2694 = vmatpush.bf16.msrb.mxu0 %v5482_v1  ;;  %v5636_v19 = vunpack.c.l.bf16 %v5818_v63  ;;  %v5637_v23 = vunpack.c.h.bf16 %v5818_v63  ;;  %v5811_v60 = vld [vmem:[%s5990_s9 + $0x30] sm:$0xff]  }
  0x3b   : > { %v6131_v58 = vmax.f32 %v457_v52, 0.0  ;;  %v466_v14 = vadd.f32 %v6041_v57, %v431_v7  ;;  %v439_v27 = vmul.f32 %v5620_v15, %v6030_v46  ;;  %v440_v28 = vmul.f32 %v5621_v16, %v6030_v46  ;;  %v5819_v63 = vld [vmem:[%s5990_s9 + $0x70] sm:$0xff]   ;;  %v5455_v7 = vld [vmem:[%s7088_s5 + $0xc8] sm:$0xff] }
  0x3c   : > { %5832 = vst [vmem:[#allocation2 + $0xf8] sm:$0xff] %v5709_v55   ;;  %2067 = vmatpush.bf16.msrb.mxu2 %v5433_v61  ;;  %1785 = vmatpush.bf16.msrb.mxu1 %v5385_v8  ;;  %v467_v22 = vadd.f32 %v6041_v57, %v432_v10  ;;  %v447_v29 = vmul.f32 %v5636_v19, %v6030_v46  ;;  %v5588_v33 = vunpack.c.l.bf16 %v5806_v20  ;;  %v5589_v44 = vunpack.c.h.bf16 %v5806_v20  ;;  %v5431_v55 = vld [vmem:[%s7088_s5 + $0x88] sm:$0xff]  ;;  %v5815_v61 = vld [vmem:[%s5990_s9 + $0x50] sm:$0xff]  }
  0x3d   : > { %v5394_v39 = vld [vmem:[#allocation2 + $0xb0] sm:$0xff]  ;;  %v5649_v2 = vpack.c.bf16 %v6131_v58, %v6129_v56  ;;  %2381 = vmatpush.bf16.msrb.mxu3 %v5457_v0  ;;  %v6163_v26 = vmax.f32 %v466_v14, 0.0  ;;  %v448_v32 = vmul.f32 %v5637_v23, %v6030_v46  ;;  %v474_v34 = vadd.f32 %v6041_v57, %v439_v27  ;;  %v5430_v14 = vld [vmem:[%s7088_s5 + $0x80] sm:$0xff] }
  0x3e   : > { %v5398_v41 = vld [vmem:[#allocation2 + $0xd0] sm:$0xff]  ;;  %1576 = vmatmul.bf16.vlgmr.msra.gmra.mxu1 %v5394_v39  ;;  %v6171_v31 = vmax.f32 %v467_v22, 0.0  ;;  %2695 = vmatpush.bf16.msrb.mxu0 %v5481_v12  ;;  %v475_v35 = vadd.f32 %v6041_v57, %v440_v28  ;;  %v482_v36 = vadd.f32 %v6041_v57, %v447_v29  ;;  %v423_v51 = vmul.f32 %v5588_v33, %v6030_v46  ;;  %v5454_v22 = vld [vmem:[%s7088_s5 + $0xc0] sm:$0xff]  ;;  %v5479_v29 = vld [vmem:[%s7088_s5 + $0x108] sm:$0xff] }
  0x3f   : > { %1596 = vmatmul.bf16.vlgmr.msra.gmra.mxu2 %v5398_v41  ;;  %v5402_v54 = vld [vmem:[#allocation2 + $0xf0] sm:$0xff]  ;;  %5650 = vst [vmem:[#allocation2 + $0x98] sm:$0xff] %v5649_v2   ;;  %v483_v38 = vadd.f32 %v6041_v57, %v448_v32  ;;  %v6180_v40 = vmax.f32 %v474_v34, 0.0  ;;  %v5608_v1 = vunpack.c.l.bf16 %v5811_v60  ;;  %v5609_v2 = vunpack.c.h.bf16 %v5811_v60 }
  0x40   : > { %1616 = vmatmul.bf16.vlgmr.msra.gmra.mxu3 %v5402_v54  ;;  %v5395_v13 = vld [vmem:[#allocation2 + $0xb8] sm:$0xff]  ;;  %2068 = vmatpush.bf16.msrb.mxu2 %v5432_v9  ;;  %v5674_v37 = vpack.c.bf16 %v6171_v31, %v6163_v26  ;;  %v6182_v41 = vmax.f32 %v475_v35, 0.0  ;;  %v6184_v47 = vmax.f32 %v482_v36, 0.0  ;;  %v424_v54 = vmul.f32 %v5589_v44, %v6030_v46  ;;  %v5480_v8 = vld [vmem:[%s7088_s5 + $0x110] sm:$0xff]  ;;  %v5383_v9 = vld [vmem:[%s7088_s5 + $0x8] sm:$0xff] }
  0x41   : > { %v5399_v21 = vld [vmem:[#allocation2 + $0xd8] sm:$0xff]  ;;  %2382 = vmatpush.bf16.msrb.mxu3 %v5456_v11  ;;  %1786 = vmatpush.bf16.msrb.mxu1 %v5384_v30  ;;  %v6186_v48 = vmax.f32 %v483_v38, 0.0  ;;  %v458_v59 = vadd.f32 %v6041_v57, %v423_v51  ;;  %v5624_v12 = vunpack.c.l.bf16 %v5815_v61  ;;  %v433_v16 = vmul.f32 %v5608_v1, %v6030_v46  ;;  %v5382_v30 = vld [vmem:[%s7088_s5] sm:$0xff] }
  0x42   : > { %5825 = vst [vmem:[#allocation2 + $0xc0] sm:$0xff] %v5674_v37   ;;  %v5694_v52 = vpack.c.bf16 %v6182_v41, %v6180_v40  ;;  %v459_v62 = vadd.f32 %v6041_v57, %v424_v54  ;;  %v434_v19 = vmul.f32 %v5609_v2, %v6030_v46  ;;  %v5640_v20 = vunpack.c.l.bf16 %v5819_v63  ;;  %2696 = vmatpush.bf16.msrb.mxu0 %v5480_v8 }
  0x43   : > { %v5403_v39 = vld [vmem:[#allocation2 + $0xf8] sm:$0xff]  ;;  %v5714_v53 = vpack.c.bf16 %v6186_v48, %v6184_v47  ;;  %v6202_v0 = vmax.f32 %v458_v59, 0.0  ;;  %v441_v27 = vmul.f32 %v5624_v12, %v6030_v46  ;;  %v468_v32 = vadd.f32 %v6041_v57, %v433_v16  ;;  %v5807_v59 = vld [vmem:[%s5990_s9 + $0x10] sm:$0xff]  }
  0x44   : > { %5829 = vst [vmem:[#allocation2 + $0xe0] sm:$0xff] %v5694_v52   ;;  %2069 = vmatpush.bf16.msrb.mxu2 %v5431_v55  ;;  %v6213_v11 = vmax.f32 %v459_v62, 0.0  ;;  %v469_v33 = vadd.f32 %v6041_v57, %v434_v19  ;;  %v449_v38 = vmul.f32 %v5640_v20, %v6030_v46  ;;  %v6245_v44 = vpack.c.bf16 %v6129_v56, %v6129_v56 }
  0x45   : > { %5833 = vst [vmem:[#allocation2 + $0x100] sm:$0xff] %v5714_v53   ;;  %2383 = vmatpush.bf16.msrb.mxu3 %v5455_v7  ;;  %1787 = vmatpush.bf16.msrb.mxu1 %v5383_v9  ;;  %v476_v34 = vadd.f32 %v6041_v57, %v441_v27  ;;  %v6237_v36 = vmax.f32 %v468_v32, 0.0  ;;  %v5478_v53 = vld [vmem:[%s7088_s5 + $0x100] sm:$0xff]  ;;  %v6256_v54 = vpack.c.bf16 %v6131_v58, %v6131_v58  ;;  %v5533_v58 = vld [vmem:[%s7088_s5 + $0x1b8] sm:$0xff]  ;;  %v5593_v9 = vunpack.c.h.bf16 %v5807_v59 }
  0x46   : > { %v5391_v45 = vld [vmem:[#allocation2 + $0x98] sm:$0xff]  ;;  %v5654_v23 = vpack.c.bf16 %v6213_v11, %v6202_v0  ;;  %v6239_v37 = vmax.f32 %v469_v33, 0.0  ;;  %2697 = vmatpush.bf16.msrb.mxu0 %v5479_v29  ;;  %v484_v56 = vadd.f32 %v6041_v57, %v449_v38  ;;  %v612_v62 = vshrl.u32 %v6245_v44, 16 }
  0x47   : > { %1561 = vmatmul.bf16.gmra.mxu0 %v5391_v45  ;;  %v6247_v51 = vmax.f32 %v476_v34, 0.0  ;;  %v620_v1 = vshrl.u32 %v6256_v54, 16  ;;  %v623_v12 = vshll.u32 %v6256_v54, 16  ;;  %v6283_v19 = vpack.c.bf16 %v6202_v0, %v6202_v0  ;;  %v5509_v0 = vld [vmem:[%s7088_s5 + $0x178] sm:$0xff] }
  0x48   : > { %2070 = vmatpush.bf16.msrb.mxu2 %v5430_v14  ;;  %5821 = vst [vmem:[#allocation2 + $0xa0] sm:$0xff] %v5654_v23   ;;  %v5679_v55 = vpack.c.bf16 %v6239_v37, %v6237_v36  ;;  %v6270_v7 = vmax.f32 %v484_v56, 0.0  ;;  %v426_v14 = vmul.f32 %v5593_v9, %v6030_v46  ;;  %v6287_v20 = vpack.c.bf16 %v6213_v11, %v6213_v11  ;;  %v5581_v32 = vld [vmem:[%s7088_s5 + $0x238] sm:$0xff] }
  0x49   : > { %v5396_v10 = vld [vmem:[#allocation2 + $0xc0] sm:$0xff]  ;;  %2384 = vmatpush.bf16.msrb.mxu3 %v5454_v22  ;;  %1788 = vmatpush.bf16.msrb.mxu1 %v5382_v30  ;;  %v622_v16 = vrot.slane %v620_v1, 7  ;;  %v5557_v22 = vld [vmem:[%s7088_s5 + $0x1f8] sm:$0xff]  ;;  %v615_v11 = vshll.u32 %v6245_v44, 16  ;;  %v1072_v33 = vrot.slane %v620_v1, 4 }
  0x4a   : > { %5826 = vst [vmem:[#allocation2 + $0xc8] sm:$0xff] %v5679_v55   ;;  %2698 = vmatpush.bf16.msrb.mxu0 %v5478_v53  ;;  %v631_v53 = vshll.u32 %v6283_v19, 16  ;;  %v636_v56 = vshrl.u32 %v6287_v20, 16  ;;  %v5526_v30 = vld [vmem:[%s7088_s5 + $0x180] sm:$0xff] }
  0x4b   : > { %v5400_v15 = vld [vmem:[#allocation2 + $0xe0] sm:$0xff]  ;;  %v625_v55 = vor.u32 %v623_v12, %v622_v16 }
  0x4c   : > { %v5404_v45 = vld [vmem:[#allocation2 + $0x100] sm:$0xff]  ;;  %3320 = vmatpush.bf16.msra.mxu2 %v5533_v58  ;;  %v1081_v9 = vrot.slane %v636_v56, 4 }
  0x4d   : > { %3635 = vmatpush.bf16.msra.mxu3 %v5557_v22  ;;  %3005 = vmatpush.bf16.msra.mxu1 %v5509_v0  ;;  %v1070_v22 = vrot.slane %v623_v12, 5  ;;  %v1018_v0 = vld [vmem:[#allocation2 + $0x134] sm:$0x8] }
  0x4e   : > { %1581 = vmatmul.bf16.gmra.mxu1 %v5395_v13  ;;  %v5625_v13 = vunpack.c.h.bf16 %v5815_v61  ;;  %3950 = vmatpush.bf16.msra.mxu0 %v5581_v32 }
  0x4f   : > { %1601 = vmatmul.bf16.gmra.mxu2 %v5399_v21  ;;  %v5641_v21 = vunpack.c.h.bf16 %v5819_v63  ;;  %v5592_v63 = vunpack.c.l.bf16 %v5807_v59  ;;  %v5392_v2 = vld [vmem:[#allocation2 + $0xa0] sm:$0xff]  ;;  %v1073_v32 = vor.u32 %v1072_v33, %v1070_v22 }
  0x50   : > { %1621 = vmatmul.bf16.gmra.mxu3 %v5403_v39  ;;  %v442_v28 = vmul.f32 %v5625_v13, %v6030_v46 }
  0x51   : > { %v450_v39 = vmul.f32 %v5641_v21, %v6030_v46  ;;  %v425_v13 = vmul.f32 %v5592_v63, %v6030_v46  ;;  %v561_v21 = vld [vmem:[#allocation2 + $0x8] sm:$0x1]  ;;  %v564_v63 = vld [vmem:[#allocation2 + $0x10] sm:$0x1] }
  0x52   : > { %v477_v35 = vadd.f32 %v6041_v57, %v442_v28  ;;  %v5397_v23 = vld [vmem:[#allocation2 + $0xc8] sm:$0xff]  ;;  %v461_v28 = vadd.f32 %v6041_v57, %v426_v14  ;;  %v562_v38 = vsel %vm6299_vm6, 0, %v561_v21  ;;  %v1067_v21 = vrot.slane %v615_v11, 5 }
  0x53   : > { %v485_v61 = vadd.f32 %v6041_v57, %v450_v39  ;;  %v460_v27 = vadd.f32 %v6041_v57, %v425_v13  ;;  %563 = vst [vmem:[#allocation2 + $0x8] sm:$0x1] %v562_v38 }
  0x54   : > { %v6249_v52 = vmax.f32 %v477_v35, 0.0  ;;  %v493_v35 = vmax.f32 %v461_v28, 0.0  ;;  %v638_v28 = vrot.slane %v636_v56, 7  ;;  %v1074_v56 = vrot.slane %v1073_v32, 4  ;;  %v5366_v32 = vld [vmem:[#allocation2] sm:$0xff] }
  0x55   : > { %v6272_v8 = vmax.f32 %v485_v61, 0.0  ;;  %v492_v34 = vmax.f32 %v460_v27, 0.0  ;;  %v1015_v61 = vld [vmem:[#allocation2 + $0x12c] sm:$0x8] }
  0x56   : > { %v5699_v60 = vpack.c.bf16 %v6249_v52, %v6247_v51  ;;  %v6324_v14 = vpack.c.bf16 %v493_v35, %v493_v35  ;;  %v1016_v16 = vsel %vm6320_vm12, 0, %v1015_v61 }
  0x57   : > { %1566 = vmatmul.bf16.gmra.mxu0 %v5392_v2  ;;  %v6315_v59 = vpack.c.bf16 %v492_v34, %v492_v34  ;;  %v639_v2 = vshll.u32 %v6287_v20, 16  ;;  %1017 = vst [vmem:[#allocation2 + $0x12c] sm:$0x8] %v1016_v16  ;;  %v1076_v16 = vrot.slane %v631_v53, 5 }
  0x58   : > { %5830 = vst [vmem:[#allocation2 + $0xe8] sm:$0xff] %v5699_v60   ;;  %v5659_v60 = vpack.c.bf16 %v493_v35, %v492_v34  ;;  %v1019_v34 = vsel %vm6320_vm12, 0, %v1018_v0  ;;  %v567_v35 = vld [vmem:[#allocation2 + $0x18] sm:$0x1] }
  0x59   : > { %v647_v44 = vshll.u32 %v6315_v59, 16  ;;  %1020 = vst [vmem:[#allocation2 + $0x134] sm:$0x8] %v1019_v34  ;;  %v568_v61 = vsel %vm6299_vm6, 0, %v567_v35 }
  0x5a   : > { %5822 = vst [vmem:[#allocation2 + $0xa8] sm:$0xff] %v5659_v60  }
  0x5b   : > { %569 = vst [vmem:[#allocation2 + $0x18] sm:$0x1] %v568_v61 }
  0x5e   : > { %1586 = vmatmul.bf16.gmra.mxu1 %v5396_v10  ;;  %v5719_v10 = vpack.c.bf16 %v6272_v8, %v6270_v7 }
  0x5f   : > { %1606 = vmatmul.bf16.gmra.mxu2 %v5400_v15  ;;  %v614_v15 = vrot.slane %v612_v62, 7  ;;  %v5401_v29 = vld [vmem:[#allocation2 + $0xe8] sm:$0xff] }
  0x60   : > { %1626 = vmatmul.bf16.gmra.mxu3 %v5404_v45  ;;  %5834 = vst [vmem:[#allocation2 + $0x108] sm:$0xff] %v5719_v10   ;;  %v628_v45 = vshrl.u32 %v6283_v19, 16  ;;  %v644_v19 = vshrl.u32 %v6315_v59, 16 }
  0x61   : > { %v618_v54 = vrot.slane %v614_v15, 4  ;;  %v617_v1 = vor.u32 %v615_v11, %v614_v15  ;;  %v1066_v15 = vrot.slane %v612_v62, 4  ;;  %v902_v62 = vld [vmem:[#allocation2 + $0x8] sm:$0xf]  ;;  %v652_v11 = vshrl.u32 %v6324_v14, 16 }
  0x62   : > { %v630_v27 = vrot.slane %v628_v45, 7 }
  0x63   : > { %v626_v58 = vsel %vm6308_vm7, %v618_v54, %v625_v55  ;;  %v903_v12 = vsel %vm6333_vm15, %v617_v1, %v902_v62  ;;  %v641_v55 = vor.u32 %v639_v2, %v638_v28  ;;  %v646_v62 = vrot.slane %v644_v19, 7 }
  0x64   : > { %905 = vst [vmem:[#allocation2 + $0xc] sm:$0xf] %v626_v58  ;;  %v634_v54 = vrot.slane %v630_v27, 4  ;;  %v633_v60 = vor.u32 %v631_v53, %v630_v27  ;;  %v1244_v27 = vld [vmem:[#allocation2 + $0x12c] sm:$0xf] }
  0x65   : > { %904 = vst [vmem:[#allocation2 + $0x8] sm:$0xf] %v903_v12  ;;  %v649_v35 = vor.u32 %v647_v44, %v646_v62  ;;  %v650_v12 = vrot.slane %v646_v62, 4  ;;  %v5462_v62 = vld [vmem:[#allocation2 + $0x98] sm:$0xff] }
  0x66   : > { %v642_v1 = vsel %vm6308_vm7, %v634_v54, %v641_v55 }
  0x67   : > { %v5405_v10 = vld [vmem:[#allocation2 + $0x108] sm:$0xff]  ;;  %909 = vst [vmem:[#allocation2 + $0x14] sm:$0xf] %v642_v1 }
  0x6c   : > { %v5438_v1 = vld [vmem:[#allocation2 + $0x8] sm:$0xff] }
  0x6e   : > { %1591 = vmatmul.bf16.gmra.mxu1 %v5397_v23  ;;  %v565_v23 = vsel %vm6299_vm6, 0, %v564_v63  ;;  %v5393_v63 = vld [vmem:[#allocation2 + $0xa8] sm:$0xff] }
  0x6f   : > { %1611 = vmatmul.bf16.gmra.mxu2 %v5401_v29  ;;  %566 = vst [vmem:[#allocation2 + $0x10] sm:$0x1] %v565_v23  ;;  %v1068_v29 = vor.u32 %v1067_v21, %v1066_v15  ;;  %v1079_v15 = vrot.slane %v639_v2, 5  ;;  %v655_v21 = vshll.u32 %v6324_v14, 16  ;;  %1571 = vmatmul.bf16.gmra.mxu0 %v5393_v63  ;;  %v5414_v2 = vld [vmem:[#allocation2 + $0x120] sm:$0xff]  ;;  %v6382_v63 = vpack.c.bf16 %v6052_v3, %v6052_v3 }
  0x70   : > { %1631 = vmatmul.bf16.gmra.mxu3 %v5405_v10  ;;  %v1075_v10 = vrot.slane %v628_v45, 4  ;;  %v1245_v45 = vsel %vm6355_vm1, %v1074_v56, %v1244_v27  ;;  %v570_v3 = vld [vmem:[#allocation2 + $0x20] sm:$0x1] }
  0x71   : > { %v1069_v33 = vrot.slane %v1068_v29, 4  ;;  %v1082_v0 = vor.u32 %v1081_v9, %v1079_v15  ;;  %v654_v29 = vrot.slane %v652_v11, 7  ;;  %1246 = vst [vmem:[#allocation2 + $0x12c] sm:$0xf] %v1245_v45  ;;  %v1248_v9 = vld [vmem:[#allocation2 + $0x134] sm:$0xf] }
  0x72   : > { %v1077_v28 = vor.u32 %v1076_v16, %v1075_v10  ;;  %v6386_v10 = vpack.c.bf16 %v6054_v4, %v6054_v4  ;;  %v1021_v16 = vld [vmem:[#allocation2 + $0x13c] sm:$0x8]  ;;  %v571_v4 = vsel %vm6299_vm6, 0, %v570_v3  ;;  %v1085_v45 = vrot.slane %v647_v44, 5  ;;  %v1024_v3 = vld [vmem:[#allocation2 + $0x144] sm:$0x8] }
  0x73   : > { %v1071_v23 = vsel %vm6347_vm0, %v1069_v33, %v1070_v22  ;;  %v1083_v34 = vrot.slane %v1082_v0, 4  ;;  %v657_v54 = vor.u32 %v655_v21, %v654_v29  ;;  %v1022_v27 = vsel %vm6320_vm12, 0, %v1021_v16  ;;  %572 = vst [vmem:[#allocation2 + $0x20] sm:$0x1] %v571_v4 }
  0x74   : > { %1242 = vst [vmem:[#allocation2 + $0x128] sm:$0xf] %v1071_v23  ;;  %v1078_v22 = vrot.slane %v1077_v28, 4  ;;  %v5532_v23 = vld [vmem:[%s7088_s5 + $0x1b0] sm:$0xff]  ;;  %v668_v28 = vshrl.u32 %v6386_v10, 16  ;;  %v1090_v0 = vrot.slane %v652_v11, 4 }
  0x75   : > { %v1249_v33 = vsel %vm6355_vm1, %v1083_v34, %v1248_v9  ;;  %v658_v56 = vsel %vm6308_vm7, %v650_v12, %v657_v54  ;;  %1023 = vst [vmem:[#allocation2 + $0x13c] sm:$0x8] %v1022_v27  ;;  %3321 = vmatpush.bf16.msra.mxu2 %v5532_v23  ;;  %v663_v29 = vshll.u32 %v6382_v63, 16  ;;  %v5556_v11 = vld [vmem:[%s7088_s5 + $0x1f0] sm:$0xff]  ;;  %v528_v23 = vpack.c.bf16 %v6087_v24, %v6087_v24 }
  0x76   : > { %v906_v53 = vld [vmem:[#allocation2 + $0x10] sm:$0xf]  ;;  %v1080_v55 = vsel %vm6347_vm0, %v1078_v22, %v1079_v15  ;;  %1250 = vst [vmem:[#allocation2 + $0x134] sm:$0xf] %v1249_v33  ;;  %v660_v15 = vshrl.u32 %v6382_v63, 16  ;;  %v670_v44 = vrot.slane %v668_v28, 7  ;;  %3636 = vmatpush.bf16.msra.mxu3 %v5556_v11  ;;  %v529_v27 = vpack.c.bf16 %v6089_v25, %v6089_v25 }
  0x77   : > { %v907_v14 = vsel %vm6333_vm15, %v633_v60, %v906_v53  ;;  %1247 = vst [vmem:[#allocation2 + $0x130] sm:$0xf] %v1080_v55  ;;  %v910_v60 = vld [vmem:[#allocation2 + $0x18] sm:$0xf]  ;;  %v1088_v53 = vrot.slane %v655_v21, 5  ;;  %v5580_v22 = vld [vmem:[%s7088_s5 + $0x230] sm:$0xff] }
  0x78   : > { %908 = vst [vmem:[#allocation2 + $0x10] sm:$0xf] %v907_v14  ;;  %v911_v61 = vsel %vm6333_vm15, %v649_v35, %v910_v60  ;;  %v5508_v14 = vld [vmem:[%s7088_s5 + $0x170] sm:$0xff]  ;;  %v662_v59 = vrot.slane %v660_v15, 7  ;;  %v5367_v21 = vld [vmem:[#allocation2 + $0x8] sm:$0xff]  ;;  %3951 = vmatpush.bf16.msra.mxu0 %v5580_v22  ;;  %v5463_v11 = vld [vmem:[#allocation2 + $0xa0] sm:$0xff] }
  0x79   : > { %912 = vst [vmem:[#allocation2 + $0x18] sm:$0xf] %v911_v61  ;;  %v1091_v34 = vor.u32 %v1090_v0, %v1088_v53  ;;  %3006 = vmatpush.bf16.msra.mxu1 %v5508_v14  ;;  %v573_v0 = vld [vmem:[#allocation2 + $0x28] sm:$0x1]  ;;  %v679_v24 = vshll.u32 %v528_v23, 16  ;;  %v1093_v14 = vrot.slane %v660_v15, 4 }
  0x7a   : > { %913 = vst [vmem:[#allocation2 + $0x1c] sm:$0xf] %v658_v56  ;;  %v665_v54 = vor.u32 %v663_v29, %v662_v59  ;;  %v666_v55 = vrot.slane %v662_v59, 4  ;;  %v914_v63 = vld [vmem:[#allocation2 + $0x20] sm:$0xf]  ;;  %v574_v4 = vsel %vm6299_vm6, 0, %v573_v0 }
  0x7b   : > { %v5415_v35 = vld [vmem:[#allocation2 + $0x128] sm:$0xff]  ;;  %v1092_v12 = vrot.slane %v1091_v34, 4  ;;  %575 = vst [vmem:[#allocation2 + $0x28] sm:$0x1] %v574_v4  ;;  %v1094_v22 = vrot.slane %v663_v29, 5 }
  0x7c   : > { %v1252_v33 = vld [vmem:[#allocation2 + $0x13c] sm:$0xf]  ;;  %v5464_v4 = vld [vmem:[#allocation2 + $0xa8] sm:$0xff] }
  0x7d   : > { %v1253_v61 = vsel %vm6355_vm1, %v1092_v12, %v1252_v33  ;;  %v1095_v34 = vor.u32 %v1094_v22, %v1093_v14  ;;  %v1103_v14 = vrot.slane %v679_v24, 5 }
  0x7e   : > { %1789 = vmatmul.bf16.vlgmr.msrb.gmra.mxu1 %v5366_v32  ;;  %v1084_v32 = vrot.slane %v644_v19, 4  ;;  %1254 = vst [vmem:[#allocation2 + $0x13c] sm:$0xf] %v1253_v61 }
  0x7f   : > { %2071 = vmatmul.bf16.vlgmr.msrb.gmra.mxu2 %v5414_v2  ;;  %v671_v2 = vshll.u32 %v6386_v10, 16  ;;  %2699 = vmatmul.bf16.vlgmr.msrb.gmra.mxu0 %v5462_v62  ;;  %v915_v10 = vsel %vm6333_vm15, %v665_v54, %v914_v63  ;;  %v5439_v16 = vld [vmem:[#allocation2 + $0x10] sm:$0xff]  ;;  %v1025_v62 = vsel %vm6320_vm12, 0, %v1024_v3  ;;  %v1096_v12 = vrot.slane %v1095_v34, 4  ;;  %v5507_v34 = vld [vmem:[%s7088_s5 + $0x168] sm:$0xff] }
  0x80   : > { %2385 = vmatmul.bf16.vlgmr.msrb.gmra.mxu3 %v5438_v1  ;;  %v1086_v19 = vor.u32 %v1085_v45, %v1084_v32  ;;  %916 = vst [vmem:[#allocation2 + $0x20] sm:$0xf] %v915_v10  ;;  %v1099_v32 = vrot.slane %v668_v28, 4  ;;  %v676_v45 = vshrl.u32 %v528_v23, 16  ;;  %v6442_v10 = vpack.c.bf16 %v6171_v31, %v6171_v31  ;;  %v576_v23 = vld [vmem:[#allocation2 + $0x30] sm:$0x1]  ;;  %3007 = vmatpush.bf16.msra.mxu1 %v5507_v34 }
  0x81   : > { %v673_v56 = vor.u32 %v671_v2, %v670_v44  ;;  %1026 = vst [vmem:[#allocation2 + $0x144] sm:$0x8] %v1025_v62  ;;  %v1097_v25 = vrot.slane %v671_v2, 5  ;;  %v5440_v63 = vld [vmem:[#allocation2 + $0x18] sm:$0xff]  ;;  %v577_v0 = vsel %vm6299_vm6, 0, %v576_v23 }
  0x82   : > { %v1087_v9 = vrot.slane %v1086_v19, 4  ;;  %v687_v19 = vshll.u32 %v529_v27, 16  ;;  %v678_v44 = vrot.slane %v676_v45, 7  ;;  %v918_v29 = vld [vmem:[#allocation2 + $0x28] sm:$0xf]  ;;  %v700_v31 = vshrl.u32 %v6442_v10, 16 }
  0x83   : > { %v674_v1 = vsel %vm6308_vm7, %v666_v55, %v673_v56  ;;  %v1100_v59 = vor.u32 %v1099_v32, %v1097_v25  ;;  %578 = vst [vmem:[#allocation2 + $0x30] sm:$0x1] %v577_v0 }
  0x84   : > { %v1089_v60 = vsel %vm6347_vm0, %v1087_v9, %v1088_v53  ;;  %917 = vst [vmem:[#allocation2 + $0x24] sm:$0xf] %v674_v1  ;;  %v684_v53 = vshrl.u32 %v529_v27, 16  ;;  %v5416_v9 = vld [vmem:[#allocation2 + $0x130] sm:$0xff]  ;;  %v681_v28 = vor.u32 %v679_v24, %v678_v44  ;;  %v682_v55 = vrot.slane %v678_v44, 4  ;;  %v5531_v27 = vld [vmem:[%s7088_s5 + $0x1a8] sm:$0xff] }
  0x85   : > { %1251 = vst [vmem:[#allocation2 + $0x138] sm:$0xf] %v1089_v60  ;;  %v1101_v54 = vrot.slane %v1100_v59, 4  ;;  %v1098_v60 = vsel %vm6347_vm0, %v1096_v12, %v1097_v25  ;;  %v6438_v1 = vpack.c.bf16 %v6163_v26, %v6163_v26  ;;  %3322 = vmatpush.bf16.msra.mxu2 %v5531_v27  ;;  %v1106_v22 = vrot.slane %v687_v19, 5  ;;  %v5579_v59 = vld [vmem:[%s7088_s5 + $0x228] sm:$0xff] }
  0x86   : > { %1255 = vst [vmem:[#allocation2 + $0x140] sm:$0xf] %v1098_v60  ;;  %v919_v61 = vsel %vm6333_vm15, %v681_v28, %v918_v29  ;;  %v1108_v26 = vrot.slane %v684_v53, 4  ;;  %v703_v25 = vshll.u32 %v6442_v10, 16  ;;  %v702_v24 = vrot.slane %v700_v31, 7  ;;  %3952 = vmatpush.bf16.msra.mxu0 %v5579_v59 }
  0x87   : > { %920 = vst [vmem:[#allocation2 + $0x28] sm:$0xf] %v919_v61  ;;  %v692_v62 = vshrl.u32 %v6438_v1, 16  ;;  %v695_v32 = vshll.u32 %v6438_v1, 16  ;;  %v6478_v1 = vpack.c.bf16 %v6239_v37, %v6239_v37  ;;  %v1030_v10 = vld [vmem:[#allocation2 + $0x154] sm:$0x8] }
  0x88   : > { %v1256_v33 = vld [vmem:[#allocation2 + $0x144] sm:$0xf]  ;;  %v1031_v23 = vsel %vm6320_vm12, 0, %v1030_v10 }
  0x89   : > { %v1257_v15 = vsel %vm6355_vm1, %v1101_v54, %v1256_v33  ;;  %v705_v33 = vor.u32 %v703_v25, %v702_v24  ;;  %1032 = vst [vmem:[#allocation2 + $0x154] sm:$0x8] %v1031_v23 }
  0x8a   : > { %1258 = vst [vmem:[#allocation2 + $0x144] sm:$0xf] %v1257_v15  ;;  %v922_v15 = vld [vmem:[#allocation2 + $0x30] sm:$0xf] }
  0x8b   : > { %v5441_v61 = vld [vmem:[#allocation2 + $0x20] sm:$0xff] }
  0x8e   : > { %1794 = vmatmul.bf16.gmra.mxu1 %v5367_v21  ;;  %v686_v21 = vrot.slane %v684_v53, 7  ;;  %v5555_v53 = vld [vmem:[%s7088_s5 + $0x1e8] sm:$0xff] }
  0x8f   : > { %2076 = vmatmul.bf16.gmra.mxu2 %v5415_v35  ;;  %2704 = vmatmul.bf16.gmra.mxu0 %v5463_v11  ;;  %v5368_v35 = vld [vmem:[#allocation2 + $0x10] sm:$0xff]  ;;  %v1102_v11 = vrot.slane %v676_v45, 4  ;;  %v694_v45 = vrot.slane %v692_v62, 7 }
  0x90   : > { %2390 = vmatmul.bf16.gmra.mxu3 %v5439_v16  ;;  %v689_v56 = vor.u32 %v687_v19, %v686_v21  ;;  %v1027_v16 = vld [vmem:[#allocation2 + $0x14c] sm:$0x8]  ;;  %v1109_v21 = vor.u32 %v1108_v26, %v1106_v22  ;;  %v5369_v19 = vld [vmem:[#allocation2 + $0x18] sm:$0xff]  ;;  %v5465_v26 = vld [vmem:[#allocation2 + $0xb0] sm:$0xff] }
  0x91   : > { %v1028_v3 = vsel %vm6320_vm12, 0, %v1027_v16  ;;  %v1104_v44 = vor.u32 %v1103_v14, %v1102_v11  ;;  %3637 = vmatpush.bf16.msra.mxu3 %v5555_v53  ;;  %v697_v54 = vor.u32 %v695_v32, %v694_v45  ;;  %v698_v28 = vrot.slane %v694_v45, 4  ;;  %v579_v16 = vld [vmem:[#allocation2 + $0x38] sm:$0x1]  ;;  %v5418_v45 = vld [vmem:[#allocation2 + $0x140] sm:$0xff] }
  0x92   : > { %v690_v2 = vsel %vm6308_vm7, %v682_v55, %v689_v56  ;;  %1029 = vst [vmem:[#allocation2 + $0x14c] sm:$0x8] %v1028_v3  ;;  %v1110_v12 = vrot.slane %v1109_v21, 4  ;;  %v580_v27 = vsel %vm6299_vm6, 0, %v579_v16  ;;  %v1117_v3 = vrot.slane %v700_v31, 4  ;;  %v5370_v31 = vld [vmem:[#allocation2 + $0x20] sm:$0xff] }
  0x93   : > { %921 = vst [vmem:[#allocation2 + $0x2c] sm:$0xf] %v690_v2  ;;  %v706_v29 = vsel %vm6308_vm7, %v698_v28, %v705_v33  ;;  %v923_v2 = vsel %vm6333_vm15, %v697_v54, %v922_v15  ;;  %v1112_v11 = vrot.slane %v695_v32, 5  ;;  %v1115_v14 = vrot.slane %v703_v25, 5 }
  0x94   : > { %924 = vst [vmem:[#allocation2 + $0x30] sm:$0xf] %v923_v2  ;;  %v6506_v15 = vpack.c.bf16 %v6058_v6, %v6058_v6 }
  0x95   : > { %925 = vst [vmem:[#allocation2 + $0x34] sm:$0xf] %v706_v29  ;;  %v1118_v34 = vor.u32 %v1117_v3, %v1115_v14 }
  0x96   : > { %581 = vst [vmem:[#allocation2 + $0x38] sm:$0x1] %v580_v27  ;;  %v732_v16 = vshrl.u32 %v6506_v15, 16  ;;  %v5466_v27 = vld [vmem:[#allocation2 + $0xb8] sm:$0xff] }
  0x99   : > { %v1260_v55 = vld [vmem:[#allocation2 + $0x14c] sm:$0xf] }
  0x9a   : > { %v1261_v60 = vsel %vm6355_vm1, %v1110_v12, %v1260_v55 }
  0x9b   : > { %1262 = vst [vmem:[#allocation2 + $0x14c] sm:$0xf] %v1261_v60  ;;  %v6502_v60 = vpack.c.bf16 %v6056_v5, %v6056_v5 }
  0x9d   : > { %v926_v28 = vld [vmem:[#allocation2 + $0x38] sm:$0xf]  ;;  %v724_v6 = vshrl.u32 %v6502_v60, 16 }
  0x9e   : > { %1799 = vmatmul.bf16.gmra.mxu1 %v5368_v35  ;;  %v5417_v35 = vld [vmem:[#allocation2 + $0x138] sm:$0xff] }
  0x9f   : > { %2081 = vmatmul.bf16.gmra.mxu2 %v5416_v9  ;;  %2709 = vmatmul.bf16.gmra.mxu0 %v5464_v4  ;;  %v1105_v9 = vrot.slane %v1104_v44, 4  ;;  %v1111_v4 = vrot.slane %v692_v62, 4  ;;  %v1264_v62 = vld [vmem:[#allocation2 + $0x154] sm:$0xf] }
  0xa0   : > { %2395 = vmatmul.bf16.gmra.mxu3 %v5440_v63  ;;  %v6474_v63 = vpack.c.bf16 %v6237_v36, %v6237_v36  ;;  %v716_v36 = vshrl.u32 %v6478_v1, 16 }
  0xa1   : > { %v1107_v56 = vsel %vm6347_vm0, %v1105_v9, %v1106_v22  ;;  %v719_v22 = vshll.u32 %v6478_v1, 16  ;;  %v1113_v53 = vor.u32 %v1112_v11, %v1111_v4  ;;  %v5530_v1 = vld [vmem:[%s7088_s5 + $0x1a0] sm:$0xff] }
  0xa2   : > { %1259 = vst [vmem:[#allocation2 + $0x148] sm:$0xf] %v1107_v56  ;;  %v708_v0 = vshrl.u32 %v6474_v63, 16  ;;  %v711_v37 = vshll.u32 %v6474_v63, 16  ;;  %v718_v44 = vrot.slane %v716_v36, 7  ;;  %v5442_v56 = vld [vmem:[#allocation2 + $0x28] sm:$0xff]  ;;  %3323 = vmatpush.bf16.msra.mxu2 %v5530_v1 }
  0xa3   : > { %v1114_v24 = vrot.slane %v1113_v53, 4  ;;  %v582_v63 = vld [vmem:[#allocation2 + $0x40] sm:$0x1]  ;;  %v1126_v23 = vrot.slane %v716_v36, 4  ;;  %v1124_v53 = vrot.slane %v719_v22, 5 }
  0xa4   : > { %v710_v59 = vrot.slane %v708_v0, 7  ;;  %v721_v32 = vor.u32 %v719_v22, %v718_v44  ;;  %v583_v10 = vsel %vm6299_vm6, 0, %v582_v63  ;;  %v1120_v11 = vrot.slane %v708_v0, 4  ;;  %v5554_v36 = vld [vmem:[%s7088_s5 + $0x1e0] sm:$0xff]  ;;  %v5371_v0 = vld [vmem:[#allocation2 + $0x28] sm:$0xff] }
  0xa5   : > { %v1116_v25 = vsel %vm6347_vm0, %v1114_v24, %v1115_v14  ;;  %584 = vst [vmem:[#allocation2 + $0x40] sm:$0x1] %v583_v10  ;;  %v1121_v14 = vrot.slane %v711_v37, 5  ;;  %v734_v24 = vrot.slane %v732_v16, 7  ;;  %3638 = vmatpush.bf16.msra.mxu3 %v5554_v36  ;;  %v6554_v63 = vpack.c.bf16 %v6113_v43, %v6113_v43  ;;  %v585_v43 = vld [vmem:[#allocation2 + $0x48] sm:$0x1] }
  0xa6   : > { %v714_v9 = vrot.slane %v710_v59, 4  ;;  %1263 = vst [vmem:[#allocation2 + $0x150] sm:$0xf] %v1116_v25  ;;  %v5578_v25 = vld [vmem:[%s7088_s5 + $0x220] sm:$0xff]  ;;  %v586_v36 = vsel %vm6299_vm6, 0, %v585_v43  ;;  %v6588_v43 = vpack.c.bf16 %v6180_v40, %v6180_v40 }
  0xa7   : > { %v1122_v44 = vor.u32 %v1121_v14, %v1120_v11  ;;  %3953 = vmatpush.bf16.msra.mxu0 %v5578_v25  ;;  %v1036_v14 = vld [vmem:[#allocation2 + $0x164] sm:$0x8]  ;;  %587 = vst [vmem:[#allocation2 + $0x48] sm:$0x1] %v586_v36  ;;  %v6594_v36 = vpack.c.bf16 %v6182_v41, %v6182_v41 }
  0xa8   : > { %v722_v55 = vsel %vm6308_vm7, %v714_v9, %v721_v32 }
  0xa9   : > { %929 = vst [vmem:[#allocation2 + $0x3c] sm:$0xf] %v722_v55  ;;  %v5419_v22 = vld [vmem:[#allocation2 + $0x148] sm:$0xff] }
  0xab   : > { %v6490_v12 = vpop.f32.mrf.mxu0 }
  0xae   : > { %1804 = vmatmul.bf16.gmra.mxu1 %v5369_v19  ;;  %v1119_v19 = vrot.slane %v1118_v34, 4  ;;  %v735_v34 = vshll.u32 %v6506_v15, 16 }
  0xaf   : > { %2086 = vmatmul.bf16.gmra.mxu2 %v5417_v35  ;;  %2714 = vmatmul.bf16.gmra.mxu0 %v5465_v26  ;;  %v713_v35 = vor.u32 %v711_v37, %v710_v59  ;;  %v727_v26 = vshll.u32 %v6502_v60, 16  ;;  %v5506_v59 = vld [vmem:[%s7088_s5 + $0x160] sm:$0xff]  ;;  %v6546_v60 = vpack.c.bf16 %v6111_v42, %v6111_v42  ;;  %v5443_v42 = vld [vmem:[#allocation2 + $0x30] sm:$0xff] }
  0xb0   : > { %2400 = vmatmul.bf16.gmra.mxu3 %v5441_v61  ;;  %v1265_v54 = vsel %vm6355_vm1, %v1119_v19, %v1264_v62  ;;  %v1033_v61 = vld [vmem:[#allocation2 + $0x15c] sm:$0x8]  ;;  %3008 = vmatpush.bf16.msra.mxu1 %v5506_v59  ;;  %v1129_v59 = vrot.slane %v724_v6, 4 }
  0xb1   : > { %v927_v33 = vsel %vm6333_vm15, %v713_v35, %v926_v28  ;;  %1266 = vst [vmem:[#allocation2 + $0x154] sm:$0xf] %v1265_v54  ;;  %v1034_v5 = vsel %vm6320_vm12, 0, %v1033_v61  ;;  %v1123_v35 = vrot.slane %v1122_v44, 4  ;;  %v737_v28 = vor.u32 %v735_v34, %v734_v24 }
  0xb2   : > { %928 = vst [vmem:[#allocation2 + $0x38] sm:$0xf] %v927_v33  ;;  %v740_v10 = vshrl.u32 %v6546_v60, 16  ;;  %v1130_v44 = vrot.slane %v727_v26, 5 }
  0xb3   : > { %1035 = vst [vmem:[#allocation2 + $0x15c] sm:$0x8] %v1034_v5  ;;  %v6521_v3 = vpop.f32.mrf.mxu0  ;;  %v1125_v55 = vsel %vm6347_vm0, %v1123_v35, %v1124_v53  ;;  %v751_v35 = vshll.u32 %v6554_v63, 16 }
  0xb4   : > { %1267 = vst [vmem:[#allocation2 + $0x158] sm:$0xf] %v1125_v55  ;;  %v742_v24 = vrot.slane %v740_v10, 7 }
  0xb8   : > { %v5420_v55 = vld [vmem:[#allocation2 + $0x150] sm:$0xff] }
  0xba   : > { %v1268_v54 = vld [vmem:[#allocation2 + $0x15c] sm:$0xf] }
  0xbb   : > { %v6488_v21 = vpop.f32.mrf.mxu1 }
  0xbe   : > { %1809 = vmatmul.bf16.gmra.mxu1 %v5370_v31  ;;  %v1127_v31 = vor.u32 %v1126_v23, %v1124_v53  ;;  %v1037_v53 = vsel %vm6320_vm12, 0, %v1036_v14  ;;  %v934_v14 = vld [vmem:[#allocation2 + $0x48] sm:$0xf] }
  0xbf   : > { %2091 = vmatmul.bf16.gmra.mxu2 %v5418_v45  ;;  %2719 = vmatmul.bf16.gmra.mxu0 %v5466_v27  ;;  %v726_v45 = vrot.slane %v724_v6, 7  ;;  %v748_v27 = vshrl.u32 %v6554_v63, 16  ;;  %1038 = vst [vmem:[#allocation2 + $0x164] sm:$0x8] %v1037_v53 }
  0xc0   : > { %2405 = vmatmul.bf16.gmra.mxu3 %v5442_v56  ;;  %v1128_v9 = vrot.slane %v1127_v31, 4  ;;  %v930_v56 = vld [vmem:[#allocation2 + $0x40] sm:$0xf]  ;;  %v1135_v31 = vrot.slane %v732_v16, 4  ;;  %v5372_v16 = vld [vmem:[#allocation2 + $0x30] sm:$0xff] }
  0xc1   : > { %v729_v62 = vor.u32 %v727_v26, %v726_v45  ;;  %v730_v32 = vrot.slane %v726_v45, 4  ;;  %v5467_v45 = vld [vmem:[#allocation2 + $0xc0] sm:$0xff] }
  0xc2   : > { %v6508_v29 = vpop.f32.mrf.mxu2  ;;  %v1269_v33 = vsel %vm6355_vm1, %v1128_v9, %v1268_v54 }
  0xc3   : > { %v6510_v2 = vpop.f32.mrf.mxu1  ;;  %v6524_v4 = vpop.f32.mrf.mxu3  ;;  %v738_v15 = vsel %vm6308_vm7, %v730_v32, %v737_v28  ;;  %v931_v61 = vsel %vm6333_vm15, %v729_v62, %v930_v56  ;;  %1270 = vst [vmem:[#allocation2 + $0x15c] sm:$0xf] %v1269_v33  ;;  %v1133_v62 = vrot.slane %v735_v34, 5  ;;  %v1131_v32 = vor.u32 %v1130_v44, %v1129_v59  ;;  %v5444_v44 = vld [vmem:[#allocation2 + $0x38] sm:$0xff] }
  0xc4   : > { %7113 = vst [vmem:[#allocation3_spill] sm:$0xff] %v6524_v4  ;;  %v6558_v5 = vpop.f32.mrf.mxu0 }
  0xc5   : > { %932 = vst [vmem:[#allocation2 + $0x40] sm:$0xf] %v931_v61  ;;  %v1136_v25 = vor.u32 %v1135_v31, %v1133_v62  ;;  %v1132_v33 = vrot.slane %v1131_v32, 4  ;;  %v7093_v31 = vshrl.u32 %v6588_v43, 16 }
  0xc6   : > { %933 = vst [vmem:[#allocation2 + $0x44] sm:$0xf] %v738_v15  ;;  %v1272_v61 = vld [vmem:[#allocation2 + $0x164] sm:$0xf] }
  0xc7   : > { %v1137_v56 = vrot.slane %v1136_v25, 4  ;;  %v1134_v34 = vsel %vm6347_vm0, %v1132_v33, %v1133_v62  ;;  %v588_v62 = vld [vmem:[#allocation2 + $0x50] sm:$0x1]  ;;  %v5468_v33 = vld [vmem:[#allocation2 + $0xc8] sm:$0xff] }
  0xc8   : > { %1271 = vst [vmem:[#allocation2 + $0x160] sm:$0xf] %v1134_v34  ;;  %v589_v25 = vsel %vm6299_vm6, 0, %v588_v62  ;;  %v767_v34 = vshll.u32 %v6594_v36, 16 }
  0xc9   : > { %v1273_v63 = vsel %vm6355_vm1, %v1137_v56, %v1272_v61  ;;  %v758_v56 = vrot.slane %v7093_v31, 7  ;;  %590 = vst [vmem:[#allocation2 + $0x50] sm:$0x1] %v589_v25 }
  0xca   : > { %v6533_v19 = vpop.f32.mrf.mxu2  ;;  %1274 = vst [vmem:[#allocation2 + $0x164] sm:$0xf] %v1273_v63  ;;  %v5505_v63 = vld [vmem:[%s7088_s5 + $0x158] sm:$0xff] }
  0xcb   : > { %v6535_v37 = vpop.f32.mrf.mxu1  ;;  %v6556_v1 = vpop.f32.mrf.mxu3  ;;  %3009 = vmatpush.bf16.msra.mxu1 %v5505_v63 }
  0xcc   : > { %7114 = vst [vmem:[#allocation4_spill] sm:$0xff] %v6556_v1  ;;  %v6574_v28 = vpop.f32.mrf.mxu0 }
  0xcd   : > { %v5445_v63 = vld [vmem:[#allocation2 + $0x40] sm:$0xff] }
  0xce   : > { %1814 = vmatmul.bf16.gmra.mxu1 %v5371_v0  ;;  %v743_v0 = vshll.u32 %v6546_v60, 16  ;;  %v746_v60 = vrot.slane %v742_v24, 4 }
  0xcf   : > { %2096 = vmatmul.bf16.gmra.mxu2 %v5419_v22  ;;  %v750_v22 = vrot.slane %v748_v27, 7  ;;  %2724 = vmatmul.bf16.gmra.mxu0 %v5467_v45  ;;  %v7092_v45 = vshrl.u32 %v6594_v36, 16 }
  0xd0   : > { %2410 = vmatmul.bf16.gmra.mxu3 %v5443_v42  ;;  %v745_v54 = vor.u32 %v743_v0, %v742_v24 }
  0xd1   : > { %v753_v15 = vor.u32 %v751_v35, %v750_v22  ;;  %v1039_v22 = vld [vmem:[#allocation2 + $0x16c] sm:$0x8]  ;;  %v766_v61 = vrot.slane %v7092_v45, 7 }
  0xd2   : > { %v6561_v23 = vpop.f32.mrf.mxu2  ;;  %v935_v53 = vsel %vm6333_vm15, %v745_v54, %v934_v14  ;;  %v1040_v41 = vsel %vm6320_vm12, 0, %v1039_v22  ;;  %v1138_v54 = vrot.slane %v740_v10, 4  ;;  %v5373_v22 = vld [vmem:[#allocation2 + $0x38] sm:$0xff] }
  0xd3   : > { %v6564_v11 = vpop.f32.mrf.mxu1  ;;  %v6572_v9 = vpop.f32.mrf.mxu3  ;;  %v754_v42 = vsel %vm6308_vm7, %v746_v60, %v753_v15  ;;  %936 = vst [vmem:[#allocation2 + $0x48] sm:$0xf] %v935_v53  ;;  %v759_v60 = vshll.u32 %v6588_v43, 16  ;;  %v5529_v15 = vld [vmem:[%s7088_s5 + $0x198] sm:$0xff] }
  0xd4   : > { %7115 = vst [vmem:[#allocation5_spill] sm:$0xff] %v6572_v9  ;;  %v6604_v32 = vpop.f32.mrf.mxu0  ;;  %3324 = vmatpush.bf16.msra.mxu2 %v5529_v15  ;;  %v769_v15 = vor.u32 %v767_v34, %v766_v61 }
  0xd5   : > { %937 = vst [vmem:[#allocation2 + $0x4c] sm:$0xf] %v754_v42  ;;  %v761_v53 = vor.u32 %v759_v60, %v758_v56 }
  0xd6   : > { %1041 = vst [vmem:[#allocation2 + $0x16c] sm:$0x8] %v1040_v41  ;;  %v5421_v41 = vld [vmem:[#allocation2 + $0x158] sm:$0xff] }
  0xda   : > { %v6576_v6 = vpop.f32.mrf.mxu2 }
  0xdb   : > { %v6578_v26 = vpop.f32.mrf.mxu1  ;;  %v6596_v59 = vpop.f32.mrf.mxu3 }
  0xdc   : > { %7116 = vst [vmem:[#allocation6_spill] sm:$0xff] %v6596_v59  ;;  %v6631_v45 = vpop.f32.mrf.mxu0 }
  0xdd   : > { %v1276_v31 = vld [vmem:[#allocation2 + $0x16c] sm:$0xf] }
  0xde   : > { %1819 = vmatmul.bf16.gmra.mxu1 %v5372_v16  ;;  %v1139_v16 = vrot.slane %v743_v0, 5  ;;  %v5553_v0 = vld [vmem:[%s7088_s5 + $0x1d8] sm:$0xff] }
  0xdf   : > { %2101 = vmatmul.bf16.gmra.mxu2 %v5420_v55  ;;  %v1144_v55 = vrot.slane %v748_v27, 4  ;;  %v1142_v27 = vrot.slane %v751_v35, 5  ;;  %2729 = vmatmul.bf16.gmra.mxu0 %v5468_v33  ;;  %v762_v33 = vrot.slane %v758_v56, 4  ;;  %v5577_v56 = vld [vmem:[%s7088_s5 + $0x218] sm:$0xff] }
  0xe0   : > { %2415 = vmatmul.bf16.gmra.mxu3 %v5444_v44  ;;  %v1140_v42 = vor.u32 %v1139_v16, %v1138_v54  ;;  %3954 = vmatpush.bf16.msra.mxu0 %v5577_v56 }
  0xe1   : > { %v1145_v14 = vor.u32 %v1144_v55, %v1142_v27  ;;  %3639 = vmatpush.bf16.msra.mxu3 %v5553_v0  ;;  %v770_v55 = vsel %vm6308_vm7, %v762_v33, %v769_v15  ;;  %v6641_v0 = vpack.c.bf16 %v6247_v51, %v6247_v51  ;;  %v1148_v33 = vrot.slane %v759_v60, 5 }
  0xe2   : > { %v6599_v40 = vpop.f32.mrf.mxu2  ;;  %v1141_v35 = vrot.slane %v1140_v42, 4  ;;  %941 = vst [vmem:[#allocation2 + $0x54] sm:$0xf] %v770_v55  ;;  %v7120_v15 = vshrl.u32 %v6594_v36, 16 }
  0xe3   : > { %v6602_v24 = vpop.f32.mrf.mxu1  ;;  %v6619_v10 = vpop.f32.mrf.mxu3  ;;  %v1146_v25 = vrot.slane %v1145_v14, 4  ;;  %v7094_v51 = vshrl.u32 %v6641_v0, 16  ;;  %v775_v56 = vshll.u32 %v6641_v0, 16 }
  0xe4   : > { %7117 = vst [vmem:[#allocation7_spill] sm:$0xff] %v6619_v10  ;;  %v1143_v54 = vsel %vm6347_vm0, %v1141_v35, %v1142_v27  ;;  %v938_v10 = vld [vmem:[#allocation2 + $0x50] sm:$0xf]  ;;  %v7119_v35 = vshrl.u32 %v6588_v43, 16  ;;  %v1151_v43 = vrot.slane %v767_v34, 5 }
  0xe5   : > { %v1277_v16 = vsel %vm6355_vm1, %v1146_v25, %v1276_v31  ;;  %1275 = vst [vmem:[#allocation2 + $0x168] sm:$0xf] %v1143_v54  ;;  %v939_v61 = vsel %vm6333_vm15, %v761_v53, %v938_v10  ;;  %v6650_v31 = vpack.c.bf16 %v6249_v52, %v6249_v52  ;;  %v1042_v10 = vld [vmem:[#allocation2 + $0x174] sm:$0x8]  ;;  %v591_v53 = vld [vmem:[#allocation2 + $0x58] sm:$0x1] }
  0xe6   : > { %1278 = vst [vmem:[#allocation2 + $0x16c] sm:$0xf] %v1277_v16  ;;  %v1043_v52 = vsel %vm6320_vm12, 0, %v1042_v10  ;;  %v1147_v25 = vrot.slane %v7119_v35, 4  ;;  %v1153_v54 = vrot.slane %v7120_v15, 4  ;;  %v5469_v16 = vld [vmem:[#allocation2 + $0xd0] sm:$0xff] }
  0xe7   : > { %940 = vst [vmem:[#allocation2 + $0x50] sm:$0xf] %v939_v61  ;;  %v780_v14 = vshrl.u32 %v6650_v31, 16  ;;  %v774_v55 = vrot.slane %v7094_v51, 7  ;;  %v783_v10 = vshll.u32 %v6650_v31, 16  ;;  %v5422_v51 = vld [vmem:[#allocation2 + $0x160] sm:$0xff] }
  0xe8   : > { %1044 = vst [vmem:[#allocation2 + $0x174] sm:$0x8] %v1043_v52  ;;  %v1149_v60 = vor.u32 %v1148_v33, %v1147_v25  ;;  %v1154_v36 = vor.u32 %v1153_v54, %v1151_v43  ;;  %v5374_v52 = vld [vmem:[#allocation2 + $0x40] sm:$0xff]  ;;  %v6686_v54 = vpack.c.bf16 %v6076_v17, %v6076_v17 }
  0xe9   : > { %v777_v35 = vor.u32 %v775_v56, %v774_v55  ;;  %v778_v1 = vrot.slane %v774_v55, 4 }
  0xea   : > { %v6627_v44 = vpop.f32.mrf.mxu2  ;;  %v1150_v59 = vrot.slane %v1149_v60, 4  ;;  %v1155_v9 = vrot.slane %v1154_v36, 4  ;;  %v1045_v36 = vld [vmem:[#allocation2 + $0x17c] sm:$0x8] }
  0xeb   : > { %v6629_v62 = vpop.f32.mrf.mxu1  ;;  %v6652_v27 = vpop.f32.mrf.mxu3 }
  0xec   : > { %7118 = vst [vmem:[#allocation8_spill] sm:$0xff] %v6652_v27  ;;  %v6671_v61 = vpop.f32.mrf.mxu0  ;;  %v1152_v31 = vsel %vm6347_vm0, %v1150_v59, %v1151_v43 }
  0xed   : > { %1279 = vst [vmem:[#allocation2 + $0x170] sm:$0xf] %v1152_v31  ;;  %v1157_v31 = vrot.slane %v775_v56, 5 }
  0xee   : > { %1824 = vmatmul.bf16.gmra.mxu1 %v5373_v22 }
  0xef   : > { %2106 = vmatmul.bf16.gmra.mxu2 %v5421_v41  ;;  %v592_v41 = vsel %vm6299_vm6, 0, %v591_v53  ;;  %2734 = vmatmul.bf16.gmra.mxu0 %v5469_v16 }
  0xf0   : > { %2420 = vmatmul.bf16.gmra.mxu3 %v5445_v63  ;;  %593 = vst [vmem:[#allocation2 + $0x58] sm:$0x1] %v592_v41  ;;  %v782_v63 = vrot.slane %v780_v14, 7  ;;  %v1280_v41 = vld [vmem:[#allocation2 + $0x174] sm:$0xf] }
  0xf1   : > { %v1281_v34 = vsel %vm6355_vm1, %v1155_v9, %v1280_v41  ;;  %v6696_v9 = vpack.c.bf16 %v6078_v18, %v6078_v18  ;;  %v1046_v18 = vsel %vm6320_vm12, 0, %v1045_v36  ;;  %v5504_v36 = vld [vmem:[%s7088_s5 + $0x150] sm:$0xff] }
  0xf2   : > { %v6655_v42 = vpop.f32.mrf.mxu2  ;;  %v785_v4 = vor.u32 %v783_v10, %v782_v63  ;;  %1282 = vst [vmem:[#allocation2 + $0x174] sm:$0xf] %v1281_v34  ;;  %v1162_v34 = vrot.slane %v780_v14, 4  ;;  %3010 = vmatpush.bf16.msra.mxu1 %v5504_v36 }
  0xf3   : > { %v6658_v22 = vpop.f32.mrf.mxu1  ;;  %v6674_v53 = vpop.f32.mrf.mxu3  ;;  %1047 = vst [vmem:[#allocation2 + $0x17c] sm:$0x8] %v1046_v18 }
  0xf4   : > { %7121 = vst [vmem:[#allocation9_spill] sm:$0xff] %v6674_v53  ;;  %v786_v25 = vsel %vm6308_vm7, %v778_v1, %v785_v4  ;;  %v6688_v16 = vpop.f32.mrf.mxu0  ;;  %v5446_v4 = vld [vmem:[#allocation2 + $0x48] sm:$0xff]  ;;  %v7095_v1 = vshrl.u32 %v6686_v54, 16 }
  0xf5   : > { %945 = vst [vmem:[#allocation2 + $0x5c] sm:$0xf] %v786_v25  ;;  %v5470_v25 = vld [vmem:[#allocation2 + $0xd8] sm:$0xff] }
  0xf7   : > { %v942_v33 = vld [vmem:[#allocation2 + $0x58] sm:$0xf] }
  0xf8   : > { %v943_v55 = vsel %vm6333_vm15, %v777_v35, %v942_v33  ;;  %v594_v35 = vld [vmem:[#allocation2 + $0x60] sm:$0x1]  ;;  %v790_v33 = vrot.slane %v7095_v1, 7 }
  0xf9   : > { %944 = vst [vmem:[#allocation2 + $0x58] sm:$0xf] %v943_v55  ;;  %v595_v41 = vsel %vm6299_vm6, 0, %v594_v35  ;;  %v791_v55 = vshll.u32 %v6686_v54, 16 }
  0xfa   : > { %v6676_v15 = vpop.f32.mrf.mxu2  ;;  %596 = vst [vmem:[#allocation2 + $0x60] sm:$0x1] %v595_v41  ;;  %v1284_v53 = vld [vmem:[#allocation2 + $0x17c] sm:$0xf] }
  0xfb   : > { %7122 = vst [vmem:[#allocation10_spill] sm:$0xff] %v6676_v15  ;;  %v1790_v27 = vpop.f32.mrf.mxu1  ;;  %v6692_v63 = vpop.f32.mrf.mxu3  ;;  %v793_v41 = vor.u32 %v791_v55, %v790_v33  ;;  %v7125_v15 = vshll.u32 %v6696_v9, 16 }
  0xfc   : > { %7123 = vst [vmem:[#allocation11_spill] sm:$0xff] %v6692_v63  ;;  %v1791_v17 = vadd.f32 %v1790_v27, %v6490_v12  ;;  %v7124_v12 = vshrl.u32 %v6641_v0, 16 }
  0xfe   : > { %1829 = vmatmul.bf16.gmra.mxu1 %v5374_v52  ;;  %v7096_v52 = vshrl.u32 %v6696_v9, 16  ;;  %v1156_v27 = vrot.slane %v7124_v12, 4  ;;  %v5375_v12 = vld [vmem:[#allocation2 + $0x48] sm:$0xff] }
  0xff   : > { %2111 = vmatmul.bf16.gmra.mxu2 %v5422_v51  ;;  %2739 = vmatmul.bf16.gmra.mxu0 %v5470_v25 }
 0x100   : > { %2425 = vmatmul.bf16.gmra.mxu3 %v5446_v4  ;;  %v2700_v4 = vpop.f32.mrf.mxu0  ;;  %v798_v0 = vrot.slane %v7096_v52, 7  ;;  %v1158_v35 = vor.u32 %v1157_v31, %v1156_v27 }
 0x102   : > { %v2072_v59 = vpop.f32.mrf.mxu2  ;;  %v1159_v25 = vrot.slane %v1158_v35, 4  ;;  %v801_v27 = vor.u32 %v7125_v15, %v798_v0  ;;  %v5447_v0 = vld [vmem:[#allocation2 + $0x50] sm:$0xff] }
 0x103   : > { %v2152_v43 = vadd.f32 %v2072_v59, %v1791_v17  ;;  %v1792_v60 = vpop.f32.mrf.mxu1  ;;  %v2386_v17 = vpop.f32.mrf.mxu3  ;;  %v1160_v59 = vrot.slane %v783_v10, 5 }
 0x104   : > { %v1793_v51 = vadd.f32 %v1792_v60, %v6521_v3  ;;  %v5528_v3 = vld [vmem:[%s7088_s5 + $0x190] sm:$0xff] }
 0x105   : > { %v2466_v56 = vadd.f32 %v2386_v17, %v2152_v43  ;;  %3325 = vmatpush.bf16.msra.mxu2 %v5528_v3  ;;  %v5552_v60 = vld [vmem:[%s7088_s5 + $0x1d0] sm:$0xff]  ;;  %v1163_v18 = vor.u32 %v1162_v34, %v1160_v59  ;;  %v5423_v43 = vld [vmem:[#allocation2 + $0x168] sm:$0xff]  ;;  %v794_v17 = vrot.slane %v790_v33, 4  ;;  %v1161_v31 = vsel %vm6347_vm0, %v1159_v25, %v1160_v59 }
 0x106   : > { %3640 = vmatpush.bf16.msra.mxu3 %v5552_v60  ;;  %1283 = vst [vmem:[#allocation2 + $0x178] sm:$0xf] %v1161_v31  ;;  %v7126_v25 = vshrl.u32 %v6686_v54, 16  ;;  %v5471_v31 = vld [vmem:[#allocation2 + $0xe0] sm:$0xff] }
 0x107   : > { %v6723_v1 = vadd.f32 %v2700_v4, %v2466_v56  ;;  %v1164_v3 = vrot.slane %v1163_v18, 4  ;;  %v6734_v4 = vpack.c.bf16 %v6120_v49, %v6120_v49  ;;  %v802_v15 = vsel %vm6308_vm7, %v794_v17, %v801_v27 }
 0x108   : > { %v2702_v56 = vpop.f32.mrf.mxu0  ;;  %v6745_v49 = vpack.c.bf16 %v6122_v50, %v6122_v50  ;;  %949 = vst [vmem:[#allocation2 + $0x64] sm:$0xf] %v802_v15  ;;  %v1166_v17 = vrot.slane %v791_v55, 5 }
 0x109   : > { %v1285_v34 = vsel %vm6355_vm1, %v1164_v3, %v1284_v53  ;;  %v1165_v3 = vrot.slane %v7126_v25, 4 }
 0x10a   : > { %v2074_v10 = vpop.f32.mrf.mxu2  ;;  %1286 = vst [vmem:[#allocation2 + $0x17c] sm:$0xf] %v1285_v34  ;;  %v815_v55 = vshll.u32 %v6745_v49, 16 }
 0x10b   : > { %v2153_v52 = vadd.f32 %v2074_v10, %v1793_v51  ;;  %v1795_v14 = vpop.f32.mrf.mxu1  ;;  %v946_v51 = vld [vmem:[#allocation2 + $0x60] sm:$0xf]  ;;  %v2388_v59 = vpop.f32.mrf.mxu3  ;;  %v597_v10 = vld [vmem:[#allocation2 + $0x68] sm:$0x1] }
 0x10c   : > { %v1796_v63 = vadd.f32 %v1795_v14, %v6558_v5  ;;  %v5576_v5 = vld [vmem:[%s7088_s5 + $0x210] sm:$0xff]  ;;  %v947_v33 = vsel %vm6333_vm15, %v793_v41, %v946_v51  ;;  %v7098_v14 = vshrl.u32 %v6734_v4, 16  ;;  %v1048_v41 = vld [vmem:[#allocation2 + $0x184] sm:$0x8] }
 0x10d   : > { %v2467_v53 = vadd.f32 %v2388_v59, %v2153_v52  ;;  %3955 = vmatpush.bf16.msra.mxu0 %v5576_v5  ;;  %948 = vst [vmem:[#allocation2 + $0x60] sm:$0xf] %v947_v33  ;;  %v1049_v52 = vsel %vm6320_vm12, 0, %v1048_v41  ;;  %v7128_v5 = vshll.u32 %v6696_v9, 16  ;;  %v1167_v59 = vor.u32 %v1166_v17, %v1165_v3 }
 0x10e   : > { %1834 = vmatmul.bf16.gmra.mxu1 %v5375_v12  ;;  %v7097_v12 = vshrl.u32 %v6745_v49, 16  ;;  %1050 = vst [vmem:[#allocation2 + $0x184] sm:$0x8] %v1049_v52  ;;  %v806_v34 = vrot.slane %v7098_v14, 7 }
 0x10f   : > { %2116 = vmatmul.bf16.gmra.mxu2 %v5423_v43  ;;  %v6748_v36 = vadd.f32 %v2702_v56, %v2467_v53  ;;  %v598_v43 = vsel %vm6299_vm6, 0, %v597_v10  ;;  %v1169_v15 = vrot.slane %v7128_v5, 5  ;;  %2744 = vmatmul.bf16.gmra.mxu0 %v5471_v31  ;;  %v1168_v25 = vrot.slane %v1167_v59, 4  ;;  %v1051_v59 = vld [vmem:[#allocation2 + $0x18c] sm:$0x8] }
 0x110   : > { %2430 = vmatmul.bf16.gmra.mxu3 %v5447_v0  ;;  %v2705_v51 = vpop.f32.mrf.mxu0  ;;  %599 = vst [vmem:[#allocation2 + $0x68] sm:$0x1] %v598_v43  ;;  %v814_v54 = vrot.slane %v7097_v12, 7  ;;  %v5424_v43 = vld [vmem:[#allocation2 + $0x170] sm:$0xff] }
 0x112   : > { %v2077_v60 = vpop.f32.mrf.mxu2  ;;  %v817_v14 = vor.u32 %v815_v55, %v814_v54 }
 0x113   : > { %v2154_v35 = vadd.f32 %v2077_v60, %v1796_v63  ;;  %v1797_v18 = vpop.f32.mrf.mxu1  ;;  %v7127_v63 = vshrl.u32 %v6696_v9, 16  ;;  %v2391_v56 = vpop.f32.mrf.mxu3 }
 0x114   : > { %v1798_v50 = vadd.f32 %v1797_v18, %v6574_v28  ;;  %v807_v28 = vshll.u32 %v6734_v4, 16  ;;  %v5376_v18 = vld [vmem:[#allocation2 + $0x50] sm:$0xff] }
 0x115   : > { %v1171_v27 = vrot.slane %v7127_v63, 4  ;;  %v2468_v33 = vadd.f32 %v2391_v56, %v2154_v35  ;;  %v810_v63 = vrot.slane %v806_v34, 4  ;;  %v1288_v12 = vld [vmem:[#allocation2 + $0x184] sm:$0xf]  ;;  %v1170_v35 = vsel %vm6347_vm0, %v1168_v25, %v1169_v15  ;;  %v5448_v56 = vld [vmem:[#allocation2 + $0x58] sm:$0xff] }
 0x116   : > { %v809_v0 = vor.u32 %v807_v28, %v806_v34  ;;  %1287 = vst [vmem:[#allocation2 + $0x180] sm:$0xf] %v1170_v35  ;;  %v7130_v25 = vshrl.u32 %v6745_v49, 16 }
 0x117   : > { %v1172_v53 = vor.u32 %v1171_v27, %v1169_v15  ;;  %v6768_v41 = vadd.f32 %v2705_v51, %v2468_v33  ;;  %v950_v17 = vld [vmem:[#allocation2 + $0x68] sm:$0xf]  ;;  %v6777_v27 = vpack.c.bf16 %v6184_v47, %v6184_v47  ;;  %v818_v31 = vsel %vm6308_vm7, %v810_v63, %v817_v14 }
 0x118   : > { %953 = vst [vmem:[#allocation2 + $0x6c] sm:$0xf] %v818_v31  ;;  %v5472_v63 = vld [vmem:[#allocation2 + $0xe8] sm:$0xff] }
 0x119   : > { %v1173_v9 = vrot.slane %v1172_v53, 4  ;;  %v820_v47 = vshrl.u32 %v6777_v27, 16  ;;  %v600_v53 = vld [vmem:[#allocation2 + $0x70] sm:$0x1]  ;;  %v5551_v31 = vld [vmem:[%s7088_s5 + $0x1c8] sm:$0xff] }
 0x11a   : > { %v2079_v60 = vpop.f32.mrf.mxu2  ;;  %3641 = vmatpush.bf16.msra.mxu3 %v5551_v31 }
 0x11b   : > { %v2155_v10 = vadd.f32 %v2079_v60, %v1798_v50  ;;  %v1800_v52 = vpop.f32.mrf.mxu1  ;;  %v1289_v3 = vsel %vm6355_vm1, %v1173_v9, %v1288_v12  ;;  %v2707_v50 = vpop.f32.mrf.mxu0  ;;  %v6785_v12 = vpack.c.bf16 %v6186_v48, %v6186_v48  ;;  %v1052_v48 = vsel %vm6320_vm12, 0, %v1051_v59 }
 0x11c   : > { %v1801_v5 = vadd.f32 %v1800_v52, %v6604_v32  ;;  %v951_v32 = vsel %vm6333_vm15, %v809_v0, %v950_v17  ;;  %v2393_v34 = vpop.f32.mrf.mxu3  ;;  %1290 = vst [vmem:[#allocation2 + $0x184] sm:$0xf] %v1289_v3  ;;  %v1180_v9 = vrot.slane %v7130_v25, 4  ;;  %v5527_v3 = vld [vmem:[%s7088_s5 + $0x188] sm:$0xff] }
 0x11d   : > { %v2469_v51 = vadd.f32 %v2393_v34, %v2155_v10  ;;  %952 = vst [vmem:[#allocation2 + $0x68] sm:$0xf] %v951_v32  ;;  %v828_v0 = vshrl.u32 %v6785_v12, 16  ;;  %v7129_v10 = vshrl.u32 %v6734_v4, 16  ;;  %v1178_v4 = vrot.slane %v815_v55, 5  ;;  %3326 = vmatpush.bf16.msra.mxu2 %v5527_v3  ;;  %v5503_v32 = vld [vmem:[%s7088_s5 + $0x148] sm:$0xff] }
 0x11e   : > { %1839 = vmatmul.bf16.gmra.mxu1 %v5376_v18  ;;  %v601_v18 = vsel %vm6299_vm6, 0, %v600_v53  ;;  %1053 = vst [vmem:[#allocation2 + $0x18c] sm:$0x8] %v1052_v48  ;;  %v831_v49 = vshll.u32 %v6785_v12, 16 }
 0x11f   : > { %2121 = vmatmul.bf16.gmra.mxu2 %v5424_v43  ;;  %v6788_v54 = vadd.f32 %v2707_v50, %v2469_v51  ;;  %v1174_v52 = vrot.slane %v7129_v10, 4  ;;  %v1175_v43 = vrot.slane %v807_v28, 5  ;;  %602 = vst [vmem:[#allocation2 + $0x70] sm:$0x1] %v601_v18  ;;  %v830_v28 = vrot.slane %v828_v0, 7  ;;  %2749 = vmatmul.bf16.gmra.mxu0 %v5472_v63 }
 0x120   : > { %2435 = vmatmul.bf16.gmra.mxu3 %v5448_v56  ;;  %v1181_v51 = vor.u32 %v1180_v9, %v1178_v4  ;;  %3011 = vmatpush.bf16.msra.mxu1 %v5503_v32 }
 0x121   : > { %v1176_v34 = vor.u32 %v1175_v43, %v1174_v52  ;;  %v833_v52 = vor.u32 %v831_v49, %v830_v28  ;;  %3327 = vmatpush.bf16.msra.mxu2 %v5526_v30 }
 0x122   : > { %v2082_v15 = vpop.f32.mrf.mxu2  ;;  %v1182_v18 = vrot.slane %v1181_v51, 4 }
 0x123   : > { %v2156_v14 = vadd.f32 %v2082_v15, %v1801_v5  ;;  %v1802_v33 = vpop.f32.mrf.mxu1  ;;  %v822_v5 = vrot.slane %v820_v47, 7  ;;  %v2710_v35 = vpop.f32.mrf.mxu0  ;;  %v5377_v15 = vld [vmem:[#allocation2 + $0x58] sm:$0xff]  ;;  %v1177_v48 = vrot.slane %v1176_v34, 4 }
 0x124   : > { %v1803_v60 = vadd.f32 %v1802_v33, %v6631_v45  ;;  %v823_v45 = vshll.u32 %v6777_v27, 16  ;;  %v2396_v17 = vpop.f32.mrf.mxu3 }
 0x125   : > { %v2470_v50 = vadd.f32 %v2396_v17, %v2156_v14  ;;  %v5425_v14 = vld [vmem:[#allocation2 + $0x178] sm:$0xff]  ;;  %v826_v10 = vrot.slane %v822_v5, 4  ;;  %v1292_v63 = vld [vmem:[#allocation2 + $0x18c] sm:$0xf]  ;;  %v1179_v43 = vsel %vm6347_vm0, %v1177_v48, %v1178_v4  ;;  %v1183_v48 = vrot.slane %v820_v47, 4 }
 0x126   : > { %v825_v56 = vor.u32 %v823_v45, %v822_v5  ;;  %v1293_v9 = vsel %vm6355_vm1, %v1182_v18, %v1292_v63  ;;  %1291 = vst [vmem:[#allocation2 + $0x188] sm:$0xf] %v1179_v43  ;;  %v1184_v18 = vrot.slane %v823_v45, 5 }
 0x127   : > { %v6815_v33 = vadd.f32 %v2710_v35, %v2470_v50  ;;  %v6826_v35 = vpack.c.bf16 %v6270_v7, %v6270_v7  ;;  %v834_v5 = vsel %vm6308_vm7, %v826_v10, %v833_v52  ;;  %1294 = vst [vmem:[#allocation2 + $0x18c] sm:$0xf] %v1293_v9  ;;  %v6837_v7 = vpack.c.bf16 %v6272_v8, %v6272_v8  ;;  %v5449_v50 = vld [vmem:[#allocation2 + $0x60] sm:$0xff] }
 0x128   : > { %957 = vst [vmem:[#allocation2 + $0x74] sm:$0xf] %v834_v5  ;;  %v1189_v10 = vrot.slane %v828_v0, 4  ;;  %v1187_v9 = vrot.slane %v831_v49, 5  ;;  %v1185_v0 = vor.u32 %v1184_v18, %v1183_v48  ;;  %v5378_v5 = vld [vmem:[#allocation2 + $0x60] sm:$0xff] }
 0x129   : > { %v836_v31 = vshrl.u32 %v6826_v35, 16  ;;  %v847_v47 = vshll.u32 %v6837_v7, 16 }
 0x12a   : > { %v2084_v55 = vpop.f32.mrf.mxu2  ;;  %v1186_v12 = vrot.slane %v1185_v0, 4 }
 0x12b   : > { %v2157_v59 = vadd.f32 %v2084_v55, %v1803_v60  ;;  %v1805_v53 = vpop.f32.mrf.mxu1  ;;  %v954_v60 = vld [vmem:[#allocation2 + $0x70] sm:$0xf]  ;;  %v2712_v3 = vpop.f32.mrf.mxu0  ;;  %v838_v63 = vrot.slane %v836_v31, 7 }
 0x12c   : > { %v1806_v25 = vadd.f32 %v1805_v53, %v6671_v61  ;;  %v5575_v61 = vld [vmem:[%s7088_s5 + $0x208] sm:$0xff]  ;;  %v955_v17 = vsel %vm6333_vm15, %v825_v56, %v954_v60  ;;  %v2398_v4 = vpop.f32.mrf.mxu3  ;;  %v1054_v56 = vld [vmem:[#allocation2 + $0x194] sm:$0x8]  ;;  %v844_v53 = vshrl.u32 %v6837_v7, 16  ;;  %v1190_v60 = vor.u32 %v1189_v10, %v1187_v9 }
 0x12d   : > { %v2471_v28 = vadd.f32 %v2398_v4, %v2157_v59  ;;  %3956 = vmatpush.bf16.msra.mxu0 %v5575_v61  ;;  %956 = vst [vmem:[#allocation2 + $0x70] sm:$0xf] %v955_v17  ;;  %v1055_v59 = vsel %vm6320_vm12, 0, %v1054_v56 }
 0x12e   : > { %1844 = vmatmul.bf16.gmra.mxu1 %v5377_v15  ;;  %v603_v15 = vld [vmem:[#allocation2 + $0x78] sm:$0x1]  ;;  %1056 = vst [vmem:[#allocation2 + $0x194] sm:$0x8] %v1055_v59  ;;  %v846_v27 = vrot.slane %v844_v53, 7  ;;  %v1191_v49 = vrot.slane %v1190_v60, 4 }
 0x12f   : > { %2126 = vmatmul.bf16.gmra.mxu2 %v5425_v14  ;;  %v6840_v34 = vadd.f32 %v2712_v3, %v2471_v28  ;;  %v604_v14 = vsel %vm6299_vm6, 0, %v603_v15  ;;  %v5820_v15 = vld [vmem:[%s5990_s9 + $0x78] sm:$0xff]  }
 0x130   : > { %2440 = vmatmul.bf16.gmra.mxu3 %v5449_v50  ;;  %605 = vst [vmem:[#allocation2 + $0x78] sm:$0x1] %v604_v14  ;;  %v5426_v50 = vld [vmem:[#allocation2 + $0x180] sm:$0xff]  ;;  %v849_v56 = vor.u32 %v847_v47, %v846_v27  ;;  %v5644_v48 = vunpack.c.l.bf16 %v5820_v15  ;;  %v5645_v18 = vunpack.c.h.bf16 %v5820_v15  ;;  %v5450_v27 = vld [vmem:[#allocation2 + $0x68] sm:$0xff] }
 0x132   : > { %v2087_v32 = vpop.f32.mrf.mxu2 }
 0x133   : > { %v2158_v51 = vadd.f32 %v2087_v32, %v1806_v25  ;;  %v1807_v55 = vpop.f32.mrf.mxu1  ;;  %v5473_v25 = vld [vmem:[#allocation2 + $0xf0] sm:$0xff]  ;;  %v2715_v52 = vpop.f32.mrf.mxu0  ;;  %v842_v32 = vrot.slane %v838_v63, 4 }
 0x134   : > { %v1808_v8 = vadd.f32 %v1807_v55, %v6688_v16  ;;  %v839_v16 = vshll.u32 %v6826_v35, 16  ;;  %v2401_v43 = vpop.f32.mrf.mxu3  ;;  %2754 = vmatmul.bf16.gmra.mxu0 %v5473_v25 }
 0x135   : > { %v2472_v45 = vadd.f32 %v2401_v43, %v2158_v51  ;;  %v1296_v55 = vld [vmem:[#allocation2 + $0x194] sm:$0xf]  ;;  %v1188_v51 = vsel %vm6347_vm0, %v1186_v12, %v1187_v9  ;;  %v452_v43 = vmul.f32 %v5645_v18, %v6030_v46  ;;  %v1057_v12 = vld [vmem:[#allocation2 + $0x19c] sm:$0x8]  ;;  %v5502_v18 = vld [vmem:[%s7088_s5 + $0x140] sm:$0xff] }
 0x136   : > { %v841_v3 = vor.u32 %v839_v16, %v838_v63  ;;  %v1297_v59 = vsel %vm6355_vm1, %v1191_v49, %v1296_v55  ;;  %1295 = vst [vmem:[#allocation2 + $0x190] sm:$0xf] %v1188_v51  ;;  %v1198_v55 = vrot.slane %v844_v53, 4  ;;  %v1196_v51 = vrot.slane %v847_v47, 5  ;;  %3012 = vmatpush.bf16.msra.mxu1 %v5502_v18 }
 0x137   : > { %v6860_v17 = vadd.f32 %v2715_v52, %v2472_v45  ;;  %v958_v14 = vld [vmem:[#allocation2 + $0x78] sm:$0xf]  ;;  %1298 = vst [vmem:[#allocation2 + $0x194] sm:$0xf] %v1297_v59  ;;  %v451_v52 = vmul.f32 %v5644_v48, %v6030_v46  ;;  %v487_v60 = vadd.f32 %v6041_v57, %v452_v43  ;;  %v606_v46 = vld [vmem:[#allocation2 + $0x80] sm:$0x1] }
 0x138   : > { %v959_v25 = vsel %vm6333_vm15, %v841_v3, %v958_v14  ;;  %v5550_v48 = vld [vmem:[%s7088_s5 + $0x1c0] sm:$0xff] }
 0x139   : > { %960 = vst [vmem:[#allocation2 + $0x78] sm:$0xf] %v959_v25  ;;  %v486_v0 = vadd.f32 %v6041_v57, %v451_v52  ;;  %v607_v57 = vsel %vm6299_vm6, 0, %v606_v46  ;;  %v5379_v52 = vld [vmem:[#allocation2 + $0x68] sm:$0xff]  ;;  %3642 = vmatpush.bf16.msra.mxu3 %v5550_v48 }
 0x13a   : > { %v2089_v61 = vpop.f32.mrf.mxu2  ;;  %608 = vst [vmem:[#allocation2 + $0x80] sm:$0x1] %v607_v57 }
 0x13b   : > { %v2159_v4 = vadd.f32 %v2089_v61, %v1808_v8  ;;  %v1810_v28 = vpop.f32.mrf.mxu1  ;;  %v2717_v10 = vpop.f32.mrf.mxu0  ;;  %v850_v8 = vsel %vm6308_vm7, %v842_v32, %v849_v56  ;;  %v6878_v49 = vmax.f32 %v486_v0, 0.0  ;;  %v6880_v32 = vmax.f32 %v487_v60, 0.0  ;;  %v5474_v56 = vld [vmem:[#allocation2 + $0xf8] sm:$0xff]  ;;  %v5427_v0 = vld [vmem:[#allocation2 + $0x188] sm:$0xff] }
 0x13c   : > { %v2403_v63 = vpop.f32.mrf.mxu3  ;;  %v1811_v45 = vadd.f32 %v1810_v28, %v6488_v21  ;;  %961 = vst [vmem:[#allocation2 + $0x7c] sm:$0xf] %v850_v8  ;;  %v1058_v21 = vsel %vm6320_vm12, 0, %v1057_v12  ;;  %v1193_v28 = vrot.slane %v839_v16, 5  ;;  %v1199_v8 = vor.u32 %v1198_v55, %v1196_v51  ;;  %v5574_v55 = vld [vmem:[%s7088_s5 + $0x200] sm:$0xff] }
 0x13d   : > { %v2473_v9 = vadd.f32 %v2403_v63, %v2159_v4  ;;  %v1192_v4 = vrot.slane %v836_v31, 4  ;;  %1059 = vst [vmem:[#allocation2 + $0x19c] sm:$0x8] %v1058_v21  ;;  %v6892_v15 = vpack.c.bf16 %v6878_v49, %v6878_v49  ;;  %v6896_v35 = vpack.c.bf16 %v6880_v32, %v6880_v32  ;;  %3957 = vmatpush.bf16.msra.mxu0 %v5574_v55 }
 0x13e   : > { %1849 = vmatmul.bf16.gmra.mxu1 %v5378_v5  ;;  %v5724_v30 = vpack.c.bf16 %v6880_v32, %v6878_v49 }
 0x13f   : > { %2131 = vmatmul.bf16.gmra.mxu2 %v5426_v50  ;;  %v6876_v5 = vadd.f32 %v2717_v10, %v2473_v9  ;;  %v852_v7 = vshrl.u32 %v6892_v15, 16  ;;  %v860_v53 = vshrl.u32 %v6896_v35, 16  ;;  %v1194_v10 = vor.u32 %v1193_v28, %v1192_v4 }
 0x140   : > { %2445 = vmatmul.bf16.gmra.mxu3 %v5450_v27  ;;  %v855_v25 = vshll.u32 %v6892_v15, 16  ;;  %v863_v43 = vshll.u32 %v6896_v35, 16  ;;  %5835 = vst [vmem:[#allocation2 + $0x110] sm:$0xff] %v5724_v30  }
 0x141   : > { %v854_v47 = vrot.slane %v852_v7, 7  ;;  %v1195_v60 = vrot.slane %v1194_v10, 4  ;;  %v962_v57 = vld [vmem:[#allocation2 + $0x80] sm:$0xf] }
 0x142   : > { %v2092_v61 = vpop.f32.mrf.mxu2  ;;  %v5475_v10 = vld [vmem:[#allocation2 + $0x100] sm:$0xff] }
 0x143   : > { %v2160_v3 = vadd.f32 %v2092_v61, %v1811_v45  ;;  %v1812_v50 = vpop.f32.mrf.mxu1  ;;  %v2720_v31 = vpop.f32.mrf.mxu0  ;;  %v1200_v61 = vrot.slane %v1199_v8, 4  ;;  %v858_v12 = vrot.slane %v854_v47, 4  ;;  %v1197_v4 = vsel %vm6347_vm0, %v1195_v60, %v1196_v51  ;;  %v5381_v30 = vld [vmem:[#allocation2 + $0x78] sm:$0xff] }
 0x144   : > { %v2406_v16 = vpop.f32.mrf.mxu3  ;;  %v1813_v14 = vadd.f32 %v1812_v50, %v6510_v2  ;;  %2759 = vmatmul.bf16.gmra.mxu0 %v5474_v56  ;;  %v862_v2 = vrot.slane %v860_v53, 7  ;;  %v1300_v50 = vld [vmem:[#allocation2 + $0x19c] sm:$0xf]  ;;  %1299 = vst [vmem:[#allocation2 + $0x198] sm:$0xf] %v1197_v4 }
 0x145   : > { %v2474_v59 = vadd.f32 %v2406_v16, %v2160_v3  ;;  %v857_v3 = vor.u32 %v855_v25, %v854_v47  ;;  %v1301_v21 = vsel %vm6355_vm1, %v1200_v61, %v1300_v50 }
 0x146   : > { %v865_v46 = vor.u32 %v863_v43, %v862_v2  ;;  %1302 = vst [vmem:[#allocation2 + $0x19c] sm:$0xf] %v1301_v21  ;;  %v5476_v21 = vld [vmem:[#allocation2 + $0x108] sm:$0xff] }
 0x147   : > { %v6916_v9 = vadd.f32 %v2720_v31, %v2474_v59  ;;  %v963_v31 = vsel %vm6333_vm15, %v857_v3, %v962_v57  ;;  %v5451_v59 = vld [vmem:[#allocation2 + $0x70] sm:$0xff]  ;;  %v5452_v3 = vld [vmem:[#allocation2 + $0x78] sm:$0xff] }
 0x148   : > { %v866_v56 = vsel %vm6308_vm7, %v858_v12, %v865_v46  ;;  %964 = vst [vmem:[#allocation2 + $0x80] sm:$0xf] %v963_v31 }
 0x149   : > { %965 = vst [vmem:[#allocation2 + $0x84] sm:$0xf] %v866_v56 }
 0x14a   : > { %v2094_v63 = vpop.f32.mrf.mxu2 }
 0x14b   : > { %v2161_v27 = vadd.f32 %v2094_v63, %v1813_v14  ;;  %v1815_v45 = vpop.f32.mrf.mxu1  ;;  %v2722_v28 = vpop.f32.mrf.mxu0 }
 0x14c   : > { %v2408_v16 = vpop.f32.mrf.mxu3  ;;  %v1816_v14 = vadd.f32 %v1815_v45, %v6535_v37  ;;  %v5428_v45 = vld [vmem:[#allocation2 + $0x190] sm:$0xff] }
 0x14d   : > { %v2475_v51 = vadd.f32 %v2408_v16, %v2161_v27 }
 0x14e   : > { %1854 = vmatmul.bf16.gmra.mxu1 %v5379_v52  ;;  %v5380_v52 = vld [vmem:[#allocation2 + $0x70] sm:$0xff] }
 0x14f   : > { %2136 = vmatmul.bf16.gmra.mxu2 %v5427_v0  ;;  %v6936_v39 = vadd.f32 %v2722_v28, %v2475_v51 }
 0x150   : > { %2450 = vmatmul.bf16.gmra.mxu3 %v5451_v59 }
 0x152   : > { %v2097_v48 = vpop.f32.mrf.mxu2 }
 0x153   : > { %v2162_v18 = vadd.f32 %v2097_v48, %v1816_v14  ;;  %v1817_v20 = vpop.f32.mrf.mxu1  ;;  %v2725_v8 = vpop.f32.mrf.mxu0 }
 0x154   : > { %v2411_v49 = vpop.f32.mrf.mxu3  ;;  %2764 = vmatmul.bf16.gmra.mxu0 %v5475_v10  ;;  %v1818_v47 = vadd.f32 %v1817_v20, %v6564_v11  ;;  %v5453_v20 = vld [vmem:[#allocation2 + $0x80] sm:$0xff] }
 0x155   : > { %v2476_v32 = vadd.f32 %v2411_v49, %v2162_v18 }
 0x157   : > { %v6939_v2 = vadd.f32 %v2725_v8, %v2476_v32 }
 0x15a   : > { %v2099_v63 = vpop.f32.mrf.mxu2 }
 0x15b   : > { %v2163_v37 = vadd.f32 %v2099_v63, %v1818_v47  ;;  %v1820_v27 = vpop.f32.mrf.mxu1  ;;  %v2727_v0 = vpop.f32.mrf.mxu0  ;;  %v5477_v47 = vld [vmem:[#allocation2 + $0x110] sm:$0xff] }
 0x15c   : > { %v2413_v60 = vpop.f32.mrf.mxu3  ;;  %v1821_v50 = vadd.f32 %v1820_v27, %v6578_v26  ;;  %v5429_v26 = vld [vmem:[#allocation2 + $0x198] sm:$0xff] }
 0x15d   : > { %v2477_v61 = vadd.f32 %v2413_v60, %v2163_v37 }
 0x15e   : > { %1859 = vmatmul.bf16.gmra.mxu1 %v5380_v52 }
 0x15f   : > { %2141 = vmatmul.bf16.gmra.mxu2 %v5428_v45  ;;  %v6942_v46 = vadd.f32 %v2727_v0, %v2477_v61  ;;  %v5486_v0 = vld [vmem:[#allocation2 + $0x128] sm:$0xff] }
 0x160   : > { %2455 = vmatmul.bf16.gmra.mxu3 %v5452_v3 }
 0x162   : > { %v2102_v12 = vpop.f32.mrf.mxu2 }
 0x163   : > { %v2164_v4 = vadd.f32 %v2102_v12, %v1821_v50  ;;  %v1822_v11 = vpop.f32.mrf.mxu1  ;;  %v2730_v57 = vpop.f32.mrf.mxu0 }
 0x164   : > { %v2416_v28 = vpop.f32.mrf.mxu3  ;;  %2769 = vmatmul.bf16.gmra.mxu0 %v5476_v21  ;;  %v1823_v56 = vadd.f32 %v1822_v11, %v6602_v24  ;;  %v5534_v11 = vld [vmem:[#allocation2 + $0xa0] sm:$0xff] }
 0x165   : > { %v2478_v55 = vadd.f32 %v2416_v28, %v2164_v4 }
 0x167   : > { %v6945_v16 = vadd.f32 %v2730_v57, %v2478_v55 }
 0x16a   : > { %v2104_v31 = vpop.f32.mrf.mxu2 }
 0x16b   : > { %v2165_v51 = vadd.f32 %v2104_v31, %v1823_v56  ;;  %v1825_v59 = vpop.f32.mrf.mxu1  ;;  %v2732_v14 = vpop.f32.mrf.mxu0  ;;  %v5558_v56 = vld [vmem:[#allocation2 + $0x130] sm:$0xff] }
 0x16c   : > { %v2418_v48 = vpop.f32.mrf.mxu3  ;;  %v1826_v10 = vadd.f32 %v1825_v59, %v6629_v62  ;;  %v5510_v62 = vld [vmem:[#allocation2 + $0x10] sm:$0xff] }
 0x16d   : > { %v2479_v18 = vadd.f32 %v2418_v48, %v2165_v51 }
 0x16e   : > { %1864 = vmatmul.bf16.gmra.mxu1 %v5381_v30 }
 0x16f   : > { %2146 = vmatmul.bf16.gmra.mxu2 %v5429_v26  ;;  %v6948_v49 = vadd.f32 %v2732_v14, %v2479_v18  ;;  %v5487_v14 = vld [vmem:[#allocation2 + $0x130] sm:$0xff] }
 0x170   : > { %2460 = vmatmul.bf16.gmra.mxu3 %v5453_v20 }
 0x172   : > { %v2107_v8 = vpop.f32.mrf.mxu2 }
 0x173   : > { %v2166_v32 = vadd.f32 %v2107_v8, %v1826_v10  ;;  %v1827_v24 = vpop.f32.mrf.mxu1  ;;  %v2735_v63 = vpop.f32.mrf.mxu0 }
 0x174   : > { %v2421_v52 = vpop.f32.mrf.mxu3  ;;  %2774 = vmatmul.bf16.gmra.mxu0 %v5477_v47  ;;  %v1828_v27 = vadd.f32 %v1827_v24, %v6658_v22  ;;  %v5535_v24 = vld [vmem:[#allocation2 + $0xa8] sm:$0xff] }
 0x175   : > { %v2480_v37 = vadd.f32 %v2421_v52, %v2166_v32 }
 0x177   : > { %v6951_v60 = vadd.f32 %v2735_v63, %v2480_v37 }
 0x17a   : > { %v2109_v45 = vpop.f32.mrf.mxu2 }
 0x17b   : > { %v2167_v61 = vadd.f32 %v2109_v45, %v1828_v27  ;;  %v1830_v3 = vpop.f32.mrf.mxu1  ;;  %v2737_v50 = vpop.f32.mrf.mxu0  ;;  %v5559_v27 = vld [vmem:[#allocation2 + $0x138] sm:$0xff] }
 0x17c   : > { %v2423_v12 = vpop.f32.mrf.mxu3  ;;  %v1831_v21 = vadd.f32 %v1830_v3, %v6508_v29  ;;  %v5511_v29 = vld [vmem:[#allocation2 + $0x18] sm:$0xff] }
 0x17d   : > { %v2481_v4 = vadd.f32 %v2423_v12, %v2167_v61 }
 0x17e   : > { %3013 = vmatmul.bf16.vlgmr.msra.gmra.mxu1 %v5486_v0 }
 0x17f   : > { %3328 = vmatmul.bf16.vlgmr.msra.gmra.mxu2 %v5510_v62  ;;  %v6954_v28 = vadd.f32 %v2737_v50, %v2481_v4  ;;  %v5488_v50 = vld [vmem:[#allocation2 + $0x138] sm:$0xff] }
 0x180   : > { %3643 = vmatmul.bf16.vlgmr.msra.gmra.mxu3 %v5534_v11 }
 0x182   : > { %v2112_v57 = vpop.f32.mrf.mxu2 }
 0x183   : > { %v2168_v55 = vadd.f32 %v2112_v57, %v1831_v21  ;;  %v1832_v22 = vpop.f32.mrf.mxu1  ;;  %v2740_v31 = vpop.f32.mrf.mxu0 }
 0x184   : > { %v2426_v30 = vpop.f32.mrf.mxu3  ;;  %3958 = vmatmul.bf16.vlgmr.msra.gmra.mxu0 %v5558_v56  ;;  %v1833_v59 = vadd.f32 %v1832_v22, %v6533_v19  ;;  %v5536_v22 = vld [vmem:[#allocation2 + $0xb0] sm:$0xff] }
 0x185   : > { %v2482_v51 = vadd.f32 %v2426_v30, %v2168_v55 }
 0x187   : > { %v6957_v48 = vadd.f32 %v2740_v31, %v2482_v51 }
 0x18a   : > { %v2114_v26 = vpop.f32.mrf.mxu2 }
 0x18b   : > { %v2169_v18 = vadd.f32 %v2114_v26, %v1833_v59  ;;  %v1835_v20 = vpop.f32.mrf.mxu1  ;;  %v2742_v10 = vpop.f32.mrf.mxu0  ;;  %v5560_v59 = vld [vmem:[#allocation2 + $0x140] sm:$0xff] }
 0x18c   : > { %v2428_v8 = vpop.f32.mrf.mxu3  ;;  %v1836_v47 = vadd.f32 %v1835_v20, %v6561_v23  ;;  %v5512_v23 = vld [vmem:[#allocation2 + $0x20] sm:$0xff] }
 0x18d   : > { %v2483_v32 = vadd.f32 %v2428_v8, %v2169_v18 }
 0x18e   : > { %3018 = vmatmul.bf16.gmra.mxu1 %v5487_v14 }
 0x18f   : > { %3333 = vmatmul.bf16.gmra.mxu2 %v5511_v29  ;;  %v6960_v52 = vadd.f32 %v2742_v10, %v2483_v32  ;;  %v5489_v10 = vld [vmem:[#allocation2 + $0x140] sm:$0xff] }
 0x190   : > { %3648 = vmatmul.bf16.gmra.mxu3 %v5535_v24 }
 0x192   : > { %v2117_v63 = vpop.f32.mrf.mxu2 }
 0x193   : > { %v2170_v37 = vadd.f32 %v2117_v63, %v1836_v47  ;;  %v1837_v19 = vpop.f32.mrf.mxu1  ;;  %v2745_v45 = vpop.f32.mrf.mxu0 }
 0x194   : > { %v2431_v0 = vpop.f32.mrf.mxu3  ;;  %3963 = vmatmul.bf16.gmra.mxu0 %v5559_v27  ;;  %v1838_v3 = vadd.f32 %v1837_v19, %v6576_v6  ;;  %v5537_v19 = vld [vmem:[#allocation2 + $0xb8] sm:$0xff] }
 0x195   : > { %v2484_v61 = vadd.f32 %v2431_v0, %v2170_v37 }
 0x197   : > { %v6963_v12 = vadd.f32 %v2745_v45, %v2484_v61 }
 0x19a   : > { %v2119_v62 = vpop.f32.mrf.mxu2 }
 0x19b   : > { %v2171_v4 = vadd.f32 %v2119_v62, %v1838_v3  ;;  %v1840_v11 = vpop.f32.mrf.mxu1  ;;  %v2747_v21 = vpop.f32.mrf.mxu0  ;;  %v5561_v3 = vld [vmem:[#allocation2 + $0x148] sm:$0xff] }
 0x19c   : > { %v2433_v57 = vpop.f32.mrf.mxu3  ;;  %v1841_v56 = vadd.f32 %v1840_v11, %v6599_v40  ;;  %v5513_v40 = vld [vmem:[#allocation2 + $0x28] sm:$0xff] }
 0x19d   : > { %v2485_v55 = vadd.f32 %v2433_v57, %v2171_v4  ;;  %v7131_v11 = vld [vmem:[#allocation10_spill] sm:$0xff] }
 0x19e   : > { %3023 = vmatmul.bf16.gmra.mxu1 %v5488_v50  ;;  %v5490_v57 = vld [vmem:[#allocation2 + $0x148] sm:$0xff] }
 0x19f   : > { %3338 = vmatmul.bf16.gmra.mxu2 %v5512_v23  ;;  %v6966_v30 = vadd.f32 %v2747_v21, %v2485_v55 }
 0x1a0   : > { %3653 = vmatmul.bf16.gmra.mxu3 %v5536_v22 }
 0x1a2   : > { %v2122_v31 = vpop.f32.mrf.mxu2 }
 0x1a3   : > { %v2172_v51 = vadd.f32 %v2122_v31, %v1841_v56  ;;  %v1842_v6 = vpop.f32.mrf.mxu1  ;;  %v2750_v26 = vpop.f32.mrf.mxu0 }
 0x1a4   : > { %v2436_v14 = vpop.f32.mrf.mxu3  ;;  %3968 = vmatmul.bf16.gmra.mxu0 %v5560_v59  ;;  %v1843_v20 = vadd.f32 %v1842_v6, %v6627_v44  ;;  %v5538_v59 = vld [vmem:[#allocation2 + $0xc0] sm:$0xff] }
 0x1a5   : > { %v2486_v18 = vadd.f32 %v2436_v14, %v2172_v51 }
 0x1a7   : > { %v6969_v8 = vadd.f32 %v2750_v26, %v2486_v18  ;;  %v7132_v26 = vld [vmem:[#allocation3_spill] sm:$0xff] }
 0x1aa   : > { %v2124_v29 = vpop.f32.mrf.mxu2 }
 0x1ab   : > { %v2173_v32 = vadd.f32 %v2124_v29, %v1843_v20  ;;  %v1845_v24 = vpop.f32.mrf.mxu1  ;;  %v2752_v47 = vpop.f32.mrf.mxu0 }
 0x1ac   : > { %v2438_v63 = vpop.f32.mrf.mxu3  ;;  %v1846_v27 = vadd.f32 %v1845_v24, %v6655_v42  ;;  %v5514_v42 = vld [vmem:[#allocation2 + $0x30] sm:$0xff] }
 0x1ad   : > { %v2487_v37 = vadd.f32 %v2438_v63, %v2173_v32  ;;  %v5562_v32 = vld [vmem:[#allocation2 + $0x150] sm:$0xff]  ;;  %v7133_v63 = vld [vmem:[#allocation4_spill] sm:$0xff] }
 0x1ae   : > { %3028 = vmatmul.bf16.gmra.mxu1 %v5489_v10 }
 0x1af   : > { %3343 = vmatmul.bf16.gmra.mxu2 %v5513_v40  ;;  %v6972_v0 = vadd.f32 %v2752_v47, %v2487_v37 }
 0x1b0   : > { %3658 = vmatmul.bf16.gmra.mxu3 %v5537_v19 }
 0x1b2   : > { %v2127_v45 = vpop.f32.mrf.mxu2 }
 0x1b3   : > { %v2174_v61 = vadd.f32 %v2127_v45, %v1846_v27  ;;  %v1847_v44 = vpop.f32.mrf.mxu1  ;;  %v2755_v62 = vpop.f32.mrf.mxu0  ;;  %v5491_v27 = vld [vmem:[#allocation2 + $0x150] sm:$0xff] }
 0x1b4   : > { %v2441_v50 = vpop.f32.mrf.mxu3  ;;  %3973 = vmatmul.bf16.gmra.mxu0 %v5561_v3  ;;  %v1848_v23 = vadd.f32 %v1847_v44, %v7131_v11  ;;  %v5515_v3 = vld [vmem:[#allocation2 + $0x38] sm:$0xff]  ;;  %v5539_v11 = vld [vmem:[#allocation2 + $0xc8] sm:$0xff] }
 0x1b5   : > { %v2488_v4 = vadd.f32 %v2441_v50, %v2174_v61 }
 0x1b7   : > { %v6975_v55 = vadd.f32 %v2755_v62, %v2488_v4 }
 0x1ba   : > { %v2129_v21 = vpop.f32.mrf.mxu2 }
 0x1bb   : > { %v2175_v22 = vadd.f32 %v2129_v21, %v1848_v23  ;;  %v1850_v56 = vpop.f32.mrf.mxu1  ;;  %v2757_v31 = vpop.f32.mrf.mxu0  ;;  %v7134_v23 = vld [vmem:[#allocation5_spill] sm:$0xff] }
 0x1bc   : > { %v2443_v51 = vpop.f32.mrf.mxu3  ;;  %v1851_v14 = vadd.f32 %v1850_v56, %v7132_v26  ;;  %v7135_v26 = vld [vmem:[#allocation6_spill] sm:$0xff] }
 0x1bd   : > { %v2489_v6 = vadd.f32 %v2443_v51, %v2175_v22 }
 0x1be   : > { %3033 = vmatmul.bf16.gmra.mxu1 %v5490_v57 }
 0x1bf   : > { %3348 = vmatmul.bf16.gmra.mxu2 %v5514_v42  ;;  %v6978_v20 = vadd.f32 %v2757_v31, %v2489_v6  ;;  %v5563_v31 = vld [vmem:[#allocation2 + $0x158] sm:$0xff] }
 0x1c0   : > { %3663 = vmatmul.bf16.gmra.mxu3 %v5538_v59 }
 0x1c2   : > { %v2132_v18 = vpop.f32.mrf.mxu2 }
 0x1c3   : > { %v2176_v29 = vadd.f32 %v2132_v18, %v1851_v14  ;;  %v1852_v10 = vpop.f32.mrf.mxu1  ;;  %v2760_v24 = vpop.f32.mrf.mxu0 }
 0x1c4   : > { %v2446_v40 = vpop.f32.mrf.mxu3  ;;  %3978 = vmatmul.bf16.gmra.mxu0 %v5562_v32  ;;  %v1853_v37 = vadd.f32 %v1852_v10, %v7133_v63 }
 0x1c5   : > { %v2490_v47 = vadd.f32 %v2446_v40, %v2176_v29  ;;  %v5492_v29 = vld [vmem:[#allocation2 + $0x158] sm:$0xff]  ;;  %v5516_v40 = vld [vmem:[#allocation2 + $0x40] sm:$0xff] }
 0x1c7   : > { %v6981_v45 = vadd.f32 %v2760_v24, %v2490_v47 }
 0x1ca   : > { %v2134_v19 = vpop.f32.mrf.mxu2 }
 0x1cb   : > { %v2177_v61 = vadd.f32 %v2134_v19, %v1853_v37  ;;  %v1855_v44 = vpop.f32.mrf.mxu1  ;;  %v2762_v62 = vpop.f32.mrf.mxu0  ;;  %v5540_v19 = vld [vmem:[#allocation2 + $0xd0] sm:$0xff] }
 0x1cc   : > { %v2448_v50 = vpop.f32.mrf.mxu3  ;;  %v1856_v21 = vadd.f32 %v1855_v44, %v7134_v23 }
 0x1cd   : > { %v2491_v4 = vadd.f32 %v2448_v50, %v2177_v61 }
 0x1ce   : > { %3038 = vmatmul.bf16.gmra.mxu1 %v5491_v27  ;;  %v7136_v27 = vld [vmem:[#allocation7_spill] sm:$0xff] }
 0x1cf   : > { %3353 = vmatmul.bf16.gmra.mxu2 %v5515_v3  ;;  %v6984_v22 = vadd.f32 %v2762_v62, %v2491_v4  ;;  %v5564_v4 = vld [vmem:[#allocation2 + $0x160] sm:$0xff] }
 0x1d0   : > { %3668 = vmatmul.bf16.gmra.mxu3 %v5539_v11 }
 0x1d2   : > { %v2137_v57 = vpop.f32.mrf.mxu2 }
 0x1d3   : > { %v2178_v56 = vadd.f32 %v2137_v57, %v1856_v21  ;;  %v1857_v42 = vpop.f32.mrf.mxu1  ;;  %v2765_v51 = vpop.f32.mrf.mxu0  ;;  %v7137_v57 = vld [vmem:[#allocation8_spill] sm:$0xff] }
 0x1d4   : > { %v2451_v6 = vpop.f32.mrf.mxu3  ;;  %3983 = vmatmul.bf16.gmra.mxu0 %v5563_v31  ;;  %v1858_v14 = vadd.f32 %v1857_v42, %v7135_v26  ;;  %v5493_v31 = vld [vmem:[#allocation2 + $0x160] sm:$0xff]  ;;  %v5517_v26 = vld [vmem:[#allocation2 + $0x48] sm:$0xff] }
 0x1d5   : > { %v2492_v59 = vadd.f32 %v2451_v6, %v2178_v56 }
 0x1d7   : > { %v6987_v10 = vadd.f32 %v2765_v51, %v2492_v59 }
 0x1da   : > { %v2139_v18 = vpop.f32.mrf.mxu2 }
 0x1db   : > { %v2179_v32 = vadd.f32 %v2139_v18, %v1858_v14  ;;  %v1860_v24 = vpop.f32.mrf.mxu1  ;;  %v2767_v47 = vpop.f32.mrf.mxu0 }
 0x1dc   : > { %v2453_v63 = vpop.f32.mrf.mxu3  ;;  %v1861_v61 = vadd.f32 %v1860_v24, %v7136_v27  ;;  %v7138_v24 = vld [vmem:[#allocation9_spill] sm:$0xff]  ;;  %v5565_v27 = vld [vmem:[#allocation2 + $0x168] sm:$0xff] }
 0x1dd   : > { %v2493_v37 = vadd.f32 %v2453_v63, %v2179_v32  ;;  %v5541_v32 = vld [vmem:[#allocation2 + $0xd8] sm:$0xff] }
 0x1de   : > { %3043 = vmatmul.bf16.gmra.mxu1 %v5492_v29 }
 0x1df   : > { %3358 = vmatmul.bf16.gmra.mxu2 %v5516_v40  ;;  %v6990_v3 = vadd.f32 %v2767_v47, %v2493_v37 }
 0x1e0   : > { %3673 = vmatmul.bf16.gmra.mxu3 %v5540_v19 }
 0x1e2   : > { %v2142_v44 = vpop.f32.mrf.mxu2 }
 0x1e3   : > { %v2180_v62 = vadd.f32 %v2142_v44, %v1861_v61  ;;  %v1862_v50 = vpop.f32.mrf.mxu1  ;;  %v2770_v11 = vpop.f32.mrf.mxu0 }
 0x1e4   : > { %v2456_v23 = vpop.f32.mrf.mxu3  ;;  %3988 = vmatmul.bf16.gmra.mxu0 %v5564_v4  ;;  %v1863_v56 = vadd.f32 %v1862_v50, %v7137_v57  ;;  %v7139_v50 = vld [vmem:[#allocation11_spill] sm:$0xff] }
 0x1e5   : > { %v2494_v21 = vadd.f32 %v2456_v23, %v2180_v62  ;;  %v5494_v23 = vld [vmem:[#allocation2 + $0x168] sm:$0xff] }
 0x1e7   : > { %v6993_v51 = vadd.f32 %v2770_v11, %v2494_v21 }
 0x1ea   : > { %v2144_v42 = vpop.f32.mrf.mxu2 }
 0x1eb   : > { %v2181_v6 = vadd.f32 %v2144_v42, %v1863_v56  ;;  %v1865_v59 = vpop.f32.mrf.mxu1  ;;  %v2772_v14 = vpop.f32.mrf.mxu0  ;;  %v5518_v42 = vld [vmem:[#allocation2 + $0x50] sm:$0xff] }
 0x1ec   : > { %v2458_v18 = vpop.f32.mrf.mxu3  ;;  %v1866_v40 = vadd.f32 %v1865_v59, %v7138_v24  ;;  %v5566_v24 = vld [vmem:[#allocation2 + $0x170] sm:$0xff] }
 0x1ed   : > { %v2495_v29 = vadd.f32 %v2458_v18, %v2181_v6 }
 0x1ee   : > { %3048 = vmatmul.bf16.gmra.mxu1 %v5493_v31 }
 0x1ef   : > { %3363 = vmatmul.bf16.gmra.mxu2 %v5517_v26  ;;  %v6996_v63 = vadd.f32 %v2772_v14, %v2495_v29  ;;  %v5542_v26 = vld [vmem:[#allocation2 + $0xe0] sm:$0xff] }
 0x1f0   : > { %3678 = vmatmul.bf16.gmra.mxu3 %v5541_v32 }
 0x1f2   : > { %v2147_v47 = vpop.f32.mrf.mxu2 }
 0x1f3   : > { %v2182_v37 = vadd.f32 %v2147_v47, %v1866_v40  ;;  %v1867_v19 = vpop.f32.mrf.mxu1  ;;  %v2775_v61 = vpop.f32.mrf.mxu0 }
 0x1f4   : > { %v2461_v44 = vpop.f32.mrf.mxu3  ;;  %3993 = vmatmul.bf16.gmra.mxu0 %v5565_v27  ;;  %v1868_v4 = vadd.f32 %v1867_v19, %v7139_v50  ;;  %v5519_v50 = vld [vmem:[#allocation2 + $0x58] sm:$0xff] }
 0x1f5   : > { %v2496_v62 = vadd.f32 %v2461_v44, %v2182_v37 }
 0x1f7   : > { %v6999_v21 = vadd.f32 %v2775_v61, %v2496_v62  ;;  %v5495_v61 = vld [vmem:[#allocation2 + $0x170] sm:$0xff] }
 0x1fa   : > { %v2149_v11 = vpop.f32.mrf.mxu2 }
 0x1fb   : > { %v2183_v57 = vadd.f32 %v2149_v11, %v1868_v4  ;;  %v3014_v56 = vpop.f32.mrf.mxu1  ;;  %v2777_v31 = vpop.f32.mrf.mxu0 }
 0x1fc   : > { %v2463_v6 = vpop.f32.mrf.mxu3  ;;  %v3094_v32 = vadd.f32 %v3014_v56, %v6723_v1  ;;  %v5543_v56 = vld [vmem:[#allocation2 + $0xe8] sm:$0xff] }
 0x1fd   : > { %v2497_v59 = vadd.f32 %v2463_v6, %v2183_v57 }
 0x1fe   : > { %3053 = vmatmul.bf16.gmra.mxu1 %v5494_v23 }
 0x1ff   : > { %3368 = vmatmul.bf16.gmra.mxu2 %v5518_v42  ;;  %v7001_v18 = vadd.f32 %v2777_v31, %v2497_v59 }
 0x200   : > { %3683 = vmatmul.bf16.gmra.mxu3 %v5542_v26 }
 0x202   : > { %v3329_v14 = vpop.f32.mrf.mxu2 }
 0x203   : > { %v3016_v29 = vpop.f32.mrf.mxu1  ;;  %v3959_v40 = vpop.f32.mrf.mxu0  ;;  %v3409_v47 = vadd.f32 %v3329_v14, %v3094_v32 }
 0x204   : > { %v3644_v37 = vpop.f32.mrf.mxu3  ;;  %3998 = vmatmul.bf16.gmra.mxu0 %v5566_v24  ;;  %v3095_v19 = vadd.f32 %v3016_v29, %v6748_v36  ;;  %v5567_v24 = vld [vmem:[#allocation2 + $0x178] sm:$0xff] }
 0x205   : > { %v3724_v44 = vadd.f32 %v3644_v37, %v3409_v47 }
 0x207   : > { %v4039_v23 = vadd.f32 %v3959_v40, %v3724_v44  ;;  %v5496_v44 = vld [vmem:[#allocation2 + $0x178] sm:$0xff] }
 0x209   : > { %v4172_v59 = vmul.f32 %v4039_v23, %v4039_v23 }
 0x20a   : > { %v3331_v27 = vpop.f32.mrf.mxu2 }
 0x20b   : > { %v3019_v62 = vpop.f32.mrf.mxu1  ;;  %v3410_v4 = vadd.f32 %v3331_v27, %v3095_v19  ;;  %v3961_v11 = vpop.f32.mrf.mxu0 }
 0x20c   : > { %v3646_v57 = vpop.f32.mrf.mxu3  ;;  %v3096_v31 = vadd.f32 %v3019_v62, %v6768_v41 }
 0x20d   : > { %v3725_v1 = vadd.f32 %v3646_v57, %v3410_v4 }
 0x20e   : > { %3058 = vmatmul.bf16.gmra.mxu1 %v5495_v61 }
 0x20f   : > { %3373 = vmatmul.bf16.gmra.mxu2 %v5519_v50  ;;  %v4040_v42 = vadd.f32 %v3961_v11, %v3725_v1  ;;  %v5520_v50 = vld [vmem:[#allocation2 + $0x60] sm:$0xff] }
 0x210   : > { %3688 = vmatmul.bf16.gmra.mxu3 %v5543_v56 }
 0x211   : > { %v5729_v26 = vpack.c.bf16 %v4040_v42, %v4039_v23  ;;  %v4135_v14 = vadd.f32 %v4040_v42, %v4039_v23  ;;  %v4173_v29 = vmul.f32 %v4040_v42, %v4040_v42 }
 0x212   : > { %v3334_v6 = vpop.f32.mrf.mxu2 }
 0x213   : > { %v3021_v36 = vpop.f32.mrf.mxu1  ;;  %v3411_v32 = vadd.f32 %v3334_v6, %v3096_v31  ;;  %5730 = vst [vmem:[%s7011_s30] sm:$0xff] %v5729_v26   ;;  %v4204_v40 = vadd.f32 %v4173_v29, %v4172_v59  ;;  %v3964_v47 = vpop.f32.mrf.mxu0  ;;  %v5544_v31 = vld [vmem:[#allocation2 + $0xf0] sm:$0xff] }
 0x214   : > { %v3649_v41 = vpop.f32.mrf.mxu3  ;;  %4003 = vmatmul.bf16.gmra.mxu0 %v5567_v24  ;;  %v3097_v27 = vadd.f32 %v3021_v36, %v6788_v54  ;;  %v5568_v24 = vld [vmem:[#allocation2 + $0x180] sm:$0xff] }
 0x215   : > { %v3726_v37 = vadd.f32 %v3649_v41, %v3411_v32 }
 0x217   : > { %v4041_v19 = vadd.f32 %v3964_v47, %v3726_v37 }
 0x219   : > { %v4136_v4 = vadd.f32 %v4135_v14, %v4041_v19  ;;  %v4174_v11 = vmul.f32 %v4041_v19, %v4041_v19 }
 0x21a   : > { %v3336_v61 = vpop.f32.mrf.mxu2 }
 0x21b   : > { %v3024_v62 = vpop.f32.mrf.mxu1  ;;  %v3412_v23 = vadd.f32 %v3336_v61, %v3097_v27  ;;  %v4205_v57 = vadd.f32 %v4204_v40, %v4174_v11  ;;  %v3966_v1 = vpop.f32.mrf.mxu0 }
 0x21c   : > { %v3651_v56 = vpop.f32.mrf.mxu3  ;;  %v3098_v59 = vadd.f32 %v3024_v62, %v6815_v33  ;;  %v5521_v62 = vld [vmem:[#allocation2 + $0x68] sm:$0xff] }
 0x21d   : > { %v3727_v42 = vadd.f32 %v3651_v56, %v3412_v23 }
 0x21e   : > { %3063 = vmatmul.bf16.gmra.mxu1 %v5496_v44 }
 0x21f   : > { %3378 = vmatmul.bf16.gmra.mxu2 %v5520_v50  ;;  %v4042_v6 = vadd.f32 %v3966_v1, %v3727_v42  ;;  %v5497_v50 = vld [vmem:[#allocation2 + $0x180] sm:$0xff]  ;;  %v5545_v42 = vld [vmem:[#allocation2 + $0xf8] sm:$0xff] }
 0x220   : > { %3693 = vmatmul.bf16.gmra.mxu3 %v5544_v31 }
 0x221   : > { %v5734_v36 = vpack.c.bf16 %v4042_v6, %v4041_v19  ;;  %v4137_v29 = vadd.f32 %v4136_v4, %v4042_v6  ;;  %v4175_v32 = vmul.f32 %v4042_v6, %v4042_v6 }
 0x222   : > { %v3339_v26 = vpop.f32.mrf.mxu2 }
 0x223   : > { %v3026_v54 = vpop.f32.mrf.mxu1  ;;  %v3413_v14 = vadd.f32 %v3339_v26, %v3098_v59  ;;  %5836 = vst [vmem:[%s7011_s30 + $0x8] sm:$0xff] %v5734_v36   ;;  %v4206_v40 = vadd.f32 %v4205_v57, %v4175_v32  ;;  %v3969_v47 = vpop.f32.mrf.mxu0  ;;  %v5569_v32 = vld [vmem:[#allocation2 + $0x188] sm:$0xff] }
 0x224   : > { %v3654_v41 = vpop.f32.mrf.mxu3  ;;  %4008 = vmatmul.bf16.gmra.mxu0 %v5568_v24  ;;  %v3099_v61 = vadd.f32 %v3026_v54, %v6840_v34 }
 0x225   : > { %v3728_v37 = vadd.f32 %v3654_v41, %v3413_v14 }
 0x227   : > { %v4043_v27 = vadd.f32 %v3969_v47, %v3728_v37 }
 0x229   : > { %v4138_v11 = vadd.f32 %v4137_v29, %v4043_v27  ;;  %v4176_v19 = vmul.f32 %v4043_v27, %v4043_v27 }
 0x22a   : > { %v3341_v44 = vpop.f32.mrf.mxu2 }
 0x22b   : > { %v3029_v33 = vpop.f32.mrf.mxu1  ;;  %v3414_v4 = vadd.f32 %v3341_v44, %v3099_v61  ;;  %v4207_v23 = vadd.f32 %v4206_v40, %v4176_v19  ;;  %v3971_v1 = vpop.f32.mrf.mxu0  ;;  %v1060_v40 = vld [vmem:[#allocation2 + $0x1a4] sm:$0x8]  ;;  %v1205_v61 = vrot.slane %v863_v43, 5  ;;  %v1207_v44 = vrot.slane %v860_v53, 4  ;;  %v5522_v19 = vld [vmem:[#allocation2 + $0x70] sm:$0xff] }
 0x22c   : > { %v3656_v56 = vpop.f32.mrf.mxu3  ;;  %v3100_v6 = vadd.f32 %v3029_v33, %v6860_v17  ;;  %v1061_v41 = vsel %vm6320_vm12, 0, %v1060_v40  ;;  %v1201_v17 = vrot.slane %v852_v7, 4 }
 0x22d   : > { %v3729_v57 = vadd.f32 %v3656_v56, %v3414_v4  ;;  %1062 = vst [vmem:[#allocation2 + $0x1a4] sm:$0x8] %v1061_v41 }
 0x22e   : > { %3068 = vmatmul.bf16.gmra.mxu1 %v5497_v50 }
 0x22f   : > { %3383 = vmatmul.bf16.gmra.mxu2 %v5521_v62  ;;  %v4044_v31 = vadd.f32 %v3971_v1, %v3729_v57  ;;  %v5498_v62 = vld [vmem:[#allocation2 + $0x188] sm:$0xff] }
 0x230   : > { %3698 = vmatmul.bf16.gmra.mxu3 %v5545_v42 }
 0x231   : > { %v5739_v26 = vpack.c.bf16 %v4044_v31, %v4043_v27  ;;  %v4139_v54 = vadd.f32 %v4138_v11, %v4044_v31  ;;  %v4177_v36 = vmul.f32 %v4044_v31, %v4044_v31  ;;  %v1202_v27 = vrot.slane %v855_v25, 5  ;;  %v5546_v31 = vld [vmem:[#allocation2 + $0x100] sm:$0xff] }
 0x232   : > { %v3344_v59 = vpop.f32.mrf.mxu2 }
 0x233   : > { %v3031_v34 = vpop.f32.mrf.mxu1  ;;  %v3415_v29 = vadd.f32 %v3344_v59, %v3100_v6  ;;  %5837 = vst [vmem:[%s7011_s30 + $0x10] sm:$0xff] %v5739_v26   ;;  %v4208_v14 = vadd.f32 %v4207_v23, %v4177_v36  ;;  %v3974_v24 = vpop.f32.mrf.mxu0  ;;  %v1203_v4 = vor.u32 %v1202_v27, %v1201_v17  ;;  %v1208_v23 = vor.u32 %v1207_v44, %v1205_v61  ;;  %v5499_v27 = vld [vmem:[#allocation2 + $0x190] sm:$0xff] }
 0x234   : > { %v3659_v47 = vpop.f32.mrf.mxu3  ;;  %4013 = vmatmul.bf16.gmra.mxu0 %v5569_v32  ;;  %v3101_v33 = vadd.f32 %v3031_v34, %v6876_v5  ;;  %v1304_v5 = vld [vmem:[#allocation2 + $0x1a4] sm:$0xf] }
 0x235   : > { %v3730_v37 = vadd.f32 %v3659_v47, %v3415_v29  ;;  %v1204_v15 = vrot.slane %v1203_v4, 4  ;;  %v1209_v25 = vrot.slane %v1208_v23, 4  ;;  %v5547_v4 = vld [vmem:[#allocation2 + $0x108] sm:$0xff] }
 0x237   : > { %v4045_v50 = vadd.f32 %v3974_v24, %v3730_v37  ;;  %v1206_v35 = vsel %vm6347_vm0, %v1204_v15, %v1205_v61  ;;  %v1305_v6 = vsel %vm6355_vm1, %v1209_v25, %v1304_v5  ;;  %v5523_v61 = vld [vmem:[#allocation2 + $0x78] sm:$0xff] }
 0x238   : > { %1303 = vst [vmem:[#allocation2 + $0x1a0] sm:$0xf] %v1206_v35 }
 0x239   : > { %v4140_v1 = vadd.f32 %v4139_v54, %v4045_v50  ;;  %v4178_v7 = vmul.f32 %v4045_v50, %v4045_v50  ;;  %1306 = vst [vmem:[#allocation2 + $0x1a4] sm:$0xf] %v1305_v6 }
 0x23a   : > { %v3346_v13 = vpop.f32.mrf.mxu2 }
 0x23b   : > { %v3034_v11 = vpop.f32.mrf.mxu1  ;;  %v3416_v56 = vadd.f32 %v3346_v13, %v3101_v33  ;;  %v4209_v57 = vadd.f32 %v4208_v14, %v4178_v7  ;;  %v3976_v42 = vpop.f32.mrf.mxu0  ;;  %v5570_v14 = vld [vmem:[#allocation2 + $0x190] sm:$0xff] }
 0x23c   : > { %v3661_v43 = vpop.f32.mrf.mxu3  ;;  %v3102_v34 = vadd.f32 %v3034_v11, %v6916_v9 }
 0x23d   : > { %v3731_v53 = vadd.f32 %v3661_v43, %v3416_v56 }
 0x23e   : > { %3073 = vmatmul.bf16.gmra.mxu1 %v5498_v62 }
 0x23f   : > { %3388 = vmatmul.bf16.gmra.mxu2 %v5522_v19  ;;  %v4046_v59 = vadd.f32 %v3976_v42, %v3731_v53  ;;  %v5571_v42 = vld [vmem:[#allocation2 + $0x198] sm:$0xff] }
 0x240   : > { %3703 = vmatmul.bf16.gmra.mxu3 %v5546_v31 }
 0x241   : > { %v5744_v36 = vpack.c.bf16 %v4046_v59, %v4045_v50  ;;  %v4141_v29 = vadd.f32 %v4140_v1, %v4046_v59  ;;  %v4179_v32 = vmul.f32 %v4046_v59, %v4046_v59 }
 0x242   : > { %v3349_v26 = vpop.f32.mrf.mxu2 }
 0x243   : > { %v3036_v54 = vpop.f32.mrf.mxu1  ;;  %v3417_v38 = vadd.f32 %v3349_v26, %v3102_v34  ;;  %5838 = vst [vmem:[%s7011_s30 + $0x18] sm:$0xff] %v5744_v36   ;;  %v4210_v24 = vadd.f32 %v4209_v57, %v4179_v32  ;;  %v3979_v40 = vpop.f32.mrf.mxu0  ;;  %v5500_v34 = vld [vmem:[#allocation2 + $0x198] sm:$0xff]  ;;  %v5524_v26 = vld [vmem:[#allocation2 + $0x80] sm:$0xff] }
 0x244   : > { %v3664_v47 = vpop.f32.mrf.mxu3  ;;  %4018 = vmatmul.bf16.gmra.mxu0 %v5570_v14  ;;  %v3103_v37 = vadd.f32 %v3036_v54, %v6936_v39 }
 0x245   : > { %v3732_v41 = vadd.f32 %v3664_v47, %v3417_v38 }
 0x247   : > { %v4047_v58 = vadd.f32 %v3979_v40, %v3732_v41  ;;  %v5548_v40 = vld [vmem:[#allocation2 + $0x110] sm:$0xff] }
 0x249   : > { %v4142_v44 = vadd.f32 %v4141_v29, %v4047_v58  ;;  %v4180_v50 = vmul.f32 %v4047_v58, %v4047_v58 }
 0x24a   : > { %v3351_v17 = vpop.f32.mrf.mxu2 }
 0x24b   : > { %v3039_v9 = vpop.f32.mrf.mxu1  ;;  %v3418_v33 = vadd.f32 %v3351_v17, %v3103_v37  ;;  %v4211_v13 = vadd.f32 %v4210_v24, %v4180_v50  ;;  %v3981_v62 = vpop.f32.mrf.mxu0 }
 0x24c   : > { %v3666_v11 = vpop.f32.mrf.mxu3  ;;  %v3104_v1 = vadd.f32 %v3039_v9, %v6939_v2 }
 0x24d   : > { %v3733_v19 = vadd.f32 %v3666_v11, %v3418_v33 }
 0x24e   : > { %3078 = vmatmul.bf16.gmra.mxu1 %v5499_v27 }
 0x24f   : > { %3393 = vmatmul.bf16.gmra.mxu2 %v5523_v61  ;;  %v4048_v23 = vadd.f32 %v3981_v62, %v3733_v19  ;;  %v5572_v61 = vld [vmem:[#allocation2 + $0x1a0] sm:$0xff] }
 0x250   : > { %3708 = vmatmul.bf16.gmra.mxu3 %v5547_v4  ;;  %v5501_v4 = vld [vmem:[#allocation2 + $0x1a0] sm:$0xff] }
 0x251   : > { %v5749_v56 = vpack.c.bf16 %v4048_v23, %v4047_v58  ;;  %v4143_v15 = vadd.f32 %v4142_v44, %v4048_v23  ;;  %v4181_v25 = vmul.f32 %v4048_v23, %v4048_v23  ;;  %v5525_v23 = vld [vmem:[#allocation2 + $0x88] sm:$0xff] }
 0x252   : > { %v3354_v7 = vpop.f32.mrf.mxu2 }
 0x253   : > { %v3041_v39 = vpop.f32.mrf.mxu1  ;;  %v3419_v57 = vadd.f32 %v3354_v7, %v3104_v1  ;;  %5839 = vst [vmem:[%s7011_s30 + $0x20] sm:$0xff] %v5749_v56   ;;  %v4212_v43 = vadd.f32 %v4211_v13, %v4181_v25  ;;  %v3984_v35 = vpop.f32.mrf.mxu0 }
 0x254   : > { %v3669_v5 = vpop.f32.mrf.mxu3  ;;  %4023 = vmatmul.bf16.gmra.mxu0 %v5571_v42  ;;  %v3105_v6 = vadd.f32 %v3041_v39, %v6942_v46  ;;  %v5549_v42 = vld [vmem:[#allocation2 + $0x118] sm:$0xff] }
 0x255   : > { %v3734_v53 = vadd.f32 %v3669_v5, %v3419_v57 }
 0x257   : > { %v4049_v31 = vadd.f32 %v3984_v35, %v3734_v53 }
 0x259   : > { %v4144_v54 = vadd.f32 %v4143_v15, %v4049_v31  ;;  %v4182_v36 = vmul.f32 %v4049_v31, %v4049_v31 }
 0x25a   : > { %v3356_v59 = vpop.f32.mrf.mxu2 }
 0x25b   : > { %v3044_v2 = vpop.f32.mrf.mxu1  ;;  %v3420_v29 = vadd.f32 %v3356_v59, %v3105_v6  ;;  %v4213_v32 = vadd.f32 %v4212_v43, %v4182_v36  ;;  %v3986_v38 = vpop.f32.mrf.mxu0 }
 0x25c   : > { %v3671_v14 = vpop.f32.mrf.mxu3  ;;  %v3106_v41 = vadd.f32 %v3044_v2, %v6945_v16 }
 0x25d   : > { %v3735_v24 = vadd.f32 %v3671_v14, %v3420_v29 }
 0x25e   : > { %3083 = vmatmul.bf16.gmra.mxu1 %v5500_v34  ;;  %v5573_v34 = vld [vmem:[#allocation2 + $0x1a8] sm:$0xff] }
 0x25f   : > { %3398 = vmatmul.bf16.gmra.mxu2 %v5524_v26  ;;  %v4050_v47 = vadd.f32 %v3986_v38, %v3735_v24 }
 0x260   : > { %3713 = vmatmul.bf16.gmra.mxu3 %v5548_v40 }
 0x261   : > { %v5754_v37 = vpack.c.bf16 %v4050_v47, %v4049_v31  ;;  %v4145_v17 = vadd.f32 %v4144_v54, %v4050_v47  ;;  %v4183_v27 = vmul.f32 %v4050_v47, %v4050_v47 }
 0x262   : > { %v3359_v58 = vpop.f32.mrf.mxu2 }
 0x263   : > { %v3046_v46 = vpop.f32.mrf.mxu1  ;;  %v3421_v9 = vadd.f32 %v3359_v58, %v3106_v41  ;;  %5840 = vst [vmem:[%s7011_s30 + $0x28] sm:$0xff] %v5754_v37   ;;  %v4214_v44 = vadd.f32 %v4213_v32, %v4183_v27  ;;  %v3989_v50 = vpop.f32.mrf.mxu0 }
 0x264   : > { %v3674_v33 = vpop.f32.mrf.mxu3  ;;  %4028 = vmatmul.bf16.gmra.mxu0 %v5572_v61  ;;  %v3107_v11 = vadd.f32 %v3046_v46, %v6948_v49 }
 0x265   : > { %v3736_v13 = vadd.f32 %v3674_v33, %v3421_v9 }
 0x267   : > { %v4051_v62 = vadd.f32 %v3989_v50, %v3736_v13 }
 0x269   : > { %v4146_v1 = vadd.f32 %v4145_v17, %v4051_v62  ;;  %v4184_v7 = vmul.f32 %v4051_v62, %v4051_v62 }
 0x26a   : > { %v3361_v19 = vpop.f32.mrf.mxu2 }
 0x26b   : > { %v3049_v16 = vpop.f32.mrf.mxu1  ;;  %v3422_v39 = vadd.f32 %v3361_v19, %v3107_v11  ;;  %v4215_v56 = vadd.f32 %v4214_v44, %v4184_v7  ;;  %v3991_v15 = vpop.f32.mrf.mxu0 }
 0x26c   : > { %v3676_v25 = vpop.f32.mrf.mxu3  ;;  %v3108_v35 = vadd.f32 %v3049_v16, %v6951_v60 }
 0x26d   : > { %v3737_v57 = vadd.f32 %v3676_v25, %v3422_v39 }
 0x26e   : > { %3088 = vmatmul.bf16.gmra.mxu1 %v5501_v4 }
 0x26f   : > { %3403 = vmatmul.bf16.gmra.mxu2 %v5525_v23  ;;  %v4052_v43 = vadd.f32 %v3991_v15, %v3737_v57 }
 0x270   : > { %3718 = vmatmul.bf16.gmra.mxu3 %v5549_v42 }
 0x271   : > { %v5759_v53 = vpack.c.bf16 %v4052_v43, %v4051_v62  ;;  %v4147_v31 = vadd.f32 %v4146_v1, %v4052_v43  ;;  %v4185_v6 = vmul.f32 %v4052_v43, %v4052_v43 }
 0x272   : > { %v3364_v5 = vpop.f32.mrf.mxu2 }
 0x273   : > { %v3051_v49 = vpop.f32.mrf.mxu1  ;;  %v3423_v59 = vadd.f32 %v3364_v5, %v3108_v35  ;;  %5841 = vst [vmem:[%s7011_s30 + $0x30] sm:$0xff] %v5759_v53   ;;  %v4216_v2 = vadd.f32 %v4215_v56, %v4185_v6  ;;  %v3994_v26 = vpop.f32.mrf.mxu0 }
 0x274   : > { %v3679_v54 = vpop.f32.mrf.mxu3  ;;  %4033 = vmatmul.bf16.gmra.mxu0 %v5573_v34  ;;  %v3109_v32 = vadd.f32 %v3051_v49, %v6954_v28 }
 0x275   : > { %v3738_v36 = vadd.f32 %v3679_v54, %v3423_v59 }
 0x277   : > { %v4053_v29 = vadd.f32 %v3994_v26, %v3738_v36 }
 0x279   : > { %v4148_v60 = vadd.f32 %v4147_v31, %v4053_v29  ;;  %v4186_v24 = vmul.f32 %v4053_v29, %v4053_v29 }
 0x27a   : > { %v3366_v38 = vpop.f32.mrf.mxu2 }
 0x27b   : > { %v3054_v14 = vpop.f32.mrf.mxu1  ;;  %v3424_v40 = vadd.f32 %v3366_v38, %v3109_v32  ;;  %v4217_v47 = vadd.f32 %v4216_v2, %v4186_v24  ;;  %v3996_v41 = vpop.f32.mrf.mxu0 }
 0x27c   : > { %v3681_v58 = vpop.f32.mrf.mxu3  ;;  %v3110_v17 = vadd.f32 %v3054_v14, %v6957_v48 }
 0x27d   : > { %v3739_v46 = vadd.f32 %v3681_v58, %v3424_v40 }
 0x27f   : > { %v4054_v37 = vadd.f32 %v3996_v41, %v3739_v46 }
 0x281   : > { %v5764_v61 = vpack.c.bf16 %v4054_v37, %v4053_v29  ;;  %v4149_v44 = vadd.f32 %v4148_v60, %v4054_v37  ;;  %v4187_v50 = vmul.f32 %v4054_v37, %v4054_v37 }
 0x282   : > { %v3369_v27 = vpop.f32.mrf.mxu2 }
 0x283   : > { %v3056_v9 = vpop.f32.mrf.mxu1  ;;  %v3425_v33 = vadd.f32 %v3369_v27, %v3110_v17  ;;  %5842 = vst [vmem:[%s7011_s30 + $0x38] sm:$0xff] %v5764_v61   ;;  %v4218_v28 = vadd.f32 %v4217_v47, %v4187_v50  ;;  %v3999_v13 = vpop.f32.mrf.mxu0 }
 0x284   : > { %v3684_v62 = vpop.f32.mrf.mxu3  ;;  %v3111_v4 = vadd.f32 %v3056_v9, %v6960_v52 }
 0x285   : > { %v3740_v11 = vadd.f32 %v3684_v62, %v3425_v33 }
 0x287   : > { %v4055_v19 = vadd.f32 %v3999_v13, %v3740_v11 }
 0x289   : > { %v4150_v1 = vadd.f32 %v4149_v44, %v4055_v19  ;;  %v4188_v7 = vmul.f32 %v4055_v19, %v4055_v19 }
 0x28a   : > { %v3371_v16 = vpop.f32.mrf.mxu2 }
 0x28b   : > { %v3059_v23 = vpop.f32.mrf.mxu1  ;;  %v3426_v48 = vadd.f32 %v3371_v16, %v3111_v4  ;;  %v4219_v39 = vadd.f32 %v4218_v28, %v4188_v7  ;;  %v4001_v56 = vpop.f32.mrf.mxu0 }
 0x28c   : > { %v3686_v15 = vpop.f32.mrf.mxu3  ;;  %v3112_v42 = vadd.f32 %v3059_v23, %v6963_v12 }
 0x28d   : > { %v3741_v25 = vadd.f32 %v3686_v15, %v3426_v48 }
 0x28f   : > { %v4056_v57 = vadd.f32 %v4001_v56, %v3741_v25 }
 0x291   : > { %v5769_v5 = vpack.c.bf16 %v4056_v57, %v4055_v19  ;;  %v4151_v49 = vadd.f32 %v4150_v1, %v4056_v57  ;;  %v4189_v53 = vmul.f32 %v4056_v57, %v4056_v57 }
 0x292   : > { %v3374_v43 = vpop.f32.mrf.mxu2 }
 0x293   : > { %v3061_v35 = vpop.f32.mrf.mxu1  ;;  %v3427_v31 = vadd.f32 %v3374_v43, %v3112_v42  ;;  %5843 = vst [vmem:[%s7011_s30 + $0x40] sm:$0xff] %v5769_v5   ;;  %v4220_v52 = vadd.f32 %v4219_v39, %v4189_v53  ;;  %v4004_v6 = vpop.f32.mrf.mxu0 }
 0x294   : > { %v3689_v59 = vpop.f32.mrf.mxu3  ;;  %v3113_v26 = vadd.f32 %v3061_v35, %v6966_v30 }
 0x295   : > { %v3742_v34 = vadd.f32 %v3689_v59, %v3427_v31 }
 0x297   : > { %v4057_v2 = vadd.f32 %v4004_v6, %v3742_v34 }
 0x299   : > { %v4152_v29 = vadd.f32 %v4151_v49, %v4057_v2  ;;  %v4190_v32 = vmul.f32 %v4057_v2, %v4057_v2 }
 0x29a   : > { %v3376_v54 = vpop.f32.mrf.mxu2 }
 0x29b   : > { %v3064_v36 = vpop.f32.mrf.mxu1  ;;  %v3428_v12 = vadd.f32 %v3376_v54, %v3113_v26  ;;  %v4221_v38 = vadd.f32 %v4220_v52, %v4190_v32  ;;  %v4006_v14 = vpop.f32.mrf.mxu0 }
 0x29c   : > { %v3691_v60 = vpop.f32.mrf.mxu3  ;;  %v3114_v47 = vadd.f32 %v3064_v36, %v6969_v8 }
 0x29d   : > { %v3743_v24 = vadd.f32 %v3691_v60, %v3428_v12 }
 0x29f   : > { %v4058_v40 = vadd.f32 %v4006_v14, %v3743_v24 }
 0x2a1   : > { %v5774_v46 = vpack.c.bf16 %v4058_v40, %v4057_v2  ;;  %v4153_v37 = vadd.f32 %v4152_v29, %v4058_v40  ;;  %v4191_v17 = vmul.f32 %v4058_v40, %v4058_v40 }
 0x2a2   : > { %v3379_v41 = vpop.f32.mrf.mxu2 }
 0x2a3   : > { %v3066_v58 = vpop.f32.mrf.mxu1  ;;  %v3429_v27 = vadd.f32 %v3379_v41, %v3114_v47  ;;  %5844 = vst [vmem:[%s7011_s30 + $0x48] sm:$0xff] %v5774_v46   ;;  %v4222_v30 = vadd.f32 %v4221_v38, %v4191_v17  ;;  %v4009_v9 = vpop.f32.mrf.mxu0 }
 0x2a4   : > { %v3694_v61 = vpop.f32.mrf.mxu3  ;;  %v3115_v33 = vadd.f32 %v3066_v58, %v6972_v0 }
 0x2a5   : > { %v3744_v44 = vadd.f32 %v3694_v61, %v3429_v27 }
 0x2a7   : > { %v4059_v50 = vadd.f32 %v4009_v9, %v3744_v44 }
 0x2a9   : > { %v4154_v62 = vadd.f32 %v4153_v37, %v4059_v50  ;;  %v4192_v11 = vmul.f32 %v4059_v50, %v4059_v50 }
 0x2aa   : > { %v3381_v28 = vpop.f32.mrf.mxu2 }
 0x2ab   : > { %v3069_v13 = vpop.f32.mrf.mxu1  ;;  %v3430_v8 = vadd.f32 %v3381_v28, %v3115_v33  ;;  %v4223_v19 = vadd.f32 %v4222_v30, %v4192_v11  ;;  %v4011_v4 = vpop.f32.mrf.mxu0 }
 0x2ac   : > { %v3696_v16 = vpop.f32.mrf.mxu3  ;;  %v3116_v7 = vadd.f32 %v3069_v13, %v6975_v55 }
 0x2ad   : > { %v3745_v23 = vadd.f32 %v3696_v16, %v3430_v8 }
 0x2af   : > { %v4060_v1 = vadd.f32 %v4011_v4, %v3745_v23 }
 0x2b1   : > { %v5779_v56 = vpack.c.bf16 %v4060_v1, %v4059_v50  ;;  %v4155_v15 = vadd.f32 %v4154_v62, %v4060_v1  ;;  %v4193_v25 = vmul.f32 %v4060_v1, %v4060_v1 }
 0x2b2   : > { %v3384_v48 = vpop.f32.mrf.mxu2 }
 0x2b3   : > { %v3071_v39 = vpop.f32.mrf.mxu1  ;;  %v3431_v57 = vadd.f32 %v3384_v48, %v3116_v7  ;;  %5845 = vst [vmem:[%s7011_s30 + $0x50] sm:$0xff] %v5779_v56   ;;  %v4224_v0 = vadd.f32 %v4223_v19, %v4193_v25  ;;  %v4014_v42 = vpop.f32.mrf.mxu0 }
 0x2b4   : > { %v3699_v43 = vpop.f32.mrf.mxu3  ;;  %v3117_v49 = vadd.f32 %v3071_v39, %v6978_v20 }
 0x2b5   : > { %v3746_v35 = vadd.f32 %v3699_v43, %v3431_v57 }
 0x2b7   : > { %v4061_v5 = vadd.f32 %v4014_v42, %v3746_v35 }
 0x2b9   : > { %v4156_v52 = vadd.f32 %v4155_v15, %v4061_v5  ;;  %v4194_v6 = vmul.f32 %v4061_v5, %v4061_v5 }
 0x2ba   : > { %v3386_v53 = vpop.f32.mrf.mxu2 }
 0x2bb   : > { %v3074_v31 = vpop.f32.mrf.mxu1  ;;  %v3432_v55 = vadd.f32 %v3386_v53, %v3117_v49  ;;  %v4225_v59 = vadd.f32 %v4224_v0, %v4194_v6  ;;  %v4016_v34 = vpop.f32.mrf.mxu0 }
 0x2bc   : > { %v3701_v2 = vpop.f32.mrf.mxu3  ;;  %v3118_v36 = vadd.f32 %v3074_v31, %v6981_v45 }
 0x2bd   : > { %v3747_v26 = vadd.f32 %v3701_v2, %v3432_v55 }
 0x2bf   : > { %v4062_v54 = vadd.f32 %v4016_v34, %v3747_v26 }
 0x2c1   : > { %v5784_v12 = vpack.c.bf16 %v4062_v54, %v4061_v5  ;;  %v4157_v38 = vadd.f32 %v4156_v52, %v4062_v54  ;;  %v4195_v14 = vmul.f32 %v4062_v54, %v4062_v54 }
 0x2c2   : > { %v3389_v29 = vpop.f32.mrf.mxu2 }
 0x2c3   : > { %v3076_v32 = vpop.f32.mrf.mxu1  ;;  %v3433_v60 = vadd.f32 %v3389_v29, %v3118_v36  ;;  %5846 = vst [vmem:[%s7011_s30 + $0x58] sm:$0xff] %v5784_v12   ;;  %v4226_v20 = vadd.f32 %v4225_v59, %v4195_v14  ;;  %v4019_v24 = vpop.f32.mrf.mxu0 }
 0x2c4   : > { %v3704_v40 = vpop.f32.mrf.mxu3  ;;  %v3119_v58 = vadd.f32 %v3076_v32, %v6984_v22 }
 0x2c5   : > { %v3748_v47 = vadd.f32 %v3704_v40, %v3433_v60 }
 0x2c7   : > { %v4063_v41 = vadd.f32 %v4019_v24, %v3748_v47 }
 0x2c9   : > { %v4158_v17 = vadd.f32 %v4157_v38, %v4063_v41  ;;  %v4196_v27 = vmul.f32 %v4063_v41, %v4063_v41 }
 0x2ca   : > { %v3391_v46 = vpop.f32.mrf.mxu2 }
 0x2cb   : > { %v3079_v37 = vpop.f32.mrf.mxu1  ;;  %v3434_v45 = vadd.f32 %v3391_v46, %v3119_v58  ;;  %v4227_v30 = vadd.f32 %v4226_v20, %v4196_v27  ;;  %v4021_v9 = vpop.f32.mrf.mxu0 }
 0x2cc   : > { %v3706_v61 = vpop.f32.mrf.mxu3  ;;  %v3120_v33 = vadd.f32 %v3079_v37, %v6987_v10 }
 0x2cd   : > { %v3749_v44 = vadd.f32 %v3706_v61, %v3434_v45 }
 0x2cf   : > { %v4064_v50 = vadd.f32 %v4021_v9, %v3749_v44 }
 0x2d1   : > { %v5789_v62 = vpack.c.bf16 %v4064_v50, %v4063_v41  ;;  %v4159_v11 = vadd.f32 %v4158_v17, %v4064_v50  ;;  %v4197_v8 = vmul.f32 %v4064_v50, %v4064_v50 }
 0x2d2   : > { %v3394_v28 = vpop.f32.mrf.mxu2 }
 0x2d3   : > { %v3081_v13 = vpop.f32.mrf.mxu1  ;;  %v3435_v19 = vadd.f32 %v3394_v28, %v3120_v33  ;;  %5847 = vst [vmem:[%s7011_s30 + $0x60] sm:$0xff] %v5789_v62   ;;  %v4228_v22 = vadd.f32 %v4227_v30, %v4197_v8  ;;  %v4024_v4 = vpop.f32.mrf.mxu0 }
 0x2d4   : > { %v3709_v16 = vpop.f32.mrf.mxu3  ;;  %v3121_v7 = vadd.f32 %v3081_v13, %v6990_v3 }
 0x2d5   : > { %v3750_v23 = vadd.f32 %v3709_v16, %v3435_v19 }
 0x2d7   : > { %v4065_v1 = vadd.f32 %v4024_v4, %v3750_v23 }
 0x2d9   : > { %v4160_v56 = vadd.f32 %v4159_v11, %v4065_v1  ;;  %v4198_v15 = vmul.f32 %v4065_v1, %v4065_v1 }
 0x2da   : > { %v3396_v48 = vpop.f32.mrf.mxu2 }
 0x2db   : > { %v3084_v39 = vpop.f32.mrf.mxu1  ;;  %v3436_v10 = vadd.f32 %v3396_v48, %v3121_v7  ;;  %v4229_v25 = vadd.f32 %v4228_v22, %v4198_v15  ;;  %v4026_v57 = vpop.f32.mrf.mxu0 }
 0x2dc   : > { %v3711_v0 = vpop.f32.mrf.mxu3  ;;  %v3122_v35 = vadd.f32 %v3084_v39, %v6993_v51 }
 0x2dd   : > { %v3751_v42 = vadd.f32 %v3711_v0, %v3436_v10 }
 0x2df   : > { %v4066_v43 = vadd.f32 %v4026_v57, %v3751_v42 }
 0x2e1   : > { %v5794_v53 = vpack.c.bf16 %v4066_v43, %v4065_v1  ;;  %v4161_v31 = vadd.f32 %v4160_v56, %v4066_v43  ;;  %v4199_v52 = vmul.f32 %v4066_v43, %v4066_v43 }
 0x2e2   : > { %v3399_v5 = vpop.f32.mrf.mxu2 }
 0x2e3   : > { %v3086_v49 = vpop.f32.mrf.mxu1  ;;  %v3437_v6 = vadd.f32 %v3399_v5, %v3122_v35  ;;  %5848 = vst [vmem:[%s7011_s30 + $0x68] sm:$0xff] %v5794_v53   ;;  %v4230_v3 = vadd.f32 %v4229_v25, %v4199_v52  ;;  %v4029_v55 = vpop.f32.mrf.mxu0 }
 0x2e4   : > { %v3714_v59 = vpop.f32.mrf.mxu3  ;;  %v3123_v26 = vadd.f32 %v3086_v49, %v6996_v63 }
 0x2e5   : > { %v3752_v34 = vadd.f32 %v3714_v59, %v3437_v6 }
 0x2e7   : > { %v4067_v2 = vadd.f32 %v4029_v55, %v3752_v34 }
 0x2e9   : > { %v4162_v36 = vadd.f32 %v4161_v31, %v4067_v2  ;;  %v4200_v29 = vmul.f32 %v4067_v2, %v4067_v2 }
 0x2ea   : > { %v3401_v54 = vpop.f32.mrf.mxu2 }
 0x2eb   : > { %v3438_v32 = vadd.f32 %v3401_v54, %v3123_v26  ;;  %v3089_v51 = vpop.f32.mrf.mxu1  ;;  %v4231_v12 = vadd.f32 %v4230_v3, %v4200_v29  ;;  %v4031_v38 = vpop.f32.mrf.mxu0 }
 0x2ec   : > { %v3716_v14 = vpop.f32.mrf.mxu3  ;;  %v3124_v24 = vadd.f32 %v3089_v51, %v6999_v21 }
 0x2ed   : > { %v3753_v60 = vadd.f32 %v3716_v14, %v3438_v32 }
 0x2ef   : > { %v4068_v20 = vadd.f32 %v4031_v38, %v3753_v60 }
 0x2f1   : > { %v5799_v47 = vpack.c.bf16 %v4068_v20, %v4067_v2  ;;  %v4163_v41 = vadd.f32 %v4162_v36, %v4068_v20  ;;  %v4201_v58 = vmul.f32 %v4068_v20, %v4068_v20 }
 0x2f2   : > { %v3404_v40 = vpop.f32.mrf.mxu2 }
 0x2f3   : > { %v3439_v46 = vadd.f32 %v3404_v40, %v3124_v24  ;;  %5849 = vst [vmem:[%s7011_s30 + $0x70] sm:$0xff] %v5799_v47   ;;  %v4232_v63 = vadd.f32 %v4231_v12, %v4201_v58  ;;  %v3091_v37 = vpop.f32.mrf.mxu1  ;;  %v4034_v17 = vpop.f32.mrf.mxu0 }
 0x2f4   : > { %v3719_v27 = vpop.f32.mrf.mxu3  ;;  %v3125_v9 = vadd.f32 %v3091_v37, %v7001_v18 }
 0x2f5   : > { %v3754_v45 = vadd.f32 %v3719_v27, %v3439_v46 }
 0x2f7   : > { %v4069_v30 = vadd.f32 %v4034_v17, %v3754_v45 }
 0x2f9   : > { %v4164_v44 = vadd.f32 %v4163_v41, %v4069_v30  ;;  %v4202_v21 = vmul.f32 %v4069_v30, %v4069_v30 }
 0x2fa   : > { %v3406_v61 = vpop.f32.mrf.mxu2 }
 0x2fb   : > { %v3440_v50 = vadd.f32 %v3406_v61, %v3125_v9  ;;  %v4233_v33 = vadd.f32 %v4232_v63, %v4202_v21  ;;  %v4036_v62 = vpop.f32.mrf.mxu0 }
 0x2fc   : > { %v3721_v28 = vpop.f32.mrf.mxu3 }
 0x2fd   : > { %v3755_v13 = vadd.f32 %v3721_v28, %v3440_v50 }
 0x2ff   : > { %v4070_v11 = vadd.f32 %v4036_v62, %v3755_v13 }
 0x301   : > { %v5804_v8 = vpack.c.bf16 %v4070_v11, %v4069_v30  ;;  %v4165_v19 = vadd.f32 %v4164_v44, %v4070_v11  ;;  %v4203_v22 = vmul.f32 %v4070_v11, %v4070_v11 }
 0x303   : > { %5850 = vst [vmem:[%s7011_s30 + $0x78] sm:$0xff] %v5804_v8   ;;  %v4166_v4 = vrot.slane %v4165_v19, 4  ;;  %v4234_v16 = vadd.f32 %v4233_v33, %v4203_v22 }
 0x305   : > { %v4167_v23 = vadd.f32 %v4166_v4, %v4165_v19  ;;  %v4235_v18 = vrot.slane %v4234_v16, 4 }
 0x307   : > { %v4168_v1 = vrot.slane %v4167_v23, 2  ;;  %v4236_v7 = vadd.f32 %v4235_v18, %v4234_v16 }
 0x309   : > { %v4169_v48 = vadd.f32 %v4168_v1, %v4167_v23  ;;  %v4237_v39 = vrot.slane %v4236_v7, 2 }
 0x30b   : > { %v4170_v56 = vrot.slane %v4169_v48, 1  ;;  %v4238_v15 = vadd.f32 %v4237_v39, %v4236_v7 }
 0x30d   : > { %v4171_v10 = vadd.f32 %v4170_v56, %v4169_v48  ;;  %v4239_v25 = vrot.slane %v4238_v15, 1 }
 0x30f   : > { %v4240_v57 = vadd.f32 %v4239_v25, %v4238_v15  ;;  %4241 = vst [vmem:[%s325_s11] sm:$0xff] %v4171_v10 }
 0x311   : > { %4242 = vst [vmem:[%s329_s14] sm:$0xff] %v4240_v57 }
 0x312 PF: > { %s19_s27 = sadd.s32 1, %s5892_s27  }
 0x313   : > { %p16_p5 = scmp.ge.s32.totalorder %s19_s27, 4  }
 0x315   :  { %18 = sbr.rel (!%p16_p5) target bundleno = 1 (0x1), region = 117 }

</bundles_post_ra>
